<compile_context>
chip_gen: v5e
topology: v5e:2x2
jax: 0.10.0
libtpu: 0.0.40
codegen_flags: <defaults>
</compile_context>

<pallas_src>
import functools

import jax
import jax.numpy as jnp
from jax import lax
from jax.experimental import pallas as pl
from jax.experimental.pallas import tpu as pltpu

EPS = 1e-5              # nn.BatchNorm3d default eps
KS = 5                  # Conv3d kernel size
PAD = 2                 # Conv3d padding
NG = KS * KS            # 25 (kd, kh) groups
KPACK = NG * 8          # 200-row contraction (5 real + 3 zero rows per group)


def _round_up(x, m):
    return (x + m - 1) // m * m


def _footprint_bytes(td, C, H, W, wp_pad, hpwp):
    """Rough per-grid-step VMEM footprint (scratch + buffers + working values)."""
    lspan = (td - 1) * hpwp + (H - 1) * wp_pad + W
    lsp = _round_up(lspan, 128)
    use_len = (KS - 1) * hpwp + (KS - 1) * wp_pad + lsp
    ls2a = use_len + 128
    tm = td * H * W
    patch = KPACK * lsp * 4
    shift = 8 * use_len * 4
    slab = 2 * ls2a * 4                 # double-buffered input block
    outb = 2 * C * tm * 4               # double-buffered output block
    work = 4 * C * lsp * 4              # y / act / outp working values
    return patch + shift + slab + outb + work


def _tile_plan(N, D, H, W, C, *, vmem_cap_bytes=20 * 2**20, target_vox=32768):
    """Pick the depth-tile td: large tiles, VMEM-capped, >= 2 grid blocks."""
    wp_pad = _round_up(W + 2 * PAD, 128)
    hpwp = (H + 2 * PAD) * wp_pad
    cands = [t for t in range(1, D + 1)
             if D % t == 0 and ((t * H * W) % 128 == 0 or t == D)]
    fits = [t for t in cands
            if _footprint_bytes(t, C, H, W, wp_pad, hpwp) <= vmem_cap_bytes]
    pool = fits if fits else cands
    small = [t for t in pool if t * H * W <= target_vox]
    td = max(small) if small else min(pool)
    # v7x has 2 TensorCores: keep at least 2 (balanced) parallel grid blocks.
    if N * (D // td) < 2:
        alt = [t for t in pool if t < td]
        if alt:
            td = max(alt)
    return td, wp_pad, hpwp


def _assemble_patch(xf_ref, shift_ref, patch_ref, *, wp_pad, hpwp, lsp, use_len):
    """Fill the (200, lsp) patch scratch from the flat lane-aligned padded slab.

    shift_ref row kw (0..4) is the slab shifted left by kw lanes (the only lane
    shifts in the kernel); rows 5..7 are zeros.  Group g = kd*5 + kh copies the
    lane-ALIGNED window shift_ref[:, s_g : s_g + lsp] (s_g = kd*hpwp + kh*wp_pad,
    a multiple of 128) into patch rows [8g, 8g+8): row 8g+kw is tap (kd, kh, kw),
    rows 8g+5..8g+7 are zeros (matching zero weight columns).
    """
    for kw in range(KS):
        shift_ref[kw:kw + 1, :] = xf_ref[:, kw:kw + use_len]
    # Zero every step: scratch persists across grid steps and megacore splits the
    # grid, so a "first step" guard is not reliable per core.  Cost is 3 rows.
    shift_ref[KS:, :] = jnp.zeros((8 - KS, use_len), jnp.float32)
    for kd in range(KS):
        for kh in range(KS):
            g = kd * KS + kh
            s = kd * hpwp + kh * wp_pad          # multiple of 128 -> aligned copy
            patch_ref[8 * g:8 * (g + 1), :] = shift_ref[:, s:s + lsp]


def _conv_stats_kernel(xf_ref, w_ref, stats_ref, shift_ref, patch_ref, *,
                       td, h_dim, w_dim, wp_pad, hpwp, lsp, use_len):
    """Pass 1: conv on the MXU + per-tile sum / sum-of-squares over valid voxels."""
    _assemble_patch(xf_ref, shift_ref, patch_ref,
                    wp_pad=wp_pad, hpwp=hpwp, lsp=lsp, use_len=use_len)
    y = jnp.dot(w_ref[...], patch_ref[...],
                preferred_element_type=jnp.float32)                  # (C, lsp)
    c = y.shape[0]
    acc = jnp.zeros((c, w_dim), jnp.float32)
    acc2 = jnp.zeros((c, w_dim), jnp.float32)
    # Accumulate only the valid windows (no mask input / no integer div needed).
    for dl in range(td):
        for hh in range(h_dim):
            src = dl * hpwp + hh * wp_pad
            blk = y[:, src:src + w_dim]
            acc = acc + blk
            acc2 = acc2 + blk * blk
    s = jnp.sum(acc, axis=1, keepdims=True)                          # (C, 1)
    sq = jnp.sum(acc2, axis=1, keepdims=True)                        # (C, 1)
    # One lane-dense (C, 128) store per tile (lanes 0/1 carry sum / sumsq).
    stats_ref[...] = jnp.concatenate(
        [s, sq, jnp.zeros((c, 126), jnp.float32)], axis=1)


def _conv_bn_prelu_add_kernel(xf_ref, w_ref, par_ref, o_ref, shift_ref, patch_ref, *,
                              td, h_dim, w_dim, wp_pad, hpwp, lsp, use_len):
    """Pass 2: conv recompute + folded BN + PReLU + residual + dense NCDHW store."""
    _assemble_patch(xf_ref, shift_ref, patch_ref,
                    wp_pad=wp_pad, hpwp=hpwp, lsp=lsp, use_len=use_len)
    y = jnp.dot(w_ref[...], patch_ref[...],
                preferred_element_type=jnp.float32)                  # (C, lsp)

    scale = par_ref[:, 0:1]       # gamma * rsqrt(var + eps)         (C, 1)
    bias = par_ref[:, 1:2]        # beta - mean * scale              (C, 1)
    alpha = par_ref[:, 2:3]       # PReLU slope                      (C, 1)
    yn = y * scale + bias
    act = jnp.where(yn > 0, yn, alpha * yn)

    # Residual = original x (centre tap kd=kh=kw=2): row 2 of shift_ref at the
    # lane-aligned offset PAD*hpwp + PAD*wp_pad.  Broadcasts over the C channels
    # (== torch .expand).
    s_c = PAD * hpwp + PAD * wp_pad
    res = shift_ref[PAD:PAD + 1, s_c:s_c + lsp]                      # (1, lsp)
    outp = (act + res).astype(o_ref.dtype)                           # (C, lsp)

    # Direct compaction: each (depth, row) window is stored straight into its
    # dense NCDHW slot (no pieces-concatenate, no extra (C, tm) temp).
    for dl in range(td):
        for hh in range(h_dim):
            src = dl * hpwp + hh * wp_pad
            dst = (dl * h_dim + hh) * w_dim
            o_ref[:, dst:dst + w_dim] = outp[:, src:src + w_dim]


def input_transition_forward(x, conv_w, gamma, beta, alpha, *,
                             out_dtype=jnp.float32, td=None):
    """x: (N, 1, D, H, W) f32; conv_w: (C, 1, 5, 5, 5) -> (N, C, D, H, W)."""
    N, in_c, D, H, W = x.shape
    assert in_c == 1, "InputTransition expects a single input channel"
    C = conv_w.shape[0]
    assert conv_w.shape == (C, 1, KS, KS, KS)

    td_auto, wp_pad, hpwp = _tile_plan(N, D, H, W, C)
    if td is None:
        td = td_auto
    assert D % td == 0 and ((td * H * W) % 128 == 0 or td == D)
    n_t = D // td
    tm = td * H * W

    Dp = D + 2 * PAD
    lspan = (td - 1) * hpwp + (H - 1) * wp_pad + W
    lsp = _round_up(lspan, 128)
    use_len = (KS - 1) * hpwp + (KS - 1) * wp_pad + lsp
    ls2a = use_len + 128
    M = N * D * H * W

    # ---- layout glue: zero-padded, lane-aligned flat slab per (batch, tile) ----
    xs = x[:, 0].astype(jnp.float32)                                   # (N,D,H,W)
    xp = jnp.pad(xs, ((0, 0), (PAD, PAD), (PAD, PAD),
                      (PAD, wp_pad - W - PAD)))                        # lane-aligned rows
    xf = xp.reshape(N, Dp * hpwp)
    need = (n_t - 1) * td * hpwp + ls2a
    if need > xf.shape[1]:
        xf = jnp.pad(xf, ((0, 0), (0, need - xf.shape[1])))
    # Haloed depth windows.  With the larger tiles the halo fraction is small.
    # TODO(synk): replace with a manual windowed DMA from a pl.ANY ref to drop
    # this extra HBM copy entirely.
    xslab = jnp.stack([xf[:, t * td * hpwp: t * td * hpwp + ls2a]
                       for t in range(n_t)], axis=1)[:, :, None, :]    # (N,n_t,1,ls2a)

    # Weight matrix in grouped (kd, kh) order, kw padded 5 -> 8  ->  (C, 200).
    w_mat = conv_w.reshape(C, KS, KS, KS).astype(jnp.float32)
    w_mat = jnp.pad(w_mat, ((0, 0), (0, 0), (0, 0), (0, 8 - KS))).reshape(C, KPACK)

    grid = (N, n_t)
    fp = _footprint_bytes(td, C, H, W, wp_pad, hpwp)
    vmem_limit = int(min(56 * 2**20, max(24 * 2**20, fp + 8 * 2**20)))
    cparams = pltpu.CompilerParams(
        dimension_semantics=("parallel", "parallel"),
        vmem_limit_bytes=vmem_limit)
    scratch = [pltpu.VMEM((8, use_len), jnp.float32),      # 5 kw-shifted slabs
               pltpu.VMEM((KPACK, lsp), jnp.float32)]      # 200-row patch matrix

    # ---- pass 1: conv + per-tile partial statistics (fully parallel) ----------
    stats = pl.pallas_call(
        functools.partial(_conv_stats_kernel, td=td, h_dim=H, w_dim=W,
                          wp_pad=wp_pad, hpwp=hpwp, lsp=lsp, use_len=use_len),
        out_shape=jax.ShapeDtypeStruct((N, n_t, C, 128), jnp.float32),
        grid_spec=pltpu.PrefetchScalarGridSpec(
            num_scalar_prefetch=0, grid=grid,
            in_specs=[pl.BlockSpec((None, None, 1, ls2a), lambda n, t: (n, t, 0, 0)),
                      pl.BlockSpec((C, KPACK), lambda n, t: (0, 0))],
            out_specs=pl.BlockSpec((None, None, C, 128), lambda n, t: (n, t, 0, 0)),
            scratch_shapes=scratch),
        compiler_params=cparams,
    )(xslab, w_mat)

    # ---- fold train-mode BN batch stats into per-channel scale / bias ---------
    tot = jnp.sum(stats[:, :, :, 0], axis=(0, 1))                     # (C,)
    tot2 = jnp.sum(stats[:, :, :, 1], axis=(0, 1))                    # (C,)
    mean = tot / M
    var = jnp.maximum(tot2 / M - mean * mean, 0.0)                    # biased var
    scale = gamma.astype(jnp.float32) * lax.rsqrt(var + EPS)
    bias = beta.astype(jnp.float32) - mean * scale
    params = jnp.stack([scale, bias, alpha.astype(jnp.float32)], axis=1)   # (C, 3)
    params = jnp.pad(params, ((0, 0), (0, 128 - 3)))                  # lane-dense (C,128)

    # ---- pass 2: conv recompute + BN + PReLU + residual, dense NCDHW store ----
    out = pl.pallas_call(
        functools.partial(_conv_bn_prelu_add_kernel, td=td, h_dim=H, w_dim=W,
                          wp_pad=wp_pad, hpwp=hpwp, lsp=lsp, use_len=use_len),
        out_shape=jax.ShapeDtypeStruct((N, C, D * H * W), out_dtype),
        grid_spec=pltpu.PrefetchScalarGridSpec(
            num_scalar_prefetch=0, grid=grid,
            in_specs=[pl.BlockSpec((None, None, 1, ls2a), lambda n, t: (n, t, 0, 0)),
                      pl.BlockSpec((C, KPACK), lambda n, t: (0, 0)),
                      pl.BlockSpec((C, 128), lambda n, t: (0, 0))],
            out_specs=pl.BlockSpec((None, C, tm), lambda n, t: (n, 0, t)),
            scratch_shapes=scratch),
        compiler_params=cparams,
    )(xslab, w_mat, params)

    return out.reshape(N, C, D, H, W)        # free reshape, no transpose


def reference_forward(x, conv_w, gamma, beta, alpha):
    """Pure-JAX reference mirroring the PyTorch module (train-mode BN)."""
    y = lax.conv_general_dilated(
        x.astype(jnp.float32), conv_w.astype(jnp.float32),
        window_strides=(1, 1, 1), padding=((PAD, PAD),) * 3,
        dimension_numbers=("NCDHW", "OIDHW", "NCDHW"))
    mean = jnp.mean(y, axis=(0, 2, 3, 4), keepdims=True)
    var = jnp.var(y, axis=(0, 2, 3, 4), keepdims=True)
    yn = (y - mean) * lax.rsqrt(var + EPS)
    yn = yn * gamma.reshape(1, -1, 1, 1, 1) + beta.reshape(1, -1, 1, 1, 1)
    act = jnp.where(yn > 0, yn, alpha.reshape(1, -1, 1, 1, 1) * yn)
    return act + x      # x has 1 channel -> broadcast == torch .expand to C


if __name__ == "__main__":
    key = jax.random.PRNGKey(0)
    kx, kw = jax.random.split(key)

    # Small but representative shape; W chosen so the padded row (W + 4 = 128)
    # is exactly one lane tile (zero lane-padding waste).
    N, C, D, H, W = 2, 16, 8, 8, 124
    x = jax.random.normal(kx, (N, 1, D, H, W), dtype=jnp.float32)

    # Conv3d(1, C, 5, bias=False) default init bound = 1/sqrt(fan_in)
    fan_in = 1 * KS * KS * KS
    bound = (1.0 / fan_in) ** 0.5
    conv_w = jax.random.uniform(kw, (C, 1, KS, KS, KS), jnp.float32, -bound, bound)

    gamma = jnp.ones((C,), jnp.float32)            # BatchNorm3d weight default
    beta = jnp.zeros((C,), jnp.float32)            # BatchNorm3d bias default
    alpha = jnp.full((C,), 0.25, jnp.float32)      # nn.PReLU(C) default

    out = jax.block_until_ready(
        input_transition_forward(x, conv_w, gamma, beta, alpha))
    ref = reference_forward(x, conv_w, gamma, beta, alpha)

    assert out.shape == (N, C, D, H, W)
    err = jnp.max(jnp.abs(out - ref))
    if not jnp.allclose(out, ref, atol=3e-4, rtol=3e-4):
        raise AssertionError(f"mismatch, max abs err = {err}")
    print("KERNEL_OK")
</pallas_src>

<mosaic_0001>
module attributes {stable_mosaic.version = 11 : i64} {
  func.func @_conv_stats_kernel(%arg0: i32, %arg1: i32, %arg2: memref<1x1x1x18560xf32, #tpu.memory_space<vmem>>, %arg3: memref<16x200xf32, #tpu.memory_space<vmem>>, %arg4: memref<1x1x16x128xf32, #tpu.memory_space<vmem>>, %arg5: memref<8x18432xf32, #tpu.memory_space<vmem>>, %arg6: memref<200x11776xf32, #tpu.memory_space<vmem>>) attributes {dimension_semantics = [#tpu.dimension_semantics<parallel>, #tpu.dimension_semantics<parallel>], iteration_bounds = array<i64: 2, 1>, scalar_prefetch = 0 : i64, scratch_operands = 2 : i64, tpu.core_type = #tpu.core_type<tc>, window_params = [{transform_indices = @transform_0, window_bounds = array<i64: 1, 1, 1, 18560>}, {pipeline_mode = #tpu.pipeline_mode<synchronous>, transform_indices = @transform_1, window_bounds = array<i64: 16, 200>}, {transform_indices = @transform_2, window_bounds = array<i64: 1, 1, 16, 128>}]} {
    %c0 = arith.constant 0 : index
    %c0_0 = arith.constant 0 : index
    %c0_1 = arith.constant 0 : index
    %c0_2 = arith.constant 0 : index
    %0 = vector.load %arg2[%c0, %c0_0, %c0_1, %c0_2] : memref<1x1x1x18560xf32, #tpu.memory_space<vmem>>, vector<1x1x1x18432xf32>
    %1 = vector.shape_cast %0 : vector<1x1x1x18432xf32> to vector<1x18432xf32>
    %c0_3 = arith.constant 0 : index
    %c0_4 = arith.constant 0 : index
    %2 = vector.load %arg5[%c0_3, %c0_4] : memref<8x18432xf32, #tpu.memory_space<vmem>>, vector<1x18432xf32>
    tpu.vector_store %arg5[%c0_3, %c0_4], %1 {strides = array<i32>} : memref<8x18432xf32, #tpu.memory_space<vmem>>, vector<1x18432xf32>,
    %c0_5 = arith.constant 0 : index
    %c0_6 = arith.constant 0 : index
    %c0_7 = arith.constant 0 : index
    %c1 = arith.constant 1 : index
    %3 = vector.load %arg2[%c0_5, %c0_6, %c0_7, %c1] : memref<1x1x1x18560xf32, #tpu.memory_space<vmem>>, vector<1x1x1x18432xf32>
    %4 = vector.shape_cast %3 : vector<1x1x1x18432xf32> to vector<1x18432xf32>
    %c1_8 = arith.constant 1 : index
    %c0_9 = arith.constant 0 : index
    %5 = vector.load %arg5[%c1_8, %c0_9] : memref<8x18432xf32, #tpu.memory_space<vmem>>, vector<1x18432xf32>
    tpu.vector_store %arg5[%c1_8, %c0_9], %4 {strides = array<i32>} : memref<8x18432xf32, #tpu.memory_space<vmem>>, vector<1x18432xf32>,
    %c0_10 = arith.constant 0 : index
    %c0_11 = arith.constant 0 : index
    %c0_12 = arith.constant 0 : index
    %c2 = arith.constant 2 : index
    %6 = vector.load %arg2[%c0_10, %c0_11, %c0_12, %c2] : memref<1x1x1x18560xf32, #tpu.memory_space<vmem>>, vector<1x1x1x18432xf32>
    %7 = vector.shape_cast %6 : vector<1x1x1x18432xf32> to vector<1x18432xf32>
    %c2_13 = arith.constant 2 : index
    %c0_14 = arith.constant 0 : index
    %8 = vector.load %arg5[%c2_13, %c0_14] : memref<8x18432xf32, #tpu.memory_space<vmem>>, vector<1x18432xf32>
    tpu.vector_store %arg5[%c2_13, %c0_14], %7 {strides = array<i32>} : memref<8x18432xf32, #tpu.memory_space<vmem>>, vector<1x18432xf32>,
    %c0_15 = arith.constant 0 : index
    %c0_16 = arith.constant 0 : index
    %c0_17 = arith.constant 0 : index
    %c3 = arith.constant 3 : index
    %9 = vector.load %arg2[%c0_15, %c0_16, %c0_17, %c3] : memref<1x1x1x18560xf32, #tpu.memory_space<vmem>>, vector<1x1x1x18432xf32>
    %10 = vector.shape_cast %9 : vector<1x1x1x18432xf32> to vector<1x18432xf32>
    %c3_18 = arith.constant 3 : index
    %c0_19 = arith.constant 0 : index
    %11 = vector.load %arg5[%c3_18, %c0_19] : memref<8x18432xf32, #tpu.memory_space<vmem>>, vector<1x18432xf32>
    tpu.vector_store %arg5[%c3_18, %c0_19], %10 {strides = array<i32>} : memref<8x18432xf32, #tpu.memory_space<vmem>>, vector<1x18432xf32>,
    %c0_20 = arith.constant 0 : index
    %c0_21 = arith.constant 0 : index
    %c0_22 = arith.constant 0 : index
    %c4 = arith.constant 4 : index
    %12 = vector.load %arg2[%c0_20, %c0_21, %c0_22, %c4] : memref<1x1x1x18560xf32, #tpu.memory_space<vmem>>, vector<1x1x1x18432xf32>
    %13 = vector.shape_cast %12 : vector<1x1x1x18432xf32> to vector<1x18432xf32>
    %c4_23 = arith.constant 4 : index
    %c0_24 = arith.constant 0 : index
    %14 = vector.load %arg5[%c4_23, %c0_24] : memref<8x18432xf32, #tpu.memory_space<vmem>>, vector<1x18432xf32>
    tpu.vector_store %arg5[%c4_23, %c0_24], %13 {strides = array<i32>} : memref<8x18432xf32, #tpu.memory_space<vmem>>, vector<1x18432xf32>,
    %cst = arith.constant 0.000000e+00 : f32
    %15 = vector.broadcast %cst : f32 to vector<3x18432xf32>
    %c5 = arith.constant 5 : index
    %c0_25 = arith.constant 0 : index
    %16 = vector.load %arg5[%c5, %c0_25] : memref<8x18432xf32, #tpu.memory_space<vmem>>, vector<3x18432xf32>
    tpu.vector_store %arg5[%c5, %c0_25], %15 {strides = array<i32>} : memref<8x18432xf32, #tpu.memory_space<vmem>>, vector<3x18432xf32>,
    %c0_26 = arith.constant 0 : index
    %c0_27 = arith.constant 0 : index
    %17 = vector.load %arg5[%c0_26, %c0_27] : memref<8x18432xf32, #tpu.memory_space<vmem>>, vector<8x11776xf32>
    %c0_28 = arith.constant 0 : index
    %c0_29 = arith.constant 0 : index
    %18 = vector.load %arg6[%c0_28, %c0_29] : memref<200x11776xf32, #tpu.memory_space<vmem>>, vector<8x11776xf32>
    tpu.vector_store %arg6[%c0_28, %c0_29], %17 {strides = array<i32>} : memref<200x11776xf32, #tpu.memory_space<vmem>>, vector<8x11776xf32>,
    %c0_30 = arith.constant 0 : index
    %c128 = arith.constant 128 : index
    %19 = vector.load %arg5[%c0_30, %c128] : memref<8x18432xf32, #tpu.memory_space<vmem>>, vector<8x11776xf32>
    %c8 = arith.constant 8 : index
    %c0_31 = arith.constant 0 : index
    %20 = vector.load %arg6[%c8, %c0_31] : memref<200x11776xf32, #tpu.memory_space<vmem>>, vector<8x11776xf32>
    tpu.vector_store %arg6[%c8, %c0_31], %19 {strides = array<i32>} : memref<200x11776xf32, #tpu.memory_space<vmem>>, vector<8x11776xf32>,
    %c0_32 = arith.constant 0 : index
    %c256 = arith.constant 256 : index
    %21 = vector.load %arg5[%c0_32, %c256] : memref<8x18432xf32, #tpu.memory_space<vmem>>, vector<8x11776xf32>
    %c16 = arith.constant 16 : index
    %c0_33 = arith.constant 0 : index
    %22 = vector.load %arg6[%c16, %c0_33] : memref<200x11776xf32, #tpu.memory_space<vmem>>, vector<8x11776xf32>
    tpu.vector_store %arg6[%c16, %c0_33], %21 {strides = array<i32>} : memref<200x11776xf32, #tpu.memory_space<vmem>>, vector<8x11776xf32>,
    %c0_34 = arith.constant 0 : index
    %c384 = arith.constant 384 : index
    %23 = vector.load %arg5[%c0_34, %c384] : memref<8x18432xf32, #tpu.memory_space<vmem>>, vector<8x11776xf32>
    %c24 = arith.constant 24 : index
    %c0_35 = arith.constant 0 : index
    %24 = vector.load %arg6[%c24, %c0_35] : memref<200x11776xf32, #tpu.memory_space<vmem>>, vector<8x11776xf32>
    tpu.vector_store %arg6[%c24, %c0_35], %23 {strides = array<i32>} : memref<200x11776xf32, #tpu.memory_space<vmem>>, vector<8x11776xf32>,
    %c0_36 = arith.constant 0 : index
    %c512 = arith.constant 512 : index
    %25 = vector.load %arg5[%c0_36, %c512] : memref<8x18432xf32, #tpu.memory_space<vmem>>, vector<8x11776xf32>
    %c32 = arith.constant 32 : index
    %c0_37 = arith.constant 0 : index
    %26 = vector.load %arg6[%c32, %c0_37] : memref<200x11776xf32, #tpu.memory_space<vmem>>, vector<8x11776xf32>
    tpu.vector_store %arg6[%c32, %c0_37], %25 {strides = array<i32>} : memref<200x11776xf32, #tpu.memory_space<vmem>>, vector<8x11776xf32>,
    %c0_38 = arith.constant 0 : index
    %c1536 = arith.constant 1536 : index
    %27 = vector.load %arg5[%c0_38, %c1536] : memref<8x18432xf32, #tpu.memory_space<vmem>>, vector<8x11776xf32>
    %c40 = arith.constant 40 : index
    %c0_39 = arith.constant 0 : index
    %28 = vector.load %arg6[%c40, %c0_39] : memref<200x11776xf32, #tpu.memory_space<vmem>>, vector<8x11776xf32>
    tpu.vector_store %arg6[%c40, %c0_39], %27 {strides = array<i32>} : memref<200x11776xf32, #tpu.memory_space<vmem>>, vector<8x11776xf32>,
    %c0_40 = arith.constant 0 : index
    %c1664 = arith.constant 1664 : index
    %29 = vector.load %arg5[%c0_40, %c1664] : memref<8x18432xf32, #tpu.memory_space<vmem>>, vector<8x11776xf32>
    %c48 = arith.constant 48 : index
    %c0_41 = arith.constant 0 : index
    %30 = vector.load %arg6[%c48, %c0_41] : memref<200x11776xf32, #tpu.memory_space<vmem>>, vector<8x11776xf32>
    tpu.vector_store %arg6[%c48, %c0_41], %29 {strides = array<i32>} : memref<200x11776xf32, #tpu.memory_space<vmem>>, vector<8x11776xf32>,
    %c0_42 = arith.constant 0 : index
    %c1792 = arith.constant 1792 : index
    %31 = vector.load %arg5[%c0_42, %c1792] : memref<8x18432xf32, #tpu.memory_space<vmem>>, vector<8x11776xf32>
    %c56 = arith.constant 56 : index
    %c0_43 = arith.constant 0 : index
    %32 = vector.load %arg6[%c56, %c0_43] : memref<200x11776xf32, #tpu.memory_space<vmem>>, vector<8x11776xf32>
    tpu.vector_store %arg6[%c56, %c0_43], %31 {strides = array<i32>} : memref<200x11776xf32, #tpu.memory_space<vmem>>, vector<8x11776xf32>,
    %c0_44 = arith.constant 0 : index
    %c1920 = arith.constant 1920 : index
    %33 = vector.load %arg5[%c0_44, %c1920] : memref<8x18432xf32, #tpu.memory_space<vmem>>, vector<8x11776xf32>
    %c64 = arith.constant 64 : index
    %c0_45 = arith.constant 0 : index
    %34 = vector.load %arg6[%c64, %c0_45] : memref<200x11776xf32, #tpu.memory_space<vmem>>, vector<8x11776xf32>
    tpu.vector_store %arg6[%c64, %c0_45], %33 {strides = array<i32>} : memref<200x11776xf32, #tpu.memory_space<vmem>>, vector<8x11776xf32>,
    %c0_46 = arith.constant 0 : index
    %c2048 = arith.constant 2048 : index
    %35 = vector.load %arg5[%c0_46, %c2048] : memref<8x18432xf32, #tpu.memory_space<vmem>>, vector<8x11776xf32>
    %c72 = arith.constant 72 : index
    %c0_47 = arith.constant 0 : index
    %36 = vector.load %arg6[%c72, %c0_47] : memref<200x11776xf32, #tpu.memory_space<vmem>>, vector<8x11776xf32>
    tpu.vector_store %arg6[%c72, %c0_47], %35 {strides = array<i32>} : memref<200x11776xf32, #tpu.memory_space<vmem>>, vector<8x11776xf32>,
    %c0_48 = arith.constant 0 : index
    %c3072 = arith.constant 3072 : index
    %37 = vector.load %arg5[%c0_48, %c3072] : memref<8x18432xf32, #tpu.memory_space<vmem>>, vector<8x11776xf32>
    %c80 = arith.constant 80 : index
    %c0_49 = arith.constant 0 : index
    %38 = vector.load %arg6[%c80, %c0_49] : memref<200x11776xf32, #tpu.memory_space<vmem>>, vector<8x11776xf32>
    tpu.vector_store %arg6[%c80, %c0_49], %37 {strides = array<i32>} : memref<200x11776xf32, #tpu.memory_space<vmem>>, vector<8x11776xf32>,
    %c0_50 = arith.constant 0 : index
    %c3200 = arith.constant 3200 : index
    %39 = vector.load %arg5[%c0_50, %c3200] : memref<8x18432xf32, #tpu.memory_space<vmem>>, vector<8x11776xf32>
    %c88 = arith.constant 88 : index
    %c0_51 = arith.constant 0 : index
    %40 = vector.load %arg6[%c88, %c0_51] : memref<200x11776xf32, #tpu.memory_space<vmem>>, vector<8x11776xf32>
    tpu.vector_store %arg6[%c88, %c0_51], %39 {strides = array<i32>} : memref<200x11776xf32, #tpu.memory_space<vmem>>, vector<8x11776xf32>,
    %c0_52 = arith.constant 0 : index
    %c3328 = arith.constant 3328 : index
    %41 = vector.load %arg5[%c0_52, %c3328] : memref<8x18432xf32, #tpu.memory_space<vmem>>, vector<8x11776xf32>
    %c96 = arith.constant 96 : index
    %c0_53 = arith.constant 0 : index
    %42 = vector.load %arg6[%c96, %c0_53] : memref<200x11776xf32, #tpu.memory_space<vmem>>, vector<8x11776xf32>
    tpu.vector_store %arg6[%c96, %c0_53], %41 {strides = array<i32>} : memref<200x11776xf32, #tpu.memory_space<vmem>>, vector<8x11776xf32>,
    %c0_54 = arith.constant 0 : index
    %c3456 = arith.constant 3456 : index
    %43 = vector.load %arg5[%c0_54, %c3456] : memref<8x18432xf32, #tpu.memory_space<vmem>>, vector<8x11776xf32>
    %c104 = arith.constant 104 : index
    %c0_55 = arith.constant 0 : index
    %44 = vector.load %arg6[%c104, %c0_55] : memref<200x11776xf32, #tpu.memory_space<vmem>>, vector<8x11776xf32>
    tpu.vector_store %arg6[%c104, %c0_55], %43 {strides = array<i32>} : memref<200x11776xf32, #tpu.memory_space<vmem>>, vector<8x11776xf32>,
    %c0_56 = arith.constant 0 : index
    %c3584 = arith.constant 3584 : index
    %45 = vector.load %arg5[%c0_56, %c3584] : memref<8x18432xf32, #tpu.memory_space<vmem>>, vector<8x11776xf32>
    %c112 = arith.constant 112 : index
    %c0_57 = arith.constant 0 : index
    %46 = vector.load %arg6[%c112, %c0_57] : memref<200x11776xf32, #tpu.memory_space<vmem>>, vector<8x11776xf32>
    tpu.vector_store %arg6[%c112, %c0_57], %45 {strides = array<i32>} : memref<200x11776xf32, #tpu.memory_space<vmem>>, vector<8x11776xf32>,
    %c0_58 = arith.constant 0 : index
    %c4608 = arith.constant 4608 : index
    %47 = vector.load %arg5[%c0_58, %c4608] : memref<8x18432xf32, #tpu.memory_space<vmem>>, vector<8x11776xf32>
    %c120 = arith.constant 120 : index
    %c0_59 = arith.constant 0 : index
    %48 = vector.load %arg6[%c120, %c0_59] : memref<200x11776xf32, #tpu.memory_space<vmem>>, vector<8x11776xf32>
    tpu.vector_store %arg6[%c120, %c0_59], %47 {strides = array<i32>} : memref<200x11776xf32, #tpu.memory_space<vmem>>, vector<8x11776xf32>,
    %c0_60 = arith.constant 0 : index
    %c4736 = arith.constant 4736 : index
    %49 = vector.load %arg5[%c0_60, %c4736] : memref<8x18432xf32, #tpu.memory_space<vmem>>, vector<8x11776xf32>
    %c128_61 = arith.constant 128 : index
    %c0_62 = arith.constant 0 : index
    %50 = vector.load %arg6[%c128_61, %c0_62] : memref<200x11776xf32, #tpu.memory_space<vmem>>, vector<8x11776xf32>
    tpu.vector_store %arg6[%c128_61, %c0_62], %49 {strides = array<i32>} : memref<200x11776xf32, #tpu.memory_space<vmem>>, vector<8x11776xf32>,
    %c0_63 = arith.constant 0 : index
    %c4864 = arith.constant 4864 : index
    %51 = vector.load %arg5[%c0_63, %c4864] : memref<8x18432xf32, #tpu.memory_space<vmem>>, vector<8x11776xf32>
    %c136 = arith.constant 136 : index
    %c0_64 = arith.constant 0 : index
    %52 = vector.load %arg6[%c136, %c0_64] : memref<200x11776xf32, #tpu.memory_space<vmem>>, vector<8x11776xf32>
    tpu.vector_store %arg6[%c136, %c0_64], %51 {strides = array<i32>} : memref<200x11776xf32, #tpu.memory_space<vmem>>, vector<8x11776xf32>,
    %c0_65 = arith.constant 0 : index
    %c4992 = arith.constant 4992 : index
    %53 = vector.load %arg5[%c0_65, %c4992] : memref<8x18432xf32, #tpu.memory_space<vmem>>, vector<8x11776xf32>
    %c144 = arith.constant 144 : index
    %c0_66 = arith.constant 0 : index
    %54 = vector.load %arg6[%c144, %c0_66] : memref<200x11776xf32, #tpu.memory_space<vmem>>, vector<8x11776xf32>
    tpu.vector_store %arg6[%c144, %c0_66], %53 {strides = array<i32>} : memref<200x11776xf32, #tpu.memory_space<vmem>>, vector<8x11776xf32>,
    %c0_67 = arith.constant 0 : index
    %c5120 = arith.constant 5120 : index
    %55 = vector.load %arg5[%c0_67, %c5120] : memref<8x18432xf32, #tpu.memory_space<vmem>>, vector<8x11776xf32>
    %c152 = arith.constant 152 : index
    %c0_68 = arith.constant 0 : index
    %56 = vector.load %arg6[%c152, %c0_68] : memref<200x11776xf32, #tpu.memory_space<vmem>>, vector<8x11776xf32>
    tpu.vector_store %arg6[%c152, %c0_68], %55 {strides = array<i32>} : memref<200x11776xf32, #tpu.memory_space<vmem>>, vector<8x11776xf32>,
    %c0_69 = arith.constant 0 : index
    %c6144 = arith.constant 6144 : index
    %57 = vector.load %arg5[%c0_69, %c6144] : memref<8x18432xf32, #tpu.memory_space<vmem>>, vector<8x11776xf32>
    %c160 = arith.constant 160 : index
    %c0_70 = arith.constant 0 : index
    %58 = vector.load %arg6[%c160, %c0_70] : memref<200x11776xf32, #tpu.memory_space<vmem>>, vector<8x11776xf32>
    tpu.vector_store %arg6[%c160, %c0_70], %57 {strides = array<i32>} : memref<200x11776xf32, #tpu.memory_space<vmem>>, vector<8x11776xf32>,
    %c0_71 = arith.constant 0 : index
    %c6272 = arith.constant 6272 : index
    %59 = vector.load %arg5[%c0_71, %c6272] : memref<8x18432xf32, #tpu.memory_space<vmem>>, vector<8x11776xf32>
    %c168 = arith.constant 168 : index
    %c0_72 = arith.constant 0 : index
    %60 = vector.load %arg6[%c168, %c0_72] : memref<200x11776xf32, #tpu.memory_space<vmem>>, vector<8x11776xf32>
    tpu.vector_store %arg6[%c168, %c0_72], %59 {strides = array<i32>} : memref<200x11776xf32, #tpu.memory_space<vmem>>, vector<8x11776xf32>,
    %c0_73 = arith.constant 0 : index
    %c6400 = arith.constant 6400 : index
    %61 = vector.load %arg5[%c0_73, %c6400] : memref<8x18432xf32, #tpu.memory_space<vmem>>, vector<8x11776xf32>
    %c176 = arith.constant 176 : index
    %c0_74 = arith.constant 0 : index
    %62 = vector.load %arg6[%c176, %c0_74] : memref<200x11776xf32, #tpu.memory_space<vmem>>, vector<8x11776xf32>
    tpu.vector_store %arg6[%c176, %c0_74], %61 {strides = array<i32>} : memref<200x11776xf32, #tpu.memory_space<vmem>>, vector<8x11776xf32>,
    %c0_75 = arith.constant 0 : index
    %c6528 = arith.constant 6528 : index
    %63 = vector.load %arg5[%c0_75, %c6528] : memref<8x18432xf32, #tpu.memory_space<vmem>>, vector<8x11776xf32>
    %c184 = arith.constant 184 : index
    %c0_76 = arith.constant 0 : index
    %64 = vector.load %arg6[%c184, %c0_76] : memref<200x11776xf32, #tpu.memory_space<vmem>>, vector<8x11776xf32>
    tpu.vector_store %arg6[%c184, %c0_76], %63 {strides = array<i32>} : memref<200x11776xf32, #tpu.memory_space<vmem>>, vector<8x11776xf32>,
    %c0_77 = arith.constant 0 : index
    %c6656 = arith.constant 6656 : index
    %65 = vector.load %arg5[%c0_77, %c6656] : memref<8x18432xf32, #tpu.memory_space<vmem>>, vector<8x11776xf32>
    %c192 = arith.constant 192 : index
    %c0_78 = arith.constant 0 : index
    %66 = vector.load %arg6[%c192, %c0_78] : memref<200x11776xf32, #tpu.memory_space<vmem>>, vector<8x11776xf32>
    tpu.vector_store %arg6[%c192, %c0_78], %65 {strides = array<i32>} : memref<200x11776xf32, #tpu.memory_space<vmem>>, vector<8x11776xf32>,
    %c0_79 = arith.constant 0 : index
    %c0_80 = arith.constant 0 : index
    %67 = vector.load %arg3[%c0_79, %c0_80] : memref<16x200xf32, #tpu.memory_space<vmem>>, vector<16x200xf32>
    %c0_81 = arith.constant 0 : index
    %c0_82 = arith.constant 0 : index
    %68 = vector.load %arg6[%c0_81, %c0_82] : memref<200x11776xf32, #tpu.memory_space<vmem>>, vector<200x11776xf32>
    %cst_83 = arith.constant dense<0.000000e+00> : vector<16x11776xf32>
    %69 = tpu.matmul %67, %68, %cst_83 {dimension_numbers = #tpu.dot_dimension_numbers<[1], [0], [0], [1], [0, 0, 1, 1], [], []>} : vector<16x200xf32>, vector<200x11776xf32>, vector<16x11776xf32> -> vector<16x11776xf32>
    %cst_84 = arith.constant 0.000000e+00 : f32
    %70 = vector.broadcast %cst_84 : f32 to vector<16x124xf32>
    %cst_85 = arith.constant 0.000000e+00 : f32
    %71 = vector.broadcast %cst_85 : f32 to vector<16x124xf32>
    %72 = vector.extract_strided_slice %69 {offsets = [0, 0], sizes = [16, 124], strides = [1, 1]} : vector<16x11776xf32> to vector<16x124xf32>
    %73 = arith.addf %70, %72 : vector<16x124xf32>
    %74 = arith.mulf %72, %72 : vector<16x124xf32>
    %75 = arith.addf %71, %74 : vector<16x124xf32>
    %76 = vector.extract_strided_slice %69 {offsets = [0, 128], sizes = [16, 124], strides = [1, 1]} : vector<16x11776xf32> to vector<16x124xf32>
    %77 = arith.addf %73, %76 : vector<16x124xf32>
    %78 = arith.mulf %76, %76 : vector<16x124xf32>
    %79 = arith.addf %75, %78 : vector<16x124xf32>
    %80 = vector.extract_strided_slice %69 {offsets = [0, 256], sizes = [16, 124], strides = [1, 1]} : vector<16x11776xf32> to vector<16x124xf32>
    %81 = arith.addf %77, %80 : vector<16x124xf32>
    %82 = arith.mulf %80, %80 : vector<16x124xf32>
    %83 = arith.addf %79, %82 : vector<16x124xf32>
    %84 = vector.extract_strided_slice %69 {offsets = [0, 384], sizes = [16, 124], strides = [1, 1]} : vector<16x11776xf32> to vector<16x124xf32>
    %85 = arith.addf %81, %84 : vector<16x124xf32>
    %86 = arith.mulf %84, %84 : vector<16x124xf32>
    %87 = arith.addf %83, %86 : vector<16x124xf32>
    %88 = vector.extract_strided_slice %69 {offsets = [0, 512], sizes = [16, 124], strides = [1, 1]} : vector<16x11776xf32> to vector<16x124xf32>
    %89 = arith.addf %85, %88 : vector<16x124xf32>
    %90 = arith.mulf %88, %88 : vector<16x124xf32>
    %91 = arith.addf %87, %90 : vector<16x124xf32>
    %92 = vector.extract_strided_slice %69 {offsets = [0, 640], sizes = [16, 124], strides = [1, 1]} : vector<16x11776xf32> to vector<16x124xf32>
    %93 = arith.addf %89, %92 : vector<16x124xf32>
    %94 = arith.mulf %92, %92 : vector<16x124xf32>
    %95 = arith.addf %91, %94 : vector<16x124xf32>
    %96 = vector.extract_strided_slice %69 {offsets = [0, 768], sizes = [16, 124], strides = [1, 1]} : vector<16x11776xf32> to vector<16x124xf32>
    %97 = arith.addf %93, %96 : vector<16x124xf32>
    %98 = arith.mulf %96, %96 : vector<16x124xf32>
    %99 = arith.addf %95, %98 : vector<16x124xf32>
    %100 = vector.extract_strided_slice %69 {offsets = [0, 896], sizes = [16, 124], strides = [1, 1]} : vector<16x11776xf32> to vector<16x124xf32>
    %101 = arith.addf %97, %100 : vector<16x124xf32>
    %102 = arith.mulf %100, %100 : vector<16x124xf32>
    %103 = arith.addf %99, %102 : vector<16x124xf32>
    %104 = vector.extract_strided_slice %69 {offsets = [0, 1536], sizes = [16, 124], strides = [1, 1]} : vector<16x11776xf32> to vector<16x124xf32>
    %105 = arith.addf %101, %104 : vector<16x124xf32>
    %106 = arith.mulf %104, %104 : vector<16x124xf32>
    %107 = arith.addf %103, %106 : vector<16x124xf32>
    %108 = vector.extract_strided_slice %69 {offsets = [0, 1664], sizes = [16, 124], strides = [1, 1]} : vector<16x11776xf32> to vector<16x124xf32>
    %109 = arith.addf %105, %108 : vector<16x124xf32>
    %110 = arith.mulf %108, %108 : vector<16x124xf32>
    %111 = arith.addf %107, %110 : vector<16x124xf32>
    %112 = vector.extract_strided_slice %69 {offsets = [0, 1792], sizes = [16, 124], strides = [1, 1]} : vector<16x11776xf32> to vector<16x124xf32>
    %113 = arith.addf %109, %112 : vector<16x124xf32>
    %114 = arith.mulf %112, %112 : vector<16x124xf32>
    %115 = arith.addf %111, %114 : vector<16x124xf32>
    %116 = vector.extract_strided_slice %69 {offsets = [0, 1920], sizes = [16, 124], strides = [1, 1]} : vector<16x11776xf32> to vector<16x124xf32>
    %117 = arith.addf %113, %116 : vector<16x124xf32>
    %118 = arith.mulf %116, %116 : vector<16x124xf32>
    %119 = arith.addf %115, %118 : vector<16x124xf32>
    %120 = vector.extract_strided_slice %69 {offsets = [0, 2048], sizes = [16, 124], strides = [1, 1]} : vector<16x11776xf32> to vector<16x124xf32>
    %121 = arith.addf %117, %120 : vector<16x124xf32>
    %122 = arith.mulf %120, %120 : vector<16x124xf32>
    %123 = arith.addf %119, %122 : vector<16x124xf32>
    %124 = vector.extract_strided_slice %69 {offsets = [0, 2176], sizes = [16, 124], strides = [1, 1]} : vector<16x11776xf32> to vector<16x124xf32>
    %125 = arith.addf %121, %124 : vector<16x124xf32>
    %126 = arith.mulf %124, %124 : vector<16x124xf32>
    %127 = arith.addf %123, %126 : vector<16x124xf32>
    %128 = vector.extract_strided_slice %69 {offsets = [0, 2304], sizes = [16, 124], strides = [1, 1]} : vector<16x11776xf32> to vector<16x124xf32>
    %129 = arith.addf %125, %128 : vector<16x124xf32>
    %130 = arith.mulf %128, %128 : vector<16x124xf32>
    %131 = arith.addf %127, %130 : vector<16x124xf32>
    %132 = vector.extract_strided_slice %69 {offsets = [0, 2432], sizes = [16, 124], strides = [1, 1]} : vector<16x11776xf32> to vector<16x124xf32>
    %133 = arith.addf %129, %132 : vector<16x124xf32>
    %134 = arith.mulf %132, %132 : vector<16x124xf32>
    %135 = arith.addf %131, %134 : vector<16x124xf32>
    %136 = vector.extract_strided_slice %69 {offsets = [0, 3072], sizes = [16, 124], strides = [1, 1]} : vector<16x11776xf32> to vector<16x124xf32>
    %137 = arith.addf %133, %136 : vector<16x124xf32>
    %138 = arith.mulf %136, %136 : vector<16x124xf32>
    %139 = arith.addf %135, %138 : vector<16x124xf32>
    %140 = vector.extract_strided_slice %69 {offsets = [0, 3200], sizes = [16, 124], strides = [1, 1]} : vector<16x11776xf32> to vector<16x124xf32>
    %141 = arith.addf %137, %140 : vector<16x124xf32>
    %142 = arith.mulf %140, %140 : vector<16x124xf32>
    %143 = arith.addf %139, %142 : vector<16x124xf32>
    %144 = vector.extract_strided_slice %69 {offsets = [0, 3328], sizes = [16, 124], strides = [1, 1]} : vector<16x11776xf32> to vector<16x124xf32>
    %145 = arith.addf %141, %144 : vector<16x124xf32>
    %146 = arith.mulf %144, %144 : vector<16x124xf32>
    %147 = arith.addf %143, %146 : vector<16x124xf32>
    %148 = vector.extract_strided_slice %69 {offsets = [0, 3456], sizes = [16, 124], strides = [1, 1]} : vector<16x11776xf32> to vector<16x124xf32>
    %149 = arith.addf %145, %148 : vector<16x124xf32>
    %150 = arith.mulf %148, %148 : vector<16x124xf32>
    %151 = arith.addf %147, %150 : vector<16x124xf32>
    %152 = vector.extract_strided_slice %69 {offsets = [0, 3584], sizes = [16, 124], strides = [1, 1]} : vector<16x11776xf32> to vector<16x124xf32>
    %153 = arith.addf %149, %152 : vector<16x124xf32>
    %154 = arith.mulf %152, %152 : vector<16x124xf32>
    %155 = arith.addf %151, %154 : vector<16x124xf32>
    %156 = vector.extract_strided_slice %69 {offsets = [0, 3712], sizes = [16, 124], strides = [1, 1]} : vector<16x11776xf32> to vector<16x124xf32>
    %157 = arith.addf %153, %156 : vector<16x124xf32>
    %158 = arith.mulf %156, %156 : vector<16x124xf32>
    %159 = arith.addf %155, %158 : vector<16x124xf32>
    %160 = vector.extract_strided_slice %69 {offsets = [0, 3840], sizes = [16, 124], strides = [1, 1]} : vector<16x11776xf32> to vector<16x124xf32>
    %161 = arith.addf %157, %160 : vector<16x124xf32>
    %162 = arith.mulf %160, %160 : vector<16x124xf32>
    %163 = arith.addf %159, %162 : vector<16x124xf32>
    %164 = vector.extract_strided_slice %69 {offsets = [0, 3968], sizes = [16, 124], strides = [1, 1]} : vector<16x11776xf32> to vector<16x124xf32>
    %165 = arith.addf %161, %164 : vector<16x124xf32>
    %166 = arith.mulf %164, %164 : vector<16x124xf32>
    %167 = arith.addf %163, %166 : vector<16x124xf32>
    %168 = vector.extract_strided_slice %69 {offsets = [0, 4608], sizes = [16, 124], strides = [1, 1]} : vector<16x11776xf32> to vector<16x124xf32>
    %169 = arith.addf %165, %168 : vector<16x124xf32>
    %170 = arith.mulf %168, %168 : vector<16x124xf32>
    %171 = arith.addf %167, %170 : vector<16x124xf32>
    %172 = vector.extract_strided_slice %69 {offsets = [0, 4736], sizes = [16, 124], strides = [1, 1]} : vector<16x11776xf32> to vector<16x124xf32>
    %173 = arith.addf %169, %172 : vector<16x124xf32>
    %174 = arith.mulf %172, %172 : vector<16x124xf32>
    %175 = arith.addf %171, %174 : vector<16x124xf32>
    %176 = vector.extract_strided_slice %69 {offsets = [0, 4864], sizes = [16, 124], strides = [1, 1]} : vector<16x11776xf32> to vector<16x124xf32>
    %177 = arith.addf %173, %176 : vector<16x124xf32>
    %178 = arith.mulf %176, %176 : vector<16x124xf32>
    %179 = arith.addf %175, %178 : vector<16x124xf32>
    %180 = vector.extract_strided_slice %69 {offsets = [0, 4992], sizes = [16, 124], strides = [1, 1]} : vector<16x11776xf32> to vector<16x124xf32>
    %181 = arith.addf %177, %180 : vector<16x124xf32>
    %182 = arith.mulf %180, %180 : vector<16x124xf32>
    %183 = arith.addf %179, %182 : vector<16x124xf32>
    %184 = vector.extract_strided_slice %69 {offsets = [0, 5120], sizes = [16, 124], strides = [1, 1]} : vector<16x11776xf32> to vector<16x124xf32>
    %185 = arith.addf %181, %184 : vector<16x124xf32>
    %186 = arith.mulf %184, %184 : vector<16x124xf32>
    %187 = arith.addf %183, %186 : vector<16x124xf32>
    %188 = vector.extract_strided_slice %69 {offsets = [0, 5248], sizes = [16, 124], strides = [1, 1]} : vector<16x11776xf32> to vector<16x124xf32>
    %189 = arith.addf %185, %188 : vector<16x124xf32>
    %190 = arith.mulf %188, %188 : vector<16x124xf32>
    %191 = arith.addf %187, %190 : vector<16x124xf32>
    %192 = vector.extract_strided_slice %69 {offsets = [0, 5376], sizes = [16, 124], strides = [1, 1]} : vector<16x11776xf32> to vector<16x124xf32>
    %193 = arith.addf %189, %192 : vector<16x124xf32>
    %194 = arith.mulf %192, %192 : vector<16x124xf32>
    %195 = arith.addf %191, %194 : vector<16x124xf32>
    %196 = vector.extract_strided_slice %69 {offsets = [0, 5504], sizes = [16, 124], strides = [1, 1]} : vector<16x11776xf32> to vector<16x124xf32>
    %197 = arith.addf %193, %196 : vector<16x124xf32>
    %198 = arith.mulf %196, %196 : vector<16x124xf32>
    %199 = arith.addf %195, %198 : vector<16x124xf32>
    %200 = vector.extract_strided_slice %69 {offsets = [0, 6144], sizes = [16, 124], strides = [1, 1]} : vector<16x11776xf32> to vector<16x124xf32>
    %201 = arith.addf %197, %200 : vector<16x124xf32>
    %202 = arith.mulf %200, %200 : vector<16x124xf32>
    %203 = arith.addf %199, %202 : vector<16x124xf32>
    %204 = vector.extract_strided_slice %69 {offsets = [0, 6272], sizes = [16, 124], strides = [1, 1]} : vector<16x11776xf32> to vector<16x124xf32>
    %205 = arith.addf %201, %204 : vector<16x124xf32>
    %206 = arith.mulf %204, %204 : vector<16x124xf32>
    %207 = arith.addf %203, %206 : vector<16x124xf32>
    %208 = vector.extract_strided_slice %69 {offsets = [0, 6400], sizes = [16, 124], strides = [1, 1]} : vector<16x11776xf32> to vector<16x124xf32>
    %209 = arith.addf %205, %208 : vector<16x124xf32>
    %210 = arith.mulf %208, %208 : vector<16x124xf32>
    %211 = arith.addf %207, %210 : vector<16x124xf32>
    %212 = vector.extract_strided_slice %69 {offsets = [0, 6528], sizes = [16, 124], strides = [1, 1]} : vector<16x11776xf32> to vector<16x124xf32>
    %213 = arith.addf %209, %212 : vector<16x124xf32>
    %214 = arith.mulf %212, %212 : vector<16x124xf32>
    %215 = arith.addf %211, %214 : vector<16x124xf32>
    %216 = vector.extract_strided_slice %69 {offsets = [0, 6656], sizes = [16, 124], strides = [1, 1]} : vector<16x11776xf32> to vector<16x124xf32>
    %217 = arith.addf %213, %216 : vector<16x124xf32>
    %218 = arith.mulf %216, %216 : vector<16x124xf32>
    %219 = arith.addf %215, %218 : vector<16x124xf32>
    %220 = vector.extract_strided_slice %69 {offsets = [0, 6784], sizes = [16, 124], strides = [1, 1]} : vector<16x11776xf32> to vector<16x124xf32>
    %221 = arith.addf %217, %220 : vector<16x124xf32>
    %222 = arith.mulf %220, %220 : vector<16x124xf32>
    %223 = arith.addf %219, %222 : vector<16x124xf32>
    %224 = vector.extract_strided_slice %69 {offsets = [0, 6912], sizes = [16, 124], strides = [1, 1]} : vector<16x11776xf32> to vector<16x124xf32>
    %225 = arith.addf %221, %224 : vector<16x124xf32>
    %226 = arith.mulf %224, %224 : vector<16x124xf32>
    %227 = arith.addf %223, %226 : vector<16x124xf32>
    %228 = vector.extract_strided_slice %69 {offsets = [0, 7040], sizes = [16, 124], strides = [1, 1]} : vector<16x11776xf32> to vector<16x124xf32>
    %229 = arith.addf %225, %228 : vector<16x124xf32>
    %230 = arith.mulf %228, %228 : vector<16x124xf32>
    %231 = arith.addf %227, %230 : vector<16x124xf32>
    %232 = vector.extract_strided_slice %69 {offsets = [0, 7680], sizes = [16, 124], strides = [1, 1]} : vector<16x11776xf32> to vector<16x124xf32>
    %233 = arith.addf %229, %232 : vector<16x124xf32>
    %234 = arith.mulf %232, %232 : vector<16x124xf32>
    %235 = arith.addf %231, %234 : vector<16x124xf32>
    %236 = vector.extract_strided_slice %69 {offsets = [0, 7808], sizes = [16, 124], strides = [1, 1]} : vector<16x11776xf32> to vector<16x124xf32>
    %237 = arith.addf %233, %236 : vector<16x124xf32>
    %238 = arith.mulf %236, %236 : vector<16x124xf32>
    %239 = arith.addf %235, %238 : vector<16x124xf32>
    %240 = vector.extract_strided_slice %69 {offsets = [0, 7936], sizes = [16, 124], strides = [1, 1]} : vector<16x11776xf32> to vector<16x124xf32>
    %241 = arith.addf %237, %240 : vector<16x124xf32>
    %242 = arith.mulf %240, %240 : vector<16x124xf32>
    %243 = arith.addf %239, %242 : vector<16x124xf32>
    %244 = vector.extract_strided_slice %69 {offsets = [0, 8064], sizes = [16, 124], strides = [1, 1]} : vector<16x11776xf32> to vector<16x124xf32>
    %245 = arith.addf %241, %244 : vector<16x124xf32>
    %246 = arith.mulf %244, %244 : vector<16x124xf32>
    %247 = arith.addf %243, %246 : vector<16x124xf32>
    %248 = vector.extract_strided_slice %69 {offsets = [0, 8192], sizes = [16, 124], strides = [1, 1]} : vector<16x11776xf32> to vector<16x124xf32>
    %249 = arith.addf %245, %248 : vector<16x124xf32>
    %250 = arith.mulf %248, %248 : vector<16x124xf32>
    %251 = arith.addf %247, %250 : vector<16x124xf32>
    %252 = vector.extract_strided_slice %69 {offsets = [0, 8320], sizes = [16, 124], strides = [1, 1]} : vector<16x11776xf32> to vector<16x124xf32>
    %253 = arith.addf %249, %252 : vector<16x124xf32>
    %254 = arith.mulf %252, %252 : vector<16x124xf32>
    %255 = arith.addf %251, %254 : vector<16x124xf32>
    %256 = vector.extract_strided_slice %69 {offsets = [0, 8448], sizes = [16, 124], strides = [1, 1]} : vector<16x11776xf32> to vector<16x124xf32>
    %257 = arith.addf %253, %256 : vector<16x124xf32>
    %258 = arith.mulf %256, %256 : vector<16x124xf32>
    %259 = arith.addf %255, %258 : vector<16x124xf32>
    %260 = vector.extract_strided_slice %69 {offsets = [0, 8576], sizes = [16, 124], strides = [1, 1]} : vector<16x11776xf32> to vector<16x124xf32>
    %261 = arith.addf %257, %260 : vector<16x124xf32>
    %262 = arith.mulf %260, %260 : vector<16x124xf32>
    %263 = arith.addf %259, %262 : vector<16x124xf32>
    %264 = vector.extract_strided_slice %69 {offsets = [0, 9216], sizes = [16, 124], strides = [1, 1]} : vector<16x11776xf32> to vector<16x124xf32>
    %265 = arith.addf %261, %264 : vector<16x124xf32>
    %266 = arith.mulf %264, %264 : vector<16x124xf32>
    %267 = arith.addf %263, %266 : vector<16x124xf32>
    %268 = vector.extract_strided_slice %69 {offsets = [0, 9344], sizes = [16, 124], strides = [1, 1]} : vector<16x11776xf32> to vector<16x124xf32>
    %269 = arith.addf %265, %268 : vector<16x124xf32>
    %270 = arith.mulf %268, %268 : vector<16x124xf32>
    %271 = arith.addf %267, %270 : vector<16x124xf32>
    %272 = vector.extract_strided_slice %69 {offsets = [0, 9472], sizes = [16, 124], strides = [1, 1]} : vector<16x11776xf32> to vector<16x124xf32>
    %273 = arith.addf %269, %272 : vector<16x124xf32>
    %274 = arith.mulf %272, %272 : vector<16x124xf32>
    %275 = arith.addf %271, %274 : vector<16x124xf32>
    %276 = vector.extract_strided_slice %69 {offsets = [0, 9600], sizes = [16, 124], strides = [1, 1]} : vector<16x11776xf32> to vector<16x124xf32>
    %277 = arith.addf %273, %276 : vector<16x124xf32>
    %278 = arith.mulf %276, %276 : vector<16x124xf32>
    %279 = arith.addf %275, %278 : vector<16x124xf32>
    %280 = vector.extract_strided_slice %69 {offsets = [0, 9728], sizes = [16, 124], strides = [1, 1]} : vector<16x11776xf32> to vector<16x124xf32>
    %281 = arith.addf %277, %280 : vector<16x124xf32>
    %282 = arith.mulf %280, %280 : vector<16x124xf32>
    %283 = arith.addf %279, %282 : vector<16x124xf32>
    %284 = vector.extract_strided_slice %69 {offsets = [0, 9856], sizes = [16, 124], strides = [1, 1]} : vector<16x11776xf32> to vector<16x124xf32>
    %285 = arith.addf %281, %284 : vector<16x124xf32>
    %286 = arith.mulf %284, %284 : vector<16x124xf32>
    %287 = arith.addf %283, %286 : vector<16x124xf32>
    %288 = vector.extract_strided_slice %69 {offsets = [0, 9984], sizes = [16, 124], strides = [1, 1]} : vector<16x11776xf32> to vector<16x124xf32>
    %289 = arith.addf %285, %288 : vector<16x124xf32>
    %290 = arith.mulf %288, %288 : vector<16x124xf32>
    %291 = arith.addf %287, %290 : vector<16x124xf32>
    %292 = vector.extract_strided_slice %69 {offsets = [0, 10112], sizes = [16, 124], strides = [1, 1]} : vector<16x11776xf32> to vector<16x124xf32>
    %293 = arith.addf %289, %292 : vector<16x124xf32>
    %294 = arith.mulf %292, %292 : vector<16x124xf32>
    %295 = arith.addf %291, %294 : vector<16x124xf32>
    %296 = vector.extract_strided_slice %69 {offsets = [0, 10752], sizes = [16, 124], strides = [1, 1]} : vector<16x11776xf32> to vector<16x124xf32>
    %297 = arith.addf %293, %296 : vector<16x124xf32>
    %298 = arith.mulf %296, %296 : vector<16x124xf32>
    %299 = arith.addf %295, %298 : vector<16x124xf32>
    %300 = vector.extract_strided_slice %69 {offsets = [0, 10880], sizes = [16, 124], strides = [1, 1]} : vector<16x11776xf32> to vector<16x124xf32>
    %301 = arith.addf %297, %300 : vector<16x124xf32>
    %302 = arith.mulf %300, %300 : vector<16x124xf32>
    %303 = arith.addf %299, %302 : vector<16x124xf32>
    %304 = vector.extract_strided_slice %69 {offsets = [0, 11008], sizes = [16, 124], strides = [1, 1]} : vector<16x11776xf32> to vector<16x124xf32>
    %305 = arith.addf %301, %304 : vector<16x124xf32>
    %306 = arith.mulf %304, %304 : vector<16x124xf32>
    %307 = arith.addf %303, %306 : vector<16x124xf32>
    %308 = vector.extract_strided_slice %69 {offsets = [0, 11136], sizes = [16, 124], strides = [1, 1]} : vector<16x11776xf32> to vector<16x124xf32>
    %309 = arith.addf %305, %308 : vector<16x124xf32>
    %310 = arith.mulf %308, %308 : vector<16x124xf32>
    %311 = arith.addf %307, %310 : vector<16x124xf32>
    %312 = vector.extract_strided_slice %69 {offsets = [0, 11264], sizes = [16, 124], strides = [1, 1]} : vector<16x11776xf32> to vector<16x124xf32>
    %313 = arith.addf %309, %312 : vector<16x124xf32>
    %314 = arith.mulf %312, %312 : vector<16x124xf32>
    %315 = arith.addf %311, %314 : vector<16x124xf32>
    %316 = vector.extract_strided_slice %69 {offsets = [0, 11392], sizes = [16, 124], strides = [1, 1]} : vector<16x11776xf32> to vector<16x124xf32>
    %317 = arith.addf %313, %316 : vector<16x124xf32>
    %318 = arith.mulf %316, %316 : vector<16x124xf32>
    %319 = arith.addf %315, %318 : vector<16x124xf32>
    %320 = vector.extract_strided_slice %69 {offsets = [0, 11520], sizes = [16, 124], strides = [1, 1]} : vector<16x11776xf32> to vector<16x124xf32>
    %321 = arith.addf %317, %320 : vector<16x124xf32>
    %322 = arith.mulf %320, %320 : vector<16x124xf32>
    %323 = arith.addf %319, %322 : vector<16x124xf32>
    %324 = vector.extract_strided_slice %69 {offsets = [0, 11648], sizes = [16, 124], strides = [1, 1]} : vector<16x11776xf32> to vector<16x124xf32>
    %325 = arith.addf %321, %324 : vector<16x124xf32>
    %326 = arith.mulf %324, %324 : vector<16x124xf32>
    %327 = arith.addf %323, %326 : vector<16x124xf32>
    %cst_86 = arith.constant dense<0.000000e+00> : vector<16xf32>
    %328 = vector.multi_reduction <add>, %325, %cst_86 [1] : vector<16x124xf32> to vector<16xf32>
    %329 = vector.shape_cast %328 : vector<16xf32> to vector<16x1xf32>
    %cst_87 = arith.constant dense<0.000000e+00> : vector<16xf32>
    %330 = vector.multi_reduction <add>, %327, %cst_87 [1] : vector<16x124xf32> to vector<16xf32>
    %331 = vector.shape_cast %330 : vector<16xf32> to vector<16x1xf32>
    %cst_88 = arith.constant 0.000000e+00 : f32
    %332 = vector.broadcast %cst_88 : f32 to vector<16x126xf32>
    %333 = tpu.concatenate %329, %331, %332 in 1 : vector<16x1xf32>, vector<16x1xf32>, vector<16x126xf32> -> vector<16x128xf32>
    %c0_89 = arith.constant 0 : index
    %c0_90 = arith.constant 0 : index
    %c0_91 = arith.constant 0 : index
    %c0_92 = arith.constant 0 : index
    %334 = vector.load %arg4[%c0_89, %c0_90, %c0_91, %c0_92] : memref<1x1x16x128xf32, #tpu.memory_space<vmem>>, vector<1x1x16x128xf32>
    %335 = vector.shape_cast %334 : vector<1x1x16x128xf32> to vector<16x128xf32>
    %336 = vector.shape_cast %333 : vector<16x128xf32> to vector<1x1x16x128xf32>
    tpu.vector_store %arg4[%c0_89, %c0_90, %c0_91, %c0_92], %336 {strides = array<i32>} : memref<1x1x16x128xf32, #tpu.memory_space<vmem>>, vector<1x1x16x128xf32>,
    return
  }
  func.func @transform_0(%arg0: i32, %arg1: i32) -> (i32, i32, i32, i32) {
    %c0_i32 = arith.constant 0 : i32
    %c0_i32_0 = arith.constant 0 : i32
    %c0_i32_1 = arith.constant 0 : i32
    return %arg0, %arg1, %c0_i32, %c0_i32_0 : i32, i32, i32, i32
  }
  func.func @transform_1(%arg0: i32, %arg1: i32) -> (i32, i32) {
    %c0_i32 = arith.constant 0 : i32
    %c0_i32_0 = arith.constant 0 : i32
    %c0_i32_1 = arith.constant 0 : i32
    return %c0_i32, %c0_i32_0 : i32, i32
  }
  func.func @transform_2(%arg0: i32, %arg1: i32) -> (i32, i32, i32, i32) {
    %c0_i32 = arith.constant 0 : i32
    %c0_i32_0 = arith.constant 0 : i32
    %c0_i32_1 = arith.constant 0 : i32
    return %arg0, %arg1, %c0_i32, %c0_i32_0 : i32, i32, i32, i32
  }
}

</mosaic_0001>

<bundles_post_ra>
// kernel: tpu_custom_call.1
= control target key start
LH: loop header
LB: loop body
LE: loop exit
PB: predicated region body
PF: predicated region fallthrough
CT: control target
= control target key end

     0   :  { %7 = vsyncpa [#allocation5], 0  ;;  %s15542_s0 = inlined_call_operand.hbm [shape: f32[2,1,1,18560], index: 0, kind: input, shape index: {}]   ;;  %s15543_s1 = inlined_call_operand.hbm [shape: f32[16,200], index: 1, kind: input, shape index: {}]   ;;  %s15544_s2 = inlined_call_operand.hbm [shape: f32[2,1,16,128], index: 2, kind: output, shape index: {}]  }
   0x1   :  { %9 = vsyncpa [#allocation5 + $0x1], 0 }
   0x2   :  { %10 = vsyncpa [#allocation8], 0 }
   0x3   :  { %11 = vsyncpa [#allocation6], 0 }
   0x4   :  { %13 = vsyncpa [#allocation6 + $0x1], 0  ;;  %s11330_s9 = smov 0   ;;  %s11332_s10 = smov 0  }
   0x5   :  { %s11334_s11 = smov 0   ;;  %s11336_s12 = smov 0  }
   0x6   :  { %s11338_s13 = smov 0   ;;  %s11340_s14 = smov 0  }
   0x7 LB: > { %s10901_s15 = sadd.s32 4294967295, %s11303_s14   ;;  %p10903_p0 = scmp.ge.s32.totalorder %s11303_s14, 1  ;;  %s11303_s14 = sphi %s11340_s14, %s19_s14   ;;  %s11299_s13 = sphi %s11338_s13, %s15902_s13   ;;  %s11295_s12 = sphi %s11336_s12, %s15901_s12   ;;  %s11291_s11 = sphi %s11334_s11, %s15900_s11   ;;  %s11287_s10 = sphi %s11332_s10, %s15899_s10   ;;  %s11283_s9 = sphi %s11330_s9, %s15898_s9  }
   0x8   : > { %p11362_p1 = scmp.eq.s32.totalorder %s10901_s15, 0  ;;  %p113_p2 = scmp.lt.s32.totalorder %s11303_s14, 3 }
   0x9   : > { %s124_s19 = sshll.u32 %s15543_s1, 4  ;;  %s11305_s21 = smov [#allocation7]   ;;  %s125_s19 = int_to_ptr.hbm [resolvable:$true] %s124_s19 }
   0xa   : > { %p11370_p3 = pnand %p10903_p0, %p113_p2  ;;  %s126_s22 = sshll.u32 %s11305_s21, 4  ;;  %s127_s22 = int_to_ptr.vmem [resolvable:$true] %s126_s22 }
   0xb   : > { %p10905_p6 = scmp.ge.s32.totalorder %s11303_s14, 2  ;;  %s11306_s23 = smov 256  }
   0xc   : > { %p11054_p4 = pneg %p11370_p3  ;;  %s11307_s24 = smov 16  }
   0xd   : > { %s10902_s25 = sadd.s32 4294967294, %s11303_s14   ;;  %s31_s26 = sadd.s32 1, %s11299_s13 }
   0xe   : > { %p11055_p5 = pnand %p11054_p4, %p11362_p1  ;;  %s40_s27 = sadd.s32 1, %s11291_s11 }
   0xf   : > { %p33_p7 = scmp.ge.s32.totalorder %s31_s26, 2  ;;  %p47_p8 = scmp.ne.s32.totalorder %s11291_s11, %s11287_s10 }
  0x10   : > { %11057 = dma.hbm_to_vmem [thread:$0]  (!%p11055_p5), %s125_s19, 512, %s127_s22, [#allocation8], %s11306_s23, %s11306_s23, %s11307_s24  }
  0x11   : > { %p48_p9 = scmp.eq.s32.totalorder %s11303_s14, 0  ;;  %p53_p10 = scmp.ne.s32.totalorder %s11287_s10, %s11283_s9 }
  0x12   : > { %s15904_s26 = smov (%p33_p7, %s31_s26), 0  ;;  %p100_p13 = scmp.eq.s32.totalorder %s10901_s15, 1 }
  0x13   : > { %p11389_p11 = por %p48_p9, %p47_p8  ;;  %p11395_p12 = por %p11362_p1, %p53_p10 }
  0x14   : > { %s35_s30 = ssub.s32 %s11299_s13, %s15904_s26  ;;  %p106_p2 = scmp.eq.s32.totalorder %s10902_s25, 1 }
  0x15   : > { %p38_p0 = scmp.eq.s32.totalorder %s35_s30, 0  ;;  %p11401_p4 = por %p100_p13, %p47_p8 }
  0x16   : > { %p11067_p5 = scmp.lt.s32.totalorder %s11303_s14, 2  ;;  %p11409_p7 = por %p106_p2, %p53_p10 }
  0x17   : > { %s11407_s4 = scalar_select %p38_p0, %s11291_s11, %s40_s27  }
  0x18   : > { %s140_s6 = sand.u32 1, %s11291_s11   ;;  %s11044_s8 = smul.u32 145, %s11299_s13 }
  0x19   : > { %s11043_s7 = smul.u32 145, %s140_s6  ;;  %p11059_p9 = pnand %p11067_p5, %p11389_p11 }
  0x1a   : > { %s150_s18 = scalar_lea.hbm %s15542_s0, %s11044_s8  ;;  %s141_s23 = scalar_lea.sflag [#allocation5], %s140_s6 }
  0x1b   : > { %s144_s19 = scalar_lea.vmem [#allocation4], %s11043_s7  ;;  %s152_s22 = sshll.u32 %s150_s18, 4  ;;  %s153_s22 = int_to_ptr.hbm [resolvable:$true] %s152_s22 }
  0x1c   : > { %s154_s21 = sshll.u32 %s144_s19, 4  ;;  %163 = sbr.rel (%p11370_p3) target bundleno = 1462 (0x5b6), region = 28  ;;  %s155_s21 = int_to_ptr.vmem [resolvable:$true] %s154_s21 }
  0x1d   : > { %11061 = dma.hbm_to_vmem [thread:$0]  (!%p11059_p9), %s153_s22, 2320, %s155_s21, %s141_s23  }
  0x21   : > { %s11423_s24 = sand.u32 1, %s11287_s10  }
  0x22   : > { %s11045_s25 = smul.u32 145, %s11423_s24  ;;  %s166_s27 = scalar_lea.sflag [#allocation5], %s11423_s24 }
  0x24   : > { %s11427_s28 = scalar_lea.vmem [#allocation4], %s11045_s25 }
  0x25   : > { %11270 = dma.done.wait (%p11395_p12), %s166_s27, 2320  }
  0x26   : > { %11272 = vsyncadd (%p11395_p12), %s166_s27, 4294964976 }
  0x27   : > { %11274 = dma.done.wait (%p11362_p1), [#allocation8], 512  }
  0x28   : > { %11276 = vsyncadd (%p11362_p1), [#allocation8], 4294966784  ;;  %v682_v0 = vld [vmem:[%s11427_s28 + $0x30] sm:$0xff]  ;;  %s11308_s20 = smov 125   ;;  %s11309_s30 = smov 126   ;;  %v271_v1 = vld [vmem:[%s11427_s28 + $0x20] sm:$0xff] }
  0x29   : > { %726 = vrot.lane.b32.xlu2 %v682_v0, %s11308_s20  ;;  %522 = vrot.lane.b32.xlu1 %v682_v0, %s11309_s30  ;;  %233 = vst [vmem:[#allocation2 + $0x180] ss:$8 sm:$0xf0] %v682_v0  ;;  %s11310_s29 = smov 127   ;;  %v272_v2 = vld [vmem:[%s11427_s28 + $0x28] sm:$0xff]  ;;  %v683_v3 = vld [vmem:[%s11427_s28 + $0x38] sm:$0xff] }
  0x2a   : > { %317 = vrot.lane.b32.xlu0 %v682_v0, %s11310_s29  ;;  %232 = vst [vmem:[#allocation2 + $0x180] ss:$8 sm:$0xf] %v682_v0  ;;  %v475_v4 = vld [vmem:[%s11427_s28 + $0x18] sm:$0xff]  ;;  %s11311_s16 = smov 124   ;;  %v269_v5 = vld [vmem:[%s11427_s28 + $0x10] sm:$0xff] }
  0x2b   : > { %227 = vst [vmem:[#allocation2 + $0x100] ss:$8 sm:$0xf0] %v271_v1  ;;  %v473_v6 = vld [vmem:[%s11427_s28 + $0x8] sm:$0xff]  ;;  %v472_v7 = vld [vmem:[%s11427_s28] sm:$0xff]  ;;  %vm772_vm0 = vcmask 1022976  }
  0x2c   : > { %226 = vst [vmem:[#allocation2 + $0x100] ss:$8 sm:$0xf] %v271_v1  ;;  %v275_v8 = vld [vmem:[%s11427_s28 + $0x40] sm:$0xff]  ;;  %v276_v10 = vld [vmem:[%s11427_s28 + $0x48] sm:$0xff]  ;;  %vm362_vm1 = vcmask 1046528  }
  0x2d   : > { %229 = vst [vmem:[#allocation2 + $0x140] ss:$8 sm:$0xf] %v272_v2  ;;  %v11312_v17 = vmov 0.0   ;;  %v277_v18 = vld [vmem:[%s11427_s28 + $0x50] sm:$0xff]  ;;  %vm568_vm2 = vcmask 1031168  }
  0x2e   : > { %230 = vst [vmem:[#allocation2 + $0x140] ss:$8 sm:$0xf0] %v272_v2  ;;  %vm364_vm3 = vcmask 1039360   ;;  %vm976_vm4 = vcmask 1014784   ;;  %vm7432_vm5 = vcmask 588800  }
  0x2f   : > { %224 = vst [vmem:[#allocation2 + $0xc0] ss:$8 sm:$0xf0] %v475_v4  ;;  %s10908_s6 = sshll.u32 %s11423_s24, 4  ;;  %vm10779_vm6 = vcmask 7168   ;;  %vm10782_vm7 = vcmask 15360  }
  0x30   : > { %223 = vst [vmem:[#allocation2 + $0xc0] ss:$8 sm:$0xf] %v475_v4  ;;  %s195_s7 = scalar_lea.vmem [#allocation9], %s10908_s6  ;;  %s11042_s8 = sshll.u32 %s11295_s12, 4 }
  0x31   : > { %728 = vrot.lane.b32.xlu2 %v683_v3, %s11308_s20  ;;  %524 = vrot.lane.b32.xlu1 %v683_v3, %s11309_s30  ;;  %220 = vst [vmem:[#allocation2 + $0x80] ss:$8 sm:$0xf] %v269_v5  ;;  %s10801_s18 = scalar_lea.hbm %s15544_s2, %s11042_s8  ;;  %s10802_s19 = sshll.u32 %s195_s7, 4  ;;  %s10803_s19 = int_to_ptr.vmem [resolvable:$true] %s10802_s19 }
  0x32   : > { %319 = vrot.lane.b32.xlu0 %v683_v3, %s11310_s29  ;;  %221 = vst [vmem:[#allocation2 + $0x80] ss:$8 sm:$0xf0] %v269_v5  ;;  %s10804_s21 = sshll.u32 %s10801_s18, 4  ;;  %s10788_s22 = scalar_lea.sflag [#allocation6], %s11423_s24  ;;  %s10805_s21 = int_to_ptr.hbm [resolvable:$true] %s10804_s21 }
  0x33   : > { %218 = vst [vmem:[#allocation2 + $0x40] ss:$8 sm:$0xf0] %v473_v6  ;;  %s11231_s23 = sshra.s32 %s10805_s21, 4  ;;  %s11232_s23 = int_to_ptr.hbm [resolvable:$true] %s11231_s23 }
  0x34   : > { %217 = vst [vmem:[#allocation2 + $0x40] ss:$8 sm:$0xf] %v473_v6  ;;  %s11233_s12 = scalar_lea.hbm %s11232_s23, 16  ;;  %p11238_p10 = scmp.lt.s32.totalorder %s11232_s23, %s15544_s2 }
  0x35   : > { %1136 = vst [vmem:[#allocation2 + $0x1a0] sm:$0xe0] %v11312_v17  ;;  %p11234_p1 = scmp.ne.s32.totalorder %s11232_s23, %s11233_s12 }
  0x36   : > { %1084 = vst [vmem:[#allocation2] sm:$0xe0] %v11312_v17 }
  0x37   : > { %1085 = vst [vmem:[#allocation2 + $0x8] sm:$0xe0] %v11312_v17  ;;  %p11235_p3 = pnand %p11234_p1, %p11401_p4 }
  0x38   : > { %1086 = vst [vmem:[#allocation2 + $0x10] sm:$0xe0] %v11312_v17 }
  0x39   : > { %932 = vrot.lane.b32.xlu1 %v683_v3, %s11311_s16  ;;  %313 = vrot.lane.b32.xlu2 %v271_v1, %s11310_s29  ;;  %1087 = vst [vmem:[#allocation2 + $0x18] sm:$0xe0] %v11312_v17  ;;  %p11236_p8 = pneg %p11235_p3 }
  0x3a   : > { %930 = vrot.lane.b32.xlu0 %v682_v0, %s11311_s16  ;;  %1088 = vst [vmem:[#allocation2 + $0x20] sm:$0xe0] %v11312_v17 }
  0x3b   : > { %1089 = vst [vmem:[#allocation2 + $0x28] sm:$0xe0] %v11312_v17 }
  0x3c   : > { %1090 = vst [vmem:[#allocation2 + $0x30] sm:$0xe0] %v11312_v17 }
  0x3d   : > { %1091 = vst [vmem:[#allocation2 + $0x38] sm:$0xe0] %v11312_v17 }
  0x3e   : > { %1092 = vst [vmem:[#allocation2 + $0x40] sm:$0xe0] %v11312_v17 }
  0x3f   : > { %1093 = vst [vmem:[#allocation2 + $0x48] sm:$0xe0] %v11312_v17 }
  0x40   : > { %1094 = vst [vmem:[#allocation2 + $0x50] sm:$0xe0] %v11312_v17 }
  0x41   : > { %518 = vrot.lane.b32.xlu1 %v271_v1, %s11309_s30  ;;  %520 = vrot.lane.b32.xlu2 %v272_v2, %s11309_s30  ;;  %1095 = vst [vmem:[#allocation2 + $0x58] sm:$0xe0] %v11312_v17 }
  0x42   : > { %315 = vrot.lane.b32.xlu0 %v272_v2, %s11310_s29  ;;  %1096 = vst [vmem:[#allocation2 + $0x60] sm:$0xe0] %v11312_v17 }
  0x43   : > { %1097 = vst [vmem:[#allocation2 + $0x68] sm:$0xe0] %v11312_v17 }
  0x44   : > { %1098 = vst [vmem:[#allocation2 + $0x70] sm:$0xe0] %v11312_v17 }
  0x45   : > { %1099 = vst [vmem:[#allocation2 + $0x78] sm:$0xe0] %v11312_v17 }
  0x46   : > { %1100 = vst [vmem:[#allocation2 + $0x80] sm:$0xe0] %v11312_v17 }
  0x47   : > { %1101 = vst [vmem:[#allocation2 + $0x88] sm:$0xe0] %v11312_v17 }
  0x48   : > { %1102 = vst [vmem:[#allocation2 + $0x90] sm:$0xe0] %v11312_v17 }
  0x49   : > { %724 = vrot.lane.b32.xlu1 %v272_v2, %s11308_s20  ;;  %926 = vrot.lane.b32.xlu2 %v271_v1, %s11311_s16  ;;  %1103 = vst [vmem:[#allocation2 + $0x98] sm:$0xe0] %v11312_v17 }
  0x4a   : > { %722 = vrot.lane.b32.xlu0 %v271_v1, %s11308_s20  ;;  %1104 = vst [vmem:[#allocation2 + $0xa0] sm:$0xe0] %v11312_v17 }
  0x4b   : > { %1105 = vst [vmem:[#allocation2 + $0xa8] sm:$0xe0] %v11312_v17 }
  0x4c   : > { %1106 = vst [vmem:[#allocation2 + $0xb0] sm:$0xe0] %v11312_v17 }
  0x4d   : > { %1107 = vst [vmem:[#allocation2 + $0xb8] sm:$0xe0] %v11312_v17 }
  0x4e   : > { %1108 = vst [vmem:[#allocation2 + $0xc0] sm:$0xe0] %v11312_v17 }
  0x4f   : > { %1109 = vst [vmem:[#allocation2 + $0xc8] sm:$0xe0] %v11312_v17 }
  0x50   : > { %1110 = vst [vmem:[#allocation2 + $0xd0] sm:$0xe0] %v11312_v17 }
  0x51   : > { %516 = vrot.lane.b32.xlu2 %v475_v4, %s11309_s30  ;;  %311 = vrot.lane.b32.xlu1 %v475_v4, %s11310_s29  ;;  %1111 = vst [vmem:[#allocation2 + $0xd8] sm:$0xe0] %v11312_v17 }
  0x52   : > { %928 = vrot.lane.b32.xlu0 %v272_v2, %s11311_s16  ;;  %1112 = vst [vmem:[#allocation2 + $0xe0] sm:$0xe0] %v11312_v17 }
  0x53   : > { %1113 = vst [vmem:[#allocation2 + $0xe8] sm:$0xe0] %v11312_v17 }
  0x54   : > { %1114 = vst [vmem:[#allocation2 + $0xf0] sm:$0xe0] %v11312_v17 }
  0x55   : > { %1115 = vst [vmem:[#allocation2 + $0xf8] sm:$0xe0] %v11312_v17 }
  0x56   : > { %1116 = vst [vmem:[#allocation2 + $0x100] sm:$0xe0] %v11312_v17 }
  0x57   : > { %1117 = vst [vmem:[#allocation2 + $0x108] sm:$0xe0] %v11312_v17 }
  0x58   : > { %1118 = vst [vmem:[#allocation2 + $0x110] sm:$0xe0] %v11312_v17 }
  0x59   : > { %924 = vrot.lane.b32.xlu1 %v475_v4, %s11311_s16  ;;  %309 = vrot.lane.b32.xlu2 %v269_v5, %s11310_s29  ;;  %1119 = vst [vmem:[#allocation2 + $0x118] sm:$0xe0] %v11312_v17 }
  0x5a   : > { %720 = vrot.lane.b32.xlu0 %v475_v4, %s11308_s20  ;;  %1120 = vst [vmem:[#allocation2 + $0x120] sm:$0xe0] %v11312_v17 }
  0x5b   : > { %1121 = vst [vmem:[#allocation2 + $0x128] sm:$0xe0] %v11312_v17 }
  0x5c   : > { %1122 = vst [vmem:[#allocation2 + $0x130] sm:$0xe0] %v11312_v17 }
  0x5d   : > { %1123 = vst [vmem:[#allocation2 + $0x138] sm:$0xe0] %v11312_v17 }
  0x5e   : > { %1124 = vst [vmem:[#allocation2 + $0x140] sm:$0xe0] %v11312_v17 }
  0x5f   : > { %1125 = vst [vmem:[#allocation2 + $0x148] sm:$0xe0] %v11312_v17 }
  0x60   : > { %1126 = vst [vmem:[#allocation2 + $0x150] sm:$0xe0] %v11312_v17 }
  0x61   : > { %718 = vrot.lane.b32.xlu1 %v269_v5, %s11308_s20  ;;  %922 = vrot.lane.b32.xlu2 %v269_v5, %s11311_s16  ;;  %1127 = vst [vmem:[#allocation2 + $0x158] sm:$0xe0] %v11312_v17 }
  0x62   : > { %514 = vrot.lane.b32.xlu0 %v269_v5, %s11309_s30  ;;  %1128 = vst [vmem:[#allocation2 + $0x160] sm:$0xe0] %v11312_v17 }
  0x63   : > { %1129 = vst [vmem:[#allocation2 + $0x168] sm:$0xe0] %v11312_v17 }
  0x64   : > { %1130 = vst [vmem:[#allocation2 + $0x170] sm:$0xe0] %v11312_v17 }
  0x65   : > { %1131 = vst [vmem:[#allocation2 + $0x178] sm:$0xe0] %v11312_v17 }
  0x66   : > { %1132 = vst [vmem:[#allocation2 + $0x180] sm:$0xe0] %v11312_v17 }
  0x67   : > { %1133 = vst [vmem:[#allocation2 + $0x188] sm:$0xe0] %v11312_v17 }
  0x68   : > { %1134 = vst [vmem:[#allocation2 + $0x190] sm:$0xe0] %v11312_v17 }
  0x69   : > { %512 = vrot.lane.b32.xlu1 %v473_v6, %s11309_s30  ;;  %716 = vrot.lane.b32.xlu2 %v473_v6, %s11308_s20  ;;  %1135 = vst [vmem:[#allocation2 + $0x198] sm:$0xe0] %v11312_v17 }
  0x6a   : > { %307 = vrot.lane.b32.xlu0 %v473_v6, %s11310_s29  ;;  %1137 = vst [vmem:[#allocation2 + $0x1a8] sm:$0xe0] %v11312_v17 }
  0x6b   : > { %1138 = vst [vmem:[#allocation2 + $0x1b0] sm:$0xe0] %v11312_v17 }
  0x6c   : > { %1139 = vst [vmem:[#allocation2 + $0x1b8] sm:$0xe0] %v11312_v17 }
  0x6d   : > { %1140 = vst [vmem:[#allocation2 + $0x1c0] sm:$0xe0] %v11312_v17 }
  0x6e   : > { %1141 = vst [vmem:[#allocation2 + $0x1c8] sm:$0xe0] %v11312_v17 }
  0x6f   : > { %1142 = vst [vmem:[#allocation2 + $0x1d0] sm:$0xe0] %v11312_v17 }
  0x70   : > { %1143 = vst [vmem:[#allocation2 + $0x1d8] sm:$0xe0] %v11312_v17 }
  0x71   : > { %510 = vrot.lane.b32.xlu2 %v472_v7, %s11309_s30  ;;  %305 = vrot.lane.b32.xlu1 %v472_v7, %s11310_s29  ;;  %1144 = vst [vmem:[#allocation2 + $0x1e0] sm:$0xe0] %v11312_v17 }
  0x72   : > { %920 = vrot.lane.b32.xlu0 %v473_v6, %s11311_s16  ;;  %1145 = vst [vmem:[#allocation2 + $0x1e8] sm:$0xe0] %v11312_v17 }
  0x73   : > { %1146 = vst [vmem:[#allocation2 + $0x1f0] sm:$0xe0] %v11312_v17 }
  0x74   : > { %1147 = vst [vmem:[#allocation2 + $0x1f8] sm:$0xe0] %v11312_v17 }
  0x75   : > { %1148 = vst [vmem:[#allocation2 + $0x200] sm:$0xe0] %v11312_v17 }
  0x76   : > { %1149 = vst [vmem:[#allocation2 + $0x208] sm:$0xe0] %v11312_v17 }
  0x77   : > { %1150 = vst [vmem:[#allocation2 + $0x210] sm:$0xe0] %v11312_v17 }
  0x78   : > { %1151 = vst [vmem:[#allocation2 + $0x218] sm:$0xe0] %v11312_v17 }
  0x79   : > { %321 = vrot.lane.b32.xlu2 %v275_v8, %s11310_s29  ;;  %918 = vrot.lane.b32.xlu1 %v472_v7, %s11311_s16  ;;  %1152 = vst [vmem:[#allocation2 + $0x220] sm:$0xe0] %v11312_v17 }
  0x7a   : > { %714 = vrot.lane.b32.xlu0 %v472_v7, %s11308_s20  ;;  %1153 = vst [vmem:[#allocation2 + $0x228] sm:$0xe0] %v11312_v17 }
  0x7b   : > { %1154 = vst [vmem:[#allocation2 + $0x230] sm:$0xe0] %v11312_v17 }
  0x7c   : > { %1155 = vst [vmem:[#allocation2 + $0x238] sm:$0xe0] %v11312_v17 }
  0x7d   : > { %1156 = vst [vmem:[#allocation2 + $0x240] sm:$0xe0] %v11312_v17 }
  0x7e   : > { %1157 = vst [vmem:[#allocation2 + $0x248] sm:$0xe0] %v11312_v17 }
  0x7f   : > { %1158 = vst [vmem:[#allocation2 + $0x250] sm:$0xe0] %v11312_v17 }
  0x80   : > { %1159 = vst [vmem:[#allocation2 + $0x258] sm:$0xe0] %v11312_v17 }
  0x81   : > { %934 = vrot.lane.b32.xlu2 %v275_v8, %s11311_s16  ;;  %730 = vrot.lane.b32.xlu1 %v275_v8, %s11308_s20  ;;  %1160 = vst [vmem:[#allocation2 + $0x260] sm:$0xe0] %v11312_v17 }
  0x82   : > { %526 = vrot.lane.b32.xlu0 %v275_v8, %s11309_s30  ;;  %1161 = vst [vmem:[#allocation2 + $0x268] sm:$0xe0] %v11312_v17 }
  0x83   : > { %v11482_v9 = vpop.permute.xlu2 %726  ;;  %1162 = vst [vmem:[#allocation2 + $0x270] sm:$0xe0] %v11312_v17 }
  0x84   : > { %v758_v11 = vrot.slane %v11482_v9, 1  ;;  %1163 = vst [vmem:[#allocation2 + $0x278] sm:$0xe0] %v11312_v17 }
  0x85   : > { %1164 = vst [vmem:[#allocation2 + $0x280] sm:$0xe0] %v11312_v17 }
  0x86   : > { %1165 = vst [vmem:[#allocation2 + $0x288] sm:$0xe0] %v11312_v17 }
  0x87   : > { %1166 = vst [vmem:[#allocation2 + $0x290] sm:$0xe0] %v11312_v17 }
  0x88   : > { %1167 = vst [vmem:[#allocation2 + $0x298] sm:$0xe0] %v11312_v17 }
  0x89   : > { %528 = vrot.lane.b32.xlu1 %v276_v10, %s11309_s30  ;;  %732 = vrot.lane.b32.xlu2 %v276_v10, %s11308_s20  ;;  %1168 = vst [vmem:[#allocation2 + $0x2a0] sm:$0xe0] %v11312_v17 }
  0x8a   : > { %323 = vrot.lane.b32.xlu0 %v276_v10, %s11310_s29  ;;  %1169 = vst [vmem:[#allocation2 + $0x2a8] sm:$0xe0] %v11312_v17 }
  0x8b   : > { %v11489_v12 = vpop.permute.xlu2 %728  ;;  %1170 = vst [vmem:[#allocation2 + $0x2b0] sm:$0xe0] %v11312_v17 }
  0x8c   : > { %v759_v13 = vrot.slane %v11489_v12, 1  ;;  %1171 = vst [vmem:[#allocation2 + $0x2b8] sm:$0xe0] %v11312_v17 }
  0x8d   : > { %1172 = vst [vmem:[#allocation2 + $0x2c0] sm:$0xe0] %v11312_v17 }
  0x8e   : > { %v784_v14 = vsel %vm362_vm1, %v758_v11, %v759_v13  ;;  %1173 = vst [vmem:[#allocation2 + $0x2c8] sm:$0xe0] %v11312_v17 }
  0x8f   : > { %v785_v15 = vsel %vm772_vm0, %v11482_v9, %v784_v14  ;;  %1174 = vst [vmem:[#allocation2 + $0x2d0] sm:$0xe0] %v11312_v17 }
  0x90   : > { %845 = vst [vmem:[#allocation2 + $0x183] ss:$8 sm:$0xf] %v785_v15 }
  0x91   : > { %846 = vst [vmem:[#allocation2 + $0x183] ss:$8 sm:$0xf0] %v785_v15  ;;  %325 = vrot.lane.b32.xlu1 %v277_v18, %s11310_s29  ;;  %530 = vrot.lane.b32.xlu2 %v277_v18, %s11309_s30 }
  0x92   : > { %936 = vrot.lane.b32.xlu0 %v276_v10, %s11311_s16  ;;  %1175 = vst [vmem:[#allocation2 + $0x2d8] sm:$0xe0] %v11312_v17 }
  0x93   : > { %v11500_v16 = vpop.permute.xlu2 %313  ;;  %1176 = vst [vmem:[#allocation2 + $0x2e0] sm:$0xe0] %v11312_v17 }
  0x94   : > { %v347_v44 = vrot.slane %v11500_v16, 1  ;;  %1177 = vst [vmem:[#allocation2 + $0x2e8] sm:$0xe0] %v11312_v17 }
  0x95   : > { %1178 = vst [vmem:[#allocation2 + $0x2f0] sm:$0xe0] %v11312_v17 }
  0x96   : > { %1179 = vst [vmem:[#allocation2 + $0x2f8] sm:$0xe0] %v11312_v17 }
  0x97   : > { %1180 = vst [vmem:[#allocation2 + $0x300] sm:$0xe0] %v11312_v17 }
  0x98   : > { %1181 = vst [vmem:[#allocation2 + $0x308] sm:$0xe0] %v11312_v17 }
  0x99   : > { %938 = vrot.lane.b32.xlu1 %v277_v18, %s11311_s16  ;;  %1182 = vst [vmem:[#allocation2 + $0x310] sm:$0xe0] %v11312_v17 }
  0x9a   : > { %734 = vrot.lane.b32.xlu0 %v277_v18, %s11308_s20  ;;  %1183 = vst [vmem:[#allocation2 + $0x318] sm:$0xe0] %v11312_v17 }
  0x9b   : > { %v523_v19 = vpop.permute.xlu1 %522  ;;  %v11507_v20 = vpop.permute.xlu2 %520  ;;  %1184 = vst [vmem:[#allocation2 + $0x320] sm:$0xe0] %v11312_v17 }
  0x9c   : > { %v554_v21 = vrot.slane %v523_v19, 1  ;;  %v11512_v22 = vpop.permute.xlu0 %317  ;;  %v553_v23 = vrot.slane %v11507_v20, 1  ;;  %1185 = vst [vmem:[#allocation2 + $0x328] sm:$0xe0] %v11312_v17 }
  0x9d   : > { %v349_v29 = vrot.slane %v11512_v22, 1  ;;  %1186 = vst [vmem:[#allocation2 + $0x330] sm:$0xe0] %v11312_v17 }
  0x9e   : > { %v578_v24 = vsel %vm362_vm1, %v553_v23, %v554_v21  ;;  %1187 = vst [vmem:[#allocation2 + $0x338] sm:$0xe0] %v11312_v17 }
  0x9f   : > { %v579_v25 = vsel %vm568_vm2, %v11507_v20, %v578_v24  ;;  %1188 = vst [vmem:[#allocation2 + $0x340] sm:$0xe0] %v11312_v17 }
  0xa0   : > { %638 = vst [vmem:[#allocation2 + $0x142] ss:$8 sm:$0xf] %v579_v25 }
  0xa1   : > { %639 = vst [vmem:[#allocation2 + $0x142] ss:$8 sm:$0xf0] %v579_v25 }
  0xa2   : > { %1189 = vst [vmem:[#allocation2 + $0x348] sm:$0xe0] %v11312_v17 }
  0xa3   : > { %v11524_v26 = vpop.permute.xlu1 %524  ;;  %v11543_v34 = vpop.permute.xlu2 %926  ;;  %1190 = vst [vmem:[#allocation2 + $0x350] sm:$0xe0] %v11312_v17 }
  0xa4   : > { %v555_v27 = vrot.slane %v11524_v26, 1  ;;  %v11529_v28 = vpop.permute.xlu0 %319  ;;  %1191 = vst [vmem:[#allocation2 + $0x358] sm:$0xe0] %v11312_v17  ;;  %v960_v18 = vrot.slane %v11543_v34, 1 }
  0xa5   : > { %v350_v30 = vrot.slane %v11529_v28, 1  ;;  %1192 = vst [vmem:[#allocation2 + $0x360] sm:$0xe0] %v11312_v17 }
  0xa6   : > { %v580_v31 = vsel %vm362_vm1, %v554_v21, %v555_v27  ;;  %1193 = vst [vmem:[#allocation2 + $0x368] sm:$0xe0] %v11312_v17 }
  0xa7   : > { %v581_v32 = vsel %vm568_vm2, %v523_v19, %v580_v31  ;;  %v376_v33 = vsel %vm362_vm1, %v349_v29, %v350_v30  ;;  %1194 = vst [vmem:[#allocation2 + $0x370] sm:$0xe0] %v11312_v17 }
  0xa8   : > { %641 = vst [vmem:[#allocation2 + $0x182] ss:$8 sm:$0xf] %v581_v32  ;;  %v377_v35 = vsel %vm364_vm3, %v11512_v22, %v376_v33 }
  0xa9   : > { %642 = vst [vmem:[#allocation2 + $0x182] ss:$8 sm:$0xf0] %v581_v32 }
  0xaa   : > { %437 = vst [vmem:[#allocation2 + $0x181] ss:$8 sm:$0xf] %v377_v35 }
  0xab   : > { %438 = vst [vmem:[#allocation2 + $0x181] ss:$8 sm:$0xf0] %v377_v35  ;;  %v11548_v36 = vpop.permute.xlu1 %932  ;;  %v11566_v42 = vpop.permute.xlu2 %516 }
  0xac   : > { %v963_v37 = vrot.slane %v11548_v36, 1  ;;  %v11551_v38 = vpop.permute.xlu0 %930  ;;  %v551_v43 = vrot.slane %v11566_v42, 1  ;;  %1195 = vst [vmem:[#allocation2 + $0x378] sm:$0xe0] %v11312_v17 }
  0xad   : > { %v962_v39 = vrot.slane %v11551_v38, 1  ;;  %1196 = vst [vmem:[#allocation2 + $0x380] sm:$0xe0] %v11312_v17 }
  0xae   : > { %1197 = vst [vmem:[#allocation2 + $0x388] sm:$0xe0] %v11312_v17 }
  0xaf   : > { %v988_v40 = vsel %vm362_vm1, %v962_v39, %v963_v37  ;;  %1198 = vst [vmem:[#allocation2 + $0x390] sm:$0xe0] %v11312_v17 }
  0xb0   : > { %v989_v41 = vsel %vm976_vm4, %v11551_v38, %v988_v40  ;;  %1199 = vst [vmem:[#allocation2 + $0x398] sm:$0xe0] %v11312_v17 }
  0xb1   : > { %1049 = vst [vmem:[#allocation2 + $0x184] ss:$8 sm:$0xf] %v989_v41 }
  0xb2   : > { %1050 = vst [vmem:[#allocation2 + $0x184] ss:$8 sm:$0xf0] %v989_v41 }
  0xb3   : > { %v519_v45 = vpop.permute.xlu1 %518  ;;  %v11692_v1 = vpop.permute.xlu2 %309  ;;  %1200 = vst [vmem:[#allocation2 + $0x3a0] sm:$0xe0] %v11312_v17 }
  0xb4   : > { %v552_v46 = vrot.slane %v519_v45, 1  ;;  %v316_v47 = vpop.permute.xlu0 %315  ;;  %1201 = vst [vmem:[#allocation2 + $0x3a8] sm:$0xe0] %v11312_v17  ;;  %v345_v24 = vrot.slane %v11692_v1, 1 }
  0xb5   : > { %v348_v48 = vrot.slane %v316_v47, 1  ;;  %1202 = vst [vmem:[#allocation2 + $0x3b0] sm:$0xe0] %v11312_v17 }
  0xb6   : > { %v574_v49 = vsel %vm362_vm1, %v551_v43, %v552_v46  ;;  %v576_v50 = vsel %vm362_vm1, %v552_v46, %v553_v23  ;;  %1203 = vst [vmem:[#allocation2 + $0x3b8] sm:$0xe0] %v11312_v17 }
  0xb7   : > { %v575_v51 = vsel %vm568_vm2, %v11566_v42, %v574_v49  ;;  %v577_v52 = vsel %vm568_vm2, %v519_v45, %v576_v50  ;;  %v372_v53 = vsel %vm362_vm1, %v347_v44, %v348_v48  ;;  %v374_v54 = vsel %vm362_vm1, %v348_v48, %v349_v29  ;;  %1204 = vst [vmem:[#allocation2 + $0x3c0] sm:$0xe0] %v11312_v17 }
  0xb8   : > { %632 = vst [vmem:[#allocation2 + $0xc2] ss:$8 sm:$0xf] %v575_v51  ;;  %v373_v55 = vsel %vm364_vm3, %v11500_v16, %v372_v53  ;;  %v375_v57 = vsel %vm364_vm3, %v316_v47, %v374_v54  ;;  %v11627_v58 = vld [vmem:[#allocation2 + $0x198] sm:$0xff]  ;;  %v11682_v60 = vld [vmem:[#allocation2 + $0x190] sm:$0xff]  ;;  %v5092_v63 = vld [vmem:[#allocation2 + $0x188] sm:$0xff] }
  0xb9   : > { %633 = vst [vmem:[#allocation2 + $0xc2] ss:$8 sm:$0xf0] %v575_v51  ;;  %v11588_v56 = vld [vmem:[#allocation2 + $0x1a0] sm:$0xff]  ;;  %v11630_v59 = vld [vmem:[#allocation2 + $0x1a8] sm:$0xff] }
  0xba   : > { %635 = vst [vmem:[#allocation2 + $0x102] ss:$8 sm:$0xf] %v577_v52  ;;  %7469 = vmatpush.msra.mxu1 %v11588_v56  ;;  %7515 = vmatpush.msra.mxu3 %v11630_v59  ;;  %v4908_v0 = vld [vmem:[#allocation2 + $0x180] sm:$0xff] }
  0xbb   : > { %636 = vst [vmem:[#allocation2 + $0x102] ss:$8 sm:$0xf0] %v577_v52  ;;  %v725_v61 = vpop.permute.xlu1 %724  ;;  %v11707_v4 = vpop.permute.xlu2 %922 }
  0xbc   : > { %431 = vst [vmem:[#allocation2 + $0x101] ss:$8 sm:$0xf] %v373_v55  ;;  %7470 = vmatpush.msra.mxu1 %v11627_v58  ;;  %7516 = vmatpush.msra.mxu3 %v11588_v56  ;;  %v11688_v62 = vpop.permute.xlu0 %722  ;;  %v757_v10 = vrot.slane %v725_v61, 1  ;;  %v958_v38 = vrot.slane %v11707_v4, 1 }
  0xbd   : > { %432 = vst [vmem:[#allocation2 + $0x101] ss:$8 sm:$0xf0] %v373_v55  ;;  %v756_v15 = vrot.slane %v11688_v62, 1 }
  0xbe   : > { %434 = vst [vmem:[#allocation2 + $0x141] ss:$8 sm:$0xf] %v375_v57  ;;  %7517 = vmatpush.msra.mxu3 %v11627_v58  ;;  %7471 = vmatpush.msra.mxu1 %v11682_v60  ;;  %v782_v19 = vsel %vm362_vm1, %v757_v10, %v758_v11 }
  0xbf   : > { %435 = vst [vmem:[#allocation2 + $0x141] ss:$8 sm:$0xf0] %v375_v57  ;;  %v780_v21 = vsel %vm362_vm1, %v756_v15, %v757_v10  ;;  %v783_v22 = vsel %vm772_vm0, %v725_v61, %v782_v19 }
  0xc0   : > { %7518 = vmatpush.msra.mxu3 %v11682_v60  ;;  %7472 = vmatpush.msra.mxu1 %v5092_v63  ;;  %1205 = vst [vmem:[#allocation2 + $0x3c8] sm:$0xe0] %v11312_v17  ;;  %v781_v25 = vsel %vm772_vm0, %v11688_v62, %v780_v21 }
  0xc1   : > { %1206 = vst [vmem:[#allocation2 + $0x3d0] sm:$0xe0] %v11312_v17 }
  0xc2   : > { %7519 = vmatpush.msra.mxu3 %v5092_v63  ;;  %7473 = vmatpush.msra.mxu1 %v4908_v0  ;;  %1207 = vst [vmem:[#allocation2 + $0x3d8] sm:$0xe0] %v11312_v17 }
  0xc3   : > { %v11702_v3 = vpop.permute.xlu1 %311  ;;  %1208 = vst [vmem:[#allocation2 + $0x3e0] sm:$0xe0] %v11312_v17  ;;  %v11723_v7 = vpop.permute.xlu2 %716 }
  0xc4   : > { %v929_v2 = vpop.permute.xlu0 %928  ;;  %1209 = vst [vmem:[#allocation2 + $0x3e8] sm:$0xe0] %v11312_v17  ;;  %v346_v11 = vrot.slane %v11702_v3, 1  ;;  %v753_v50 = vrot.slane %v11723_v7, 1 }
  0xc5   : > { %1210 = vst [vmem:[#allocation2 + $0x3f0] sm:$0xe0] %v11312_v17  ;;  %v961_v20 = vrot.slane %v929_v2, 1 }
  0xc6   : > { %1211 = vst [vmem:[#allocation2 + $0x3f8] sm:$0xe0] %v11312_v17 }
  0xc7   : > { %1212 = vst [vmem:[#allocation2 + $0x400] sm:$0xe0] %v11312_v17  ;;  %v984_v9 = vsel %vm362_vm1, %v960_v18, %v961_v20  ;;  %v986_v31 = vsel %vm362_vm1, %v961_v20, %v962_v39  ;;  %v370_v39 = vsel %vm362_vm1, %v346_v11, %v347_v44 }
  0xc8   : > { %1213 = vst [vmem:[#allocation2 + $0x408] sm:$0xe0] %v11312_v17  ;;  %v985_v33 = vsel %vm976_vm4, %v11543_v34, %v984_v9  ;;  %v987_v40 = vsel %vm976_vm4, %v929_v2, %v986_v31  ;;  %v371_v46 = vsel %vm364_vm3, %v11702_v3, %v370_v39  ;;  %v11840_v9 = vld [vmem:[#allocation2 + $0x1b0] sm:$0xff] }
  0xc9   : > { %1214 = vst [vmem:[#allocation2 + $0x410] sm:$0xe0] %v11312_v17 }
  0xca   : > { %1215 = vst [vmem:[#allocation2 + $0x418] sm:$0xe0] %v11312_v17 }
  0xcb   : > { %v11716_v6 = vpop.permute.xlu1 %924  ;;  %1216 = vst [vmem:[#allocation2 + $0x420] sm:$0xe0] %v11312_v17  ;;  %v11746_v23 = vpop.permute.xlu2 %510 }
  0xcc   : > { %v11712_v5 = vpop.permute.xlu0 %720  ;;  %1217 = vst [vmem:[#allocation2 + $0x428] sm:$0xe0] %v11312_v17  ;;  %v959_v41 = vrot.slane %v11716_v6, 1 }
  0xcd   : > { %1218 = vst [vmem:[#allocation2 + $0x430] sm:$0xe0] %v11312_v17  ;;  %v755_v35 = vrot.slane %v11712_v5, 1 }
  0xce   : > { %1219 = vst [vmem:[#allocation2 + $0x438] sm:$0xe0] %v11312_v17  ;;  %v980_v16 = vsel %vm362_vm1, %v958_v38, %v959_v41  ;;  %v982_v51 = vsel %vm362_vm1, %v959_v41, %v960_v18 }
  0xcf   : > { %1220 = vst [vmem:[#allocation2 + $0x440] sm:$0xe0] %v11312_v17  ;;  %v778_v45 = vsel %vm362_vm1, %v755_v35, %v756_v15  ;;  %v981_v54 = vsel %vm976_vm4, %v11707_v4, %v980_v16  ;;  %v983_v62 = vsel %vm976_vm4, %v11716_v6, %v982_v51  ;;  %v548_v6 = vrot.slane %v11746_v23, 1 }
  0xd0   : > { %1221 = vst [vmem:[#allocation2 + $0x448] sm:$0xe0] %v11312_v17  ;;  %v779_v49 = vsel %vm772_vm0, %v11712_v5, %v778_v45 }
  0xd1   : > { %1222 = vst [vmem:[#allocation2 + $0x450] sm:$0xe0] %v11312_v17 }
  0xd2   : > { %1223 = vst [vmem:[#allocation2 + $0x458] sm:$0xe0] %v11312_v17 }
  0xd3   : > { %v11730_v14 = vpop.permute.xlu1 %718  ;;  %1224 = vst [vmem:[#allocation2 + $0x460] sm:$0xe0] %v11312_v17  ;;  %v11779_v47 = vpop.permute.xlu2 %321 }
  0xd4   : > { %v11727_v8 = vpop.permute.xlu0 %514  ;;  %1225 = vst [vmem:[#allocation2 + $0x468] sm:$0xe0] %v11312_v17  ;;  %v754_v52 = vrot.slane %v11730_v14, 1 }
  0xd5   : > { %1226 = vst [vmem:[#allocation2 + $0x470] sm:$0xe0] %v11312_v17  ;;  %v550_v44 = vrot.slane %v11727_v8, 1 }
  0xd6   : > { %1227 = vst [vmem:[#allocation2 + $0x478] sm:$0xe0] %v11312_v17  ;;  %v368_v17 = vsel %vm362_vm1, %v345_v24, %v346_v11  ;;  %v774_v42 = vsel %vm362_vm1, %v753_v50, %v754_v52  ;;  %v776_v10 = vsel %vm362_vm1, %v754_v52, %v755_v35 }
  0xd7   : > { %842 = vst [vmem:[#allocation2 + $0x143] ss:$8 sm:$0xf] %v783_v22  ;;  %v369_v34 = vsel %vm364_vm3, %v11692_v1, %v368_v17  ;;  %v572_v61 = vsel %vm362_vm1, %v550_v44, %v551_v43  ;;  %v351_v43 = vrot.slane %v11779_v47, 1  ;;  %v775_v18 = vsel %vm772_vm0, %v11723_v7, %v774_v42 }
  0xd8   : > { %843 = vst [vmem:[#allocation2 + $0x143] ss:$8 sm:$0xf0] %v783_v22  ;;  %v573_v3 = vsel %vm568_vm2, %v11727_v8, %v572_v61  ;;  %v777_v21 = vsel %vm772_vm0, %v11730_v14, %v776_v10  ;;  %v11837_v22 = vld [vmem:[#allocation7 + $0x8] sm:$0xff] }
  0xd9   : > { %839 = vst [vmem:[#allocation2 + $0x103] ss:$8 sm:$0xf] %v781_v25  ;;  %v378_v20 = vsel %vm362_vm1, %v350_v30, %v351_v43 }
  0xda   : > { %840 = vst [vmem:[#allocation2 + $0x103] ss:$8 sm:$0xf0] %v781_v25  ;;  %v379_v31 = vsel %vm364_vm3, %v11529_v28, %v378_v20 }
  0xdb   : > { %v11760_v32 = vpop.permute.xlu1 %512  ;;  %1043 = vst [vmem:[#allocation2 + $0x104] ss:$8 sm:$0xf] %v985_v33  ;;  %v11826_v8 = vpop.permute.xlu2 %934 }
  0xdc   : > { %v11755_v29 = vpop.permute.xlu0 %307  ;;  %1044 = vst [vmem:[#allocation2 + $0x104] ss:$8 sm:$0xf0] %v985_v33  ;;  %v549_v15 = vrot.slane %v11760_v32, 1  ;;  %v964_v30 = vrot.slane %v11826_v8, 1 }
  0xdd   : > { %1046 = vst [vmem:[#allocation2 + $0x144] ss:$8 sm:$0xf] %v987_v40  ;;  %v344_v33 = vrot.slane %v11755_v29, 1 }
  0xde   : > { %1047 = vst [vmem:[#allocation2 + $0x144] ss:$8 sm:$0xf0] %v987_v40  ;;  %v567_v11 = vsel %vm362_vm1, %v548_v6, %v549_v15  ;;  %v570_v14 = vsel %vm362_vm1, %v549_v15, %v550_v44 }
  0xdf   : > { %425 = vst [vmem:[#allocation2 + $0x81] ss:$8 sm:$0xf] %v369_v34  ;;  %v569_v28 = vsel %vm568_vm2, %v11746_v23, %v567_v11  ;;  %v571_v23 = vsel %vm568_vm2, %v11760_v32, %v570_v14 }
  0xe0   : > { %426 = vst [vmem:[#allocation2 + $0x81] ss:$8 sm:$0xf0] %v369_v34  ;;  %v990_v34 = vsel %vm362_vm1, %v963_v37, %v964_v30 }
  0xe1   : > { %428 = vst [vmem:[#allocation2 + $0xc1] ss:$8 sm:$0xf] %v371_v46  ;;  %v991_v32 = vsel %vm976_vm4, %v11548_v36, %v990_v34  ;;  %v203_v34 = vld [vmem:[%s11427_s28 + $0x38] sm:$0xff] }
  0xe2   : > { %429 = vst [vmem:[#allocation2 + $0xc1] ss:$8 sm:$0xf0] %v371_v46  ;;  %v366_v46 = vsel %vm362_vm1, %v344_v33, %v345_v24  ;;  %v11971_v15 = vld [vmem:[#allocation2 + $0x100] sm:$0xff] }
  0xe3   : > { %v11792_v53 = vpop.permute.xlu1 %305  ;;  %836 = vst [vmem:[#allocation2 + $0xc3] ss:$8 sm:$0xf] %v779_v49  ;;  %v3988_v55 = vld [vmem:[#allocation2 + $0x120] sm:$0xff]  ;;  %v3989_v57 = vld [vmem:[#allocation2 + $0x128] sm:$0xff]  ;;  %v11811_v2 = vld [vmem:[#allocation2 + $0x138] sm:$0xff]  ;;  %v367_v24 = vsel %vm364_vm3, %v11755_v29, %v366_v46  ;;  %v11968_v10 = vpop.permute.xlu2 %732 }
  0xe4   : > { %v11781_v48 = vpop.permute.xlu0 %920  ;;  %837 = vst [vmem:[#allocation2 + $0xc3] ss:$8 sm:$0xf0] %v779_v49  ;;  %7439 = vmatpush.msra.mxu0 %v3988_v55  ;;  %v11801_v63 = vld [vmem:[#allocation2 + $0x140] sm:$0xff]  ;;  %7485 = vmatpush.msra.mxu2 %v3989_v57  ;;  %v11803_v0 = vld [vmem:[#allocation2 + $0x148] sm:$0xff]  ;;  %v11824_v19 = vld [vmem:[#allocation2 + $0x130] sm:$0xff] }
  0xe5   : > { %1037 = vst [vmem:[#allocation2 + $0x84] ss:$8 sm:$0xf] %v981_v54  ;;  %7474 = vmatpush.msra.mxu1 %v11801_v63  ;;  %7520 = vmatpush.msra.mxu3 %v11803_v0  ;;  %v957_v17 = vrot.slane %v11781_v48, 1  ;;  %v343_v37 = vrot.slane %v11792_v53, 1  ;;  %v11911_v29 = vld [vmem:[#allocation2 + $0x150] sm:$0xff] }
  0xe6   : > { %1038 = vst [vmem:[#allocation2 + $0x84] ss:$8 sm:$0xf0] %v981_v54  ;;  %v761_v11 = vrot.slane %v11968_v10, 1 }
  0xe7   : > { %1040 = vst [vmem:[#allocation2 + $0xc4] ss:$8 sm:$0xf] %v983_v62  ;;  %7475 = vmatpush.msra.mxu1 %v11811_v2  ;;  %7521 = vmatpush.msra.mxu3 %v11801_v63  ;;  %v363_v4 = vsel %vm362_vm1, %v343_v37, %v344_v33 }
  0xe8   : > { %1041 = vst [vmem:[#allocation2 + $0xc4] ss:$8 sm:$0xf0] %v983_v62 }
  0xe9   : > { %629 = vst [vmem:[#allocation2 + $0x82] ss:$8 sm:$0xf] %v573_v3  ;;  %7476 = vmatpush.msra.mxu1 %v11824_v19  ;;  %7522 = vmatpush.msra.mxu3 %v11811_v2 }
  0xea   : > { %630 = vst [vmem:[#allocation2 + $0x82] ss:$8 sm:$0xf0] %v573_v3 }
  0xeb   : > { %830 = vst [vmem:[#allocation2 + $0x43] ss:$8 sm:$0xf] %v775_v18  ;;  %7477 = vmatpush.msra.mxu1 %v3989_v57  ;;  %7523 = vmatpush.msra.mxu3 %v11824_v19  ;;  %v11844_v25 = vpop.permute.xlu1 %918 }
  0xec   : > { %v11815_v5 = vpop.permute.xlu0 %714  ;;  %831 = vst [vmem:[#allocation2 + $0x43] ss:$8 sm:$0xf0] %v775_v18  ;;  %10911 = vmatmul.msk.f32.vlgmr.msra.gmra.mxu3 %vm7432_vm5, %v11837_v22  ;;  %10909 = vmatmul.msk.f32.vlgmr.msra.gmra.mxu1 %vm7432_vm5, %v11837_v22 }
  0xed   : > { %7531 = vmatpush.msrb.mxu1 %v11824_v19  ;;  %7561 = vmatpush.msrb.mxu3 %v11840_v9  ;;  %833 = vst [vmem:[#allocation2 + $0x83] ss:$8 sm:$0xf] %v777_v21  ;;  %v752_v1 = vrot.slane %v11815_v5, 1 }
  0xee   : > { %834 = vst [vmem:[#allocation2 + $0x83] ss:$8 sm:$0xf0] %v777_v21  ;;  %v11878_v45 = vld [vmem:[#allocation2 + $0xd8] sm:$0xff]  ;;  %v11890_v16 = vld [vmem:[#allocation2 + $0xd0] sm:$0xff]  ;;  %v11902_v36 = vld [vmem:[#allocation2 + $0xc8] sm:$0xff] }
  0xef   : > { %7562 = vmatpush.msrb.mxu3 %v11630_v59  ;;  %440 = vst [vmem:[#allocation2 + $0x1c1] ss:$8 sm:$0xf] %v379_v31  ;;  %v11862_v40 = vld [vmem:[#allocation2 + $0xe0] sm:$0xff]  ;;  %v11864_v39 = vld [vmem:[#allocation2 + $0xe8] sm:$0xff]  ;;  %v11866_v41 = vld [vmem:[#allocation2 + $0xf0] sm:$0xff]  ;;  %v771_v52 = vsel %vm362_vm1, %v752_v1, %v753_v50 }
  0xf0   : > { %441 = vst [vmem:[#allocation2 + $0x1c1] ss:$8 sm:$0xf0] %v379_v31  ;;  %7440 = vmatpush.msra.mxu0 %v11862_v40  ;;  %7486 = vmatpush.msra.mxu2 %v11864_v39  ;;  %v11937_v50 = vld [vmem:[#allocation7 + $0x18] sm:$0xff]  ;;  %v773_v62 = vsel %vm772_vm0, %v11815_v5, %v771_v52 }
  0xf1   : > { %7532 = vmatpush.msrb.mxu1 %v11866_v41  ;;  %623 = vst [vmem:[#allocation2 + $0x2] ss:$8 sm:$0xf] %v569_v28  ;;  %7563 = vmatpush.msrb.mxu3 %v11588_v56  ;;  %v978_v56 = vsel %vm362_vm1, %v957_v17, %v958_v38  ;;  %v956_v38 = vrot.slane %v11844_v25, 1 }
  0xf2   : > { %7441 = vmatpush.msra.mxu0 %v11878_v45  ;;  %7487 = vmatpush.msra.mxu2 %v11862_v40  ;;  %624 = vst [vmem:[#allocation2 + $0x2] ss:$8 sm:$0xf0] %v569_v28  ;;  %v979_v49 = vsel %vm976_vm4, %v11781_v48, %v978_v56  ;;  %v365_v48 = vsel %vm364_vm3, %v11792_v53, %v363_v4 }
  0xf3   : > { %626 = vst [vmem:[#allocation2 + $0x42] ss:$8 sm:$0xf] %v571_v23  ;;  %7533 = vmatpush.msrb.mxu1 %v11864_v39  ;;  %7564 = vmatpush.msrb.mxu3 %v11627_v58  ;;  %v11907_v44 = vpop.permute.xlu1 %730  ;;  %v975_v7 = vsel %vm362_vm1, %v956_v38, %v957_v17 }
  0xf4   : > { %v11860_v35 = vpop.permute.xlu0 %526  ;;  %627 = vst [vmem:[#allocation2 + $0x42] ss:$8 sm:$0xf0] %v571_v23  ;;  %7442 = vmatpush.msra.mxu0 %v11890_v16  ;;  %7488 = vmatpush.msra.mxu2 %v11878_v45  ;;  %v760_v55 = vrot.slane %v11907_v44, 1  ;;  %v11931_v57 = vld [vmem:[#allocation2 + $0x80] sm:$0xff]  ;;  %v11933_v61 = vld [vmem:[#allocation2 + $0x88] sm:$0xff]  ;;  %v977_v3 = vsel %vm976_vm4, %v11844_v25, %v975_v7 }
  0xf5   : > { %1052 = vst [vmem:[#allocation2 + $0x1c4] ss:$8 sm:$0xf] %v991_v32  ;;  %7534 = vmatpush.msrb.mxu1 %v11862_v40  ;;  %7565 = vmatpush.msrb.mxu3 %v11682_v60  ;;  %v11918_v60 = vld [vmem:[#allocation2 + $0xc0] sm:$0xff]  ;;  %v556_v54 = vrot.slane %v11860_v35, 1  ;;  %v11941_v53 = vld [vmem:[#allocation2 + $0x90] sm:$0xff] }
  0xf6   : > { %1053 = vst [vmem:[#allocation2 + $0x1c4] ss:$8 sm:$0xf0] %v991_v32  ;;  %7443 = vmatpush.msra.mxu0 %v11902_v36  ;;  %7489 = vmatpush.msra.mxu2 %v11890_v16  ;;  %v786_v5 = vsel %vm362_vm1, %v759_v13, %v760_v55  ;;  %v788_v28 = vsel %vm362_vm1, %v760_v55, %v761_v11  ;;  %v12027_v37 = vld [vmem:[#allocation2 + $0xa0] sm:$0xff]  ;;  %v12037_v56 = vld [vmem:[#allocation2 + $0x98] sm:$0xff] }
  0xf7   : > { %422 = vst [vmem:[#allocation2 + $0x41] ss:$8 sm:$0xf] %v367_v24  ;;  %7535 = vmatpush.msrb.mxu1 %v11878_v45  ;;  %7566 = vmatpush.msrb.mxu3 %v11911_v29  ;;  %v582_v42 = vsel %vm362_vm1, %v555_v27, %v556_v54  ;;  %v787_v13 = vsel %vm772_vm0, %v11489_v12, %v786_v5  ;;  %v196_v12 = vld [vmem:[%s11427_s28] sm:$0xff] }
  0xf8   : > { %423 = vst [vmem:[#allocation2 + $0x41] ss:$8 sm:$0xf0] %v367_v24  ;;  %7444 = vmatpush.msra.mxu0 %v11918_v60  ;;  %7490 = vmatpush.msra.mxu2 %v11902_v36  ;;  %v583_v6 = vsel %vm568_vm2, %v11524_v26, %v582_v42  ;;  %v11978_v26 = vld [vmem:[#allocation2 + $0xf8] sm:$0xff]  ;;  %v789_v46 = vsel %vm772_vm0, %v11907_v44, %v788_v28  ;;  %v12089_v42 = vld [vmem:[#allocation2 + $0x1a0] sm:$0xff]  ;;  %v12134_v28 = vld [vmem:[#allocation2 + $0x168] sm:$0xff] }
  0xf9   : > { %7536 = vmatpush.msrb.mxu1 %v11890_v16  ;;  %1034 = vst [vmem:[#allocation2 + $0x44] ss:$8 sm:$0xf] %v979_v49  ;;  %7567 = vmatpush.msrb.mxu3 %v11803_v0  ;;  %v204_v44 = vld [vmem:[%s11427_s28 + $0x40] sm:$0xff] }
  0xfa   : > { %7445 = vmatpush.msra.mxu0 %v11931_v57  ;;  %7491 = vmatpush.msra.mxu2 %v11933_v61  ;;  %1035 = vst [vmem:[#allocation2 + $0x44] ss:$8 sm:$0xf0] %v979_v49  ;;  %v12103_v5 = vld [vmem:[#allocation2 + $0x158] sm:$0xff] }
  0xfb   : > { %419 = vst [vmem:[#allocation2 + $0x1] ss:$8 sm:$0xf] %v365_v48  ;;  %7537 = vmatpush.msrb.mxu1 %v11941_v53  ;;  %7568 = vmatpush.msrb.mxu3 %v11801_v63  ;;  %v11991_v25 = vpop.permute.xlu1 %528 }
  0xfc   : > { %v11915_v51 = vpop.permute.xlu0 %323  ;;  %420 = vst [vmem:[#allocation2 + $0x1] ss:$8 sm:$0xf0] %v365_v48  ;;  %7492 = vmatpush.msra.mxu2 %v11931_v57  ;;  %10912 = vmatmul.msk.f32.gmra.mxu3 %vm7432_vm5, %v11937_v50  ;;  %v557_v17 = vrot.slane %v11991_v25, 1  ;;  %v12066_v48 = vld [vmem:[#allocation7] sm:$0xff] }
  0xfd   : > { %7538 = vmatpush.msrb.mxu1 %v11933_v61  ;;  %7569 = vmatpush.msrb.mxu3 %v11811_v2  ;;  %827 = vst [vmem:[#allocation2 + $0x3] ss:$8 sm:$0xf] %v773_v62  ;;  %v352_v27 = vrot.slane %v11915_v51, 1 }
  0xfe   : > { %828 = vst [vmem:[#allocation2 + $0x3] ss:$8 sm:$0xf0] %v773_v62  ;;  %10910 = vmatmul.msk.f32.gmra.mxu1 %vm7432_vm5, %v11937_v50  ;;  %v12075_v62 = vld [vmem:[#allocation2 + $0x1b8] sm:$0xff] }
  0xff   : > { %7623 = vmatpush.msra.mxu3 %v11801_v63  ;;  %7539 = vmatpush.msrb.mxu1 %v11931_v57  ;;  %1031 = vst [vmem:[#allocation2 + $0x4] ss:$8 sm:$0xf] %v977_v3  ;;  %v380_v21 = vsel %vm362_vm1, %v351_v43, %v352_v27 }
 0x100   : > { %1032 = vst [vmem:[#allocation2 + $0x4] ss:$8 sm:$0xf0] %v977_v3  ;;  %v381_v14 = vsel %vm364_vm3, %v11779_v47, %v380_v21  ;;  %v12062_v52 = vld [vmem:[#allocation2 + $0x40] sm:$0xff] }
 0x101   : > { %7624 = vmatpush.msra.mxu3 %v11971_v15  ;;  %v11980_v20 = vld [vmem:[#allocation2 + $0x78] sm:$0xff]  ;;  %644 = vst [vmem:[#allocation2 + $0x1c2] ss:$8 sm:$0xf] %v583_v6  ;;  %v11995_v31 = vld [vmem:[#allocation2 + $0x70] sm:$0xff]  ;;  %v12004_v33 = vld [vmem:[#allocation2 + $0x68] sm:$0xff] }
 0x102   : > { %7446 = vmatpush.msra.mxu0 %v11980_v20  ;;  %645 = vst [vmem:[#allocation2 + $0x1c2] ss:$8 sm:$0xf0] %v583_v6  ;;  %7493 = vmatpush.msra.mxu2 %v11980_v20  ;;  %v12014_v47 = vld [vmem:[#allocation2 + $0x60] sm:$0xff] }
 0x103   : > { %7625 = vmatpush.msra.mxu3 %v11978_v26  ;;  %7540 = vmatpush.msrb.mxu1 %v11980_v20  ;;  %848 = vst [vmem:[#allocation2 + $0x1c3] ss:$8 sm:$0xf] %v787_v13  ;;  %v12108_v6 = vld [vmem:[#allocation2 + $0x160] sm:$0xff] }
 0x104   : > { %v11976_v18 = vpop.permute.xlu0 %936  ;;  %7447 = vmatpush.msra.mxu0 %v11995_v31  ;;  %849 = vst [vmem:[#allocation2 + $0x1c3] ss:$8 sm:$0xf0] %v787_v13  ;;  %7494 = vmatpush.msra.mxu2 %v11995_v31 }
 0x105   : > { %v965_v43 = vrot.slane %v11976_v18, 1  ;;  %7626 = vmatpush.msra.mxu3 %v11866_v41  ;;  %7541 = vmatpush.msrb.mxu1 %v11995_v31  ;;  %215 = vst [vmem:[#allocation2] ss:$8 sm:$0xf0] %v196_v12 }
 0x106   : > { %7448 = vmatpush.msra.mxu0 %v12004_v33  ;;  %214 = vst [vmem:[#allocation2] ss:$8 sm:$0xf] %v196_v12  ;;  %7495 = vmatpush.msra.mxu2 %v12004_v33  ;;  %v12128_v12 = vld [vmem:[#allocation7 + $0x10] sm:$0xff] }
 0x107   : > { %7627 = vmatpush.msra.mxu3 %v11864_v39  ;;  %443 = vst [vmem:[#allocation2 + $0x201] ss:$8 sm:$0xf] %v381_v14  ;;  %v992_v23 = vsel %vm362_vm1, %v964_v30, %v965_v43  ;;  %v584_v30 = vsel %vm362_vm1, %v556_v54, %v557_v17 }
 0x108   : > { %10913 = vmatmul.msk.f32.vlgmr.msrb.gmra.mxu3 %vm7432_vm5, %v11837_v22  ;;  %7449 = vmatpush.msra.mxu0 %v12014_v47  ;;  %444 = vst [vmem:[#allocation2 + $0x201] ss:$8 sm:$0xf0] %v381_v14  ;;  %v993_v32 = vsel %vm976_vm4, %v11826_v8, %v992_v23  ;;  %v585_v38 = vsel %vm568_vm2, %v11860_v35, %v584_v30 }
 0x109   : > { %7628 = vmatpush.msra.mxu3 %v11862_v40  ;;  %235 = vst [vmem:[#allocation2 + $0x1c0] ss:$8 sm:$0xf] %v203_v34 }
 0x10a   : > { %236 = vst [vmem:[#allocation2 + $0x1c0] ss:$8 sm:$0xf0] %v203_v34 }
 0x10b   : > { %7629 = vmatpush.msra.mxu3 %v12027_v37  ;;  %851 = vst [vmem:[#allocation2 + $0x203] ss:$8 sm:$0xf] %v789_v46 }
 0x10c   : > { %v12040_v1 = vld [vmem:[#allocation2 + $0x20] sm:$0xff]  ;;  %v12042_v24 = vld [vmem:[#allocation2 + $0x28] sm:$0xff]  ;;  %v12044_v4 = vld [vmem:[#allocation2 + $0x30] sm:$0xff]  ;;  %852 = vst [vmem:[#allocation2 + $0x203] ss:$8 sm:$0xf0] %v789_v46 }
 0x10d   : > { %7630 = vmatpush.msra.mxu3 %v12037_v56  ;;  %7450 = vmatpush.msra.mxu0 %v12040_v1  ;;  %1055 = vst [vmem:[#allocation2 + $0x204] ss:$8 sm:$0xf] %v993_v32  ;;  %v12052_v8 = vld [vmem:[#allocation2 + $0x18] sm:$0xff]  ;;  %v1596_v35 = vld [vmem:[#allocation2 + $0x10] sm:$0xff]  ;;  %v1412_v49 = vld [vmem:[#allocation2 + $0x8] sm:$0xff] }
 0x10e   : > { %7496 = vmatpush.msra.mxu2 %v12042_v24  ;;  %7542 = vmatpush.msrb.mxu1 %v12044_v4  ;;  %1056 = vst [vmem:[#allocation2 + $0x204] ss:$8 sm:$0xf0] %v993_v32  ;;  %v1228_v54 = vld [vmem:[#allocation2] sm:$0xff]  ;;  %v12068_v55 = vld [vmem:[#allocation2 + $0x38] sm:$0xff] }
 0x10f   : > { %7631 = vmatpush.msra.mxu3 %v11941_v53  ;;  %7451 = vmatpush.msra.mxu0 %v12052_v8  ;;  %647 = vst [vmem:[#allocation2 + $0x202] ss:$8 sm:$0xf] %v585_v38 }
 0x110   : > { %7497 = vmatpush.msra.mxu2 %v12040_v1  ;;  %7543 = vmatpush.msrb.mxu1 %v12042_v24  ;;  %648 = vst [vmem:[#allocation2 + $0x202] ss:$8 sm:$0xf0] %v585_v38  ;;  %v12070_v7 = vld [vmem:[#allocation2 + $0x1c0] sm:$0xff]  ;;  %v12093_v3 = vld [vmem:[#allocation2 + $0x1c8] sm:$0xff]  ;;  %v12167_v32 = vld [vmem:[#allocation2 + $0x1d0] sm:$0xff] }
 0x111   : > { %7632 = vmatpush.msra.mxu3 %v11933_v61  ;;  %7452 = vmatpush.msra.mxu0 %v1596_v35  ;;  %238 = vst [vmem:[#allocation2 + $0x200] ss:$8 sm:$0xf] %v204_v44 }
 0x112   : > { %7498 = vmatpush.msra.mxu2 %v12052_v8  ;;  %7544 = vmatpush.msrb.mxu1 %v12040_v1  ;;  %239 = vst [vmem:[#allocation2 + $0x200] ss:$8 sm:$0xf0] %v204_v44 }
 0x113   : > { %7633 = vmatpush.msra.mxu3 %v11931_v57  ;;  %7453 = vmatpush.msra.mxu0 %v1412_v49 }
 0x114   : > { %7499 = vmatpush.msra.mxu2 %v1596_v35  ;;  %7545 = vmatpush.msrb.mxu1 %v12052_v8 }
 0x115   : > { %7634 = vmatpush.msra.mxu3 %v12062_v52  ;;  %7454 = vmatpush.msra.mxu0 %v1228_v54  ;;  %v12375_v54 = vld [vmem:[#allocation2 + $0xe8] sm:$0xff] }
 0x116   : > { %7500 = vmatpush.msra.mxu2 %v1412_v49  ;;  %7546 = vmatpush.msrb.mxu1 %v1596_v35  ;;  %v12341_v49 = vld [vmem:[#allocation2 + $0x140] sm:$0xff] }
 0x117   : > { %7635 = vmatpush.msra.mxu3 %v12068_v55  ;;  %7501 = vmatmul.f32.vlgmr.msra.gmra.mxu2 %v12066_v48 }
 0x118   : > { %7577 = vmatpush.msrb.mxu0 %v11811_v2  ;;  %7607 = vmatpush.msrb.mxu2 %v12075_v62 }
 0x119   : > { %7653 = vmatpush.msra.mxu1 %v12070_v7  ;;  %7636 = vmatpush.msra.mxu3 %v12044_v4 }
 0x11a   : > { %7578 = vmatpush.msrb.mxu0 %v11978_v26  ;;  %7608 = vmatpush.msrb.mxu2 %v11840_v9 }
 0x11b   : > { %7654 = vmatpush.msra.mxu1 %v12075_v62  ;;  %7637 = vmatpush.msra.mxu3 %v12042_v24 }
 0x11c   : > { %7579 = vmatpush.msrb.mxu0 %v11866_v41  ;;  %7609 = vmatpush.msrb.mxu2 %v11630_v59 }
 0x11d   : > { %7655 = vmatpush.msra.mxu1 %v11840_v9  ;;  %7638 = vmatpush.msra.mxu3 %v12040_v1 }
 0x11e   : > { %7455 = vmatmul.f32.vlgmr.msra.gmra.mxu0 %v12066_v48  ;;  %7610 = vmatpush.msrb.mxu2 %v12089_v42 }
 0x11f   : > { %7580 = vmatpush.msrb.mxu0 %v11864_v39  ;;  %7656 = vmatpush.msra.mxu1 %v11630_v59 }
 0x120   : > { %7699 = vmatpush.msrb.mxu3 %v12093_v3  ;;  %7547 = vmatmul.f32.vlgmr.msrb.gmra.mxu1 %v12066_v48 }
 0x121   : > { %7581 = vmatpush.msrb.mxu0 %v11862_v40  ;;  %7611 = vmatpush.msrb.mxu2 %v11627_v58  ;;  %v12112_v58 = vpop.permute.xlu1 %325 }
 0x122   : > { %7657 = vmatpush.msra.mxu1 %v12089_v42  ;;  %7700 = vmatpush.msrb.mxu3 %v12070_v7  ;;  %v353_v13 = vrot.slane %v12112_v58, 1 }
 0x123   : > { %7582 = vmatpush.msrb.mxu0 %v11878_v45  ;;  %10914 = vmatmul.msk.f32.gmra.mxu3 %vm7432_vm5, %v11937_v50 }
 0x124   : > { %7612 = vmatpush.msrb.mxu2 %v12103_v5  ;;  %7658 = vmatpush.msra.mxu1 %v12108_v6  ;;  %v382_v21 = vsel %vm362_vm1, %v352_v27, %v353_v13  ;;  %v12152_v27 = vpop.permute.xlu2 %530 }
 0x125   : > { %7701 = vmatpush.msrb.mxu3 %v12075_v62  ;;  %7583 = vmatpush.msrb.mxu0 %v12037_v56  ;;  %v383_v14 = vsel %vm364_vm3, %v11915_v51, %v382_v21  ;;  %v12145_v51 = vld [vmem:[#allocation2 + $0x108] sm:$0xff]  ;;  %v558_v34 = vrot.slane %v12152_v27, 1 }
 0x126   : > { %7613 = vmatpush.msrb.mxu2 %v11911_v29  ;;  %7659 = vmatpush.msra.mxu1 %v12103_v5  ;;  %446 = vst [vmem:[#allocation2 + $0x241] ss:$8 sm:$0xf] %v383_v14  ;;  %v12409_v21 = vld [vmem:[#allocation2 + $0xc8] sm:$0xff] }
 0x127   : > { %7702 = vmatpush.msrb.mxu3 %v11840_v9  ;;  %7584 = vmatpush.msrb.mxu0 %v11941_v53  ;;  %447 = vst [vmem:[#allocation2 + $0x241] ss:$8 sm:$0xf0] %v383_v14  ;;  %v586_v38 = vsel %vm362_vm1, %v557_v17, %v558_v34  ;;  %v12415_v14 = vld [vmem:[#allocation2 + $0x88] sm:$0xff] }
 0x128   : > { %7614 = vmatpush.msrb.mxu2 %v11803_v0  ;;  %7660 = vmatpush.msra.mxu1 %v11911_v29 }
 0x129   : > { %7703 = vmatpush.msrb.mxu3 %v11630_v59  ;;  %7585 = vmatpush.msrb.mxu0 %v11933_v61  ;;  %v12142_v59 = vld [vmem:[#allocation2 + $0x110] sm:$0xff]  ;;  %v12160_v46 = vpop.permute.xlu1 %938 }
 0x12a   : > { %7615 = vmatpush.msrb.mxu2 %v11801_v63  ;;  %7661 = vmatpush.msra.mxu1 %v11803_v0  ;;  %v966_v30 = vrot.slane %v12160_v46, 1 }
 0x12b   : > { %7704 = vmatpush.msrb.mxu3 %v12134_v28  ;;  %7504 = vmatmul.f32.gmra.mxu2 %v12128_v12 }
 0x12c   : > { %7715 = vmatpush.msrb.mxu1 %v11911_v29  ;;  %7669 = vmatpush.msra.mxu2 %v11803_v0  ;;  %v12154_v0 = vpop.permute.xlu0 %734  ;;  %v994_v17 = vsel %vm362_vm1, %v965_v43, %v966_v30  ;;  %v1970_v43 = vld [vmem:[#allocation2 + $0x50] sm:$0xff] }
 0x12d   : > { %7586 = vmatpush.msrb.mxu0 %v11931_v57  ;;  %7639 = vmatmul.f32.vlgmr.msra.gmra.mxu3 %v12066_v48  ;;  %v762_v23 = vrot.slane %v12154_v0, 1 }
 0x12e   : > { %7716 = vmatpush.msrb.mxu1 %v12142_v59  ;;  %7705 = vmatpush.msrb.mxu3 %v12108_v6 }
 0x12f   : > { %7670 = vmatpush.msra.mxu2 %v12145_v51  ;;  %7587 = vmatpush.msrb.mxu0 %v11980_v20  ;;  %v790_v44 = vsel %vm362_vm1, %v761_v11, %v762_v23  ;;  %v12196_v11 = vld [vmem:[%s11427_s28 + $0x58] sm:$0xff] }
 0x130   : > { %7717 = vmatpush.msrb.mxu1 %v12145_v51  ;;  %7706 = vmatpush.msrb.mxu3 %v12103_v5  ;;  %v791_v35 = vsel %vm772_vm0, %v11968_v10, %v790_v44  ;;  %v995_v10 = vsel %vm976_vm4, %v11976_v18, %v994_v17  ;;  %v2889_v18 = vld [vmem:[#allocation2 + $0xa8] sm:$0xff]  ;;  %v1425_v44 = vld [vmem:[#allocation2 + $0x70] sm:$0xff]  ;;  %v12462_v17 = vld [vmem:[#allocation2 + $0x98] sm:$0xff] }
 0x131   : > { %7671 = vmatpush.msra.mxu2 %v11971_v15  ;;  %7588 = vmatpush.msrb.mxu0 %v12068_v55  ;;  %854 = vst [vmem:[#allocation2 + $0x243] ss:$8 sm:$0xf] %v791_v35 }
 0x132   : > { %7718 = vmatpush.msrb.mxu1 %v11971_v15  ;;  %7707 = vmatpush.msrb.mxu3 %v11911_v29  ;;  %v587_v29 = vsel %vm568_vm2, %v11991_v25, %v586_v38  ;;  %855 = vst [vmem:[#allocation2 + $0x243] ss:$8 sm:$0xf0] %v791_v35  ;;  %v2890_v25 = vld [vmem:[#allocation2 + $0xb0] sm:$0xff]  ;;  %v12430_v38 = vld [vmem:[#allocation2 + $0xf8] sm:$0xff]  ;;  %v12458_v35 = vld [vmem:[#allocation2 + $0x100] sm:$0xff] }
 0x133   : > { %7458 = vmatmul.f32.gmra.mxu0 %v12128_v12  ;;  %7672 = vmatpush.msra.mxu2 %v11978_v26  ;;  %650 = vst [vmem:[#allocation2 + $0x242] ss:$8 sm:$0xf] %v587_v29 }
 0x134   : > { %7745 = vmatpush.msra.mxu3 %v12167_v32  ;;  %7589 = vmatpush.msrb.mxu0 %v12044_v4  ;;  %651 = vst [vmem:[#allocation2 + $0x242] ss:$8 sm:$0xf0] %v587_v29  ;;  %v12442_v29 = vld [vmem:[#allocation2 + $0x220] sm:$0xff] }
 0x135   : > { %7550 = vmatmul.f32.gmra.mxu1 %v12128_v12  ;;  %10915 = vmatmul.msk.f32.vlgmr.msrb.gmra.mxu2 %vm7432_vm5, %v11837_v22  ;;  %1058 = vst [vmem:[#allocation2 + $0x244] ss:$8 sm:$0xf] %v995_v10 }
 0x136   : > { %7719 = vmatpush.msrb.mxu1 %v11978_v26  ;;  %7673 = vmatpush.msra.mxu2 %v11866_v41  ;;  %1059 = vst [vmem:[#allocation2 + $0x244] ss:$8 sm:$0xf0] %v995_v10  ;;  %v12482_v10 = vld [vmem:[#allocation2 + $0x1c0] sm:$0xff] }
 0x137   : > { %7746 = vmatpush.msra.mxu3 %v12093_v3  ;;  %7590 = vmatpush.msrb.mxu0 %v12042_v24 }
 0x138   : > { %7642 = vmatmul.f32.gmra.mxu3 %v12128_v12  ;;  %532 = vrot.lane.b32.xlu0 %v12196_v11, %s11309_s30 }
 0x139   : > { %736 = vrot.lane.b32.xlu1 %v12196_v11, %s11308_s20  ;;  %7674 = vmatpush.msra.mxu2 %v11864_v39  ;;  %v12223_v39 = vld [vmem:[#allocation2 + $0x170] sm:$0xff] }
 0x13a   : > { %7720 = vmatpush.msrb.mxu1 %v11866_v41  ;;  %7747 = vmatpush.msra.mxu3 %v12070_v7  ;;  %v3811_v41 = vld [vmem:[#allocation2 + $0x118] sm:$0xff] }
 0x13b   : > { %7591 = vmatpush.msrb.mxu0 %v12040_v1  ;;  %7675 = vmatpush.msra.mxu2 %v2889_v18  ;;  %v4000_v1 = vld [vmem:[#allocation2 + $0x180] sm:$0xff] }
 0x13c   : > { %7721 = vmatpush.msrb.mxu1 %v2890_v25  ;;  %7748 = vmatpush.msra.mxu3 %v12075_v62 }
 0x13d   : > { %7592 = vmatpush.msrb.mxu0 %v12052_v8  ;;  %7676 = vmatpush.msra.mxu2 %v12027_v37  ;;  %v12332_v8 = vld [vmem:[#allocation2 + $0x148] sm:$0xff] }
 0x13e   : > { %7593 = vmatmul.f32.vlgmr.msrb.gmra.mxu0 %v12066_v48  ;;  %7722 = vmatpush.msrb.mxu1 %v2889_v18 }
 0x13f   : > { %7749 = vmatpush.msra.mxu3 %v11840_v9  ;;  %7761 = vmatpush.msra.mxu0 %v12103_v5  ;;  %v12237_v9 = vld [vmem:[#allocation2 + $0x48] sm:$0xff] }
 0x140   : > { %10916 = vmatmul.msk.f32.gmra.mxu2 %vm7432_vm5, %v11937_v50  ;;  %10917 = vmatmul.msk.f32.vlgmr.msra.gmra.mxu1 %vm7432_vm5, %v11837_v22 }
 0x141   : > { %7677 = vmatpush.msra.mxu2 %v12037_v56  ;;  %7723 = vmatpush.msrb.mxu1 %v12027_v37 }
 0x142   : > { %7750 = vmatpush.msra.mxu3 %v12223_v39  ;;  %7762 = vmatpush.msra.mxu0 %v3811_v41  ;;  %v12500_v41 = vld [vmem:[#allocation2 + $0x1a0] sm:$0xff] }
 0x143   : > { %10919 = vmatmul.msk.f32.vlgmr.msrb.gmra.mxu3 %vm7432_vm5, %v11837_v22  ;;  %7678 = vmatpush.msra.mxu2 %v11941_v53 }
 0x144   : > { %7724 = vmatpush.msrb.mxu1 %v12037_v56  ;;  %7751 = vmatpush.msra.mxu3 %v12134_v28 }
 0x145   : > { %7763 = vmatpush.msra.mxu0 %v12142_v59  ;;  %7679 = vmatpush.msra.mxu2 %v11933_v61  ;;  %v205_v61 = vld [vmem:[%s11427_s28 + $0x48] sm:$0xff]  ;;  %v12417_v59 = vld [vmem:[#allocation2 + $0x90] sm:$0xff] }
 0x146   : > { %7725 = vmatpush.msrb.mxu1 %v11941_v53  ;;  %7752 = vmatpush.msra.mxu3 %v12108_v6  ;;  %v2891_v53 = vld [vmem:[#allocation2 + $0xb8] sm:$0xff]  ;;  %242 = vst [vmem:[#allocation2 + $0x240] ss:$8 sm:$0xf0] %v205_v61 }
 0x147   : > { %7764 = vmatpush.msra.mxu0 %v12145_v51  ;;  %7680 = vmatpush.msra.mxu2 %v12237_v9  ;;  %241 = vst [vmem:[#allocation2 + $0x240] ss:$8 sm:$0xf] %v205_v61  ;;  %v12423_v51 = vld [vmem:[#allocation2 + $0x80] sm:$0xff] }
 0x148   : > { %7596 = vmatmul.f32.gmra.mxu0 %v12128_v12  ;;  %7726 = vmatpush.msrb.mxu1 %v1970_v43 }
 0x149   : > { %7753 = vmatpush.msra.mxu3 %v12103_v5  ;;  %7765 = vmatpush.msra.mxu0 %v11971_v15  ;;  %v5651_v15 = vld [vmem:[#allocation2 + $0x1d8] sm:$0xff] }
 0x14a   : > { %10918 = vmatmul.msk.f32.gmra.mxu1 %vm7432_vm5, %v11937_v50  ;;  %7681 = vmatpush.msra.mxu2 %v12062_v52 }
 0x14b   : > { %7807 = vmatpush.msrb.mxu3 %v4000_v1  ;;  %7727 = vmatpush.msrb.mxu1 %v12237_v9  ;;  %v12524_v1 = vld [vmem:[#allocation2 + $0x160] sm:$0xff] }
 0x14c   : > { %7766 = vmatpush.msra.mxu0 %v11978_v26  ;;  %10920 = vmatmul.msk.f32.gmra.mxu3 %vm7432_vm5, %v11937_v50  ;;  %v12273_v26 = vld [vmem:[#allocation2 + $0x1f8] sm:$0xff] }
 0x14d   : > { %327 = vrot.lane.b32.xlu2 %v12196_v11, %s11310_s29  ;;  %7808 = vmatpush.msrb.mxu3 %v11801_v63  ;;  %v12262_v63 = vld [vmem:[#allocation2 + $0x128] sm:$0xff] }
 0x14e   : > { %7682 = vmatpush.msra.mxu2 %v12068_v55  ;;  %7728 = vmatpush.msrb.mxu1 %v12062_v52 }
 0x14f   : > { %7767 = vmatpush.msra.mxu0 %v2891_v53  ;;  %7809 = vmatpush.msrb.mxu3 %v11811_v2  ;;  %v12266_v2 = vld [vmem:[#allocation2 + $0x200] sm:$0xff] }
 0x150   : > { %7683 = vmatpush.msra.mxu2 %v12044_v4  ;;  %7729 = vmatpush.msrb.mxu1 %v12068_v55 }
 0x151   : > { %7768 = vmatpush.msra.mxu0 %v2890_v25  ;;  %7810 = vmatpush.msrb.mxu3 %v11824_v19  ;;  %v3080_v19 = vld [vmem:[#allocation2 + $0x120] sm:$0xff]  ;;  %v12496_v25 = vld [vmem:[#allocation2 + $0x228] sm:$0xff] }
 0x152   : > { %7684 = vmatpush.msra.mxu2 %v12042_v24  ;;  %7730 = vmatpush.msrb.mxu1 %v12044_v4  ;;  %v12280_v24 = vld [vmem:[#allocation2 + $0x1f0] sm:$0xff]  ;;  %v5104_v4 = vld [vmem:[#allocation2 + $0x1e8] sm:$0xff] }
 0x153   : > { %7769 = vmatpush.msra.mxu0 %v2889_v18  ;;  %7685 = vmatmul.f32.vlgmr.msra.gmra.mxu2 %v12066_v48  ;;  %v12491_v18 = vld [vmem:[#allocation2 + $0xa0] sm:$0xff] }
 0x154   : > { %7811 = vmatpush.msrb.mxu3 %v12262_v63  ;;  %7791 = vmatpush.msrb.mxu2 %v5651_v15 }
 0x155   : > { %7837 = vmatpush.msra.mxu1 %v12266_v2  ;;  %7770 = vmatpush.msra.mxu0 %v12027_v37  ;;  %v1971_v37 = vld [vmem:[#allocation2 + $0x58] sm:$0xff] }
 0x156   : > { %10921 = vmatmul.msk.f32.vlgmr.msra.gmra.mxu3 %vm7432_vm5, %v11837_v22  ;;  %7792 = vmatpush.msrb.mxu2 %v12167_v32  ;;  %v1609_v32 = vld [vmem:[#allocation2 + $0x78] sm:$0xff] }
 0x157   : > { %7812 = vmatpush.msrb.mxu3 %v3080_v19  ;;  %7838 = vmatpush.msra.mxu1 %v12273_v26  ;;  %v12553_v19 = vld [vmem:[#allocation2 + $0x1c8] sm:$0xff] }
 0x158   : > { %940 = vrot.lane.b32.xlu2 %v12196_v11, %s11311_s16  ;;  %7771 = vmatpush.msra.mxu0 %v12037_v56  ;;  %v12289_v56 = vld [vmem:[#allocation2 + $0x1e0] sm:$0xff]  ;;  %v12477_v11 = vld [vmem:[#allocation2 + $0x1b8] sm:$0xff] }
 0x159   : > { %7793 = vmatpush.msrb.mxu2 %v12093_v3  ;;  %7813 = vmatpush.msrb.mxu3 %v11862_v40  ;;  %v12296_v40 = vld [vmem:[#allocation2 + $0x178] sm:$0xff]  ;;  %v12400_v3 = vld [vmem:[#allocation2 + $0xd0] sm:$0xff] }
 0x15a   : > { %7839 = vmatpush.msra.mxu1 %v12280_v24  ;;  %7772 = vmatpush.msra.mxu0 %v1971_v37  ;;  %v12566_v37 = vld [vmem:[#allocation7 + $0x18] sm:$0xff] }
 0x15b   : > { %7794 = vmatpush.msrb.mxu2 %v12070_v7  ;;  %7814 = vmatpush.msrb.mxu3 %v11878_v45  ;;  %v12304_v45 = vld [vmem:[#allocation2 + $0x198] sm:$0xff]  ;;  %v12386_v7 = vld [vmem:[#allocation2 + $0xe0] sm:$0xff] }
 0x15c   : > { %7840 = vmatpush.msra.mxu1 %v5104_v4  ;;  %7773 = vmatpush.msra.mxu0 %v1970_v43 }
 0x15d   : > { %7688 = vmatmul.f32.gmra.mxu2 %v12128_v12  ;;  %7731 = vmatmul.f32.vlgmr.msrb.gmra.mxu1 %v12066_v48 }
 0x15e   : > { %7795 = vmatpush.msrb.mxu2 %v12075_v62  ;;  %7815 = vmatpush.msrb.mxu3 %v11890_v16  ;;  %v12310_v16 = vld [vmem:[#allocation2 + $0x190] sm:$0xff] }
 0x15f   : > { %7841 = vmatpush.msra.mxu1 %v12289_v56  ;;  %7774 = vmatpush.msra.mxu0 %v12237_v9  ;;  %v12396_v62 = vld [vmem:[#allocation2 + $0x1b0] sm:$0xff] }
 0x160   : > { %10922 = vmatmul.msk.f32.gmra.mxu3 %vm7432_vm5, %v11937_v50  ;;  %7796 = vmatpush.msrb.mxu2 %v12296_v40 }
 0x161   : > { %7816 = vmatpush.msrb.mxu3 %v11902_v36  ;;  %7842 = vmatpush.msra.mxu1 %v12089_v42  ;;  %v12312_v36 = vld [vmem:[#allocation2 + $0x208] sm:$0xff] }
 0x162   : > { %7775 = vmatpush.msra.mxu0 %v12062_v52  ;;  %7797 = vmatpush.msrb.mxu2 %v12223_v39  ;;  %v12356_v52 = vld [vmem:[#allocation2 + $0x1a8] sm:$0xff] }
 0x163   : > { %7817 = vmatpush.msrb.mxu3 %v11918_v60  ;;  %7843 = vmatpush.msra.mxu1 %v12304_v45  ;;  %v12318_v60 = vld [vmem:[#allocation2 + $0x188] sm:$0xff] }
 0x164   : > { %7776 = vmatpush.msra.mxu0 %v12068_v55  ;;  %7798 = vmatpush.msrb.mxu2 %v12134_v28  ;;  %v12380_v55 = vld [vmem:[#allocation2 + $0xf0] sm:$0xff] }
 0x165   : > { %7818 = vmatpush.msrb.mxu3 %v11931_v57  ;;  %7844 = vmatpush.msra.mxu1 %v12310_v16  ;;  %v12326_v57 = vld [vmem:[%s11427_s28 + $0x60] sm:$0xff] }
 0x166   : > { %7883 = vmatpush.msrb.mxu0 %v12312_v36  ;;  %7734 = vmatmul.f32.gmra.mxu1 %v12128_v12 }
 0x167   : > { %7799 = vmatpush.msrb.mxu2 %v12108_v6  ;;  %7819 = vmatpush.msrb.mxu3 %v11980_v20  ;;  %v12337_v20 = vld [vmem:[#allocation2 + $0x150] sm:$0xff] }
 0x168   : > { %7845 = vmatpush.msra.mxu1 %v12318_v60  ;;  %7884 = vmatpush.msrb.mxu0 %v12266_v2 }
 0x169   : > { %10923 = vmatmul.msk.f32.vlgmr.msrb.gmra.mxu2 %vm7432_vm5, %v11837_v22  ;;  %7820 = vmatpush.msrb.mxu3 %v11995_v31  ;;  %v12348_v31 = vld [vmem:[#allocation2 + $0x138] sm:$0xff] }
 0x16a   : > { %7853 = vmatpush.msra.mxu2 %v12318_v60  ;;  %7899 = vmatpush.msrb.mxu1 %v12310_v16 }
 0x16b   : > { %7885 = vmatpush.msrb.mxu0 %v12273_v26  ;;  %329 = vrot.lane.b32.xlu0 %v12326_v57, %s11310_s29 }
 0x16c   : > { %7854 = vmatpush.msra.mxu2 %v12332_v8  ;;  %7900 = vmatpush.msrb.mxu1 %v12337_v20 }
 0x16d   : > { %7821 = vmatpush.msrb.mxu3 %v12004_v33  ;;  %7886 = vmatpush.msrb.mxu0 %v12280_v24  ;;  %v12352_v33 = vld [vmem:[#allocation2 + $0x210] sm:$0xff] }
 0x16e   : > { %7855 = vmatpush.msra.mxu2 %v12341_v49  ;;  %7901 = vmatpush.msrb.mxu1 %v12332_v8 }
 0x16f   : > { %7822 = vmatpush.msrb.mxu3 %v12014_v47  ;;  %7887 = vmatpush.msrb.mxu0 %v5104_v4  ;;  %v12361_v47 = vld [vmem:[#allocation2 + $0x130] sm:$0xff] }
 0x170   : > { %7823 = vmatmul.f32.vlgmr.msrb.gmra.mxu3 %v12066_v48  ;;  %7777 = vmatmul.f32.vlgmr.msra.gmra.mxu0 %v12066_v48 }
 0x171   : > { %7856 = vmatpush.msra.mxu2 %v12348_v31  ;;  %7902 = vmatpush.msrb.mxu1 %v12341_v49 }
 0x172   : > { %7929 = vmatpush.msra.mxu3 %v12352_v33  ;;  %7888 = vmatpush.msrb.mxu0 %v12356_v52 }
 0x173   : > { %10924 = vmatmul.msk.f32.gmra.mxu2 %vm7432_vm5, %v11937_v50  ;;  %7903 = vmatpush.msrb.mxu1 %v12348_v31 }
 0x174   : > { %7857 = vmatpush.msra.mxu2 %v12361_v47  ;;  %7930 = vmatpush.msra.mxu3 %v12312_v36 }
 0x175   : > { %7889 = vmatpush.msrb.mxu0 %v12089_v42  ;;  %942 = vrot.lane.b32.xlu0 %v12326_v57, %s11311_s16 }
 0x176   : > { %534 = vrot.lane.b32.xlu1 %v12326_v57, %s11309_s30  ;;  %7858 = vmatpush.msra.mxu2 %v12262_v63 }
 0x177   : > { %7904 = vmatpush.msrb.mxu1 %v12361_v47  ;;  %7931 = vmatpush.msra.mxu3 %v12266_v2 }
 0x178   : > { %7890 = vmatpush.msrb.mxu0 %v12304_v45  ;;  %10925 = vmatmul.msk.f32.vlgmr.msra.gmra.mxu1 %vm7432_vm5, %v11837_v22  ;;  %v12392_v22 = vld [vmem:[#allocation2 + $0xd8] sm:$0xff] }
 0x179   : > { %7859 = vmatpush.msra.mxu2 %v12375_v54  ;;  %7905 = vmatpush.msrb.mxu1 %v12380_v55 }
 0x17a   : > { %7932 = vmatpush.msra.mxu3 %v12273_v26  ;;  %7891 = vmatpush.msrb.mxu0 %v12310_v16 }
 0x17b   : > { %7826 = vmatmul.f32.gmra.mxu3 %v12128_v12  ;;  %7780 = vmatmul.f32.gmra.mxu0 %v12128_v12 }
 0x17c   : > { %7860 = vmatpush.msra.mxu2 %v12386_v7  ;;  %7906 = vmatpush.msrb.mxu1 %v12375_v54 }
 0x17d   : > { %7933 = vmatpush.msra.mxu3 %v12280_v24  ;;  %7945 = vmatpush.msra.mxu0 %v12304_v45 }
 0x17e   : > { %7861 = vmatpush.msra.mxu2 %v12392_v22  ;;  %7907 = vmatpush.msrb.mxu1 %v12386_v7 }
 0x17f   : > { %7934 = vmatpush.msra.mxu3 %v12396_v62  ;;  %7946 = vmatpush.msra.mxu0 %v12103_v5 }
 0x180   : > { %7862 = vmatpush.msra.mxu2 %v12400_v3  ;;  %7908 = vmatpush.msrb.mxu1 %v12392_v22 }
 0x181   : > { %7935 = vmatpush.msra.mxu3 %v12356_v52  ;;  %7947 = vmatpush.msra.mxu0 %v12337_v20 }
 0x182   : > { %10926 = vmatmul.msk.f32.gmra.mxu1 %vm7432_vm5, %v11937_v50  ;;  %7863 = vmatpush.msra.mxu2 %v12409_v21 }
 0x183   : > { %7909 = vmatpush.msrb.mxu1 %v12400_v3  ;;  %7936 = vmatpush.msra.mxu3 %v12089_v42 }
 0x184   : > { %7948 = vmatpush.msra.mxu0 %v12332_v8  ;;  %7864 = vmatpush.msra.mxu2 %v12415_v14 }
 0x185   : > { %7910 = vmatpush.msrb.mxu1 %v12417_v59  ;;  %7937 = vmatpush.msra.mxu3 %v12304_v45 }
 0x186   : > { %7949 = vmatpush.msra.mxu0 %v12341_v49  ;;  %7865 = vmatpush.msra.mxu2 %v12423_v51 }
 0x187   : > { %7991 = vmatpush.msrb.mxu3 %v12089_v42  ;;  %7911 = vmatpush.msrb.mxu1 %v12415_v14  ;;  %v1241_v42 = vld [vmem:[#allocation2 + $0x68] sm:$0xff] }
 0x188   : > { %7950 = vmatpush.msra.mxu0 %v12348_v31  ;;  %7866 = vmatpush.msra.mxu2 %v1609_v32 }
 0x189   : > { %7992 = vmatpush.msrb.mxu3 %v12108_v6  ;;  %7912 = vmatpush.msrb.mxu1 %v12423_v51  ;;  %v12439_v6 = vld [vmem:[#allocation2 + $0x218] sm:$0xff] }
 0x18a   : > { %7951 = vmatpush.msra.mxu0 %v12430_v38  ;;  %7867 = vmatpush.msra.mxu2 %v1425_v44 }
 0x18b   : > { %7993 = vmatpush.msrb.mxu3 %v12103_v5  ;;  %7913 = vmatpush.msrb.mxu1 %v1609_v32  ;;  %v12447_v5 = vld [vmem:[#allocation7 + $0x8] sm:$0xff] }
 0x18c   : > { %7952 = vmatpush.msra.mxu0 %v12380_v55  ;;  %7868 = vmatpush.msra.mxu2 %v1241_v42 }
 0x18d   : > { %7994 = vmatpush.msrb.mxu3 %v12337_v20  ;;  %7914 = vmatpush.msrb.mxu1 %v1425_v44  ;;  %v12691_v44 = vld [vmem:[#allocation2 + $0x268] sm:$0xff] }
 0x18e   : > { %7953 = vmatpush.msra.mxu0 %v12375_v54  ;;  %7869 = vmatmul.f32.vlgmr.msra.gmra.mxu2 %v12066_v48 }
 0x18f   : > { %7995 = vmatpush.msrb.mxu3 %v12332_v8  ;;  %7975 = vmatpush.msrb.mxu2 %v12439_v6 }
 0x190   : > { %8021 = vmatpush.msra.mxu1 %v12442_v29  ;;  %7954 = vmatpush.msra.mxu0 %v12386_v7 }
 0x191   : > { %10929 = vmatmul.msk.f32.vlgmr.msra.gmra.mxu3 %vm7432_vm5, %v12447_v5  ;;  %7976 = vmatpush.msrb.mxu2 %v12352_v33 }
 0x192   : > { %7996 = vmatpush.msrb.mxu3 %v12341_v49  ;;  %8022 = vmatpush.msra.mxu1 %v12439_v6 }
 0x193   : > { %738 = vrot.lane.b32.xlu2 %v12326_v57, %s11308_s20  ;;  %7955 = vmatpush.msra.mxu0 %v12392_v22 }
 0x194   : > { %7977 = vmatpush.msrb.mxu2 %v12312_v36  ;;  %7997 = vmatpush.msrb.mxu3 %v12458_v35 }
 0x195   : > { %8023 = vmatpush.msra.mxu1 %v12352_v33  ;;  %7956 = vmatpush.msra.mxu0 %v12462_v17 }
 0x196   : > { %7978 = vmatpush.msrb.mxu2 %v12266_v2  ;;  %10927 = vmatmul.msk.f32.vlgmr.msrb.gmra.mxu0 %vm7432_vm5, %v12447_v5 }
 0x197   : > { %7998 = vmatpush.msrb.mxu3 %v12430_v38  ;;  %8024 = vmatpush.msra.mxu1 %v12312_v36 }
 0x198   : > { %7957 = vmatpush.msra.mxu0 %v12417_v59  ;;  %7872 = vmatmul.f32.gmra.mxu2 %v12128_v12 }
 0x199   : > { %7915 = vmatmul.f32.vlgmr.msrb.gmra.mxu1 %v12066_v48  ;;  %7979 = vmatpush.msrb.mxu2 %v12273_v26 }
 0x19a   : > { %7999 = vmatpush.msrb.mxu3 %v12380_v55  ;;  %8025 = vmatpush.msra.mxu1 %v12266_v2  ;;  %v12543_v2 = vld [vmem:[#allocation2 + $0x158] sm:$0xff] }
 0x19b   : > { %7958 = vmatpush.msra.mxu0 %v12415_v14  ;;  %10930 = vmatmul.msk.f32.gmra.mxu3 %vm7432_vm5, %v11937_v50 }
 0x19c   : > { %7980 = vmatpush.msrb.mxu2 %v12477_v11  ;;  %8000 = vmatpush.msrb.mxu3 %v12375_v54 }
 0x19d   : > { %8026 = vmatpush.msra.mxu1 %v12482_v10  ;;  %7959 = vmatpush.msra.mxu0 %v12423_v51 }
 0x19e   : > { %7981 = vmatpush.msrb.mxu2 %v12396_v62  ;;  %8001 = vmatpush.msrb.mxu3 %v12386_v7 }
 0x19f   : > { %8027 = vmatpush.msra.mxu1 %v12477_v11  ;;  %7960 = vmatpush.msra.mxu0 %v1609_v32  ;;  %v12681_v32 = vld [vmem:[#allocation2 + $0x1f8] sm:$0xff] }
 0x1a0   : > { %7982 = vmatpush.msrb.mxu2 %v12356_v52  ;;  %10928 = vmatmul.msk.f32.gmra.mxu0 %vm7432_vm5, %v11937_v50  ;;  %v12510_v50 = vld [vmem:[%s11427_s28 + $0x68] sm:$0xff] }
 0x1a1   : > { %8002 = vmatpush.msrb.mxu3 %v12491_v18  ;;  %8028 = vmatpush.msra.mxu1 %v12396_v62 }
 0x1a2   : > { %8067 = vmatpush.msrb.mxu0 %v12496_v25  ;;  %7918 = vmatmul.f32.gmra.mxu1 %v12128_v12 }
 0x1a3   : > { %7983 = vmatpush.msrb.mxu2 %v12500_v41  ;;  %8003 = vmatpush.msrb.mxu3 %v12462_v17 }
 0x1a4   : > { %8029 = vmatpush.msra.mxu1 %v12356_v52  ;;  %8068 = vmatpush.msrb.mxu0 %v12442_v29 }
 0x1a5   : > { %10931 = vmatmul.msk.f32.vlgmr.msrb.gmra.mxu2 %vm7432_vm5, %v12447_v5  ;;  %8004 = vmatpush.msrb.mxu3 %v12417_v59 }
 0x1a6   : > { %8037 = vmatpush.msra.mxu2 %v12356_v52  ;;  %8083 = vmatpush.msrb.mxu1 %v12396_v62 }
 0x1a7   : > { %8069 = vmatpush.msrb.mxu0 %v12439_v6  ;;  %v12516_v9 = vpop.permute.xlu2 %327  ;;  %331 = vrot.lane.b32.xlu1 %v12510_v50, %s11310_s29 }
 0x1a8   : > { %8038 = vmatpush.msra.mxu2 %v12134_v28  ;;  %v354_v43 = vrot.slane %v12516_v9, 1  ;;  %8084 = vmatpush.msrb.mxu1 %v12223_v39 }
 0x1a9   : > { %8005 = vmatpush.msrb.mxu3 %v12415_v14  ;;  %8070 = vmatpush.msrb.mxu0 %v12352_v33 }
 0x1aa   : > { %8039 = vmatpush.msra.mxu2 %v12524_v1  ;;  %v384_v61 = vsel %vm362_vm1, %v353_v13, %v354_v43  ;;  %8085 = vmatpush.msrb.mxu1 %v12134_v28  ;;  %v12537_v63 = vpop.permute.xlu0 %532 }
 0x1ab   : > { %8006 = vmatpush.msrb.mxu3 %v12423_v51  ;;  %v385_v53 = vsel %vm364_vm3, %v12112_v58, %v384_v61  ;;  %v12539_v15 = vpop.permute.xlu1 %736  ;;  %8071 = vmatpush.msrb.mxu0 %v12312_v36  ;;  %v559_v13 = vrot.slane %v12537_v63, 1  ;;  %v12549_v58 = vld [vmem:[#allocation2 + $0x230] sm:$0xff]  ;;  %v12675_v51 = vld [vmem:[#allocation2 + $0x200] sm:$0xff] }
 0x1ac   : > { %8007 = vmatmul.f32.vlgmr.msrb.gmra.mxu3 %v12066_v48  ;;  %449 = vst [vmem:[#allocation2 + $0x281] ss:$8 sm:$0xf] %v385_v53  ;;  %v763_v28 = vrot.slane %v12539_v15, 1  ;;  %7961 = vmatmul.f32.vlgmr.msra.gmra.mxu0 %v12066_v48 }
 0x1ad   : > { %8040 = vmatpush.msra.mxu2 %v12543_v2  ;;  %450 = vst [vmem:[#allocation2 + $0x281] ss:$8 sm:$0xf0] %v385_v53  ;;  %8086 = vmatpush.msrb.mxu1 %v12524_v1  ;;  %v588_v26 = vsel %vm362_vm1, %v558_v34, %v559_v13  ;;  %v2901_v34 = vld [vmem:[#allocation2 + $0x108] sm:$0xff] }
 0x1ae   : > { %8113 = vmatpush.msra.mxu3 %v12549_v58  ;;  %v792_v24 = vsel %vm362_vm1, %v762_v23, %v763_v28  ;;  %8072 = vmatpush.msrb.mxu0 %v12553_v19  ;;  %v589_v4 = vsel %vm568_vm2, %v12152_v27, %v588_v26  ;;  %v2902_v23 = vld [vmem:[#allocation2 + $0x110] sm:$0xff]  ;;  %v12764_v53 = vld [vmem:[#allocation2 + $0x188] sm:$0xff] }
 0x1af   : > { %10932 = vmatmul.msk.f32.gmra.mxu2 %vm7432_vm5, %v12566_v37  ;;  %v793_v36 = vsel %vm772_vm0, %v12154_v0, %v792_v24  ;;  %8087 = vmatpush.msrb.mxu1 %v12543_v2  ;;  %653 = vst [vmem:[#allocation2 + $0x282] ss:$8 sm:$0xf] %v589_v4 }
 0x1b0   : > { %8041 = vmatpush.msra.mxu2 %v12337_v20  ;;  %8114 = vmatpush.msra.mxu3 %v12496_v25  ;;  %654 = vst [vmem:[#allocation2 + $0x282] ss:$8 sm:$0xf0] %v589_v4  ;;  %v12790_v4 = vld [vmem:[#allocation7 + $0x10] sm:$0xff] }
 0x1b1   : > { %8073 = vmatpush.msrb.mxu0 %v12482_v10  ;;  %740 = vrot.lane.b32.xlu0 %v12510_v50, %s11308_s20  ;;  %857 = vst [vmem:[#allocation2 + $0x283] ss:$8 sm:$0xf] %v793_v36 }
 0x1b2   : > { %944 = vrot.lane.b32.xlu1 %v12510_v50, %s11311_s16  ;;  %v12582_v27 = vpop.permute.xlu2 %940  ;;  %8042 = vmatpush.msra.mxu2 %v12332_v8  ;;  %858 = vst [vmem:[#allocation2 + $0x283] ss:$8 sm:$0xf0] %v793_v36  ;;  %v12794_v36 = vld [vmem:[#allocation2 + $0x140] sm:$0xff] }
 0x1b3   : > { %8088 = vmatpush.msrb.mxu1 %v12337_v20  ;;  %v967_v0 = vrot.slane %v12582_v27, 1  ;;  %8115 = vmatpush.msra.mxu3 %v12442_v29  ;;  %v206_v20 = vld [vmem:[%s11427_s28 + $0x50] sm:$0xff] }
 0x1b4   : > { %8074 = vmatpush.msrb.mxu0 %v12477_v11  ;;  %10933 = vmatmul.msk.f32.vlgmr.msra.gmra.mxu1 %vm7432_vm5, %v12447_v5  ;;  %244 = vst [vmem:[#allocation2 + $0x280] ss:$8 sm:$0xf] %v206_v20 }
 0x1b5   : > { %8043 = vmatpush.msra.mxu2 %v2901_v34  ;;  %v996_v57 = vsel %vm362_vm1, %v966_v30, %v967_v0  ;;  %8089 = vmatpush.msrb.mxu1 %v2902_v23  ;;  %245 = vst [vmem:[#allocation2 + $0x280] ss:$8 sm:$0xf0] %v206_v20  ;;  %v3455_v30 = vld [vmem:[#allocation2 + $0x168] sm:$0xff]  ;;  %v12834_v20 = vld [vmem:[#allocation2 + $0xe0] sm:$0xff] }
 0x1b6   : > { %8116 = vmatpush.msra.mxu3 %v12439_v6  ;;  %v997_v8 = vsel %vm976_vm4, %v12160_v46, %v996_v57  ;;  %8075 = vmatpush.msrb.mxu0 %v12396_v62  ;;  %v12607_v46 = vld [vmem:[#allocation2 + $0x1d0] sm:$0xff]  ;;  %v12824_v57 = vld [vmem:[#allocation2 + $0xe8] sm:$0xff] }
 0x1b7   : > { %8010 = vmatmul.f32.gmra.mxu3 %v12128_v12  ;;  %1061 = vst [vmem:[#allocation2 + $0x284] ss:$8 sm:$0xf] %v997_v8  ;;  %7964 = vmatmul.f32.gmra.mxu0 %v12128_v12 }
 0x1b8   : > { %8044 = vmatpush.msra.mxu2 %v12458_v35  ;;  %1062 = vst [vmem:[#allocation2 + $0x284] ss:$8 sm:$0xf0] %v997_v8  ;;  %8090 = vmatpush.msrb.mxu1 %v2901_v34  ;;  %v12828_v8 = vld [vmem:[#allocation2 + $0xf0] sm:$0xff] }
 0x1b9   : > { %8117 = vmatpush.msra.mxu3 %v12352_v33  ;;  %8129 = vmatpush.msra.mxu0 %v12477_v11  ;;  %v1982_v33 = vld [vmem:[#allocation2 + $0xb0] sm:$0xff] }
 0x1ba   : > { %8045 = vmatpush.msra.mxu2 %v12430_v38  ;;  %8091 = vmatpush.msrb.mxu1 %v12458_v35 }
 0x1bb   : > { %8118 = vmatpush.msra.mxu3 %v12607_v46  ;;  %8130 = vmatpush.msra.mxu0 %v12296_v40  ;;  %v1981_v40 = vld [vmem:[#allocation2 + $0xa8] sm:$0xff] }
 0x1bc   : > { %8046 = vmatpush.msra.mxu2 %v12380_v55  ;;  %8092 = vmatpush.msrb.mxu1 %v12430_v38 }
 0x1bd   : > { %8119 = vmatpush.msra.mxu3 %v12553_v19  ;;  %8131 = vmatpush.msra.mxu0 %v12223_v39  ;;  %v2903_v39 = vld [vmem:[#allocation2 + $0x118] sm:$0xff] }
 0x1be   : > { %10934 = vmatmul.msk.f32.gmra.mxu1 %vm7432_vm5, %v12566_v37  ;;  %8047 = vmatpush.msra.mxu2 %v12375_v54  ;;  %v12637_v54 = vld [vmem:[#allocation2 + $0x260] sm:$0xff] }
 0x1bf   : > { %8093 = vmatpush.msrb.mxu1 %v12380_v55  ;;  %8120 = vmatpush.msra.mxu3 %v12482_v10  ;;  %v5116_v55 = vld [vmem:[#allocation2 + $0x248] sm:$0xff] }
 0x1c0   : > { %8132 = vmatpush.msra.mxu0 %v3455_v30  ;;  %8048 = vmatpush.msra.mxu2 %v1981_v40  ;;  %v1253_v30 = vld [vmem:[#allocation2 + $0xc8] sm:$0xff] }
 0x1c1   : > { %8094 = vmatpush.msrb.mxu1 %v1982_v33  ;;  %8121 = vmatpush.msra.mxu3 %v12477_v11 }
 0x1c2   : > { %8133 = vmatpush.msra.mxu0 %v12524_v1  ;;  %8049 = vmatpush.msra.mxu2 %v12491_v18 }
 0x1c3   : > { %8175 = vmatpush.msrb.mxu3 %v12289_v56  ;;  %8095 = vmatpush.msrb.mxu1 %v1981_v40  ;;  %v5663_v56 = vld [vmem:[#allocation2 + $0x238] sm:$0xff] }
 0x1c4   : > { %8134 = vmatpush.msra.mxu0 %v12543_v2  ;;  %8050 = vmatpush.msra.mxu2 %v12462_v17 }
 0x1c5   : > { %8176 = vmatpush.msrb.mxu3 %v12500_v41  ;;  %8096 = vmatpush.msrb.mxu1 %v12491_v18 }
 0x1c6   : > { %8135 = vmatpush.msra.mxu0 %v2903_v39  ;;  %8051 = vmatpush.msra.mxu2 %v12417_v59  ;;  %v12895_v39 = vld [vmem:[#allocation2 + $0x100] sm:$0xff] }
 0x1c7   : > { %8177 = vmatpush.msrb.mxu3 %v12304_v45  ;;  %8097 = vmatpush.msrb.mxu1 %v12462_v17  ;;  %v3092_v45 = vld [vmem:[#allocation2 + $0x180] sm:$0xff] }
 0x1c8   : > { %8136 = vmatpush.msra.mxu0 %v2902_v23  ;;  %8052 = vmatpush.msra.mxu2 %v12415_v14  ;;  %v12660_v14 = vld [vmem:[#allocation7] sm:$0xff] }
 0x1c9   : > { %8178 = vmatpush.msrb.mxu3 %v12310_v16  ;;  %8098 = vmatpush.msrb.mxu1 %v12417_v59  ;;  %v12644_v16 = vld [vmem:[#allocation2 + $0x258] sm:$0xff]  ;;  %v12822_v23 = vld [vmem:[#allocation2 + $0x1a8] sm:$0xff] }
 0x1ca   : > { %8137 = vmatpush.msra.mxu0 %v2901_v34  ;;  %8053 = vmatmul.f32.vlgmr.msra.gmra.mxu2 %v12066_v48  ;;  %v12651_v48 = vld [vmem:[#allocation2 + $0x250] sm:$0xff]  ;;  %v12668_v59 = vld [vmem:[#allocation2 + $0x1d8] sm:$0xff] }
 0x1cb   : > { %8179 = vmatpush.msrb.mxu3 %v12318_v60  ;;  %8159 = vmatpush.msrb.mxu2 %v5663_v56  ;;  %v1983_v60 = vld [vmem:[#allocation2 + $0xb8] sm:$0xff]  ;;  %v12813_v34 = vld [vmem:[#allocation2 + $0x1b0] sm:$0xff]  ;;  %v12900_v56 = vld [vmem:[#allocation2 + $0x288] sm:$0xff] }
 0x1cc   : > { %8205 = vmatpush.msra.mxu1 %v12637_v54  ;;  %8138 = vmatpush.msra.mxu0 %v12458_v35 }
 0x1cd   : > { %10937 = vmatmul.msk.f32.vlgmr.msra.gmra.mxu3 %vm7432_vm5, %v12447_v5  ;;  %8160 = vmatpush.msrb.mxu2 %v12549_v58 }
 0x1ce   : > { %8180 = vmatpush.msrb.mxu3 %v3092_v45  ;;  %8206 = vmatpush.msra.mxu1 %v12644_v16 }
 0x1cf   : > { %536 = vrot.lane.b32.xlu2 %v12510_v50, %s11309_s30  ;;  %8139 = vmatpush.msra.mxu0 %v12430_v38  ;;  %v12689_v38 = vld [vmem:[#allocation2 + $0x1f0] sm:$0xff] }
 0x1d0   : > { %8161 = vmatpush.msrb.mxu2 %v12496_v25  ;;  %8181 = vmatpush.msrb.mxu3 %v12341_v49  ;;  %v12665_v49 = vld [vmem:[#allocation2 + $0x240] sm:$0xff]  ;;  %v12744_v25 = vld [vmem:[#allocation2 + $0x190] sm:$0xff] }
 0x1d1   : > { %8207 = vmatpush.msra.mxu1 %v12651_v48  ;;  %8140 = vmatpush.msra.mxu0 %v1983_v60 }
 0x1d2   : > { %8162 = vmatpush.msrb.mxu2 %v12442_v29  ;;  %10935 = vmatmul.msk.f32.vlgmr.msrb.gmra.mxu0 %vm7432_vm5, %v12447_v5 }
 0x1d3   : > { %8182 = vmatpush.msrb.mxu3 %v12348_v31  ;;  %8208 = vmatpush.msra.mxu1 %v5116_v55  ;;  %v12673_v31 = vld [vmem:[#allocation2 + $0x128] sm:$0xff] }
 0x1d4   : > { %8141 = vmatpush.msra.mxu0 %v1982_v33  ;;  %8056 = vmatmul.f32.gmra.mxu2 %v12128_v12  ;;  %v12866_v33 = vld [vmem:[#allocation2 + $0xf8] sm:$0xff] }
 0x1d5   : > { %8099 = vmatmul.f32.vlgmr.msrb.gmra.mxu1 %v12660_v14  ;;  %8163 = vmatpush.msrb.mxu2 %v12439_v6  ;;  %v12699_v6 = vld [vmem:[#allocation2 + $0x1e8] sm:$0xff] }
 0x1d6   : > { %8183 = vmatpush.msrb.mxu3 %v12361_v47  ;;  %8209 = vmatpush.msra.mxu1 %v12665_v49  ;;  %v2172_v47 = vld [vmem:[#allocation2 + $0x120] sm:$0xff] }
 0x1d7   : > { %8142 = vmatpush.msra.mxu0 %v1981_v40  ;;  %10938 = vmatmul.msk.f32.gmra.mxu3 %vm7432_vm5, %v12566_v37  ;;  %v12858_v40 = vld [vmem:[#allocation2 + $0x1a0] sm:$0xff] }
 0x1d8   : > { %8164 = vmatpush.msrb.mxu2 %v12668_v59  ;;  %8184 = vmatpush.msrb.mxu3 %v12673_v31 }
 0x1d9   : > { %8210 = vmatpush.msra.mxu1 %v12675_v51  ;;  %8143 = vmatpush.msra.mxu0 %v12491_v18 }
 0x1da   : > { %8165 = vmatpush.msrb.mxu2 %v12607_v46  ;;  %8185 = vmatpush.msrb.mxu3 %v2172_v47  ;;  %v1621_v46 = vld [vmem:[#allocation2 + $0xd8] sm:$0xff] }
 0x1db   : > { %8211 = vmatpush.msra.mxu1 %v12681_v32  ;;  %8144 = vmatpush.msra.mxu0 %v12462_v17  ;;  %v12941_v47 = vld [vmem:[#allocation2 + $0x1b8] sm:$0xff] }
 0x1dc   : > { %8166 = vmatpush.msrb.mxu2 %v12553_v19  ;;  %10936 = vmatmul.msk.f32.gmra.mxu0 %vm7432_vm5, %v12566_v37  ;;  %v12777_v19 = vld [vmem:[#allocation2 + $0x150] sm:$0xff] }
 0x1dd   : > { %8186 = vmatpush.msrb.mxu3 %v12386_v7  ;;  %8212 = vmatpush.msra.mxu1 %v12689_v38  ;;  %v12695_v42 = vpop.permute.xlu0 %329 }
 0x1de   : > { %8251 = vmatpush.msrb.mxu0 %v12691_v44  ;;  %8102 = vmatmul.f32.gmra.mxu1 %v12128_v12  ;;  %v355_v29 = vrot.slane %v12695_v42, 1 }
 0x1df   : > { %8167 = vmatpush.msrb.mxu2 %v12482_v10  ;;  %8187 = vmatpush.msrb.mxu3 %v12392_v22  ;;  %v1252_v22 = vld [vmem:[#allocation2 + $0xc0] sm:$0xff] }
 0x1e0   : > { %8213 = vmatpush.msra.mxu1 %v12699_v6  ;;  %8252 = vmatpush.msrb.mxu0 %v12637_v54  ;;  %v386_v12 = vsel %vm362_vm1, %v354_v43, %v355_v29 }
 0x1e1   : > { %10939 = vmatmul.msk.f32.vlgmr.msrb.gmra.mxu2 %vm7432_vm5, %v12447_v5  ;;  %v387_v7 = vsel %vm364_vm3, %v12516_v9, %v386_v12  ;;  %8188 = vmatpush.msrb.mxu3 %v12400_v3  ;;  %v12726_v3 = vld [vmem:[#allocation2 + $0x198] sm:$0xff]  ;;  %v12952_v12 = vld [vmem:[%s11427_s28 + $0x70] sm:$0xff] }
 0x1e2   : > { %8221 = vmatpush.msra.mxu2 %v12699_v6  ;;  %8267 = vmatpush.msrb.mxu1 %v12689_v38  ;;  %452 = vst [vmem:[#allocation2 + $0x2c1] ss:$8 sm:$0xf] %v387_v7 }
 0x1e3   : > { %8253 = vmatpush.msrb.mxu0 %v12644_v16  ;;  %453 = vst [vmem:[#allocation2 + $0x2c1] ss:$8 sm:$0xf0] %v387_v7  ;;  %8189 = vmatpush.msrb.mxu3 %v12409_v21  ;;  %v12734_v21 = vld [vmem:[#allocation2 + $0x270] sm:$0xff] }
 0x1e4   : > { %8222 = vmatpush.msra.mxu2 %v12356_v52  ;;  %8268 = vmatpush.msrb.mxu1 %v12396_v62 }
 0x1e5   : > { %8254 = vmatpush.msrb.mxu0 %v12651_v48  ;;  %8190 = vmatpush.msrb.mxu3 %v1252_v22 }
 0x1e6   : > { %8223 = vmatpush.msra.mxu2 %v12500_v41  ;;  %8269 = vmatpush.msrb.mxu1 %v12356_v52  ;;  %v12736_v52 = vld [vmem:[#allocation2 + $0x208] sm:$0xff] }
 0x1e7   : > { %8255 = vmatpush.msrb.mxu0 %v5116_v55  ;;  %8191 = vmatmul.f32.vlgmr.msrb.gmra.mxu3 %v12660_v14  ;;  %v12728_v35 = vpop.permute.xlu0 %942 }
 0x1e8   : > { %8145 = vmatmul.f32.vlgmr.msra.gmra.mxu0 %v12660_v14  ;;  %v12730_v62 = vpop.permute.xlu1 %534  ;;  %8224 = vmatpush.msra.mxu2 %v12726_v3  ;;  %v968_v17 = vrot.slane %v12728_v35, 1 }
 0x1e9   : > { %8270 = vmatpush.msrb.mxu1 %v12500_v41  ;;  %v560_v18 = vrot.slane %v12730_v62, 1  ;;  %8297 = vmatpush.msra.mxu3 %v12734_v21 }
 0x1ea   : > { %8256 = vmatpush.msrb.mxu0 %v12736_v52  ;;  %10940 = vmatmul.msk.f32.gmra.mxu2 %vm7432_vm5, %v12566_v37  ;;  %v998_v50 = vsel %vm362_vm1, %v967_v0, %v968_v17  ;;  %v12809_v0 = vld [vmem:[#allocation2 + $0x130] sm:$0xff] }
 0x1eb   : > { %8271 = vmatpush.msrb.mxu1 %v12726_v3  ;;  %v590_v9 = vsel %vm362_vm1, %v559_v13, %v560_v18  ;;  %8225 = vmatpush.msra.mxu2 %v12744_v25  ;;  %v999_v43 = vsel %vm976_vm4, %v12582_v27, %v998_v50  ;;  %v12805_v27 = vld [vmem:[#allocation2 + $0x210] sm:$0xff] }
 0x1ec   : > { %8298 = vmatpush.msra.mxu3 %v12691_v44  ;;  %v591_v61 = vsel %vm568_vm2, %v12537_v63, %v590_v9  ;;  %8257 = vmatpush.msrb.mxu0 %v12675_v51  ;;  %1064 = vst [vmem:[#allocation2 + $0x2c4] ss:$8 sm:$0xf] %v999_v43  ;;  %v12775_v63 = vld [vmem:[#allocation2 + $0x148] sm:$0xff] }
 0x1ed   : > { %8272 = vmatpush.msrb.mxu1 %v12744_v25  ;;  %v12767_v58 = vpop.permute.xlu2 %738  ;;  %8226 = vmatpush.msra.mxu2 %v12764_v53  ;;  %1065 = vst [vmem:[#allocation2 + $0x2c4] ss:$8 sm:$0xf0] %v999_v43 }
 0x1ee   : > { %8299 = vmatpush.msra.mxu3 %v12637_v54  ;;  %v764_v13 = vrot.slane %v12767_v58, 1  ;;  %8258 = vmatpush.msrb.mxu0 %v12681_v32  ;;  %656 = vst [vmem:[#allocation2 + $0x2c2] ss:$8 sm:$0xf] %v591_v61 }
 0x1ef   : > { %10941 = vmatmul.msk.f32.vlgmr.msra.gmra.mxu1 %vm7432_vm5, %v12447_v5  ;;  %8227 = vmatpush.msra.mxu2 %v12775_v63  ;;  %657 = vst [vmem:[#allocation2 + $0x2c2] ss:$8 sm:$0xf0] %v591_v61 }
 0x1f0   : > { %8273 = vmatpush.msrb.mxu1 %v12777_v19  ;;  %v794_v26 = vsel %vm362_vm1, %v763_v28, %v764_v13  ;;  %8300 = vmatpush.msra.mxu3 %v12644_v16  ;;  %v207_v28 = vld [vmem:[%s11427_s28 + $0x58] sm:$0xff] }
 0x1f1   : > { %8259 = vmatpush.msrb.mxu0 %v12689_v38  ;;  %v795_v24 = vsel %vm772_vm0, %v12539_v15, %v794_v26  ;;  %8194 = vmatmul.f32.gmra.mxu3 %v12790_v4  ;;  %v12801_v15 = vld [vmem:[#allocation2 + $0x138] sm:$0xff]  ;;  %247 = vst [vmem:[#allocation2 + $0x2c0] ss:$8 sm:$0xf] %v207_v28  ;;  %v2914_v26 = vld [vmem:[#allocation2 + $0x170] sm:$0xff] }
 0x1f2   : > { %8148 = vmatmul.f32.gmra.mxu0 %v12790_v4  ;;  %860 = vst [vmem:[#allocation2 + $0x2c3] ss:$8 sm:$0xf] %v795_v24  ;;  %8228 = vmatpush.msra.mxu2 %v12794_v36 }
 0x1f3   : > { %8274 = vmatpush.msrb.mxu1 %v12775_v63  ;;  %861 = vst [vmem:[#allocation2 + $0x2c3] ss:$8 sm:$0xf0] %v795_v24  ;;  %8301 = vmatpush.msra.mxu3 %v12651_v48  ;;  %v12920_v48 = vld [vmem:[#allocation2 + $0x1d0] sm:$0xff] }
 0x1f4   : > { %8313 = vmatpush.msra.mxu0 %v12681_v32  ;;  %8229 = vmatpush.msra.mxu2 %v12801_v15  ;;  %248 = vst [vmem:[#allocation2 + $0x2c0] ss:$8 sm:$0xf0] %v207_v28  ;;  %v13009_v28 = vld [vmem:[#allocation2 + $0x158] sm:$0xff] }
 0x1f5   : > { %8275 = vmatpush.msrb.mxu1 %v12794_v36  ;;  %8302 = vmatpush.msra.mxu3 %v12805_v27 }
 0x1f6   : > { %8314 = vmatpush.msra.mxu0 %v12477_v11  ;;  %8230 = vmatpush.msra.mxu2 %v12809_v0 }
 0x1f7   : > { %8276 = vmatpush.msrb.mxu1 %v12801_v15  ;;  %8303 = vmatpush.msra.mxu3 %v12736_v52 }
 0x1f8   : > { %8315 = vmatpush.msra.mxu0 %v12813_v34  ;;  %10942 = vmatmul.msk.f32.gmra.mxu1 %vm7432_vm5, %v12566_v37 }
 0x1f9   : > { %8231 = vmatpush.msra.mxu2 %v12673_v31  ;;  %8277 = vmatpush.msrb.mxu1 %v12809_v0  ;;  %v12933_v31 = vld [vmem:[#allocation2 + $0x1c0] sm:$0xff] }
 0x1fa   : > { %8304 = vmatpush.msra.mxu3 %v12675_v51  ;;  %8316 = vmatpush.msra.mxu0 %v12822_v23 }
 0x1fb   : > { %8232 = vmatpush.msra.mxu2 %v12824_v57  ;;  %8278 = vmatpush.msrb.mxu1 %v12828_v8 }
 0x1fc   : > { %8305 = vmatpush.msra.mxu3 %v12681_v32  ;;  %8317 = vmatpush.msra.mxu0 %v12500_v41  ;;  %v1437_v41 = vld [vmem:[#allocation2 + $0xd0] sm:$0xff] }
 0x1fd   : > { %8233 = vmatpush.msra.mxu2 %v12834_v20  ;;  %8279 = vmatpush.msrb.mxu1 %v12824_v57 }
 0x1fe   : > { %8359 = vmatpush.msrb.mxu3 %v12675_v51  ;;  %8318 = vmatpush.msra.mxu0 %v12726_v3 }
 0x1ff   : > { %8234 = vmatpush.msra.mxu2 %v1621_v46  ;;  %8280 = vmatpush.msrb.mxu1 %v12834_v20 }
 0x200   : > { %8360 = vmatpush.msrb.mxu3 %v12482_v10  ;;  %8319 = vmatpush.msra.mxu0 %v12543_v2  ;;  %v12847_v10 = vld [vmem:[#allocation2 + $0x278] sm:$0xff] }
 0x201   : > { %8235 = vmatpush.msra.mxu2 %v1437_v41  ;;  %8281 = vmatpush.msrb.mxu1 %v1621_v46 }
 0x202   : > { %8361 = vmatpush.msrb.mxu3 %v12477_v11  ;;  %8320 = vmatpush.msra.mxu0 %v12777_v19  ;;  %v12851_v11 = vld [vmem:[#allocation2 + $0x280] sm:$0xff] }
 0x203   : > { %8236 = vmatpush.msra.mxu2 %v1253_v30  ;;  %8282 = vmatpush.msrb.mxu1 %v1437_v41  ;;  %v13102_v41 = vld [vmem:[#allocation2 + $0x2c8] sm:$0xff] }
 0x204   : > { %8362 = vmatpush.msrb.mxu3 %v12813_v34  ;;  %8321 = vmatpush.msra.mxu0 %v12775_v63  ;;  %v13108_v30 = vld [vmem:[#allocation2 + $0x248] sm:$0xff] }
 0x205   : > { %8237 = vmatmul.f32.vlgmr.msra.gmra.mxu2 %v12660_v14  ;;  %8389 = vmatpush.msra.mxu1 %v12851_v11 }
 0x206   : > { %8343 = vmatpush.msrb.mxu2 %v12847_v10  ;;  %8363 = vmatpush.msrb.mxu3 %v12822_v23 }
 0x207   : > { %8322 = vmatpush.msra.mxu0 %v12794_v36  ;;  %10945 = vmatmul.msk.f32.vlgmr.msra.gmra.mxu3 %vm7432_vm5, %v12447_v5 }
 0x208   : > { %8344 = vmatpush.msrb.mxu2 %v12734_v21  ;;  %8364 = vmatpush.msrb.mxu3 %v12858_v40 }
 0x209   : > { %8390 = vmatpush.msra.mxu1 %v12847_v10  ;;  %8323 = vmatpush.msra.mxu0 %v12801_v15 }
 0x20a   : > { %8345 = vmatpush.msrb.mxu2 %v12691_v44  ;;  %8365 = vmatpush.msrb.mxu3 %v12524_v1  ;;  %v12881_v1 = vld [vmem:[#allocation2 + $0x218] sm:$0xff] }
 0x20b   : > { %8391 = vmatpush.msra.mxu1 %v12734_v21  ;;  %8324 = vmatpush.msra.mxu0 %v12866_v33 }
 0x20c   : > { %8346 = vmatpush.msrb.mxu2 %v12637_v54  ;;  %10943 = vmatmul.msk.f32.vlgmr.msrb.gmra.mxu0 %vm7432_vm5, %v12447_v5 }
 0x20d   : > { %8366 = vmatpush.msrb.mxu3 %v12543_v2  ;;  %8392 = vmatpush.msra.mxu1 %v12691_v44  ;;  %v12886_v2 = vld [vmem:[#allocation2 + $0x220] sm:$0xff] }
 0x20e   : > { %8325 = vmatpush.msra.mxu0 %v12828_v8  ;;  %8240 = vmatmul.f32.gmra.mxu2 %v12790_v4 }
 0x20f   : > { %8283 = vmatmul.f32.vlgmr.msrb.gmra.mxu1 %v12660_v14  ;;  %8347 = vmatpush.msrb.mxu2 %v12644_v16  ;;  %v12918_v16 = vld [vmem:[#allocation2 + $0x1c8] sm:$0xff] }
 0x210   : > { %8367 = vmatpush.msrb.mxu3 %v12777_v19  ;;  %8393 = vmatpush.msra.mxu1 %v12637_v54 }
 0x211   : > { %8326 = vmatpush.msra.mxu0 %v12824_v57  ;;  %10946 = vmatmul.msk.f32.gmra.mxu3 %vm7432_vm5, %v12566_v37 }
 0x212   : > { %8348 = vmatpush.msrb.mxu2 %v12881_v1  ;;  %8368 = vmatpush.msrb.mxu3 %v12775_v63 }
 0x213   : > { %8394 = vmatpush.msra.mxu1 %v12886_v2  ;;  %8327 = vmatpush.msra.mxu0 %v12834_v20 }
 0x214   : > { %8349 = vmatpush.msrb.mxu2 %v12805_v27  ;;  %8369 = vmatpush.msrb.mxu3 %v12794_v36 }
 0x215   : > { %8395 = vmatpush.msra.mxu1 %v12881_v1  ;;  %8328 = vmatpush.msra.mxu0 %v1621_v46  ;;  %v13092_v46 = vld [vmem:[#allocation2 + $0x258] sm:$0xff] }
 0x216   : > { %8350 = vmatpush.msrb.mxu2 %v12736_v52  ;;  %10944 = vmatmul.msk.f32.gmra.mxu0 %vm7432_vm5, %v12566_v37 }
 0x217   : > { %8370 = vmatpush.msrb.mxu3 %v12895_v39  ;;  %8396 = vmatpush.msra.mxu1 %v12805_v27 }
 0x218   : > { %8435 = vmatpush.msrb.mxu0 %v12900_v56  ;;  %8286 = vmatmul.f32.gmra.mxu1 %v12790_v4 }
 0x219   : > { %8351 = vmatpush.msrb.mxu2 %v12675_v51  ;;  %8371 = vmatpush.msrb.mxu3 %v12866_v33  ;;  %v12908_v54 = vpop.permute.xlu1 %331 }
 0x21a   : > { %8397 = vmatpush.msra.mxu1 %v12736_v52  ;;  %8436 = vmatpush.msrb.mxu0 %v12851_v11  ;;  %v356_v45 = vrot.slane %v12908_v54, 1 }
 0x21b   : > { %10947 = vmatmul.msk.f32.vlgmr.msrb.gmra.mxu2 %vm7432_vm5, %v12447_v5  ;;  %8372 = vmatpush.msrb.mxu3 %v12828_v8 }
 0x21c   : > { %8405 = vmatpush.msra.mxu2 %v12736_v52  ;;  %8451 = vmatpush.msrb.mxu1 %v12805_v27  ;;  %v388_v60 = vsel %vm362_vm1, %v355_v29, %v356_v45  ;;  %v12947_v29 = vld [vmem:[#allocation2 + $0x228] sm:$0xff] }
 0x21d   : > { %8437 = vmatpush.msrb.mxu0 %v12847_v10  ;;  %v389_v55 = vsel %vm364_vm3, %v12695_v42, %v388_v60  ;;  %8373 = vmatpush.msrb.mxu3 %v12824_v57  ;;  %v12945_v42 = vld [vmem:[#allocation2 + $0x290] sm:$0xff] }
 0x21e   : > { %8406 = vmatpush.msra.mxu2 %v12918_v16  ;;  %8452 = vmatpush.msrb.mxu1 %v12920_v48  ;;  %455 = vst [vmem:[#allocation2 + $0x301] ss:$8 sm:$0xf] %v389_v55  ;;  %v13156_v60 = vld [vmem:[#allocation2 + $0x1f0] sm:$0xff] }
 0x21f   : > { %8438 = vmatpush.msrb.mxu0 %v12734_v21  ;;  %456 = vst [vmem:[#allocation2 + $0x301] ss:$8 sm:$0xf0] %v389_v55  ;;  %8374 = vmatpush.msrb.mxu3 %v12834_v20  ;;  %v13166_v55 = vld [vmem:[#allocation2 + $0x1e8] sm:$0xff] }
 0x220   : > { %8407 = vmatpush.msra.mxu2 %v12933_v31  ;;  %8453 = vmatpush.msrb.mxu1 %v12918_v16 }
 0x221   : > { %8439 = vmatpush.msrb.mxu0 %v12691_v44  ;;  %8375 = vmatmul.f32.vlgmr.msrb.gmra.mxu3 %v12660_v14 }
 0x222   : > { %8329 = vmatmul.f32.vlgmr.msra.gmra.mxu0 %v12660_v14  ;;  %8408 = vmatpush.msra.mxu2 %v12941_v47 }
 0x223   : > { %8454 = vmatpush.msrb.mxu1 %v12933_v31  ;;  %8481 = vmatpush.msra.mxu3 %v12945_v42  ;;  %v12954_v44 = vpop.permute.xlu0 %740 }
 0x224   : > { %8440 = vmatpush.msrb.mxu0 %v12947_v29  ;;  %v12956_v7 = vpop.permute.xlu1 %944  ;;  %10948 = vmatmul.msk.f32.gmra.mxu2 %vm7432_vm5, %v12566_v37  ;;  %v15546_v22 = vrot.slane %v12954_v44, 1 }
 0x225   : > { %8455 = vmatpush.msrb.mxu1 %v12941_v47  ;;  %v15545_v52 = vrot.slane %v12956_v7, 1  ;;  %8409 = vmatpush.msra.mxu2 %v12813_v34 }
 0x226   : > { %8482 = vmatpush.msra.mxu3 %v12900_v56  ;;  %8441 = vmatpush.msrb.mxu0 %v12886_v2  ;;  %v796_v50 = vsel %vm362_vm1, %v764_v13, %v15546_v22 }
 0x227   : > { %538 = vrot.lane.b32.xlu0 %v12952_v12, %s11309_s30  ;;  %v1000_v9 = vsel %vm362_vm1, %v968_v17, %v15545_v52  ;;  %742 = vrot.lane.b32.xlu1 %v12952_v12, %s11308_s20  ;;  %v797_v43 = vsel %vm772_vm0, %v12767_v58, %v796_v50  ;;  %v2913_v17 = vld [vmem:[#allocation2 + $0x168] sm:$0xff] }
 0x228   : > { %8410 = vmatpush.msra.mxu2 %v12822_v23  ;;  %v1001_v61 = vsel %vm976_vm4, %v12728_v35, %v1000_v9  ;;  %8456 = vmatpush.msrb.mxu1 %v12813_v34  ;;  %863 = vst [vmem:[#allocation2 + $0x303] ss:$8 sm:$0xf] %v797_v43  ;;  %v1995_v34 = vld [vmem:[#allocation2 + $0x118] sm:$0xff]  ;;  %v5128_v23 = vld [vmem:[#allocation2 + $0x2a8] sm:$0xff] }
 0x229   : > { %8483 = vmatpush.msra.mxu3 %v12851_v11  ;;  %v12987_v13 = vpop.permute.xlu2 %536  ;;  %8442 = vmatpush.msrb.mxu0 %v12881_v1  ;;  %864 = vst [vmem:[#allocation2 + $0x303] ss:$8 sm:$0xf0] %v797_v43  ;;  %v13191_v9 = vld [vmem:[#allocation2 + $0x198] sm:$0xff]  ;;  %v13195_v43 = vld [vmem:[#allocation2 + $0x270] sm:$0xff] }
 0x22a   : > { %10949 = vmatmul.msk.f32.vlgmr.msra.gmra.mxu1 %vm7432_vm5, %v12447_v5  ;;  %v15547_v24 = vrot.slane %v12987_v13, 1  ;;  %8411 = vmatpush.msra.mxu2 %v2913_v17  ;;  %1067 = vst [vmem:[#allocation2 + $0x304] ss:$8 sm:$0xf] %v1001_v61  ;;  %v13002_v5 = vld [vmem:[#allocation2 + $0x160] sm:$0xff] }
 0x22b   : > { %8457 = vmatpush.msrb.mxu1 %v2914_v26  ;;  %8484 = vmatpush.msra.mxu3 %v12847_v10  ;;  %1068 = vst [vmem:[#allocation2 + $0x304] ss:$8 sm:$0xf0] %v1001_v61  ;;  %v13199_v61 = vld [vmem:[#allocation2 + $0x190] sm:$0xff] }
 0x22c   : > { %8443 = vmatpush.msrb.mxu0 %v12805_v27  ;;  %v592_v35 = vsel %vm362_vm1, %v560_v18, %v15547_v24  ;;  %8378 = vmatmul.f32.gmra.mxu3 %v12790_v4  ;;  %v13013_v18 = vld [vmem:[#allocation2 + $0x230] sm:$0xff]  ;;  %v13057_v27 = vld [vmem:[#allocation2 + $0x2b8] sm:$0xff] }
 0x22d   : > { %8332 = vmatmul.f32.gmra.mxu0 %v12790_v4  ;;  %v593_v58 = vsel %vm568_vm2, %v12730_v62, %v592_v35  ;;  %8412 = vmatpush.msra.mxu2 %v13002_v5  ;;  %v1993_v62 = vld [vmem:[#allocation2 + $0x108] sm:$0xff]  ;;  %v13218_v35 = vld [vmem:[#allocation2 + $0x150] sm:$0xff] }
 0x22e   : > { %8458 = vmatpush.msrb.mxu1 %v2913_v17  ;;  %659 = vst [vmem:[#allocation2 + $0x302] ss:$8 sm:$0xf] %v593_v58  ;;  %8485 = vmatpush.msra.mxu3 %v12734_v21  ;;  %v2915_v21 = vld [vmem:[#allocation2 + $0x178] sm:$0xff] }
 0x22f   : > { %8497 = vmatpush.msra.mxu0 %v12881_v1  ;;  %660 = vst [vmem:[#allocation2 + $0x302] ss:$8 sm:$0xf0] %v593_v58  ;;  %8413 = vmatpush.msra.mxu2 %v13009_v28  ;;  %v13222_v58 = vpop.f32.mrf.mxu2 }
 0x230   : > { %8459 = vmatpush.msrb.mxu1 %v13002_v5  ;;  %8486 = vmatpush.msra.mxu3 %v13013_v18 }
 0x231   : > { %8498 = vmatpush.msra.mxu0 %v12668_v59  ;;  %8414 = vmatpush.msra.mxu2 %v12777_v19  ;;  %v1994_v59 = vld [vmem:[#allocation2 + $0x110] sm:$0xff] }
 0x232   : > { %8460 = vmatpush.msrb.mxu1 %v13009_v28  ;;  %8487 = vmatpush.msra.mxu3 %v12947_v29 }
 0x233   : > { %8499 = vmatpush.msra.mxu0 %v12920_v48  ;;  %10950 = vmatmul.msk.f32.gmra.mxu1 %vm7432_vm5, %v12566_v37  ;;  %v13152_v48 = vld [vmem:[#allocation7 + $0x18] sm:$0xff] }
 0x234   : > { %8415 = vmatpush.msra.mxu2 %v12775_v63  ;;  %8461 = vmatpush.msrb.mxu1 %v12777_v19  ;;  %v208_v63 = vld [vmem:[%s11427_s28 + $0x60] sm:$0xff] }
 0x235   : > { %8488 = vmatpush.msra.mxu3 %v12886_v2  ;;  %8500 = vmatpush.msra.mxu0 %v12918_v16  ;;  %251 = vst [vmem:[#allocation2 + $0x300] ss:$8 sm:$0xf0] %v208_v63  ;;  %v3104_v19 = vld [vmem:[#allocation2 + $0x1e0] sm:$0xff]  ;;  %v13149_v16 = vld [vmem:[#allocation2 + $0x268] sm:$0xff] }
 0x236   : > { %8416 = vmatpush.msra.mxu2 %v1993_v62  ;;  %8462 = vmatpush.msrb.mxu1 %v1994_v59  ;;  %250 = vst [vmem:[#allocation2 + $0x300] ss:$8 sm:$0xf] %v208_v63  ;;  %v1449_v63 = vld [vmem:[#allocation2 + $0x130] sm:$0xff] }
 0x237   : > { %8489 = vmatpush.msra.mxu3 %v12881_v1  ;;  %8501 = vmatpush.msra.mxu0 %v12933_v31 }
 0x238   : > { %8417 = vmatpush.msra.mxu2 %v12895_v39  ;;  %8463 = vmatpush.msrb.mxu1 %v1993_v62 }
 0x239   : > { %8543 = vmatpush.msrb.mxu3 %v12665_v49  ;;  %8502 = vmatpush.msra.mxu0 %v12941_v47  ;;  %v5675_v49 = vld [vmem:[#allocation2 + $0x298] sm:$0xff] }
 0x23a   : > { %333 = vrot.lane.b32.xlu2 %v12952_v12, %s11310_s29  ;;  %8418 = vmatpush.msra.mxu2 %v12866_v33 }
 0x23b   : > { %8544 = vmatpush.msrb.mxu3 %v12675_v51  ;;  %8464 = vmatpush.msrb.mxu1 %v12895_v39  ;;  %v13046_v51 = vld [vmem:[#allocation2 + $0x2c0] sm:$0xff] }
 0x23c   : > { %8503 = vmatpush.msra.mxu0 %v2915_v21  ;;  %8419 = vmatpush.msra.mxu2 %v12828_v8  ;;  %v1633_v21 = vld [vmem:[#allocation2 + $0x138] sm:$0xff] }
 0x23d   : > { %8545 = vmatpush.msrb.mxu3 %v12681_v32  ;;  %8465 = vmatpush.msrb.mxu1 %v12866_v33  ;;  %v13049_v32 = vpop.f32.mrf.mxu3 }
 0x23e   : > { %8504 = vmatpush.msra.mxu0 %v2914_v26  ;;  %8420 = vmatpush.msra.mxu2 %v12824_v57  ;;  %v13076_v57 = vld [vmem:[#allocation2 + $0x2a0] sm:$0xff]  ;;  %v13216_v26 = vld [vmem:[#allocation2 + $0x148] sm:$0xff] }
 0x23f   : > { %8546 = vmatpush.msrb.mxu3 %v12689_v38  ;;  %8466 = vmatpush.msrb.mxu1 %v12828_v8  ;;  %v13052_v38 = vld [vmem:[#allocation7 + $0x8] sm:$0xff]  ;;  %v13079_v8 = vld [vmem:[#allocation2 + $0x238] sm:$0xff] }
 0x240   : > { %8505 = vmatpush.msra.mxu0 %v2913_v17  ;;  %8421 = vmatmul.f32.vlgmr.msra.gmra.mxu2 %v12660_v14 }
 0x241   : > { %8547 = vmatpush.msrb.mxu3 %v12699_v6  ;;  %8527 = vmatpush.msrb.mxu2 %v5675_v49  ;;  %v13064_v6 = vld [vmem:[#allocation2 + $0x2b0] sm:$0xff] }
 0x242   : > { %8573 = vmatpush.msra.mxu1 %v13046_v51  ;;  %8506 = vmatpush.msra.mxu0 %v13002_v5 }
 0x243   : > { %10953 = vmatmul.msk.f32.vlgmr.msra.gmra.mxu3 %vm7432_vm5, %v13052_v38  ;;  %8528 = vmatpush.msrb.mxu2 %v12945_v42  ;;  %v13170_v42 = vpop.f32.mrf.mxu1 }
 0x244   : > { %8548 = vmatpush.msrb.mxu3 %v3104_v19  ;;  %8574 = vmatpush.msra.mxu1 %v13057_v27  ;;  %v13243_v19 = vpop.f32.mrf.mxu2 }
 0x245   : > { %946 = vrot.lane.b32.xlu2 %v12952_v12, %s11311_s16  ;;  %8507 = vmatpush.msra.mxu0 %v13009_v28  ;;  %v13081_v20 = vpop.f32.mrf.mxu3  ;;  %v13179_v12 = vld [vmem:[#allocation2 + $0x1b0] sm:$0xff] }
 0x246   : > { %8529 = vmatpush.msrb.mxu2 %v12900_v56  ;;  %8549 = vmatpush.msrb.mxu3 %v12858_v40  ;;  %v13145_v56 = vld [vmem:[#allocation2 + $0x2d0] sm:$0xff] }
 0x247   : > { %8575 = vmatpush.msra.mxu1 %v13064_v6  ;;  %8508 = vmatpush.msra.mxu0 %v1995_v34 }
 0x248   : > { %8530 = vmatpush.msrb.mxu2 %v12851_v11  ;;  %10951 = vmatmul.msk.f32.vlgmr.msrb.gmra.mxu0 %vm7432_vm5, %v13052_v38  ;;  %v13133_v11 = vld [vmem:[#allocation2 + $0x200] sm:$0xff] }
 0x249   : > { %8550 = vmatpush.msrb.mxu3 %v12726_v3  ;;  %8576 = vmatpush.msra.mxu1 %v5128_v23  ;;  %v13086_v3 = vld [vmem:[#allocation2 + $0x260] sm:$0xff] }
 0x24a   : > { %8509 = vmatpush.msra.mxu0 %v1994_v59  ;;  %8424 = vmatmul.f32.gmra.mxu2 %v12790_v4 }
 0x24b   : > { %8467 = vmatmul.f32.vlgmr.msrb.gmra.mxu1 %v12660_v14  ;;  %8531 = vmatpush.msrb.mxu2 %v12847_v10  ;;  %v13129_v10 = vld [vmem:[#allocation2 + $0x128] sm:$0xff]  ;;  %v13205_v17 = vpop.f32.mrf.mxu1 }
 0x24c   : > { %8551 = vmatpush.msrb.mxu3 %v12744_v25  ;;  %8577 = vmatpush.msra.mxu1 %v13076_v57  ;;  %v2184_v25 = vld [vmem:[#allocation2 + $0x180] sm:$0xff] }
 0x24d   : > { %8510 = vmatpush.msra.mxu0 %v1993_v62  ;;  %10954 = vmatmul.msk.f32.gmra.mxu3 %vm7432_vm5, %v12566_v37  ;;  %v13226_v62 = vld [vmem:[#allocation2 + $0x140] sm:$0xff] }
 0x24e   : > { %8532 = vmatpush.msrb.mxu2 %v13079_v8  ;;  %8552 = vmatpush.msrb.mxu3 %v12764_v53  ;;  %v13100_v53 = vld [vmem:[#allocation2 + $0x250] sm:$0xff] }
 0x24f   : > { %8578 = vmatpush.msra.mxu1 %v13086_v3  ;;  %8511 = vmatpush.msra.mxu0 %v12895_v39  ;;  %v13141_v39 = vld [vmem:[#allocation2 + $0x1f8] sm:$0xff] }
 0x250   : > { %8533 = vmatpush.msrb.mxu2 %v13013_v18  ;;  %8553 = vmatpush.msrb.mxu3 %v2184_v25  ;;  %v13287_v25 = vpop.f32.mrf.mxu0 }
 0x251   : > { %8579 = vmatpush.msra.mxu1 %v13092_v46  ;;  %8512 = vmatpush.msra.mxu0 %v12866_v33  ;;  %v13138_v33 = vpop.f32.mrf.mxu3 }
 0x252   : > { %8534 = vmatpush.msrb.mxu2 %v12947_v29  ;;  %10952 = vmatmul.msk.f32.gmra.mxu0 %vm7432_vm5, %v12566_v37  ;;  %v13116_v37 = vld [vmem:[%s11427_s28 + $0x78] sm:$0xff] }
 0x253   : > { %8554 = vmatpush.msrb.mxu3 %v12794_v36  ;;  %8580 = vmatpush.msra.mxu1 %v13100_v53  ;;  %v13122_v36 = vld [vmem:[#allocation2 + $0x208] sm:$0xff]  ;;  %v13239_v49 = vpop.f32.mrf.mxu1 }
 0x254   : > { %8619 = vmatpush.msrb.mxu0 %v13102_v41  ;;  %8470 = vmatmul.f32.gmra.mxu1 %v12790_v4  ;;  %v13174_v29 = vld [vmem:[#allocation2 + $0x1a8] sm:$0xff] }
 0x255   : > { %8535 = vmatpush.msrb.mxu2 %v12886_v2  ;;  %8555 = vmatpush.msrb.mxu3 %v12801_v15  ;;  %v13127_v15 = vld [vmem:[#allocation2 + $0x210] sm:$0xff] }
 0x256   : > { %8581 = vmatpush.msra.mxu1 %v13108_v30  ;;  %8620 = vmatpush.msrb.mxu0 %v13046_v51 }
 0x257   : > { %10955 = vmatmul.msk.f32.vlgmr.msrb.gmra.mxu2 %vm7432_vm5, %v13052_v38  ;;  %8556 = vmatpush.msrb.mxu3 %v12809_v0  ;;  %v1264_v0 = vld [vmem:[#allocation2 + $0x120] sm:$0xff] }
 0x258   : > { %8589 = vmatpush.msra.mxu2 %v13108_v30  ;;  %8635 = vmatpush.msrb.mxu1 %v13100_v53 }
 0x259   : > { %8621 = vmatpush.msrb.mxu0 %v13057_v27  ;;  %335 = vrot.lane.b32.xlu0 %v13116_v37, %s11310_s29  ;;  %v13183_v50 = vpop.f32.mrf.mxu3 }
 0x25a   : > { %8590 = vmatpush.msra.mxu2 %v13122_v36  ;;  %8636 = vmatpush.msrb.mxu1 %v13127_v15 }
 0x25b   : > { %8557 = vmatpush.msrb.mxu3 %v13129_v10  ;;  %8622 = vmatpush.msrb.mxu0 %v13064_v6 }
 0x25c   : > { %8591 = vmatpush.msra.mxu2 %v13133_v11  ;;  %8637 = vmatpush.msrb.mxu1 %v13122_v36 }
 0x25d   : > { %8558 = vmatpush.msrb.mxu3 %v1264_v0  ;;  %8623 = vmatpush.msrb.mxu0 %v5128_v23  ;;  %v13277_v23 = vpop.f32.mrf.mxu2 }
 0x25e   : > { %8559 = vmatmul.f32.vlgmr.msrb.gmra.mxu3 %v12660_v14  ;;  %8513 = vmatmul.f32.vlgmr.msra.gmra.mxu0 %v12660_v14 }
 0x25f   : > { %8592 = vmatpush.msra.mxu2 %v13141_v39  ;;  %8638 = vmatpush.msrb.mxu1 %v13133_v11 }
 0x260   : > { %8665 = vmatpush.msra.mxu3 %v13145_v56  ;;  %8624 = vmatpush.msrb.mxu0 %v13149_v16 }
 0x261   : > { %10956 = vmatmul.msk.f32.gmra.mxu2 %vm7432_vm5, %v13152_v48  ;;  %8639 = vmatpush.msrb.mxu1 %v13141_v39  ;;  %v13230_v59 = vpop.f32.mrf.mxu3 }
 0x262   : > { %8593 = vmatpush.msra.mxu2 %v13156_v60  ;;  %8666 = vmatpush.msra.mxu3 %v13102_v41  ;;  %15602 = vst [vmem:[#allocation13_spill] sm:$0xff] %v13230_v59 }
 0x263   : > { %8625 = vmatpush.msrb.mxu0 %v13086_v3  ;;  %948 = vrot.lane.b32.xlu0 %v13116_v37, %s11311_s16 }
 0x264   : > { %540 = vrot.lane.b32.xlu1 %v13116_v37, %s11309_s30  ;;  %8594 = vmatpush.msra.mxu2 %v13166_v55 }
 0x265   : > { %8640 = vmatpush.msrb.mxu1 %v13156_v60  ;;  %8667 = vmatpush.msra.mxu3 %v13046_v51  ;;  %v13314_v0 = vpop.f32.mrf.mxu2 }
 0x266   : > { %8626 = vmatpush.msrb.mxu0 %v13092_v46  ;;  %10957 = vmatmul.msk.f32.vlgmr.msra.gmra.mxu1 %vm7432_vm5, %v13052_v38  ;;  %15606 = vst [vmem:[#allocation17_spill] sm:$0xff] %v13314_v0  ;;  %v15611_v0 = vrot.slane %v12954_v44, 1 }
 0x267   : > { %8595 = vmatpush.msra.mxu2 %v13174_v29  ;;  %8641 = vmatpush.msrb.mxu1 %v13179_v12 }
 0x268   : > { %8668 = vmatpush.msra.mxu3 %v13057_v27  ;;  %8627 = vmatpush.msrb.mxu0 %v13100_v53 }
 0x269   : > { %8562 = vmatmul.f32.gmra.mxu3 %v12790_v4  ;;  %8516 = vmatmul.f32.gmra.mxu0 %v12790_v4  ;;  %v13259_v34 = vpop.f32.mrf.mxu3 }
 0x26a   : > { %8596 = vmatpush.msra.mxu2 %v12858_v40  ;;  %8642 = vmatpush.msrb.mxu1 %v13174_v29  ;;  %15603 = vst [vmem:[#allocation14_spill] sm:$0xff] %v13259_v34 }
 0x26b   : > { %8669 = vmatpush.msra.mxu3 %v13064_v6  ;;  %8681 = vmatpush.msra.mxu0 %v13092_v46  ;;  %v13254_v6 = vld [vmem:[#allocation2 + $0x1a0] sm:$0xff] }
 0x26c   : > { %8597 = vmatpush.msra.mxu2 %v13191_v9  ;;  %8643 = vmatpush.msrb.mxu1 %v12858_v40  ;;  %v13210_v40 = vld [vmem:[#allocation2 + $0x188] sm:$0xff] }
 0x26d   : > { %8670 = vmatpush.msra.mxu3 %v13195_v43  ;;  %8682 = vmatpush.msra.mxu0 %v12881_v1  ;;  %v13350_v24 = vpop.f32.mrf.mxu2 }
 0x26e   : > { %8598 = vmatpush.msra.mxu2 %v13199_v61  ;;  %8644 = vmatpush.msrb.mxu1 %v13191_v9  ;;  %15609 = vst [vmem:[#allocation20_spill] sm:$0xff] %v13350_v24  ;;  %v13367_v24 = vld [vmem:[#allocation2 + $0x218] sm:$0xff] }
 0x26f   : > { %8671 = vmatpush.msra.mxu3 %v13149_v16  ;;  %8683 = vmatpush.msra.mxu0 %v13127_v15 }
 0x270   : > { %10958 = vmatmul.msk.f32.gmra.mxu1 %vm7432_vm5, %v13152_v48  ;;  %8599 = vmatpush.msra.mxu2 %v13210_v40 }
 0x271   : > { %8645 = vmatpush.msrb.mxu1 %v13199_v61  ;;  %8672 = vmatpush.msra.mxu3 %v13086_v3 }
 0x272   : > { %8684 = vmatpush.msra.mxu0 %v13122_v36  ;;  %8600 = vmatpush.msra.mxu2 %v13216_v26 }
 0x273   : > { %8646 = vmatpush.msrb.mxu1 %v13218_v35  ;;  %8673 = vmatpush.msra.mxu3 %v13092_v46 }
 0x274   : > { %8685 = vmatpush.msra.mxu0 %v13133_v11  ;;  %8601 = vmatpush.msra.mxu2 %v13226_v62 }
 0x275   : > { %8727 = vmatpush.msrb.mxu3 %v13086_v3  ;;  %8647 = vmatpush.msrb.mxu1 %v13216_v26 }
 0x276   : > { %8686 = vmatpush.msra.mxu0 %v13141_v39  ;;  %8602 = vmatpush.msra.mxu2 %v1633_v21 }
 0x277   : > { %8728 = vmatpush.msrb.mxu3 %v12886_v2  ;;  %8648 = vmatpush.msrb.mxu1 %v13226_v62  ;;  %v13247_v2 = vld [vmem:[#allocation2 + $0x2d8] sm:$0xff] }
 0x278   : > { %8687 = vmatpush.msra.mxu0 %v12941_v47  ;;  %8603 = vmatpush.msra.mxu2 %v1449_v63 }
 0x279   : > { %8729 = vmatpush.msrb.mxu3 %v12881_v1  ;;  %8649 = vmatpush.msrb.mxu1 %v1633_v21  ;;  %v13250_v1 = vld [vmem:[#allocation2 + $0x2e0] sm:$0xff] }
 0x27a   : > { %8688 = vmatpush.msra.mxu0 %v13179_v12  ;;  %8604 = vmatpush.msra.mxu2 %v13129_v10  ;;  %v13298_v10 = vld [vmem:[#allocation2 + $0x280] sm:$0xff] }
 0x27b   : > { %8730 = vmatpush.msrb.mxu3 %v13127_v15  ;;  %8650 = vmatpush.msrb.mxu1 %v1449_v63  ;;  %v13318_v63 = vpop.f32.mrf.mxu0 }
 0x27c   : > { %8689 = vmatpush.msra.mxu0 %v13174_v29  ;;  %8605 = vmatmul.f32.vlgmr.msra.gmra.mxu2 %v12660_v14  ;;  %v13268_v14 = vpop.f32.mrf.mxu1 }
 0x27d   : > { %8731 = vmatpush.msrb.mxu3 %v13122_v36  ;;  %8711 = vmatpush.msrb.mxu2 %v13247_v2 }
 0x27e   : > { %8757 = vmatpush.msra.mxu1 %v13250_v1  ;;  %8690 = vmatpush.msra.mxu0 %v13254_v6 }
 0x27f   : > { %10961 = vmatmul.msk.f32.vlgmr.msra.gmra.mxu3 %vm7432_vm5, %v13052_v38  ;;  %8712 = vmatpush.msrb.mxu2 %v13145_v56 }
 0x280   : > { %8732 = vmatpush.msrb.mxu3 %v13133_v11  ;;  %8758 = vmatpush.msra.mxu1 %v13247_v2 }
 0x281   : > { %744 = vrot.lane.b32.xlu2 %v13116_v37, %s11308_s20  ;;  %8691 = vmatpush.msra.mxu0 %v13191_v9  ;;  %v13293_v37 = vpop.f32.mrf.mxu3 }
 0x282   : > { %8713 = vmatpush.msrb.mxu2 %v13102_v41  ;;  %8733 = vmatpush.msrb.mxu3 %v12933_v31  ;;  %v13282_v31 = vld [vmem:[#allocation7] sm:$0xff]  ;;  %15604 = vst [vmem:[#allocation15_spill] sm:$0xff] %v13293_v37 }
 0x283   : > { %8759 = vmatpush.msra.mxu1 %v13145_v56  ;;  %8692 = vmatpush.msra.mxu0 %v13009_v28 }
 0x284   : > { %8714 = vmatpush.msrb.mxu2 %v13046_v51  ;;  %10959 = vmatmul.msk.f32.vlgmr.msrb.gmra.mxu0 %vm7432_vm5, %v13052_v38 }
 0x285   : > { %8734 = vmatpush.msrb.mxu3 %v12941_v47  ;;  %8760 = vmatpush.msra.mxu1 %v13102_v41  ;;  %v13291_v47 = vld [vmem:[#allocation2 + $0x278] sm:$0xff] }
 0x286   : > { %8693 = vmatpush.msra.mxu0 %v13218_v35  ;;  %8608 = vmatmul.f32.gmra.mxu2 %v12790_v4 }
 0x287   : > { %8651 = vmatmul.f32.vlgmr.msrb.gmra.mxu1 %v13282_v31  ;;  %8715 = vmatpush.msrb.mxu2 %v13057_v27  ;;  %v13312_v27 = vld [vmem:[#allocation2 + $0x2e8] sm:$0xff] }
 0x288   : > { %8735 = vmatpush.msrb.mxu3 %v13179_v12  ;;  %8761 = vmatpush.msra.mxu1 %v13046_v51  ;;  %v13304_v51 = vpop.f32.mrf.mxu1 }
 0x289   : > { %8694 = vmatpush.msra.mxu0 %v13216_v26  ;;  %10962 = vmatmul.msk.f32.gmra.mxu3 %vm7432_vm5, %v13152_v48  ;;  %15605 = vst [vmem:[#allocation16_spill] sm:$0xff] %v13304_v51 }
 0x28a   : > { %8716 = vmatpush.msrb.mxu2 %v13291_v47  ;;  %8736 = vmatpush.msrb.mxu3 %v13174_v29 }
 0x28b   : > { %8762 = vmatpush.msra.mxu1 %v13298_v10  ;;  %8695 = vmatpush.msra.mxu0 %v13226_v62 }
 0x28c   : > { %8717 = vmatpush.msrb.mxu2 %v13195_v43  ;;  %8737 = vmatpush.msrb.mxu3 %v13254_v6 }
 0x28d   : > { %8763 = vmatpush.msra.mxu1 %v13291_v47  ;;  %8696 = vmatpush.msra.mxu0 %v1633_v21  ;;  %v13330_v21 = vpop.f32.mrf.mxu3 }
 0x28e   : > { %8718 = vmatpush.msrb.mxu2 %v13149_v16  ;;  %10960 = vmatmul.msk.f32.gmra.mxu0 %vm7432_vm5, %v13152_v48  ;;  %15607 = vst [vmem:[#allocation18_spill] sm:$0xff] %v13330_v21 }
 0x28f   : > { %8738 = vmatpush.msrb.mxu3 %v13002_v5  ;;  %8764 = vmatpush.msra.mxu1 %v13195_v43  ;;  %v13328_v5 = vld [vmem:[%s11427_s28 + $0x80] sm:$0xff] }
 0x290   : > { %8803 = vmatpush.msrb.mxu0 %v13312_v27  ;;  %8654 = vmatmul.f32.gmra.mxu1 %v12790_v4  ;;  %v13336_v4 = vld [vmem:[#allocation2 + $0x228] sm:$0xff]  ;;  %v13344_v22 = vpop.f32.mrf.mxu1 }
 0x291   : > { %8719 = vmatpush.msrb.mxu2 %v13086_v3  ;;  %8739 = vmatpush.msrb.mxu3 %v13009_v28  ;;  %15608 = vst [vmem:[#allocation19_spill] sm:$0xff] %v13344_v22 }
 0x292   : > { %8765 = vmatpush.msra.mxu1 %v13149_v16  ;;  %8804 = vmatpush.msrb.mxu0 %v13250_v1 }
 0x293   : > { %10963 = vmatmul.msk.f32.vlgmr.msrb.gmra.mxu2 %vm7432_vm5, %v13052_v38  ;;  %8740 = vmatpush.msrb.mxu3 %v13218_v35 }
 0x294   : > { %8773 = vmatpush.msra.mxu2 %v13149_v16  ;;  %8819 = vmatpush.msrb.mxu1 %v13195_v43  ;;  %v13338_v28 = vpop.permute.xlu2 %333  ;;  %v13348_v16 = vld [vmem:[#allocation2 + $0x220] sm:$0xff] }
 0x295   : > { %8805 = vmatpush.msrb.mxu0 %v13247_v2  ;;  %337 = vrot.lane.b32.xlu1 %v13328_v5, %s11310_s29  ;;  %v15548_v52 = vrot.slane %v13338_v28, 1  ;;  %v13398_v59 = vpop.f32.mrf.mxu3 }
 0x296   : > { %8774 = vmatpush.msra.mxu2 %v13336_v4  ;;  %8820 = vmatpush.msrb.mxu1 %v13013_v18  ;;  %15612 = vst [vmem:[#allocation21_spill] sm:$0xff] %v13398_v59 }
 0x297   : > { %8741 = vmatpush.msrb.mxu3 %v13216_v26  ;;  %8806 = vmatpush.msrb.mxu0 %v13145_v56  ;;  %v390_v21 = vsel %vm362_vm1, %v356_v45, %v15548_v52  ;;  %v13372_v45 = vpop.f32.mrf.mxu0 }
 0x298   : > { %8775 = vmatpush.msra.mxu2 %v13348_v16  ;;  %8821 = vmatpush.msrb.mxu1 %v13336_v4  ;;  %v391_v18 = vsel %vm364_vm3, %v12908_v54, %v390_v21  ;;  %v13376_v54 = vld [vmem:[#allocation2 + $0x2f0] sm:$0xff]  ;;  %v15610_v21 = vrot.slane %v12987_v13, 1 }
 0x299   : > { %8742 = vmatpush.msrb.mxu3 %v13226_v62  ;;  %v13363_v37 = vpop.permute.xlu0 %538  ;;  %8807 = vmatpush.msrb.mxu0 %v13102_v41  ;;  %458 = vst [vmem:[#allocation2 + $0x341] ss:$8 sm:$0xf] %v391_v18  ;;  %v13370_v34 = vpop.permute.xlu1 %742  ;;  %v13381_v62 = vld [vmem:[#allocation2 + $0x288] sm:$0xff] }
 0x29a   : > { %8743 = vmatmul.f32.vlgmr.msrb.gmra.mxu3 %v13282_v31  ;;  %v15549_v22 = vrot.slane %v13363_v37, 1  ;;  %8697 = vmatmul.f32.vlgmr.msra.gmra.mxu0 %v13282_v31  ;;  %459 = vst [vmem:[#allocation2 + $0x341] ss:$8 sm:$0xf0] %v391_v18  ;;  %v15550_v41 = vrot.slane %v13370_v34, 1 }
 0x29b   : > { %8776 = vmatpush.msra.mxu2 %v13367_v24  ;;  %8822 = vmatpush.msrb.mxu1 %v13348_v16 }
 0x29c   : > { %8849 = vmatpush.msra.mxu3 %v13376_v54  ;;  %v594_v52 = vsel %vm362_vm1, %v15610_v21, %v15549_v22  ;;  %8808 = vmatpush.msrb.mxu0 %v13381_v62  ;;  %v798_v51 = vsel %vm362_vm1, %v15611_v0, %v15550_v41  ;;  %v13404_v22 = vpop.f32.mrf.mxu1  ;;  %v15615_v0 = vrot.slane %v12956_v7, 1  ;;  %v13437_v41 = vld [vmem:[#allocation7 + $0x10] sm:$0xff] }
 0x29d   : > { %10964 = vmatmul.msk.f32.gmra.mxu2 %vm7432_vm5, %v13152_v48  ;;  %v595_v18 = vsel %vm568_vm2, %v12987_v13, %v594_v52  ;;  %8823 = vmatpush.msrb.mxu1 %v13367_v24  ;;  %v799_v21 = vsel %vm772_vm0, %v12954_v44, %v798_v51  ;;  %15613 = vst [vmem:[#allocation22_spill] sm:$0xff] %v13404_v22  ;;  %v13417_v44 = vpop.f32.mrf.mxu2  ;;  %v13421_v51 = vld [vmem:[#allocation2 + $0x1c8] sm:$0xff] }
 0x29e   : > { %8777 = vmatpush.msra.mxu2 %v13127_v15  ;;  %662 = vst [vmem:[#allocation2 + $0x342] ss:$8 sm:$0xf] %v595_v18  ;;  %8850 = vmatpush.msra.mxu3 %v13312_v27 }
 0x29f   : > { %8809 = vmatpush.msrb.mxu0 %v13298_v10  ;;  %v13408_v52 = vpop.permute.xlu2 %946  ;;  %663 = vst [vmem:[#allocation2 + $0x342] ss:$8 sm:$0xf0] %v595_v18  ;;  %746 = vrot.lane.b32.xlu0 %v13328_v5, %s11308_s20 }
 0x2a0   : > { %950 = vrot.lane.b32.xlu1 %v13328_v5, %s11311_s16  ;;  %v15551_v13 = vrot.slane %v13408_v52, 1  ;;  %866 = vst [vmem:[#allocation2 + $0x343] ss:$8 sm:$0xf] %v799_v21  ;;  %8778 = vmatpush.msra.mxu2 %v13122_v36  ;;  %v2926_v36 = vld [vmem:[#allocation2 + $0x1d0] sm:$0xff] }
 0x2a1   : > { %8824 = vmatpush.msrb.mxu1 %v13127_v15  ;;  %867 = vst [vmem:[#allocation2 + $0x343] ss:$8 sm:$0xf0] %v799_v21  ;;  %8851 = vmatpush.msra.mxu3 %v13250_v1  ;;  %v13434_v21 = vpop.f32.mrf.mxu0 }
 0x2a2   : > { %15614 = vst [vmem:[#allocation23_spill] sm:$0xff] %v13417_v44  ;;  %8810 = vmatpush.msrb.mxu0 %v13291_v47  ;;  %v1002_v18 = vsel %vm362_vm1, %v15615_v0, %v15551_v13  ;;  %10965 = vmatmul.msk.f32.vlgmr.msra.gmra.mxu1 %vm7432_vm5, %v13052_v38  ;;  %v13440_v0 = vld [vmem:[#allocation2 + $0x1c0] sm:$0xff] }
 0x2a3   : > { %8779 = vmatpush.msra.mxu2 %v13421_v51  ;;  %v1003_v15 = vsel %vm976_vm4, %v12956_v7, %v1002_v18  ;;  %8825 = vmatpush.msrb.mxu1 %v2926_v36  ;;  %15616 = vst [vmem:[#allocation24_spill] sm:$0xff] %v13434_v21  ;;  %v209_v13 = vld [vmem:[%s11427_s28 + $0x68] sm:$0xff]  ;;  %v13449_v18 = vpop.f32.mrf.mxu3 }
 0x2a4   : > { %8852 = vmatpush.msra.mxu3 %v13247_v2  ;;  %1070 = vst [vmem:[#allocation2 + $0x344] ss:$8 sm:$0xf] %v1003_v15  ;;  %8811 = vmatpush.msrb.mxu0 %v13195_v43  ;;  %v13447_v7 = vld [vmem:[#allocation2 + $0x1b8] sm:$0xff]  ;;  %v13455_v59 = vpop.f32.mrf.mxu1 }
 0x2a5   : > { %8746 = vmatmul.f32.gmra.mxu3 %v13437_v41  ;;  %1071 = vst [vmem:[#allocation2 + $0x344] ss:$8 sm:$0xf0] %v1003_v15  ;;  %8700 = vmatmul.f32.gmra.mxu0 %v13437_v41  ;;  %v13453_v15 = vld [vmem:[#allocation2 + $0x290] sm:$0xff] }
 0x2a6   : > { %8780 = vmatpush.msra.mxu2 %v13440_v0  ;;  %253 = vst [vmem:[#allocation2 + $0x340] ss:$8 sm:$0xf] %v209_v13  ;;  %8826 = vmatpush.msrb.mxu1 %v13421_v51 }
 0x2a7   : > { %8853 = vmatpush.msra.mxu3 %v13145_v56  ;;  %254 = vst [vmem:[#allocation2 + $0x340] ss:$8 sm:$0xf0] %v209_v13  ;;  %8865 = vmatpush.msra.mxu0 %v13291_v47  ;;  %v3663_v56 = vld [vmem:[#allocation2 + $0x230] sm:$0xff]  ;;  %v13463_v13 = vpop.f32.mrf.mxu2 }
 0x2a8   : > { %15617 = vst [vmem:[#allocation25_spill] sm:$0xff] %v13449_v18  ;;  %8781 = vmatpush.msra.mxu2 %v13447_v7  ;;  %8827 = vmatpush.msrb.mxu1 %v13440_v0 }
 0x2a9   : > { %15618 = vst [vmem:[#allocation26_spill] sm:$0xff] %v13455_v59  ;;  %8854 = vmatpush.msra.mxu3 %v13453_v15  ;;  %8866 = vmatpush.msra.mxu0 %v13079_v8  ;;  %v13467_v18 = vpop.f32.mrf.mxu0  ;;  %v13473_v8 = vld [vmem:[#allocation2 + $0x168] sm:$0xff]  ;;  %v2006_v59 = vld [vmem:[#allocation2 + $0x170] sm:$0xff] }
 0x2aa   : > { %8782 = vmatpush.msra.mxu2 %v13179_v12  ;;  %8828 = vmatpush.msrb.mxu1 %v13447_v7  ;;  %15619 = vst [vmem:[#allocation27_spill] sm:$0xff] %v13463_v13  ;;  %v13480_v13 = vld [vmem:[#allocation2 + $0x160] sm:$0xff] }
 0x2ab   : > { %8855 = vmatpush.msra.mxu3 %v13381_v62  ;;  %8867 = vmatpush.msra.mxu0 %v3663_v56  ;;  %15620 = vst [vmem:[#allocation28_spill] sm:$0xff] %v13467_v18  ;;  %v13476_v56 = vpop.f32.mrf.mxu3 }
 0x2ac   : > { %10966 = vmatmul.msk.f32.gmra.mxu1 %vm7432_vm5, %v13152_v48  ;;  %8783 = vmatpush.msra.mxu2 %v13174_v29  ;;  %15621 = vst [vmem:[#allocation29_spill] sm:$0xff] %v13476_v56  ;;  %v13482_v29 = vpop.f32.mrf.mxu1 }
 0x2ad   : > { %8829 = vmatpush.msrb.mxu1 %v13179_v12  ;;  %8856 = vmatpush.msra.mxu3 %v13298_v10  ;;  %15622 = vst [vmem:[#allocation30_spill] sm:$0xff] %v13482_v29  ;;  %v13488_v12 = vld [vmem:[#allocation2 + $0x158] sm:$0xff] }
 0x2ae   : > { %8868 = vmatpush.msra.mxu0 %v13336_v4  ;;  %8784 = vmatpush.msra.mxu2 %v13473_v8  ;;  %v2927_v4 = vld [vmem:[#allocation2 + $0x1d8] sm:$0xff] }
 0x2af   : > { %8830 = vmatpush.msrb.mxu1 %v2006_v59  ;;  %8857 = vmatpush.msra.mxu3 %v13291_v47 }
 0x2b0   : > { %8869 = vmatpush.msra.mxu0 %v13348_v16  ;;  %8785 = vmatpush.msra.mxu2 %v13480_v13 }
 0x2b1   : > { %8911 = vmatpush.msrb.mxu3 %v13076_v57  ;;  %8831 = vmatpush.msrb.mxu1 %v13473_v8  ;;  %v13495_v57 = vpop.f32.mrf.mxu2  ;;  %v13498_v29 = vpop.f32.mrf.mxu0 }
 0x2b2   : > { %8870 = vmatpush.msra.mxu0 %v13367_v24  ;;  %8786 = vmatpush.msra.mxu2 %v13488_v12  ;;  %15623 = vst [vmem:[#allocation31_spill] sm:$0xff] %v13495_v57  ;;  %v1461_v57 = vld [vmem:[#allocation2 + $0x190] sm:$0xff] }
 0x2b3   : > { %8912 = vmatpush.msrb.mxu3 %v13086_v3  ;;  %8832 = vmatpush.msrb.mxu1 %v13480_v13  ;;  %15624 = vst [vmem:[#allocation32_spill] sm:$0xff] %v13498_v29  ;;  %v5687_v3 = vld [vmem:[#allocation2 + $0x2f8] sm:$0xff] }
 0x2b4   : > { %8871 = vmatpush.msra.mxu0 %v2927_v4  ;;  %8787 = vmatpush.msra.mxu2 %v13218_v35  ;;  %v13508_v4 = vpop.f32.mrf.mxu3 }
 0x2b5   : > { %8913 = vmatpush.msrb.mxu3 %v13092_v46  ;;  %8833 = vmatpush.msrb.mxu1 %v13488_v12  ;;  %v13506_v46 = vld [vmem:[#allocation2 + $0x320] sm:$0xff]  ;;  %15625 = vst [vmem:[#allocation33_spill] sm:$0xff] %v13508_v4 }
 0x2b6   : > { %8872 = vmatpush.msra.mxu0 %v2926_v36  ;;  %8788 = vmatpush.msra.mxu2 %v13216_v26  ;;  %v13511_v36 = vpop.f32.mrf.mxu1  ;;  %v13517_v26 = vld [vmem:[#allocation2 + $0x318] sm:$0xff] }
 0x2b7   : > { %8914 = vmatpush.msrb.mxu3 %v13100_v53  ;;  %8834 = vmatpush.msrb.mxu1 %v13218_v35  ;;  %15626 = vst [vmem:[#allocation34_spill] sm:$0xff] %v13511_v36  ;;  %v3116_v53 = vld [vmem:[#allocation2 + $0x240] sm:$0xff]  ;;  %v13526_v35 = vld [vmem:[#allocation2 + $0x310] sm:$0xff] }
 0x2b8   : > { %8873 = vmatpush.msra.mxu0 %v13421_v51  ;;  %8789 = vmatmul.f32.vlgmr.msra.gmra.mxu2 %v13282_v31 }
 0x2b9   : > { %8915 = vmatpush.msrb.mxu3 %v13108_v30  ;;  %8895 = vmatpush.msrb.mxu2 %v5687_v3  ;;  %v13522_v30 = vpop.f32.mrf.mxu2  ;;  %v13528_v51 = vpop.f32.mrf.mxu0 }
 0x2ba   : > { %8941 = vmatpush.msra.mxu1 %v13506_v46  ;;  %8874 = vmatpush.msra.mxu0 %v13440_v0  ;;  %15627 = vst [vmem:[#allocation35_spill] sm:$0xff] %v13522_v30  ;;  %v13666_v30 = vld [vmem:[#allocation2 + $0x248] sm:$0xff] }
 0x2bb   : > { %10969 = vmatmul.msk.f32.vlgmr.msra.gmra.mxu3 %vm7432_vm5, %v13052_v38  ;;  %8896 = vmatpush.msrb.mxu2 %v13376_v54  ;;  %15628 = vst [vmem:[#allocation36_spill] sm:$0xff] %v13528_v51  ;;  %v2007_v54 = vld [vmem:[#allocation2 + $0x178] sm:$0xff] }
 0x2bc   : > { %8916 = vmatpush.msrb.mxu3 %v3116_v53  ;;  %8942 = vmatpush.msra.mxu1 %v13517_v26 }
 0x2bd   : > { %542 = vrot.lane.b32.xlu2 %v13328_v5, %s11309_s30  ;;  %8875 = vmatpush.msra.mxu0 %v13447_v7  ;;  %v13536_v5 = vld [vmem:[#allocation2 + $0x308] sm:$0xff] }
 0x2be   : > { %8897 = vmatpush.msrb.mxu2 %v13312_v27  ;;  %8917 = vmatpush.msrb.mxu3 %v13133_v11  ;;  %v13538_v27 = vpop.f32.mrf.mxu3  ;;  %v13541_v3 = vpop.f32.mrf.mxu1  ;;  %v13547_v11 = vld [vmem:[#allocation2 + $0x300] sm:$0xff] }
 0x2bf   : > { %8943 = vmatpush.msra.mxu1 %v13526_v35  ;;  %8876 = vmatpush.msra.mxu0 %v2007_v54  ;;  %15629 = vst [vmem:[#allocation37_spill] sm:$0xff] %v13538_v27  ;;  %v15635_v54 = vrot.slane %v13338_v28, 1 }
 0x2c0   : > { %8898 = vmatpush.msrb.mxu2 %v13250_v1  ;;  %10967 = vmatmul.msk.f32.vlgmr.msrb.gmra.mxu0 %vm7432_vm5, %v13052_v38  ;;  %15630 = vst [vmem:[#allocation38_spill] sm:$0xff] %v13541_v3  ;;  %v13564_v1 = vld [vmem:[#allocation2 + $0x2b8] sm:$0xff]  ;;  %v15641_v3 = vrot.slane %v13363_v37, 1 }
 0x2c1   : > { %8918 = vmatpush.msrb.mxu3 %v13141_v39  ;;  %8944 = vmatpush.msra.mxu1 %v13536_v5  ;;  %v13551_v39 = vld [vmem:[#allocation2 + $0x298] sm:$0xff] }
 0x2c2   : > { %8877 = vmatpush.msra.mxu0 %v2006_v59  ;;  %8792 = vmatmul.f32.gmra.mxu2 %v13437_v41  ;;  %v13556_v59 = vld [vmem:[#allocation2 + $0x2c0] sm:$0xff] }
 0x2c3   : > { %8835 = vmatmul.f32.vlgmr.msrb.gmra.mxu1 %v13282_v31  ;;  %8899 = vmatpush.msrb.mxu2 %v13247_v2  ;;  %v2196_v2 = vld [vmem:[#allocation2 + $0x1e0] sm:$0xff] }
 0x2c4   : > { %8919 = vmatpush.msrb.mxu3 %v13156_v60  ;;  %8945 = vmatpush.msra.mxu1 %v13547_v11  ;;  %v13560_v60 = vpop.f32.mrf.mxu2 }
 0x2c5   : > { %8878 = vmatpush.msra.mxu0 %v13473_v8  ;;  %10970 = vmatmul.msk.f32.gmra.mxu3 %vm7432_vm5, %v13152_v48  ;;  %15631 = vst [vmem:[#allocation39_spill] sm:$0xff] %v13560_v60  ;;  %v13566_v8 = vpop.f32.mrf.mxu0 }
 0x2c6   : > { %8900 = vmatpush.msrb.mxu2 %v13551_v39  ;;  %8920 = vmatpush.msrb.mxu3 %v13166_v55  ;;  %15632 = vst [vmem:[#allocation40_spill] sm:$0xff] %v13566_v8  ;;  %v13574_v55 = vld [vmem:[#allocation2 + $0x2b0] sm:$0xff] }
 0x2c7   : > { %8946 = vmatpush.msra.mxu1 %v13556_v59  ;;  %8879 = vmatpush.msra.mxu0 %v13480_v13  ;;  %v13578_v13 = vpop.f32.mrf.mxu3 }
 0x2c8   : > { %8901 = vmatpush.msrb.mxu2 %v13453_v15  ;;  %8921 = vmatpush.msrb.mxu3 %v2196_v2  ;;  %v13576_v15 = vld [vmem:[#allocation2 + $0x328] sm:$0xff]  ;;  %15633 = vst [vmem:[#allocation41_spill] sm:$0xff] %v13578_v13 }
 0x2c9   : > { %8947 = vmatpush.msra.mxu1 %v13564_v1  ;;  %8880 = vmatpush.msra.mxu0 %v13488_v12  ;;  %v13584_v12 = vpop.f32.mrf.mxu1  ;;  %v13607_v13 = vld [vmem:[#allocation2 + $0x268] sm:$0xff] }
 0x2ca   : > { %8902 = vmatpush.msrb.mxu2 %v13381_v62  ;;  %10968 = vmatmul.msk.f32.gmra.mxu0 %vm7432_vm5, %v13152_v48  ;;  %15634 = vst [vmem:[#allocation42_spill] sm:$0xff] %v13584_v12  ;;  %v13588_v62 = vld [vmem:[#allocation2 + $0x2a8] sm:$0xff] }
 0x2cb   : > { %8922 = vmatpush.msrb.mxu3 %v13254_v6  ;;  %8948 = vmatpush.msra.mxu1 %v13574_v55  ;;  %v13582_v53 = vpop.permute.xlu0 %335 }
 0x2cc   : > { %8987 = vmatpush.msrb.mxu0 %v13576_v15  ;;  %8838 = vmatmul.f32.gmra.mxu1 %v13437_v41  ;;  %v15552_v6 = vrot.slane %v13582_v53, 1  ;;  %v13609_v12 = vpop.f32.mrf.mxu2 }
 0x2cd   : > { %8903 = vmatpush.msrb.mxu2 %v13298_v10  ;;  %8923 = vmatpush.msrb.mxu3 %v13191_v9  ;;  %15636 = vst [vmem:[#allocation43_spill] sm:$0xff] %v13609_v12  ;;  %v13646_v12 = vld [vmem:[#allocation2 + $0x250] sm:$0xff] }
 0x2ce   : > { %8949 = vmatpush.msra.mxu1 %v13588_v62  ;;  %8988 = vmatpush.msrb.mxu0 %v13506_v46  ;;  %v392_v2 = vsel %vm362_vm1, %v15635_v54, %v15552_v6  ;;  %v13613_v54 = vpop.f32.mrf.mxu0 }
 0x2cf   : > { %10971 = vmatmul.msk.f32.vlgmr.msrb.gmra.mxu2 %vm7432_vm5, %v13052_v38  ;;  %v393_v9 = vsel %vm364_vm3, %v13338_v28, %v392_v2  ;;  %8924 = vmatpush.msrb.mxu3 %v13199_v61  ;;  %15637 = vst [vmem:[#allocation44_spill] sm:$0xff] %v13613_v54  ;;  %v13617_v28 = vld [vmem:[#allocation2 + $0x260] sm:$0xff]  ;;  %v13619_v61 = vpop.f32.mrf.mxu3  ;;  %v15640_v54 = vrot.slane %v13408_v52, 1 }
 0x2d0   : > { %8957 = vmatpush.msra.mxu2 %v13588_v62  ;;  %9003 = vmatpush.msrb.mxu1 %v13574_v55  ;;  %461 = vst [vmem:[#allocation2 + $0x381] ss:$8 sm:$0xf] %v393_v9  ;;  %v1276_v2 = vld [vmem:[#allocation2 + $0x180] sm:$0xff] }
 0x2d1   : > { %8989 = vmatpush.msrb.mxu0 %v13517_v26  ;;  %462 = vst [vmem:[#allocation2 + $0x381] ss:$8 sm:$0xf0] %v393_v9  ;;  %8925 = vmatpush.msrb.mxu3 %v13210_v40  ;;  %v13623_v6 = vpop.f32.mrf.mxu1 }
 0x2d2   : > { %8958 = vmatpush.msra.mxu2 %v13607_v13  ;;  %9004 = vmatpush.msrb.mxu1 %v13195_v43  ;;  %15638 = vst [vmem:[#allocation45_spill] sm:$0xff] %v13619_v61  ;;  %v13628_v43 = vld [vmem:[#allocation2 + $0x258] sm:$0xff]  ;;  %v13636_v61 = vld [vmem:[#allocation2 + $0x330] sm:$0xff] }
 0x2d3   : > { %8990 = vmatpush.msrb.mxu0 %v13526_v35  ;;  %15639 = vst [vmem:[#allocation46_spill] sm:$0xff] %v13623_v6  ;;  %8926 = vmatpush.msrb.mxu3 %v1276_v2  ;;  %v13638_v6 = vld [vmem:[#allocation2 + $0x2c8] sm:$0xff] }
 0x2d4   : > { %8959 = vmatpush.msra.mxu2 %v13617_v28  ;;  %9005 = vmatpush.msrb.mxu1 %v13607_v13 }
 0x2d5   : > { %8991 = vmatpush.msrb.mxu0 %v13536_v5  ;;  %8927 = vmatmul.f32.vlgmr.msrb.gmra.mxu3 %v13282_v31  ;;  %v13630_v40 = vpop.permute.xlu0 %948 }
 0x2d6   : > { %8881 = vmatmul.f32.vlgmr.msra.gmra.mxu0 %v13282_v31  ;;  %v13632_v9 = vpop.permute.xlu1 %540  ;;  %8960 = vmatpush.msra.mxu2 %v13628_v43  ;;  %v15554_v5 = vrot.slane %v13630_v40, 1 }
 0x2d7   : > { %9006 = vmatpush.msrb.mxu1 %v13617_v28  ;;  %v15553_v2 = vrot.slane %v13632_v9, 1  ;;  %9033 = vmatpush.msra.mxu3 %v13636_v61 }
 0x2d8   : > { %8992 = vmatpush.msrb.mxu0 %v13638_v6  ;;  %10972 = vmatmul.msk.f32.gmra.mxu2 %vm7432_vm5, %v13152_v48  ;;  %v1004_v27 = vsel %vm362_vm1, %v15640_v54, %v15554_v5 }
 0x2d9   : > { %9007 = vmatpush.msrb.mxu1 %v13628_v43  ;;  %v596_v8 = vsel %vm362_vm1, %v15641_v3, %v15553_v2  ;;  %8961 = vmatpush.msra.mxu2 %v13646_v12  ;;  %v1005_v60 = vsel %vm976_vm4, %v13408_v52, %v1004_v27  ;;  %v13671_v3 = vpop.f32.mrf.mxu2  ;;  %v13676_v27 = vpop.f32.mrf.mxu0 }
 0x2da   : > { %9034 = vmatpush.msra.mxu3 %v13576_v15  ;;  %v597_v51 = vsel %vm568_vm2, %v13363_v37, %v596_v8  ;;  %8993 = vmatpush.msrb.mxu0 %v13556_v59  ;;  %1073 = vst [vmem:[#allocation2 + $0x384] ss:$8 sm:$0xf] %v1005_v60  ;;  %v13681_v37 = vld [vmem:[#allocation2 + $0x208] sm:$0xff]  ;;  %v13683_v8 = vld [vmem:[#allocation2 + $0x210] sm:$0xff]  ;;  %v13685_v2 = vpop.f32.mrf.mxu3 }
 0x2db   : > { %9008 = vmatpush.msrb.mxu1 %v13646_v12  ;;  %v13669_v54 = vpop.permute.xlu2 %744  ;;  %15642 = vst [vmem:[#allocation47_spill] sm:$0xff] %v13671_v3  ;;  %8962 = vmatpush.msra.mxu2 %v13666_v30  ;;  %v13702_v3 = vld [vmem:[#allocation2 + $0x200] sm:$0xff] }
 0x2dc   : > { %9035 = vmatpush.msra.mxu3 %v13506_v46  ;;  %v15555_v52 = vrot.slane %v13669_v54, 1  ;;  %1074 = vst [vmem:[#allocation2 + $0x384] ss:$8 sm:$0xf0] %v1005_v60  ;;  %8994 = vmatpush.msrb.mxu0 %v13564_v1  ;;  %v15645_v60 = vrot.slane %v13370_v34, 1  ;;  %v15673_v44 = vrot.slane %v13669_v54, 1 }
 0x2dd   : > { %15643 = vst [vmem:[#allocation48_spill] sm:$0xff] %v13676_v27  ;;  %10973 = vmatmul.msk.f32.vlgmr.msra.gmra.mxu1 %vm7432_vm5, %v13052_v38  ;;  %8963 = vmatpush.msra.mxu2 %v13681_v37  ;;  %v13756_v27 = vld [vmem:[#allocation2 + $0x198] sm:$0xff] }
 0x2de   : > { %665 = vst [vmem:[#allocation2 + $0x382] ss:$8 sm:$0xf] %v597_v51  ;;  %9009 = vmatpush.msrb.mxu1 %v13683_v8  ;;  %v800_v5 = vsel %vm362_vm1, %v15645_v60, %v15555_v52  ;;  %9036 = vmatpush.msra.mxu3 %v13517_v26  ;;  %v13725_v52 = vld [vmem:[#allocation2 + $0x270] sm:$0xff] }
 0x2df   : > { %15644 = vst [vmem:[#allocation49_spill] sm:$0xff] %v13685_v2  ;;  %8995 = vmatpush.msrb.mxu0 %v13574_v55  ;;  %v801_v38 = vsel %vm772_vm0, %v13370_v34, %v800_v5  ;;  %v13698_v2 = vpop.f32.mrf.mxu1  ;;  %8930 = vmatmul.f32.gmra.mxu3 %v13437_v41  ;;  %v13709_v34 = vld [vmem:[#allocation2 + $0x1f8] sm:$0xff]  ;;  %v13713_v5 = vld [vmem:[#allocation2 + $0x2d0] sm:$0xff] }
 0x2e0   : > { %666 = vst [vmem:[#allocation2 + $0x382] ss:$8 sm:$0xf0] %v597_v51  ;;  %8884 = vmatmul.f32.gmra.mxu0 %v13437_v41  ;;  %8964 = vmatpush.msra.mxu2 %v13702_v3  ;;  %v210_v51 = vld [vmem:[%s11427_s28 + $0x70] sm:$0xff] }
 0x2e1   : > { %15646 = vst [vmem:[#allocation50_spill] sm:$0xff] %v13698_v2  ;;  %9010 = vmatpush.msrb.mxu1 %v13681_v37  ;;  %9037 = vmatpush.msra.mxu3 %v13526_v35  ;;  %v13715_v60 = vpop.f32.mrf.mxu2  ;;  %v13721_v35 = vpop.f32.mrf.mxu0 }
 0x2e2   : > { %869 = vst [vmem:[#allocation2 + $0x383] ss:$8 sm:$0xf] %v801_v38  ;;  %9049 = vmatpush.msra.mxu0 %v13564_v1  ;;  %8965 = vmatpush.msra.mxu2 %v13709_v34  ;;  %v13727_v2 = vpop.f32.mrf.mxu3 }
 0x2e3   : > { %870 = vst [vmem:[#allocation2 + $0x383] ss:$8 sm:$0xf0] %v801_v38  ;;  %9011 = vmatpush.msrb.mxu1 %v13702_v3  ;;  %9038 = vmatpush.msra.mxu3 %v13713_v5  ;;  %v13719_v38 = vld [vmem:[#allocation2 + $0x1f0] sm:$0xff] }
 0x2e4   : > { %256 = vst [vmem:[#allocation2 + $0x380] ss:$8 sm:$0xf] %v210_v51  ;;  %9050 = vmatpush.msra.mxu0 %v13291_v47  ;;  %8966 = vmatpush.msra.mxu2 %v13719_v38 }
 0x2e5   : > { %257 = vst [vmem:[#allocation2 + $0x380] ss:$8 sm:$0xf0] %v210_v51  ;;  %9012 = vmatpush.msrb.mxu1 %v13709_v34  ;;  %9039 = vmatpush.msra.mxu3 %v13638_v6  ;;  %v13731_v51 = vld [vmem:[#allocation2 + $0x1e8] sm:$0xff] }
 0x2e6   : > { %15647 = vst [vmem:[#allocation51_spill] sm:$0xff] %v13715_v60  ;;  %9051 = vmatpush.msra.mxu0 %v13725_v52  ;;  %10974 = vmatmul.msk.f32.gmra.mxu1 %vm7432_vm5, %v13152_v48  ;;  %v13740_v60 = vld [vmem:[#allocation2 + $0x1a8] sm:$0xff] }
 0x2e7   : > { %15648 = vst [vmem:[#allocation52_spill] sm:$0xff] %v13721_v35  ;;  %8967 = vmatpush.msra.mxu2 %v13731_v51  ;;  %v13736_v35 = vpop.f32.mrf.mxu1  ;;  %9013 = vmatpush.msrb.mxu1 %v13719_v38 }
 0x2e8   : > { %15649 = vst [vmem:[#allocation53_spill] sm:$0xff] %v13727_v2  ;;  %9040 = vmatpush.msra.mxu3 %v13556_v59  ;;  %9052 = vmatpush.msra.mxu0 %v13607_v13  ;;  %v13744_v2 = vld [vmem:[#allocation2 + $0x1b0] sm:$0xff] }
 0x2e9   : > { %15650 = vst [vmem:[#allocation54_spill] sm:$0xff] %v13736_v35  ;;  %8968 = vmatpush.msra.mxu2 %v13740_v60  ;;  %9014 = vmatpush.msrb.mxu1 %v13744_v2  ;;  %v13750_v35 = vld [vmem:[#allocation2 + $0x1a0] sm:$0xff]  ;;  %v13758_v36 = vpop.f32.mrf.mxu2  ;;  %v13762_v4 = vpop.f32.mrf.mxu0 }
 0x2ea   : > { %9041 = vmatpush.msra.mxu3 %v13564_v1  ;;  %9053 = vmatpush.msra.mxu0 %v13617_v28  ;;  %15651 = vst [vmem:[#allocation55_spill] sm:$0xff] %v13758_v36  ;;  %v13766_v29 = vpop.f32.mrf.mxu3 }
 0x2eb   : > { %8969 = vmatpush.msra.mxu2 %v13750_v35  ;;  %9015 = vmatpush.msrb.mxu1 %v13740_v60  ;;  %15652 = vst [vmem:[#allocation56_spill] sm:$0xff] %v13762_v4  ;;  %v13783_v4 = vld [vmem:[#allocation7 + $0x8] sm:$0xff] }
 0x2ec   : > { %9095 = vmatpush.msrb.mxu3 %v13556_v59  ;;  %9054 = vmatpush.msra.mxu0 %v13628_v43  ;;  %15653 = vst [vmem:[#allocation57_spill] sm:$0xff] %v13766_v29  ;;  %v13779_v29 = vld [vmem:[#allocation2 + $0x340] sm:$0xff] }
 0x2ed   : > { %8970 = vmatpush.msra.mxu2 %v13756_v27  ;;  %9016 = vmatpush.msrb.mxu1 %v13750_v35 }
 0x2ee   : > { %9096 = vmatpush.msrb.mxu3 %v13298_v10  ;;  %9055 = vmatpush.msra.mxu0 %v13367_v24  ;;  %v1277_v10 = vld [vmem:[#allocation2 + $0x188] sm:$0xff] }
 0x2ef   : > { %8971 = vmatpush.msra.mxu2 %v1461_v57  ;;  %9017 = vmatpush.msrb.mxu1 %v13756_v27  ;;  %v13771_v36 = vpop.f32.mrf.mxu1 }
 0x2f0   : > { %9097 = vmatpush.msrb.mxu3 %v13291_v47  ;;  %9056 = vmatpush.msra.mxu0 %v13683_v8  ;;  %15654 = vst [vmem:[#allocation58_spill] sm:$0xff] %v13771_v36  ;;  %v13775_v47 = vld [vmem:[#allocation2 + $0x338] sm:$0xff] }
 0x2f1   : > { %8972 = vmatpush.msra.mxu2 %v1277_v10  ;;  %9018 = vmatpush.msrb.mxu1 %v1461_v57  ;;  %v13790_v57 = vpop.f32.mrf.mxu2  ;;  %v13796_v36 = vpop.f32.mrf.mxu0 }
 0x2f2   : > { %9098 = vmatpush.msrb.mxu3 %v13725_v52  ;;  %9057 = vmatpush.msra.mxu0 %v13681_v37  ;;  %15655 = vst [vmem:[#allocation59_spill] sm:$0xff] %v13790_v57  ;;  %v13792_v10 = vpop.f32.mrf.mxu3  ;;  %v13869_v57 = vld [vmem:[#allocation2 + $0x290] sm:$0xff] }
 0x2f3   : > { %8973 = vmatmul.f32.vlgmr.msra.gmra.mxu2 %v13282_v31  ;;  %9125 = vmatpush.msra.mxu1 %v13779_v29  ;;  %15656 = vst [vmem:[#allocation60_spill] sm:$0xff] %v13792_v10  ;;  %v13838_v10 = vld [vmem:[#allocation7 + $0x18] sm:$0xff] }
 0x2f4   : > { %9079 = vmatpush.msrb.mxu2 %v13775_v47  ;;  %9099 = vmatpush.msrb.mxu3 %v13607_v13  ;;  %15657 = vst [vmem:[#allocation61_spill] sm:$0xff] %v13796_v36 }
 0x2f5   : > { %9058 = vmatpush.msra.mxu0 %v13702_v3  ;;  %10977 = vmatmul.msk.f32.vlgmr.msra.gmra.mxu3 %vm7432_vm5, %v13783_v4 }
 0x2f6   : > { %9080 = vmatpush.msrb.mxu2 %v13636_v61  ;;  %9100 = vmatpush.msrb.mxu3 %v13617_v28 }
 0x2f7   : > { %9126 = vmatpush.msra.mxu1 %v13775_v47  ;;  %9059 = vmatpush.msra.mxu0 %v13709_v34  ;;  %v13800_v56 = vpop.f32.mrf.mxu1 }
 0x2f8   : > { %9081 = vmatpush.msrb.mxu2 %v13576_v15  ;;  %9101 = vmatpush.msrb.mxu3 %v13348_v16  ;;  %15658 = vst [vmem:[#allocation62_spill] sm:$0xff] %v13800_v56  ;;  %v13815_v16 = vld [vmem:[#allocation2 + $0x2d8] sm:$0xff] }
 0x2f9   : > { %9127 = vmatpush.msra.mxu1 %v13636_v61  ;;  %9060 = vmatpush.msra.mxu0 %v13447_v7 }
 0x2fa   : > { %9082 = vmatpush.msrb.mxu2 %v13506_v46  ;;  %10975 = vmatmul.msk.f32.vlgmr.msrb.gmra.mxu0 %vm7432_vm5, %v13783_v4  ;;  %v13826_v56 = vpop.f32.mrf.mxu3 }
 0x2fb   : > { %9102 = vmatpush.msrb.mxu3 %v13367_v24  ;;  %9128 = vmatpush.msra.mxu1 %v13576_v15  ;;  %v13820_v24 = vld [vmem:[#allocation2 + $0x2e0] sm:$0xff]  ;;  %15660 = vst [vmem:[#allocation64_spill] sm:$0xff] %v13826_v56  ;;  %v13843_v56 = vld [vmem:[#allocation2 + $0x348] sm:$0xff] }
 0x2fc   : > { %9061 = vmatpush.msra.mxu0 %v13744_v2  ;;  %8976 = vmatmul.f32.gmra.mxu2 %v13437_v41 }
 0x2fd   : > { %9019 = vmatmul.f32.vlgmr.msrb.gmra.mxu1 %v13282_v31  ;;  %9083 = vmatpush.msrb.mxu2 %v13517_v26  ;;  %v13824_v26 = vpop.f32.mrf.mxu2 }
 0x2fe   : > { %9103 = vmatpush.msrb.mxu3 %v13683_v8  ;;  %9129 = vmatpush.msra.mxu1 %v13506_v46  ;;  %15659 = vst [vmem:[#allocation63_spill] sm:$0xff] %v13824_v26  ;;  %v13830_v46 = vpop.f32.mrf.mxu0 }
 0x2ff   : > { %9062 = vmatpush.msra.mxu0 %v13740_v60  ;;  %10978 = vmatmul.msk.f32.gmra.mxu3 %vm7432_vm5, %v13152_v48  ;;  %15661 = vst [vmem:[#allocation65_spill] sm:$0xff] %v13830_v46  ;;  %v13834_v48 = vpop.f32.mrf.mxu1  ;;  %v13867_v46 = vld [vmem:[#allocation2 + $0x288] sm:$0xff] }
 0x300   : > { %9084 = vmatpush.msrb.mxu2 %v13815_v16  ;;  %9104 = vmatpush.msrb.mxu3 %v13681_v37  ;;  %15662 = vst [vmem:[#allocation66_spill] sm:$0xff] %v13834_v48 }
 0x301   : > { %9130 = vmatpush.msra.mxu1 %v13820_v24  ;;  %9063 = vmatpush.msra.mxu0 %v13750_v35 }
 0x302   : > { %9085 = vmatpush.msrb.mxu2 %v13713_v5  ;;  %9105 = vmatpush.msrb.mxu3 %v13702_v3  ;;  %v13859_v26 = vpop.f32.mrf.mxu3 }
 0x303   : > { %9131 = vmatpush.msra.mxu1 %v13815_v16  ;;  %9064 = vmatpush.msra.mxu0 %v13756_v27  ;;  %15665 = vst [vmem:[#allocation69_spill] sm:$0xff] %v13859_v26 }
 0x304   : > { %9086 = vmatpush.msrb.mxu2 %v13638_v6  ;;  %10976 = vmatmul.msk.f32.gmra.mxu0 %vm7432_vm5, %v13838_v10 }
 0x305   : > { %9106 = vmatpush.msrb.mxu3 %v13440_v0  ;;  %9132 = vmatpush.msra.mxu1 %v13713_v5  ;;  %v13857_v48 = vpop.f32.mrf.mxu2 }
 0x306   : > { %9171 = vmatpush.msrb.mxu0 %v13843_v56  ;;  %9022 = vmatmul.f32.gmra.mxu1 %v13437_v41  ;;  %15664 = vst [vmem:[#allocation68_spill] sm:$0xff] %v13857_v48  ;;  %v15667_v48 = vrot.slane %v13582_v53, 1 }
 0x307   : > { %9087 = vmatpush.msrb.mxu2 %v13556_v59  ;;  %9107 = vmatpush.msrb.mxu3 %v13447_v7  ;;  %v13851_v27 = vpop.permute.xlu1 %337  ;;  %v13863_v7 = vpop.f32.mrf.mxu0 }
 0x308   : > { %9133 = vmatpush.msra.mxu1 %v13638_v6  ;;  %15663 = vst [vmem:[#allocation67_spill] sm:$0xff] %v13851_v27  ;;  %9172 = vmatpush.msrb.mxu0 %v13779_v29  ;;  %v15556_v0 = vrot.slane %v13851_v27, 1  ;;  %v13876_v36 = vpop.f32.mrf.mxu1 }
 0x309   : > { %10979 = vmatmul.msk.f32.vlgmr.msrb.gmra.mxu2 %vm7432_vm5, %v13783_v4  ;;  %15666 = vst [vmem:[#allocation70_spill] sm:$0xff] %v13863_v7  ;;  %9108 = vmatpush.msrb.mxu3 %v13744_v2  ;;  %v13884_v7 = vld [vmem:[#allocation2 + $0x280] sm:$0xff] }
 0x30a   : > { %9141 = vmatpush.msra.mxu2 %v13638_v6  ;;  %9187 = vmatpush.msrb.mxu1 %v13713_v5  ;;  %v394_v26 = vsel %vm362_vm1, %v15667_v48, %v15556_v0  ;;  %15668 = vst [vmem:[#allocation71_spill] sm:$0xff] %v13876_v36  ;;  %v13898_v48 = vld [vmem:[#allocation2 + $0x2e8] sm:$0xff]  ;;  %v13916_v18 = vpop.f32.mrf.mxu3 }
 0x30b   : > { %9173 = vmatpush.msrb.mxu0 %v13775_v47  ;;  %v395_v6 = vsel %vm364_vm3, %v13582_v53, %v394_v26  ;;  %9109 = vmatpush.msrb.mxu3 %v13740_v60  ;;  %v13892_v53 = vld [vmem:[#allocation2 + $0x278] sm:$0xff]  ;;  %v13896_v26 = vld [vmem:[#allocation2 + $0x350] sm:$0xff]  ;;  %15671 = vst [vmem:[#allocation74_spill] sm:$0xff] %v13916_v18  ;;  %v15675_v18 = vrot.slane %v13630_v40, 1 }
 0x30c   : > { %9142 = vmatpush.msra.mxu2 %v13867_v46  ;;  %9188 = vmatpush.msrb.mxu1 %v13869_v57  ;;  %464 = vst [vmem:[#allocation2 + $0x3c1] ss:$8 sm:$0xf] %v395_v6 }
 0x30d   : > { %9174 = vmatpush.msrb.mxu0 %v13636_v61  ;;  %465 = vst [vmem:[#allocation2 + $0x3c1] ss:$8 sm:$0xf0] %v395_v6  ;;  %9110 = vmatpush.msrb.mxu3 %v13750_v35  ;;  %v13903_v35 = vld [vmem:[%s11427_s28 + $0x88] sm:$0xff]  ;;  %v13914_v36 = vpop.f32.mrf.mxu2 }
 0x30e   : > { %9143 = vmatpush.msra.mxu2 %v13884_v7  ;;  %9189 = vmatpush.msrb.mxu1 %v13867_v46  ;;  %15670 = vst [vmem:[#allocation73_spill] sm:$0xff] %v13914_v36 }
 0x30f   : > { %9175 = vmatpush.msrb.mxu0 %v13576_v15  ;;  %9111 = vmatmul.f32.vlgmr.msrb.gmra.mxu3 %v13282_v31  ;;  %v13920_v22 = vpop.f32.mrf.mxu0 }
 0x310   : > { %9065 = vmatmul.f32.vlgmr.msra.gmra.mxu0 %v13282_v31  ;;  %9144 = vmatpush.msra.mxu2 %v13892_v53  ;;  %15672 = vst [vmem:[#allocation75_spill] sm:$0xff] %v13920_v22  ;;  %v13935_v21 = vpop.f32.mrf.mxu1 }
 0x311   : > { %9190 = vmatpush.msrb.mxu1 %v13884_v7  ;;  %9217 = vmatpush.msra.mxu3 %v13896_v26  ;;  %v13905_v15 = vpop.permute.xlu0 %746 }
 0x312   : > { %9176 = vmatpush.msrb.mxu0 %v13898_v48  ;;  %15669 = vst [vmem:[#allocation72_spill] sm:$0xff] %v13905_v15  ;;  %v13907_v6 = vpop.permute.xlu1 %950  ;;  %10980 = vmatmul.msk.f32.gmra.mxu2 %vm7432_vm5, %v13838_v10  ;;  %v15561_v31 = vrot.slane %v13905_v15, 1 }
 0x313   : > { %9191 = vmatpush.msrb.mxu1 %v13892_v53  ;;  %9145 = vmatpush.msra.mxu2 %v13725_v52  ;;  %v15674_v36 = vrot.slane %v13907_v6, 1 }
 0x314   : > { %9218 = vmatpush.msra.mxu3 %v13843_v56  ;;  %9177 = vmatpush.msrb.mxu0 %v13820_v24  ;;  %v802_v0 = vsel %vm362_vm1, %v15673_v44, %v15561_v31 }
 0x315   : > { %544 = vrot.lane.b32.xlu0 %v13903_v35, %s11309_s30  ;;  %v1006_v27 = vsel %vm362_vm1, %v15675_v18, %v15674_v36  ;;  %748 = vrot.lane.b32.xlu1 %v13903_v35, %s11308_s20  ;;  %v803_v22 = vsel %vm772_vm0, %v13669_v54, %v802_v0  ;;  %v13951_v18 = vld [vmem:[#allocation2 + $0x228] sm:$0xff]  ;;  %v13953_v36 = vld [vmem:[#allocation2 + $0x230] sm:$0xff]  ;;  %v13979_v0 = vpop.f32.mrf.mxu2 }
 0x316   : > { %9146 = vmatpush.msra.mxu2 %v13607_v13  ;;  %v1007_v15 = vsel %vm976_vm4, %v13630_v40, %v1006_v27  ;;  %9192 = vmatpush.msrb.mxu1 %v13725_v52  ;;  %872 = vst [vmem:[#allocation2 + $0x3c3] ss:$8 sm:$0xf] %v803_v22  ;;  %v15676_v40 = vrot.slane %v13632_v9, 1  ;;  %v13971_v27 = vpop.f32.mrf.mxu3 }
 0x317   : > { %9219 = vmatpush.msra.mxu3 %v13779_v29  ;;  %v13946_v44 = vpop.permute.xlu2 %542  ;;  %9178 = vmatpush.msrb.mxu0 %v13815_v16  ;;  %873 = vst [vmem:[#allocation2 + $0x3c3] ss:$8 sm:$0xf0] %v803_v22  ;;  %v13967_v22 = vld [vmem:[#allocation2 + $0x220] sm:$0xff] }
 0x318   : > { %10981 = vmatmul.msk.f32.vlgmr.msra.gmra.mxu1 %vm7432_vm5, %v13783_v4  ;;  %v15562_v13 = vrot.slane %v13946_v44, 1  ;;  %9147 = vmatpush.msra.mxu2 %v13951_v18  ;;  %1076 = vst [vmem:[#allocation2 + $0x3c4] ss:$8 sm:$0xf] %v1007_v15 }
 0x319   : > { %9193 = vmatpush.msrb.mxu1 %v13953_v36  ;;  %9220 = vmatpush.msra.mxu3 %v13775_v47  ;;  %1077 = vst [vmem:[#allocation2 + $0x3c4] ss:$8 sm:$0xf0] %v1007_v15  ;;  %v13981_v15 = vpop.f32.mrf.mxu1 }
 0x31a   : > { %9179 = vmatpush.msrb.mxu0 %v13713_v5  ;;  %v598_v54 = vsel %vm362_vm1, %v15676_v40, %v15562_v13  ;;  %9114 = vmatmul.f32.gmra.mxu3 %v13437_v41  ;;  %v13977_v5 = vld [vmem:[#allocation2 + $0x218] sm:$0xff]  ;;  %v13987_v40 = vpop.f32.mrf.mxu0  ;;  %v14138_v13 = vld [vmem:[#allocation2 + $0x2c8] sm:$0xff] }
 0x31b   : > { %9068 = vmatmul.f32.gmra.mxu0 %v13437_v41  ;;  %v599_v52 = vsel %vm568_vm2, %v13632_v9, %v598_v54  ;;  %9148 = vmatpush.msra.mxu2 %v13967_v22  ;;  %v13985_v9 = vld [vmem:[#allocation2 + $0x2f0] sm:$0xff] }
 0x31c   : > { %9194 = vmatpush.msrb.mxu1 %v13951_v18  ;;  %668 = vst [vmem:[#allocation2 + $0x3c2] ss:$8 sm:$0xf] %v599_v52  ;;  %9221 = vmatpush.msra.mxu3 %v13636_v61  ;;  %v14000_v61 = vld [vmem:[#allocation2 + $0x1c8] sm:$0xff] }
 0x31d   : > { %9233 = vmatpush.msra.mxu0 %v13815_v16  ;;  %669 = vst [vmem:[#allocation2 + $0x3c2] ss:$8 sm:$0xf0] %v599_v52  ;;  %9149 = vmatpush.msra.mxu2 %v13977_v5  ;;  %v14020_v52 = vld [vmem:[#allocation2 + $0x1b8] sm:$0xff] }
 0x31e   : > { %9195 = vmatpush.msrb.mxu1 %v13967_v22  ;;  %9222 = vmatpush.msra.mxu3 %v13985_v9 }
 0x31f   : > { %9234 = vmatpush.msra.mxu0 %v13551_v39  ;;  %9150 = vmatpush.msra.mxu2 %v13683_v8  ;;  %v2018_v39 = vld [vmem:[#allocation2 + $0x1d0] sm:$0xff] }
 0x320   : > { %9196 = vmatpush.msrb.mxu1 %v13977_v5  ;;  %9223 = vmatpush.msra.mxu3 %v13898_v48 }
 0x321   : > { %9235 = vmatpush.msra.mxu0 %v13869_v57  ;;  %10982 = vmatmul.msk.f32.gmra.mxu1 %vm7432_vm5, %v13838_v10  ;;  %v14005_v57 = vpop.f32.mrf.mxu3  ;;  %v14016_v54 = vpop.f32.mrf.mxu1 }
 0x322   : > { %9151 = vmatpush.msra.mxu2 %v13681_v37  ;;  %9197 = vmatpush.msrb.mxu1 %v13683_v8  ;;  %15677 = vst [vmem:[#allocation76_spill] sm:$0xff] %v14005_v57  ;;  %v14009_v37 = vld [vmem:[#allocation2 + $0x1c0] sm:$0xff]  ;;  %v211_v8 = vld [vmem:[%s11427_s28 + $0x78] sm:$0xff]  ;;  %v14022_v31 = vpop.f32.mrf.mxu0 }
 0x323   : > { %9224 = vmatpush.msra.mxu3 %v13820_v24  ;;  %9236 = vmatpush.msra.mxu0 %v13867_v46  ;;  %v14014_v46 = vpop.f32.mrf.mxu2  ;;  %15678 = vst [vmem:[#allocation77_spill] sm:$0xff] %v14016_v54  ;;  %v14244_v54 = vld [vmem:[#allocation2 + $0x208] sm:$0xff] }
 0x324   : > { %9152 = vmatpush.msra.mxu2 %v14000_v61  ;;  %9198 = vmatpush.msrb.mxu1 %v2018_v39  ;;  %260 = vst [vmem:[#allocation2 + $0x3c0] ss:$8 sm:$0xf0] %v211_v8 }
 0x325   : > { %9225 = vmatpush.msra.mxu3 %v13815_v16  ;;  %9237 = vmatpush.msra.mxu0 %v13884_v7  ;;  %259 = vst [vmem:[#allocation2 + $0x3c0] ss:$8 sm:$0xf] %v211_v8  ;;  %v14038_v8 = vld [vmem:[#allocation7] sm:$0xff] }
 0x326   : > { %9153 = vmatpush.msra.mxu2 %v14009_v37  ;;  %9199 = vmatpush.msrb.mxu1 %v14000_v61 }
 0x327   : > { %9279 = vmatpush.msrb.mxu3 %v13547_v11  ;;  %9238 = vmatpush.msra.mxu0 %v13892_v53  ;;  %v2939_v11 = vld [vmem:[#allocation2 + $0x238] sm:$0xff] }
 0x328   : > { %339 = vrot.lane.b32.xlu2 %v13903_v35, %s11310_s29  ;;  %9154 = vmatpush.msra.mxu2 %v14020_v52 }
 0x329   : > { %9280 = vmatpush.msrb.mxu3 %v13556_v59  ;;  %9200 = vmatpush.msrb.mxu1 %v14009_v37  ;;  %v14034_v59 = vpop.f32.mrf.mxu3 }
 0x32a   : > { %9239 = vmatpush.msra.mxu0 %v2939_v11  ;;  %9155 = vmatpush.msra.mxu2 %v13744_v2  ;;  %15679 = vst [vmem:[#allocation78_spill] sm:$0xff] %v14034_v59  ;;  %v14042_v11 = vld [vmem:[#allocation2 + $0x380] sm:$0xff] }
 0x32b   : > { %9281 = vmatpush.msrb.mxu3 %v13564_v1  ;;  %9201 = vmatpush.msrb.mxu1 %v14020_v52  ;;  %v5699_v1 = vld [vmem:[#allocation2 + $0x358] sm:$0xff] }
 0x32c   : > { %9240 = vmatpush.msra.mxu0 %v13953_v36  ;;  %9156 = vmatpush.msra.mxu2 %v13740_v60  ;;  %v14044_v36 = vpop.f32.mrf.mxu2  ;;  %v14049_v60 = vpop.f32.mrf.mxu0 }
 0x32d   : > { %9282 = vmatpush.msrb.mxu3 %v13574_v55  ;;  %9202 = vmatpush.msrb.mxu1 %v13744_v2  ;;  %15680 = vst [vmem:[#allocation79_spill] sm:$0xff] %v14044_v36  ;;  %v14046_v55 = vpop.f32.mrf.mxu1  ;;  %v3128_v2 = vld [vmem:[#allocation2 + $0x2a0] sm:$0xff] }
 0x32e   : > { %9241 = vmatpush.msra.mxu0 %v13951_v18  ;;  %9157 = vmatmul.f32.vlgmr.msra.gmra.mxu2 %v14038_v8  ;;  %15681 = vst [vmem:[#allocation80_spill] sm:$0xff] %v14046_v55  ;;  %v14062_v18 = vld [vmem:[#allocation2 + $0x370] sm:$0xff]  ;;  %v14236_v55 = vld [vmem:[#allocation2 + $0x248] sm:$0xff] }
 0x32f   : > { %9283 = vmatpush.msrb.mxu3 %v13588_v62  ;;  %9263 = vmatpush.msrb.mxu2 %v5699_v1  ;;  %15682 = vst [vmem:[#allocation81_spill] sm:$0xff] %v14049_v60  ;;  %v14055_v62 = vld [vmem:[#allocation2 + $0x378] sm:$0xff]  ;;  %v14283_v60 = vld [vmem:[#allocation2 + $0x3a0] sm:$0xff] }
 0x330   : > { %9309 = vmatpush.msra.mxu1 %v14042_v11  ;;  %9242 = vmatpush.msra.mxu0 %v13967_v22  ;;  %v2019_v1 = vld [vmem:[#allocation2 + $0x1d8] sm:$0xff]  ;;  %15705 = vst [vmem:[#allocation104_spill] sm:$0xff] %v14236_v55 }
 0x331   : > { %10985 = vmatmul.msk.f32.vlgmr.msra.gmra.mxu3 %vm7432_vm5, %v13783_v4  ;;  %9264 = vmatpush.msrb.mxu2 %v13896_v26  ;;  %v14070_v26 = vld [vmem:[#allocation2 + $0x368] sm:$0xff] }
 0x332   : > { %9284 = vmatpush.msrb.mxu3 %v3128_v2  ;;  %9310 = vmatpush.msra.mxu1 %v14055_v62 }
 0x333   : > { %952 = vrot.lane.b32.xlu2 %v13903_v35, %s11311_s16  ;;  %9243 = vmatpush.msra.mxu0 %v13977_v5  ;;  %v14072_v35 = vpop.f32.mrf.mxu3 }
 0x334   : > { %9265 = vmatpush.msrb.mxu2 %v13843_v56  ;;  %9285 = vmatpush.msrb.mxu3 %v13617_v28  ;;  %15683 = vst [vmem:[#allocation82_spill] sm:$0xff] %v14072_v35  ;;  %v14077_v56 = vpop.f32.mrf.mxu2 }
 0x335   : > { %9311 = vmatpush.msra.mxu1 %v14062_v18  ;;  %9244 = vmatpush.msra.mxu0 %v2019_v1  ;;  %15684 = vst [vmem:[#allocation83_spill] sm:$0xff] %v14077_v56  ;;  %v14079_v28 = vpop.f32.mrf.mxu1  ;;  %v14118_v1 = vld [vmem:[#allocation7 + $0x10] sm:$0xff] }
 0x336   : > { %9266 = vmatpush.msrb.mxu2 %v13779_v29  ;;  %10983 = vmatmul.msk.f32.vlgmr.msrb.gmra.mxu0 %vm7432_vm5, %v13783_v4  ;;  %15685 = vst [vmem:[#allocation84_spill] sm:$0xff] %v14079_v28  ;;  %v14083_v29 = vld [vmem:[#allocation2 + $0x360] sm:$0xff]  ;;  %v14223_v56 = vld [vmem:[#allocation2 + $0x250] sm:$0xff] }
 0x337   : > { %9286 = vmatpush.msrb.mxu3 %v13628_v43  ;;  %9312 = vmatpush.msra.mxu1 %v14070_v26  ;;  %v14085_v43 = vpop.f32.mrf.mxu0  ;;  %v898_v28 = vld [vmem:[%s11427_s28 + $0x90] sm:$0x1]  ;;  %15702 = vst [vmem:[#allocation101_spill] sm:$0xff] %v14223_v56 }
 0x338   : > { %9245 = vmatpush.msra.mxu0 %v2018_v39  ;;  %9160 = vmatmul.f32.gmra.mxu2 %v13437_v41  ;;  %15686 = vst [vmem:[#allocation85_spill] sm:$0xff] %v14085_v43  ;;  %v14089_v39 = vld [vmem:[#allocation2 + $0x2f8] sm:$0xff]  ;;  %v14094_v41 = vld [vmem:[#allocation2 + $0x320] sm:$0xff]  ;;  %v14194_v43 = vld [vmem:[#allocation2 + $0x268] sm:$0xff] }
 0x339   : > { %9203 = vmatmul.f32.vlgmr.msrb.gmra.mxu1 %v14038_v8  ;;  %9267 = vmatpush.msrb.mxu2 %v13775_v47  ;;  %v14100_v47 = vld [vmem:[#allocation2 + $0x318] sm:$0xff] }
 0x33a   : > { %9287 = vmatpush.msrb.mxu3 %v13646_v12  ;;  %9313 = vmatpush.msra.mxu1 %v14083_v29  ;;  %v2208_v12 = vld [vmem:[#allocation2 + $0x240] sm:$0xff] }
 0x33b   : > { %9246 = vmatpush.msra.mxu0 %v14000_v61  ;;  %10986 = vmatmul.msk.f32.gmra.mxu3 %vm7432_vm5, %v13838_v10  ;;  %v14103_v61 = vpop.f32.mrf.mxu3 }
 0x33c   : > { %9268 = vmatpush.msrb.mxu2 %v14089_v39  ;;  %9288 = vmatpush.msrb.mxu3 %v13666_v30  ;;  %15687 = vst [vmem:[#allocation86_spill] sm:$0xff] %v14103_v61  ;;  %v14110_v30 = vld [vmem:[#allocation2 + $0x310] sm:$0xff] }
 0x33d   : > { %9314 = vmatpush.msra.mxu1 %v14094_v41  ;;  %9247 = vmatpush.msra.mxu0 %v14009_v37  ;;  %v14112_v37 = vld [vmem:[#allocation2 + $0x388] sm:$0xff]  ;;  %v14114_v2 = vpop.f32.mrf.mxu1 }
 0x33e   : > { %9269 = vmatpush.msrb.mxu2 %v13985_v9  ;;  %9289 = vmatpush.msrb.mxu3 %v2208_v12  ;;  %15688 = vst [vmem:[#allocation87_spill] sm:$0xff] %v14114_v2  ;;  %v285_v12 = vld [vmem:[%s11427_s28 + $0x90] sm:$0x1] }
 0x33f   : > { %9315 = vmatpush.msra.mxu1 %v14100_v47  ;;  %9248 = vmatpush.msra.mxu0 %v14020_v52  ;;  %v14128_v52 = vpop.f32.mrf.mxu0  ;;  %v14146_v2 = vld [vmem:[#allocation2 + $0x2c0] sm:$0xff] }
 0x340   : > { %9270 = vmatpush.msrb.mxu2 %v13898_v48  ;;  %10984 = vmatmul.msk.f32.gmra.mxu0 %vm7432_vm5, %v13838_v10  ;;  %v14122_v48 = vld [vmem:[#allocation2 + $0x308] sm:$0xff]  ;;  %15690 = vst [vmem:[#allocation89_spill] sm:$0xff] %v14128_v52 }
 0x341   : > { %9290 = vmatpush.msrb.mxu3 %v13702_v3  ;;  %9316 = vmatpush.msra.mxu1 %v14110_v30  ;;  %v14124_v3 = vpop.f32.mrf.mxu2 }
 0x342   : > { %9355 = vmatpush.msrb.mxu0 %v14112_v37  ;;  %9206 = vmatmul.f32.gmra.mxu1 %v14118_v1  ;;  %15689 = vst [vmem:[#allocation88_spill] sm:$0xff] %v14124_v3  ;;  %v490_v3 = vld [vmem:[%s11427_s28 + $0x90] sm:$0x1] }
 0x343   : > { %9271 = vmatpush.msrb.mxu2 %v13820_v24  ;;  %9291 = vmatpush.msrb.mxu3 %v13709_v34  ;;  %v14142_v34 = vld [vmem:[#allocation2 + $0x2d0] sm:$0xff]  ;;  %v14148_v61 = vpop.f32.mrf.mxu3 }
 0x344   : > { %9317 = vmatpush.msra.mxu1 %v14122_v48  ;;  %9356 = vmatpush.msrb.mxu0 %v14042_v11  ;;  %15691 = vst [vmem:[#allocation90_spill] sm:$0xff] %v14148_v61  ;;  %v14161_v61 = vld [vmem:[#allocation2 + $0x390] sm:$0xff] }
 0x345   : > { %10987 = vmatmul.msk.f32.vlgmr.msrb.gmra.mxu2 %vm7432_vm5, %v13783_v4  ;;  %9292 = vmatpush.msrb.mxu3 %v13719_v38  ;;  %v1288_v38 = vld [vmem:[#allocation2 + $0x1e0] sm:$0xff] }
 0x346   : > { %9325 = vmatpush.msra.mxu2 %v14122_v48  ;;  %9371 = vmatpush.msrb.mxu1 %v14110_v30 }
 0x347   : > { %9357 = vmatpush.msrb.mxu0 %v14055_v62  ;;  %341 = vrot.lane.b32.xlu0 %v285_v12, %s11310_s29  ;;  %v14153_v12 = vpop.f32.mrf.mxu1 }
 0x348   : > { %9326 = vmatpush.msra.mxu2 %v14138_v13  ;;  %9372 = vmatpush.msrb.mxu1 %v14142_v34  ;;  %15692 = vst [vmem:[#allocation91_spill] sm:$0xff] %v14153_v12  ;;  %v14169_v12 = vpop.f32.mrf.mxu0 }
 0x349   : > { %9293 = vmatpush.msrb.mxu3 %v13731_v51  ;;  %9358 = vmatpush.msrb.mxu0 %v14062_v18  ;;  %v14157_v51 = vld [vmem:[#allocation2 + $0x2b8] sm:$0xff]  ;;  %v14163_v35 = vpop.f32.mrf.mxu2  ;;  %15694 = vst [vmem:[#allocation93_spill] sm:$0xff] %v14169_v12  ;;  %v14186_v12 = vld [vmem:[#allocation2 + $0x2a8] sm:$0xff] }
 0x34a   : > { %9327 = vmatpush.msra.mxu2 %v14146_v2  ;;  %9373 = vmatpush.msrb.mxu1 %v14138_v13  ;;  %15693 = vst [vmem:[#allocation92_spill] sm:$0xff] %v14163_v35 }
 0x34b   : > { %9294 = vmatpush.msrb.mxu3 %v1288_v38  ;;  %9359 = vmatpush.msrb.mxu0 %v14070_v26  ;;  %v14167_v38 = vld [vmem:[#allocation2 + $0x328] sm:$0xff]  ;;  %v14174_v26 = vld [vmem:[#allocation2 + $0x2b0] sm:$0xff]  ;;  %v14182_v35 = vpop.f32.mrf.mxu3  ;;  %15696 = vst [vmem:[#allocation95_spill] sm:$0xff] %v14186_v12 }
 0x34c   : > { %9295 = vmatmul.f32.vlgmr.msrb.gmra.mxu3 %v14038_v8  ;;  %9249 = vmatmul.f32.vlgmr.msra.gmra.mxu0 %v14038_v8  ;;  %15695 = vst [vmem:[#allocation94_spill] sm:$0xff] %v14182_v35 }
 0x34d   : > { %9328 = vmatpush.msra.mxu2 %v14157_v51  ;;  %9374 = vmatpush.msrb.mxu1 %v14146_v2 }
 0x34e   : > { %9401 = vmatpush.msra.mxu3 %v14161_v61  ;;  %9360 = vmatpush.msrb.mxu0 %v14167_v38 }
 0x34f   : > { %10988 = vmatmul.msk.f32.gmra.mxu2 %vm7432_vm5, %v13838_v10  ;;  %9375 = vmatpush.msrb.mxu1 %v14157_v51  ;;  %v14190_v52 = vpop.f32.mrf.mxu1 }
 0x350   : > { %9329 = vmatpush.msra.mxu2 %v14174_v26  ;;  %9402 = vmatpush.msra.mxu3 %v14112_v37  ;;  %15697 = vst [vmem:[#allocation96_spill] sm:$0xff] %v14190_v52  ;;  %v14205_v35 = vpop.f32.mrf.mxu0  ;;  %v14209_v52 = vld [vmem:[#allocation2 + $0x260] sm:$0xff] }
 0x351   : > { %9361 = vmatpush.msrb.mxu0 %v14094_v41  ;;  %954 = vrot.lane.b32.xlu0 %v898_v28, %s11311_s16  ;;  %v14199_v28 = vld [vmem:[#allocation2 + $0x270] sm:$0xff]  ;;  %15699 = vst [vmem:[#allocation98_spill] sm:$0xff] %v14205_v35 }
 0x352   : > { %546 = vrot.lane.b32.xlu1 %v490_v3, %s11309_s30  ;;  %9330 = vmatpush.msra.mxu2 %v14186_v12  ;;  %v14201_v3 = vpop.f32.mrf.mxu2  ;;  %15700 = vst [vmem:[#allocation99_spill] sm:$0xff] %v14209_v52  ;;  %v14219_v35 = vld [vmem:[#allocation2 + $0x330] sm:$0xff] }
 0x353   : > { %9376 = vmatpush.msrb.mxu1 %v14174_v26  ;;  %9403 = vmatpush.msra.mxu3 %v14042_v11  ;;  %15698 = vst [vmem:[#allocation97_spill] sm:$0xff] %v14201_v3  ;;  %v14215_v3 = vld [vmem:[#allocation2 + $0x258] sm:$0xff]  ;;  %v14225_v59 = vpop.f32.mrf.mxu3  ;;  %v1473_v12 = vld [vmem:[#allocation2 + $0x1f0] sm:$0xff] }
 0x354   : > { %9362 = vmatpush.msrb.mxu0 %v14100_v47  ;;  %10989 = vmatmul.msk.f32.vlgmr.msra.gmra.mxu1 %vm7432_vm5, %v13783_v4  ;;  %15701 = vst [vmem:[#allocation100_spill] sm:$0xff] %v14215_v3 }
 0x355   : > { %9331 = vmatpush.msra.mxu2 %v14194_v43  ;;  %9377 = vmatpush.msrb.mxu1 %v14199_v28  ;;  %15703 = vst [vmem:[#allocation102_spill] sm:$0xff] %v14225_v59 }
 0x356   : > { %9404 = vmatpush.msra.mxu3 %v14055_v62  ;;  %9363 = vmatpush.msrb.mxu0 %v14110_v30 }
 0x357   : > { %9298 = vmatmul.f32.gmra.mxu3 %v14118_v1  ;;  %9252 = vmatmul.f32.gmra.mxu0 %v14118_v1 }
 0x358   : > { %9332 = vmatpush.msra.mxu2 %v14209_v52  ;;  %9378 = vmatpush.msrb.mxu1 %v14194_v43  ;;  %v14248_v57 = vpop.f32.mrf.mxu0 }
 0x359   : > { %9405 = vmatpush.msra.mxu3 %v14062_v18  ;;  %9417 = vmatpush.msra.mxu0 %v14100_v47  ;;  %v14231_v18 = vpop.f32.mrf.mxu1  ;;  %15707 = vst [vmem:[#allocation106_spill] sm:$0xff] %v14248_v57  ;;  %v14262_v57 = vld [vmem:[#allocation2 + $0x1f8] sm:$0xff] }
 0x35a   : > { %9333 = vmatpush.msra.mxu2 %v14215_v3  ;;  %9379 = vmatpush.msrb.mxu1 %v14209_v52  ;;  %15704 = vst [vmem:[#allocation103_spill] sm:$0xff] %v14231_v18  ;;  %v14240_v59 = vpop.f32.mrf.mxu2  ;;  %v14246_v18 = vld [vmem:[#allocation2 + $0x210] sm:$0xff] }
 0x35b   : > { %9406 = vmatpush.msra.mxu3 %v14219_v35  ;;  %9418 = vmatpush.msra.mxu0 %v13815_v16  ;;  %15706 = vst [vmem:[#allocation105_spill] sm:$0xff] %v14240_v59  ;;  %v14258_v59 = vpop.f32.mrf.mxu3 }
 0x35c   : > { %9334 = vmatpush.msra.mxu2 %v14223_v56  ;;  %9380 = vmatpush.msrb.mxu1 %v14215_v3  ;;  %15708 = vst [vmem:[#allocation107_spill] sm:$0xff] %v14258_v59  ;;  %v1289_v59 = vld [vmem:[#allocation2 + $0x1e8] sm:$0xff] }
 0x35d   : > { %9407 = vmatpush.msra.mxu3 %v14167_v38  ;;  %9419 = vmatpush.msra.mxu0 %v14142_v34 }
 0x35e   : > { %10990 = vmatmul.msk.f32.gmra.mxu1 %vm7432_vm5, %v13838_v10  ;;  %9335 = vmatpush.msra.mxu2 %v14236_v55  ;;  %v14254_v55 = vld [vmem:[#allocation2 + $0x200] sm:$0xff] }
 0x35f   : > { %9381 = vmatpush.msrb.mxu1 %v14223_v56  ;;  %9408 = vmatpush.msra.mxu3 %v14094_v41 }
 0x360   : > { %9420 = vmatpush.msra.mxu0 %v14138_v13  ;;  %9336 = vmatpush.msra.mxu2 %v14244_v54 }
 0x361   : > { %9382 = vmatpush.msrb.mxu1 %v14246_v18  ;;  %9409 = vmatpush.msra.mxu3 %v14100_v47  ;;  %v14266_v56 = vpop.f32.mrf.mxu1 }
 0x362   : > { %9421 = vmatpush.msra.mxu0 %v14146_v2  ;;  %9337 = vmatpush.msra.mxu2 %v14254_v55  ;;  %15709 = vst [vmem:[#allocation108_spill] sm:$0xff] %v14266_v56  ;;  %v14277_v56 = vpop.f32.mrf.mxu0 }
 0x363   : > { %9463 = vmatpush.msrb.mxu3 %v14094_v41  ;;  %9383 = vmatpush.msrb.mxu1 %v14244_v54  ;;  %15711 = vst [vmem:[#allocation110_spill] sm:$0xff] %v14277_v56 }
 0x364   : > { %9422 = vmatpush.msra.mxu0 %v14157_v51  ;;  %9338 = vmatpush.msra.mxu2 %v14262_v57 }
 0x365   : > { %9464 = vmatpush.msrb.mxu3 %v13820_v24  ;;  %9384 = vmatpush.msrb.mxu1 %v14254_v55  ;;  %v14274_v24 = vpop.f32.mrf.mxu2 }
 0x366   : > { %9423 = vmatpush.msra.mxu0 %v13892_v53  ;;  %9339 = vmatpush.msra.mxu2 %v1473_v12  ;;  %15710 = vst [vmem:[#allocation109_spill] sm:$0xff] %v14274_v24 }
 0x367   : > { %9465 = vmatpush.msrb.mxu3 %v13815_v16  ;;  %9385 = vmatpush.msrb.mxu1 %v14262_v57  ;;  %v14280_v16 = vld [vmem:[#allocation2 + $0x398] sm:$0xff] }
 0x368   : > { %9424 = vmatpush.msra.mxu0 %v14199_v28  ;;  %9340 = vmatpush.msra.mxu2 %v1289_v59  ;;  %v694_v59 = vld [vmem:[%s11427_s28 + $0x90] sm:$0x1] }
 0x369   : > { %9466 = vmatpush.msrb.mxu3 %v14142_v34  ;;  %9386 = vmatpush.msrb.mxu1 %v1473_v12  ;;  %v14291_v12 = vpop.f32.mrf.mxu3  ;;  %v14297_v24 = vpop.f32.mrf.mxu1 }
 0x36a   : > { %9425 = vmatpush.msra.mxu0 %v14194_v43  ;;  %9341 = vmatmul.f32.vlgmr.msra.gmra.mxu2 %v14038_v8  ;;  %15712 = vst [vmem:[#allocation111_spill] sm:$0xff] %v14291_v12  ;;  %v14316_v12 = vpop.f32.mrf.mxu0 }
 0x36b   : > { %9467 = vmatpush.msrb.mxu3 %v14138_v13  ;;  %9447 = vmatpush.msrb.mxu2 %v14280_v16  ;;  %15713 = vst [vmem:[#allocation112_spill] sm:$0xff] %v14297_v24  ;;  %v7526_v24 = vadd.f32 %v13049_v32, %v13222_v58  ;;  %v14333_v32 = vld [vmem:[#allocation2 + $0x340] sm:$0xff] }
 0x36c   : > { %9493 = vmatpush.msra.mxu1 %v14283_v60  ;;  %9426 = vmatpush.msra.mxu0 %v14209_v52  ;;  %15715 = vst [vmem:[#allocation114_spill] sm:$0xff] %v14316_v12  ;;  %v15724_v12 = vld [vmem:[#allocation17_spill] sm:$0xff] }
 0x36d   : > { %10993 = vmatmul.msk.f32.vlgmr.msra.gmra.mxu3 %vm7432_vm5, %v13783_v4  ;;  %9448 = vmatpush.msrb.mxu2 %v14161_v61 }
 0x36e   : > { %9468 = vmatpush.msrb.mxu3 %v14146_v2  ;;  %9494 = vmatpush.msra.mxu1 %v14280_v16 }
 0x36f   : > { %750 = vrot.lane.b32.xlu2 %v694_v59, %s11308_s20  ;;  %9427 = vmatpush.msra.mxu0 %v14215_v3  ;;  %v14308_v59 = vpop.f32.mrf.mxu2 }
 0x370   : > { %9449 = vmatpush.msrb.mxu2 %v14112_v37  ;;  %9469 = vmatpush.msrb.mxu3 %v13884_v7  ;;  %15714 = vst [vmem:[#allocation113_spill] sm:$0xff] %v14308_v59  ;;  %v7480_v7 = vadd.f32 %v13170_v42, %v13287_v25  ;;  %v14326_v42 = vld [vmem:[#allocation2 + $0x338] sm:$0xff] }
 0x371   : > { %9495 = vmatpush.msra.mxu1 %v14161_v61  ;;  %9428 = vmatpush.msra.mxu0 %v13977_v5  ;;  %v14320_v56 = vpop.f32.mrf.mxu3  ;;  %v14328_v25 = vpop.f32.mrf.mxu1 }
 0x372   : > { %9450 = vmatpush.msrb.mxu2 %v14042_v11  ;;  %10991 = vmatmul.msk.f32.vlgmr.msrb.gmra.mxu0 %vm7432_vm5, %v13783_v4  ;;  %15716 = vst [vmem:[#allocation115_spill] sm:$0xff] %v14320_v56  ;;  %v10385_v58 = vmul.f32 %v7480_v7, %v7480_v7  ;;  %v7529_v56 = vadd.f32 %v13081_v20, %v13243_v19  ;;  %v14353_v19 = vpop.f32.mrf.mxu0 }
 0x373   : > { %9470 = vmatpush.msrb.mxu3 %v13892_v53  ;;  %9496 = vmatpush.msra.mxu1 %v14112_v37  ;;  %15717 = vst [vmem:[#allocation116_spill] sm:$0xff] %v14328_v25  ;;  %v10391_v53 = vmul.f32 %v7526_v24, %v7526_v24  ;;  %v14358_v25 = vld [vmem:[#allocation2 + $0x3a8] sm:$0xff] }
 0x374   : > { %9429 = vmatpush.msra.mxu0 %v14246_v18  ;;  %9344 = vmatmul.f32.gmra.mxu2 %v14118_v1  ;;  %15719 = vst [vmem:[#allocation118_spill] sm:$0xff] %v14353_v19 }
 0x375   : > { %9387 = vmatmul.f32.vlgmr.msrb.gmra.mxu1 %v14038_v8  ;;  %9451 = vmatpush.msrb.mxu2 %v14055_v62  ;;  %v7572_v62 = vadd.f32 %v13138_v33, %v13239_v49  ;;  %v7618_v33 = vadd.f32 %v13277_v23, %v13372_v45  ;;  %v10392_v23 = vmul.f32 %v7529_v56, %v7529_v56 }
 0x376   : > { %9471 = vmatpush.msrb.mxu3 %v14199_v28  ;;  %9497 = vmatpush.msra.mxu1 %v14042_v11  ;;  %v7483_v11 = vadd.f32 %v13205_v17, %v13318_v63  ;;  %v10389_v17 = vadd.f32 %v7526_v24, %v7480_v7  ;;  %v10393_v63 = vadd.f32 %v10391_v53, %v10385_v58  ;;  %v15720_v24 = vld [vmem:[#allocation13_spill] sm:$0xff]  ;;  %v15721_v7 = vld [vmem:[#allocation16_spill] sm:$0xff] }
 0x377   : > { %9430 = vmatpush.msra.mxu0 %v14244_v54  ;;  %10994 = vmatmul.msk.f32.gmra.mxu3 %vm7432_vm5, %v13838_v10  ;;  %v14349_v49 = vpop.f32.mrf.mxu2  ;;  %v10397_v20 = vmul.f32 %v7572_v62, %v7572_v62  ;;  %v7575_v45 = vadd.f32 %v13183_v50, %v13268_v14  ;;  %v7664_v58 = vadd.f32 %v15721_v7, %v15720_v24  ;;  %v15723_v14 = vld [vmem:[#allocation24_spill] sm:$0xff] }
 0x378   : > { %9452 = vmatpush.msrb.mxu2 %v14326_v42  ;;  %9472 = vmatpush.msrb.mxu3 %v14194_v43  ;;  %15718 = vst [vmem:[#allocation117_spill] sm:$0xff] %v14349_v49  ;;  %v10386_v59 = vmul.f32 %v7483_v11, %v7483_v11  ;;  %v10395_v53 = vadd.f32 %v10389_v17, %v7572_v62  ;;  %v15727_v17 = vld [vmem:[#allocation14_spill] sm:$0xff] }
 0x379   : > { %9498 = vmatpush.msra.mxu1 %v14333_v32  ;;  %9431 = vmatpush.msra.mxu0 %v14254_v55  ;;  %v10390_v50 = vadd.f32 %v7529_v56, %v7483_v11  ;;  %v7621_v19 = vadd.f32 %v15724_v12, %v15723_v14  ;;  %v10399_v49 = vadd.f32 %v10397_v20, %v10393_v63  ;;  %v14377_v24 = vpop.f32.mrf.mxu1  ;;  %v14383_v56 = vld [vmem:[#allocation2 + $0x2e8] sm:$0xff]  ;;  %v14394_v20 = vld [vmem:[#allocation2 + $0x2e0] sm:$0xff] }
 0x37a   : > { %9453 = vmatpush.msrb.mxu2 %v14219_v35  ;;  %9473 = vmatpush.msrb.mxu3 %v14209_v52  ;;  %v10394_v3 = vadd.f32 %v10392_v23, %v10386_v59  ;;  %v10398_v52 = vmul.f32 %v7575_v45, %v7575_v45  ;;  %15725 = vst [vmem:[#allocation16_spill] sm:$0xff] %v14377_v24 }
 0x37b   : > { %9499 = vmatpush.msra.mxu1 %v14326_v42  ;;  %9432 = vmatpush.msra.mxu0 %v14262_v57  ;;  %v10403_v57 = vmul.f32 %v7618_v33, %v7618_v33  ;;  %v10404_v11 = vmul.f32 %v7621_v19, %v7621_v19 }
 0x37c   : > { %9454 = vmatpush.msrb.mxu2 %v14167_v38  ;;  %10992 = vmatmul.msk.f32.gmra.mxu0 %vm7432_vm5, %v13838_v10  ;;  %v10400_v23 = vadd.f32 %v10398_v52, %v10394_v3 }
 0x37d   : > { %9474 = vmatpush.msrb.mxu3 %v13967_v22  ;;  %9500 = vmatpush.msra.mxu1 %v14219_v35  ;;  %v14368_v22 = vpop.f32.mrf.mxu3  ;;  %v10405_v62 = vadd.f32 %v10403_v57, %v10399_v49  ;;  %v15729_v49 = vld [vmem:[#allocation20_spill] sm:$0xff]  ;;  %v15730_v57 = vld [vmem:[#allocation15_spill] sm:$0xff] }
 0x37e   : > { %9539 = vmatpush.msrb.mxu0 %v14358_v25  ;;  %9390 = vmatmul.f32.gmra.mxu1 %v14118_v1  ;;  %15722 = vst [vmem:[#allocation13_spill] sm:$0xff] %v14368_v22  ;;  %v7710_v7 = vadd.f32 %v15730_v57, %v15729_v49  ;;  %v15736_v57 = vld [vmem:[#allocation23_spill] sm:$0xff]  ;;  %v15737_v22 = vld [vmem:[#allocation18_spill] sm:$0xff] }
 0x37f   : > { %9455 = vmatpush.msrb.mxu2 %v14094_v41  ;;  %9475 = vmatpush.msrb.mxu3 %v13977_v5  ;;  %v10401_v5 = vadd.f32 %v10395_v53, %v7618_v33  ;;  %v15728_v33 = vld [vmem:[#allocation19_spill] sm:$0xff]  ;;  %v14398_v53 = vpop.f32.mrf.mxu2  ;;  %v7713_v24 = vadd.f32 %v15737_v22, %v15736_v57 }
 0x380   : > { %9501 = vmatpush.msra.mxu1 %v14167_v38  ;;  %9540 = vmatpush.msrb.mxu0 %v14283_v60  ;;  %v7667_v63 = vadd.f32 %v15728_v33, %v15727_v17  ;;  %15731 = vst [vmem:[#allocation17_spill] sm:$0xff] %v14398_v53  ;;  %v14407_v33 = vpop.f32.mrf.mxu0  ;;  %v14428_v22 = vld [vmem:[#allocation2 + $0x3b0] sm:$0xff] }
 0x381   : > { %10995 = vmatmul.msk.f32.vlgmr.msrb.gmra.mxu2 %vm7432_vm5, %v13783_v4  ;;  %9476 = vmatpush.msrb.mxu3 %v14246_v18  ;;  %v10409_v4 = vmul.f32 %v7664_v58, %v7664_v58  ;;  %v10407_v14 = vadd.f32 %v10401_v5, %v7664_v58  ;;  %15734 = vst [vmem:[#allocation14_spill] sm:$0xff] %v14407_v33  ;;  %v14435_v57 = vpop.f32.mrf.mxu1  ;;  %v15746_v33 = vld [vmem:[#allocation26_spill] sm:$0xff] }
 0x382   : > { %9509 = vmatpush.msra.mxu2 %v14167_v38  ;;  %9555 = vmatpush.msrb.mxu1 %v14219_v35  ;;  %v14385_v12 = vpop.permute.xlu2 %339  ;;  %v10396_v38 = vadd.f32 %v10390_v50, %v7575_v45  ;;  %v10406_v58 = vadd.f32 %v10404_v11, %v10400_v23  ;;  %v10410_v5 = vmul.f32 %v7667_v63, %v7667_v63  ;;  %v15743_v11 = vrot.slane %v13946_v44, 1 }
 0x383   : > { %9541 = vmatpush.msrb.mxu0 %v14280_v16  ;;  %15726 = vst [vmem:[#allocation24_spill] sm:$0xff] %v14385_v12  ;;  %v15568_v59 = vrot.slane %v14385_v12, 1  ;;  %9477 = vmatpush.msrb.mxu3 %v14244_v54  ;;  %v10411_v49 = vadd.f32 %v10409_v4, %v10405_v62  ;;  %v14430_v62 = vld [vmem:[#allocation2 + $0x348] sm:$0xff] }
 0x384   : > { %9510 = vmatpush.msra.mxu2 %v14383_v56  ;;  %9556 = vmatpush.msrb.mxu1 %v13985_v9  ;;  %v15732_v9 = vld [vmem:[#allocation67_spill] sm:$0xff]  ;;  %v10402_v17 = vadd.f32 %v10396_v38, %v7621_v19  ;;  %v10415_v38 = vmul.f32 %v7710_v7, %v7710_v7 }
 0x385   : > { %9542 = vmatpush.msrb.mxu0 %v14161_v61  ;;  %v15733_v45 = vrot.slane %v15732_v9, 1  ;;  %9478 = vmatpush.msrb.mxu3 %v14254_v55  ;;  %v14417_v53 = vpop.f32.mrf.mxu3  ;;  %v14421_v19 = vld [vmem:[#allocation2 + $0x2d8] sm:$0xff]  ;;  %15742 = vst [vmem:[#allocation67_spill] sm:$0xff] %v14435_v57 }
 0x386   : > { %9511 = vmatpush.msra.mxu2 %v14394_v20  ;;  %9557 = vmatpush.msrb.mxu1 %v14383_v56  ;;  %15738 = vst [vmem:[#allocation20_spill] sm:$0xff] %v14417_v53  ;;  %v10416_v53 = vmul.f32 %v7713_v24, %v7713_v24 }
 0x387   : > { %v396_v50 = vsel %vm362_vm1, %v15733_v45, %v15568_v59  ;;  %9543 = vmatpush.msrb.mxu0 %v14112_v37  ;;  %v14413_v3 = vpop.permute.xlu0 %544  ;;  %9479 = vmatmul.f32.vlgmr.msrb.gmra.mxu3 %v14038_v8  ;;  %v14424_v37 = vpop.permute.xlu1 %748  ;;  %v15741_v45 = vld [vmem:[#allocation21_spill] sm:$0xff]  ;;  %v10408_v59 = vadd.f32 %v10402_v17, %v7667_v63  ;;  %v10412_v63 = vadd.f32 %v10410_v5, %v10406_v58  ;;  %v15748_v17 = vld [vmem:[#allocation28_spill] sm:$0xff]  ;;  %v15752_v58 = vld [vmem:[#allocation30_spill] sm:$0xff] }
 0x388   : > { %v397_v52 = vsel %vm364_vm3, %v15732_v9, %v396_v50  ;;  %15735 = vst [vmem:[#allocation19_spill] sm:$0xff] %v14413_v3  ;;  %9433 = vmatmul.f32.vlgmr.msra.gmra.mxu0 %v14038_v8  ;;  %v15574_v55 = vrot.slane %v14413_v3, 1  ;;  %9512 = vmatpush.msra.mxu2 %v14421_v19  ;;  %v15573_v4 = vrot.slane %v14424_v37, 1  ;;  %v15740_v9 = vld [vmem:[#allocation22_spill] sm:$0xff]  ;;  %v15747_v3 = vld [vmem:[#allocation25_spill] sm:$0xff]  ;;  %v14500_v36 = vpop.f32.mrf.mxu0 }
 0x389   : > { %467 = vst [vmem:[#allocation2 + $0x401] ss:$8 sm:$0xf] %v397_v52  ;;  %9558 = vmatpush.msrb.mxu1 %v14394_v20  ;;  %v7756_v50 = vadd.f32 %v15741_v45, %v15740_v9  ;;  %9585 = vmatpush.msra.mxu3 %v14428_v22  ;;  %v15744_v9 = vld [vmem:[#allocation72_spill] sm:$0xff]  ;;  %v7759_v12 = vadd.f32 %v15747_v3, %v15746_v33 }
 0x38a   : > { %15739 = vst [vmem:[#allocation15_spill] sm:$0xff] %v14424_v37  ;;  %9544 = vmatpush.msrb.mxu0 %v14430_v62  ;;  %v600_v23 = vsel %vm362_vm1, %v15743_v11, %v15574_v55  ;;  %10996 = vmatmul.msk.f32.gmra.mxu2 %vm7432_vm5, %v13838_v10  ;;  %v15745_v45 = vrot.slane %v15744_v9, 1  ;;  %v15749_v11 = vld [vmem:[#allocation27_spill] sm:$0xff]  ;;  %v10417_v33 = vadd.f32 %v10415_v38, %v10411_v49  ;;  %v14482_v38 = vpop.f32.mrf.mxu2  ;;  %v15760_v37 = vld [vmem:[#allocation36_spill] sm:$0xff] }
 0x38b   : > { %468 = vst [vmem:[#allocation2 + $0x401] ss:$8 sm:$0xf0] %v397_v52  ;;  %9559 = vmatpush.msrb.mxu1 %v14421_v19  ;;  %v601_v52 = vsel %vm568_vm2, %v13946_v44, %v600_v23  ;;  %9513 = vmatpush.msra.mxu2 %v14142_v34  ;;  %v10413_v44 = vadd.f32 %v10407_v14, %v7710_v7  ;;  %v15751_v14 = vld [vmem:[#allocation29_spill] sm:$0xff]  ;;  %v14480_v49 = vld [vmem:[#allocation2 + $0x290] sm:$0xff] }
 0x38c   : > { %v804_v57 = vsel %vm362_vm1, %v15745_v45, %v15573_v4  ;;  %9586 = vmatpush.msra.mxu3 %v14358_v25  ;;  %671 = vst [vmem:[#allocation2 + $0x402] ss:$8 sm:$0xf] %v601_v52  ;;  %v7802_v23 = vadd.f32 %v15749_v11, %v15748_v17  ;;  %9545 = vmatpush.msrb.mxu0 %v14333_v32  ;;  %v15754_v17 = vld [vmem:[#allocation31_spill] sm:$0xff] }
 0x38d   : > { %v805_v10 = vsel %vm772_vm0, %v15744_v9, %v804_v57  ;;  %9560 = vmatpush.msrb.mxu1 %v14142_v34  ;;  %v14464_v45 = vpop.permute.xlu2 %952  ;;  %672 = vst [vmem:[#allocation2 + $0x402] ss:$8 sm:$0xf0] %v601_v52  ;;  %v10421_v3 = vmul.f32 %v7756_v50, %v7756_v50  ;;  %9514 = vmatpush.msra.mxu2 %v14138_v13  ;;  %v15753_v9 = vld [vmem:[#allocation32_spill] sm:$0xff]  ;;  %v14474_v34 = vld [vmem:[#allocation7 + $0x8] sm:$0xff]  ;;  %v15756_v52 = vrot.slane %v13907_v6, 1 }
 0x38e   : > { %15750 = vst [vmem:[#allocation23_spill] sm:$0xff] %v14464_v45  ;;  %9587 = vmatpush.msra.mxu3 %v14283_v60  ;;  %v15579_v57 = vrot.slane %v14464_v45, 1  ;;  %v10414_v7 = vadd.f32 %v10408_v59, %v7713_v24  ;;  %v7848_v5 = vadd.f32 %v15752_v58, %v15751_v14  ;;  %v7805_v11 = vadd.f32 %v15754_v17, %v15753_v9  ;;  %v14478_v13 = vld [vmem:[#allocation2 + $0x288] sm:$0xff] }
 0x38f   : > { %875 = vst [vmem:[#allocation2 + $0x403] ss:$8 sm:$0xf] %v805_v10  ;;  %9546 = vmatpush.msrb.mxu0 %v14326_v42  ;;  %10997 = vmatmul.msk.f32.vlgmr.msra.gmra.mxu1 %vm7432_vm5, %v14474_v34  ;;  %v10418_v24 = vadd.f32 %v10416_v53, %v10412_v63  ;;  %v10422_v59 = vmul.f32 %v7759_v12, %v7759_v12  ;;  %v15757_v9 = vld [vmem:[#allocation33_spill] sm:$0xff]  ;;  %v15758_v17 = vld [vmem:[#allocation34_spill] sm:$0xff] }
 0x390   : > { %876 = vst [vmem:[#allocation2 + $0x403] ss:$8 sm:$0xf0] %v805_v10  ;;  %9515 = vmatpush.msra.mxu2 %v14478_v13  ;;  %9561 = vmatpush.msrb.mxu1 %v14480_v49  ;;  %v1008_v14 = vsel %vm362_vm1, %v15756_v52, %v15579_v57  ;;  %v10427_v58 = vmul.f32 %v7802_v23, %v7802_v23  ;;  %v212_v10 = vld [vmem:[%s11427_s28 + $0x80] sm:$0xff]  ;;  %v14502_v52 = vpop.f32.mrf.mxu3 }
 0x391   : > { %15755 = vst [vmem:[#allocation18_spill] sm:$0xff] %v14482_v38  ;;  %v7851_v4 = vadd.f32 %v15758_v17, %v15757_v9  ;;  %9588 = vmatpush.msra.mxu3 %v14280_v16  ;;  %9547 = vmatpush.msrb.mxu0 %v14219_v35  ;;  %v1009_v53 = vsel %vm976_vm4, %v13907_v6, %v1008_v14  ;;  %v15759_v38 = vld [vmem:[#allocation35_spill] sm:$0xff]  ;;  %v14506_v9 = vld [vmem:[#allocation2 + $0x280] sm:$0xff] }
 0x392   : > { %v10419_v63 = vadd.f32 %v10413_v44, %v7756_v50  ;;  %v10423_v55 = vadd.f32 %v10421_v3, %v10417_v33  ;;  %v7894_v45 = vadd.f32 %v15760_v37, %v15759_v38  ;;  %15761 = vst [vmem:[#allocation22_spill] sm:$0xff] %v14500_v36  ;;  %9436 = vmatmul.f32.gmra.mxu0 %v14118_v1  ;;  %v15763_v44 = vld [vmem:[#allocation39_spill] sm:$0xff]  ;;  %v15764_v33 = vld [vmem:[#allocation40_spill] sm:$0xff]  ;;  %v14512_v38 = vpop.f32.mrf.mxu1 }
 0x393   : > { %15762 = vst [vmem:[#allocation21_spill] sm:$0xff] %v14502_v52  ;;  %9482 = vmatmul.f32.gmra.mxu3 %v14118_v1  ;;  %v10420_v17 = vadd.f32 %v10414_v7, %v7759_v12  ;;  %v10433_v57 = vmul.f32 %v7848_v5, %v7848_v5  ;;  %v10428_v6 = vmul.f32 %v7805_v11, %v7805_v11  ;;  %v14516_v14 = vld [vmem:[#allocation2 + $0x278] sm:$0xff] }
 0x394   : > { %1079 = vst [vmem:[#allocation2 + $0x404] ss:$8 sm:$0xf] %v1009_v53  ;;  %9516 = vmatpush.msra.mxu2 %v14506_v9  ;;  %9562 = vmatpush.msrb.mxu1 %v14478_v13  ;;  %v10424_v37 = vadd.f32 %v10422_v59, %v10418_v24  ;;  %v10425_v50 = vadd.f32 %v10419_v63, %v7802_v23  ;;  %v14520_v23 = vld [vmem:[#allocation2 + $0x350] sm:$0xff]  ;;  %v15767_v63 = vld [vmem:[#allocation37_spill] sm:$0xff] }
 0x395   : > { %1080 = vst [vmem:[#allocation2 + $0x404] ss:$8 sm:$0xf0] %v1009_v53  ;;  %v7897_v3 = vadd.f32 %v15764_v33, %v15763_v44  ;;  %9589 = vmatpush.msra.mxu3 %v14161_v61  ;;  %9601 = vmatpush.msra.mxu0 %v14326_v42  ;;  %v10429_v12 = vadd.f32 %v10427_v58, %v10423_v55  ;;  %v15766_v53 = vld [vmem:[#allocation38_spill] sm:$0xff] }
 0x396   : > { %15765 = vst [vmem:[#allocation72_spill] sm:$0xff] %v14512_v38  ;;  %v10426_v7 = vadd.f32 %v10420_v17, %v7805_v11  ;;  %v10434_v52 = vmul.f32 %v7851_v4, %v7851_v4  ;;  %9517 = vmatpush.msra.mxu2 %v14516_v14  ;;  %9563 = vmatpush.msrb.mxu1 %v14506_v9  ;;  %v3687_v58 = vld [vmem:[#allocation2 + $0x2f0] sm:$0xff] }
 0x397   : > { %262 = vst [vmem:[#allocation2 + $0x400] ss:$8 sm:$0xf] %v212_v10  ;;  %v10431_v24 = vadd.f32 %v10425_v50, %v7848_v5  ;;  %v10439_v59 = vmul.f32 %v7894_v45, %v7894_v45  ;;  %v7940_v61 = vadd.f32 %v15767_v63, %v15766_v53  ;;  %9590 = vmatpush.msra.mxu3 %v14520_v23  ;;  %v15768_v33 = vld [vmem:[#allocation42_spill] sm:$0xff]  ;;  %v15770_v50 = vld [vmem:[#allocation44_spill] sm:$0xff]  ;;  %v15771_v38 = vld [vmem:[#allocation43_spill] sm:$0xff] }
 0x398   : > { %263 = vst [vmem:[#allocation2 + $0x400] ss:$8 sm:$0xf0] %v212_v10  ;;  %9602 = vmatpush.msra.mxu0 %v14089_v39  ;;  %v10435_v44 = vadd.f32 %v10433_v57, %v10429_v12  ;;  %v10430_v55 = vadd.f32 %v10428_v6, %v10424_v37  ;;  %v10432_v11 = vadd.f32 %v10426_v7, %v7851_v4  ;;  %v15769_v10 = vld [vmem:[#allocation41_spill] sm:$0xff]  ;;  %v14533_v57 = vld [vmem:[#allocation7 + $0x18] sm:$0xff]  ;;  %v14538_v12 = vpop.f32.mrf.mxu2  ;;  %v14540_v7 = vpop.f32.mrf.mxu3 }
 0x399   : > { %9518 = vmatpush.msra.mxu2 %v14199_v28  ;;  %9564 = vmatpush.msrb.mxu1 %v14516_v14  ;;  %v10440_v17 = vmul.f32 %v7897_v3, %v7897_v3  ;;  %v7943_v5 = vadd.f32 %v15769_v10, %v15768_v33  ;;  %v7986_v36 = vadd.f32 %v15771_v38, %v15770_v50  ;;  %v15774_v38 = vld [vmem:[#allocation46_spill] sm:$0xff]  ;;  %v15775_v63 = vld [vmem:[#allocation48_spill] sm:$0xff]  ;;  %v15777_v33 = vld [vmem:[#allocation51_spill] sm:$0xff] }
 0x39a   : > { %9591 = vmatpush.msra.mxu3 %v14430_v62  ;;  %9603 = vmatpush.msra.mxu0 %v3687_v58  ;;  %v10436_v53 = vadd.f32 %v10434_v52, %v10430_v55  ;;  %v10437_v39 = vadd.f32 %v10431_v24, %v7894_v45  ;;  %v10441_v4 = vadd.f32 %v10439_v59, %v10435_v44  ;;  %v14544_v52 = vld [vmem:[#allocation2 + $0x228] sm:$0xff]  ;;  %v15776_v55 = vld [vmem:[#allocation47_spill] sm:$0xff]  ;;  %v15778_v10 = vld [vmem:[#allocation52_spill] sm:$0xff] }
 0x39b   : > { %10998 = vmatmul.msk.f32.gmra.mxu1 %vm7432_vm5, %v14533_v57  ;;  %9519 = vmatpush.msra.mxu2 %v14194_v43  ;;  %v10445_v6 = vmul.f32 %v7940_v61, %v7940_v61  ;;  %v10438_v37 = vadd.f32 %v10432_v11, %v7897_v3  ;;  %15772 = vst [vmem:[#allocation26_spill] sm:$0xff] %v14540_v7  ;;  %v15773_v45 = vld [vmem:[#allocation45_spill] sm:$0xff]  ;;  %v14552_v43 = vld [vmem:[#allocation2 + $0x230] sm:$0xff]  ;;  %v14556_v11 = vpop.f32.mrf.mxu1 }
 0x39c   : > { %9565 = vmatpush.msrb.mxu1 %v14199_v28  ;;  %9592 = vmatpush.msra.mxu3 %v14333_v32  ;;  %v8032_v24 = vadd.f32 %v15774_v38, %v15773_v45  ;;  %v7989_v58 = vadd.f32 %v15776_v55, %v15775_v63  ;;  %v10442_v3 = vadd.f32 %v10440_v17, %v10436_v53  ;;  %v14554_v28 = vpop.f32.mrf.mxu0  ;;  %v15779_v55 = vld [vmem:[#allocation49_spill] sm:$0xff] }
 0x39d   : > { %9604 = vmatpush.msra.mxu0 %v14383_v56  ;;  %9520 = vmatpush.msra.mxu2 %v14544_v52  ;;  %v10446_v59 = vmul.f32 %v7943_v5, %v7943_v5  ;;  %v10451_v44 = vmul.f32 %v7986_v36, %v7986_v36  ;;  %v8078_v50 = vadd.f32 %v15778_v10, %v15777_v33  ;;  %v14564_v56 = vld [vmem:[#allocation2 + $0x220] sm:$0xff]  ;;  %v15783_v10 = vld [vmem:[#allocation55_spill] sm:$0xff] }
 0x39e   : > { %9566 = vmatpush.msrb.mxu1 %v14552_v43  ;;  %9593 = vmatpush.msra.mxu3 %v14326_v42  ;;  %v10443_v17 = vadd.f32 %v10437_v39, %v7940_v61  ;;  %v10447_v53 = vadd.f32 %v10445_v6, %v10441_v4  ;;  %v10444_v45 = vadd.f32 %v10438_v37, %v7943_v5  ;;  %v15780_v42 = vld [vmem:[#allocation50_spill] sm:$0xff]  ;;  %v2951_v5 = vld [vmem:[#allocation2 + $0x298] sm:$0xff]  ;;  %v15782_v6 = vld [vmem:[#allocation53_spill] sm:$0xff] }
 0x39f   : > { %9605 = vmatpush.msra.mxu0 %v14394_v20  ;;  %9521 = vmatpush.msra.mxu2 %v14564_v56  ;;  %v10457_v38 = vmul.f32 %v8032_v24, %v8032_v24  ;;  %v10452_v63 = vmul.f32 %v7989_v58, %v7989_v58  ;;  %v8035_v7 = vadd.f32 %v15780_v42, %v15779_v55  ;;  %v14572_v20 = vld [vmem:[#allocation2 + $0x218] sm:$0xff]  ;;  %v15781_v4 = vld [vmem:[#allocation54_spill] sm:$0xff] }
 0x3a0   : > { %9647 = vmatpush.msrb.mxu3 %v14083_v29  ;;  %9567 = vmatpush.msrb.mxu1 %v14544_v52  ;;  %v10448_v29 = vadd.f32 %v10446_v59, %v10442_v3  ;;  %v10449_v33 = vadd.f32 %v10443_v17, %v7986_v36  ;;  %v10453_v61 = vadd.f32 %v10451_v44, %v10447_v53  ;;  %v15784_v55 = vld [vmem:[#allocation56_spill] sm:$0xff]  ;;  %v14581_v3 = vpop.f32.mrf.mxu2 }
 0x3a1   : > { %9606 = vmatpush.msra.mxu0 %v14421_v19  ;;  %9522 = vmatpush.msra.mxu2 %v14572_v20  ;;  %v10463_v39 = vmul.f32 %v8078_v50, %v8078_v50  ;;  %v8124_v37 = vadd.f32 %v15782_v6, %v15781_v4  ;;  %v8081_v42 = vadd.f32 %v15784_v55, %v15783_v10  ;;  %v15786_v4 = vld [vmem:[#allocation59_spill] sm:$0xff]  ;;  %v15791_v10 = vld [vmem:[#allocation65_spill] sm:$0xff] }
 0x3a2   : > { %9648 = vmatpush.msrb.mxu3 %v14094_v41  ;;  %9568 = vmatpush.msrb.mxu1 %v14564_v56  ;;  %v10455_v41 = vadd.f32 %v10449_v33, %v8032_v24  ;;  %v10450_v19 = vadd.f32 %v10444_v45, %v7989_v58  ;;  %v10459_v36 = vadd.f32 %v10457_v38, %v10453_v61  ;;  %v14591_v58 = vpop.f32.mrf.mxu3  ;;  %v15790_v33 = vld [vmem:[#allocation62_spill] sm:$0xff]  ;;  %v15792_v55 = vld [vmem:[#allocation63_spill] sm:$0xff] }
 0x3a3   : > { %9607 = vmatpush.msra.mxu0 %v2951_v5  ;;  %9523 = vmatpush.msra.mxu2 %v14246_v18  ;;  %v10454_v59 = vadd.f32 %v10452_v63, %v10448_v29  ;;  %v10458_v44 = vmul.f32 %v8035_v7, %v8035_v7  ;;  %v15785_v5 = vld [vmem:[#allocation61_spill] sm:$0xff]  ;;  %v10469_v38 = vmul.f32 %v8124_v37, %v8124_v37  ;;  %v15789_v29 = vld [vmem:[#allocation60_spill] sm:$0xff]  ;;  %v14601_v6 = vpop.f32.mrf.mxu1 }
 0x3a4   : > { %9649 = vmatpush.msrb.mxu3 %v14100_v47  ;;  %9569 = vmatpush.msrb.mxu1 %v14572_v20  ;;  %v10456_v17 = vadd.f32 %v10450_v19, %v8035_v7  ;;  %v10461_v53 = vadd.f32 %v10455_v41, %v8078_v50  ;;  %v8170_v47 = vadd.f32 %v15786_v4, %v15785_v5  ;;  %v14589_v24 = vpop.f32.mrf.mxu0  ;;  %v15788_v7 = vld [vmem:[#allocation57_spill] sm:$0xff]  ;;  %v15797_v5 = vld [vmem:[#allocation66_spill] sm:$0xff] }
 0x3a5   : > { %9608 = vmatpush.msra.mxu0 %v14480_v49  ;;  %9524 = vmatpush.msra.mxu2 %v14244_v54  ;;  %v10465_v45 = vadd.f32 %v10463_v39, %v10459_v36  ;;  %v10464_v63 = vmul.f32 %v8081_v42, %v8081_v42  ;;  %v15787_v49 = vld [vmem:[#allocation58_spill] sm:$0xff]  ;;  %v8216_v61 = vadd.f32 %v15790_v33, %v15789_v29  ;;  %v14604_v54 = vld [vmem:[#allocation2 + $0x3e0] sm:$0xff]  ;;  %v15799_v29 = vld [vmem:[#allocation75_spill] sm:$0xff] }
 0x3a6   : > { %9650 = vmatpush.msrb.mxu3 %v14110_v30  ;;  %9570 = vmatpush.msrb.mxu1 %v14246_v18  ;;  %v5711_v30 = vld [vmem:[#allocation2 + $0x3b8] sm:$0xff]  ;;  %v8127_v50 = vadd.f32 %v15788_v7, %v15787_v49  ;;  %v10460_v18 = vadd.f32 %v10458_v44, %v10454_v59  ;;  %v10462_v39 = vadd.f32 %v10456_v17, %v8081_v42  ;;  %v3140_v19 = vld [vmem:[#allocation2 + $0x300] sm:$0xff]  ;;  %v15795_v44 = vld [vmem:[#allocation70_spill] sm:$0xff] }
 0x3a7   : > { %9609 = vmatpush.msra.mxu0 %v14478_v13  ;;  %9525 = vmatmul.f32.vlgmr.msra.gmra.mxu2 %v14038_v8  ;;  %v10467_v8 = vadd.f32 %v10461_v53, %v8124_v37  ;;  %v10475_v13 = vmul.f32 %v8170_v47, %v8170_v47  ;;  %v8173_v41 = vadd.f32 %v15792_v55, %v15791_v10  ;;  %v15794_v42 = vld [vmem:[#allocation68_spill] sm:$0xff]  ;;  %v15798_v7 = vld [vmem:[#allocation73_spill] sm:$0xff] }
 0x3a8   : > { %9631 = vmatpush.msrb.mxu2 %v5711_v30  ;;  %9651 = vmatpush.msrb.mxu3 %v14122_v48  ;;  %v14613_v48 = vld [vmem:[#allocation2 + $0x3d8] sm:$0xff]  ;;  %v10471_v36 = vadd.f32 %v10469_v38, %v10465_v45  ;;  %v10466_v59 = vadd.f32 %v10464_v63, %v10460_v18  ;;  %v8262_v17 = vadd.f32 %v15795_v44, %v15794_v42  ;;  %v14628_v18 = vpop.f32.mrf.mxu2 }
 0x3a9   : > { %9677 = vmatpush.msra.mxu1 %v14604_v54  ;;  %9610 = vmatpush.msra.mxu0 %v14506_v9  ;;  %15793 = vst [vmem:[#allocation25_spill] sm:$0xff] %v14613_v48  ;;  %v10470_v9 = vmul.f32 %v8127_v50, %v8127_v50  ;;  %v10481_v37 = vmul.f32 %v8216_v61, %v8216_v61  ;;  %v15796_v53 = vld [vmem:[#allocation64_spill] sm:$0xff] }
 0x3aa   : > { %11001 = vmatmul.msk.f32.vlgmr.msra.gmra.mxu3 %vm7432_vm5, %v14474_v34  ;;  %9632 = vmatpush.msrb.mxu2 %v14428_v22  ;;  %v8219_v4 = vadd.f32 %v15797_v5, %v15796_v53  ;;  %v14622_v22 = vld [vmem:[#allocation2 + $0x3d0] sm:$0xff]  ;;  %v10468_v30 = vadd.f32 %v10462_v39, %v8127_v50  ;;  %v10473_v45 = vadd.f32 %v10467_v8, %v8170_v47  ;;  %v2031_v38 = vld [vmem:[#allocation2 + $0x238] sm:$0xff]  ;;  %v15801_v39 = vld [vmem:[#allocation69_spill] sm:$0xff] }
 0x3ab   : > { %9652 = vmatpush.msrb.mxu3 %v3140_v19  ;;  %9678 = vmatpush.msra.mxu1 %v14613_v48  ;;  %v10477_v63 = vadd.f32 %v10475_v13, %v10471_v36  ;;  %v10476_v49 = vmul.f32 %v8173_v41, %v8173_v41  ;;  %v8265_v33 = vadd.f32 %v15799_v29, %v15798_v7  ;;  %v15800_v47 = vld [vmem:[#allocation71_spill] sm:$0xff]  ;;  %v14638_v8 = vld [vmem:[#allocation2 + $0x3c8] sm:$0xff]  ;;  %v15808_v29 = vld [vmem:[#allocation76_spill] sm:$0xff] }
 0x3ac   : > { %9611 = vmatpush.msra.mxu0 %v14516_v14  ;;  %9633 = vmatpush.msrb.mxu2 %v14358_v25  ;;  %v14631_v25 = vpop.f32.mrf.mxu3  ;;  %v10479_v10 = vadd.f32 %v10473_v45, %v8216_v61  ;;  %v10487_v50 = vmul.f32 %v8262_v17, %v8262_v17  ;;  %v10472_v13 = vadd.f32 %v10470_v9, %v10466_v59  ;;  %v14640_v36 = vpop.f32.mrf.mxu0 }
 0x3ad   : > { %9653 = vmatpush.msrb.mxu3 %v14146_v2  ;;  %9679 = vmatpush.msra.mxu1 %v14622_v22  ;;  %v8308_v2 = vadd.f32 %v15801_v39, %v15800_v47  ;;  %v10483_v55 = vadd.f32 %v10481_v37, %v10477_v63  ;;  %v10482_v19 = vmul.f32 %v8219_v4, %v8219_v4  ;;  %v15802_v37 = vld [vmem:[#allocation74_spill] sm:$0xff] }
 0x3ae   : > { %9612 = vmatpush.msra.mxu0 %v2031_v38  ;;  %9634 = vmatpush.msrb.mxu2 %v14283_v60  ;;  %v14644_v60 = vpop.f32.mrf.mxu1  ;;  %v10474_v61 = vadd.f32 %v10468_v30, %v8173_v41  ;;  %v10485_v42 = vadd.f32 %v10479_v10, %v8262_v17  ;;  %v8354_v44 = vadd.f32 %v13979_v0, %v13987_v40  ;;  %v14659_v40 = vld [vmem:[#allocation2 + $0x358] sm:$0xff]  ;;  %v15809_v10 = vld [vmem:[#allocation77_spill] sm:$0xff] }
 0x3af   : > { %10999 = vmatmul.msk.f32.vlgmr.msrb.gmra.mxu0 %vm7432_vm5, %v14474_v34  ;;  %9654 = vmatpush.msrb.mxu3 %v14157_v51  ;;  %v14649_v51 = vld [vmem:[#allocation7] sm:$0xff]  ;;  %v10478_v59 = vadd.f32 %v10476_v49, %v10472_v13  ;;  %v10488_v9 = vmul.f32 %v8265_v33, %v8265_v33  ;;  %v8311_v53 = vadd.f32 %v15802_v37, %v13935_v21  ;;  %v15811_v13 = vld [vmem:[#allocation80_spill] sm:$0xff] }
 0x3b0   : > { %9680 = vmatpush.msra.mxu1 %v14638_v8  ;;  %9613 = vmatpush.msra.mxu0 %v14552_v43  ;;  %v4980_v43 = vld [vmem:[#allocation2 + $0x3c0] sm:$0xff]  ;;  %v10489_v41 = vadd.f32 %v10487_v50, %v10483_v55  ;;  %v10493_v17 = vmul.f32 %v8308_v2, %v8308_v2  ;;  %v8400_v0 = vadd.f32 %v13981_v15, %v13971_v27  ;;  %v15804_v27 = vld [vmem:[#allocation79_spill] sm:$0xff]  ;;  %v15812_v55 = vld [vmem:[#allocation78_spill] sm:$0xff] }
 0x3b1   : > { %9528 = vmatmul.f32.gmra.mxu2 %v14118_v1  ;;  %9571 = vmatmul.f32.vlgmr.msrb.gmra.mxu1 %v14649_v51  ;;  %15803 = vst [vmem:[#allocation28_spill] sm:$0xff] %v14659_v40  ;;  %v10480_v1 = vadd.f32 %v10474_v61, %v8219_v4  ;;  %v10484_v5 = vadd.f32 %v10482_v19, %v10478_v59  ;;  %v15805_v15 = vld [vmem:[#allocation81_spill] sm:$0xff]  ;;  %v15813_v61 = vld [vmem:[#allocation99_spill] sm:$0xff] }
 0x3b2   : > { %9635 = vmatpush.msrb.mxu2 %v14280_v16  ;;  %9655 = vmatpush.msrb.mxu3 %v14174_v26  ;;  %v8357_v21 = vadd.f32 %v14014_v46, %v14022_v31  ;;  %v14666_v26 = vld [vmem:[#allocation2 + $0x380] sm:$0xff]  ;;  %v10491_v16 = vadd.f32 %v10485_v42, %v8308_v2  ;;  %v10499_v30 = vmul.f32 %v8354_v44, %v8354_v44  ;;  %v14674_v46 = vld [vmem:[#allocation2 + $0x378] sm:$0xff]  ;;  %v14690_v42 = vld [vmem:[#allocation2 + $0x370] sm:$0xff] }
 0x3b3   : > { %9681 = vmatpush.msra.mxu1 %v4980_v43  ;;  %9614 = vmatpush.msra.mxu0 %v14544_v52  ;;  %v8446_v45 = vadd.f32 %v15805_v15, %v15804_v27  ;;  %v15806_v52 = vld [vmem:[#allocation95_spill] sm:$0xff]  ;;  %v10486_v4 = vadd.f32 %v10480_v1, %v8265_v33  ;;  %v10490_v38 = vadd.f32 %v10488_v9, %v10484_v5  ;;  %v2220_v31 = vld [vmem:[#allocation2 + $0x2a0] sm:$0xff]  ;;  %v14679_v33 = vpop.f32.mrf.mxu2 }
 0x3b4   : > { %11002 = vmatmul.msk.f32.gmra.mxu3 %vm7432_vm5, %v14533_v57  ;;  %9636 = vmatpush.msrb.mxu2 %v14659_v40  ;;  %v10494_v63 = vmul.f32 %v8311_v53, %v8311_v53  ;;  %15807 = vst [vmem:[#allocation27_spill] sm:$0xff] %v14674_v46  ;;  %v10495_v49 = vadd.f32 %v10493_v17, %v10489_v41  ;;  %v15815_v9 = vld [vmem:[#allocation83_spill] sm:$0xff]  ;;  %v14696_v43 = vpop.f32.mrf.mxu0  ;;  %v15820_v15 = vld [vmem:[#allocation89_spill] sm:$0xff] }
 0x3b5   : > { %9656 = vmatpush.msrb.mxu3 %v15806_v52  ;;  %9682 = vmatpush.msra.mxu1 %v14666_v26  ;;  %v10505_v7 = vmul.f32 %v8400_v0, %v8400_v0  ;;  %v8403_v50 = vadd.f32 %v15809_v10, %v15808_v29  ;;  %v10497_v47 = vadd.f32 %v10491_v16, %v8354_v44  ;;  %v14692_v44 = vld [vmem:[#allocation2 + $0x3e8] sm:$0xff]  ;;  %v14702_v16 = vld [vmem:[#allocation7 + $0x10] sm:$0xff]  ;;  %v15821_v52 = vld [vmem:[#allocation88_spill] sm:$0xff] }
 0x3b6   : > { %9615 = vmatpush.msra.mxu0 %v14564_v56  ;;  %9637 = vmatpush.msrb.mxu2 %v14520_v23  ;;  %v10500_v39 = vmul.f32 %v8357_v21, %v8357_v21  ;;  %v14683_v23 = vpop.f32.mrf.mxu3  ;;  %v10501_v56 = vadd.f32 %v10499_v30, %v10495_v49  ;;  %v10511_v2 = vmul.f32 %v8446_v45, %v8446_v45  ;;  %v14700_v41 = vpop.f32.mrf.mxu1  ;;  %v15824_v29 = vld [vmem:[#allocation82_spill] sm:$0xff] }
 0x3b7   : > { %9657 = vmatpush.msrb.mxu3 %v2220_v31  ;;  %9683 = vmatpush.msra.mxu1 %v14674_v46  ;;  %15810 = vst [vmem:[#allocation29_spill] sm:$0xff] %v14683_v23  ;;  %v8492_v19 = vadd.f32 %v15812_v55, %v15811_v13  ;;  %v10492_v59 = vadd.f32 %v10486_v4, %v8311_v53  ;;  %v14706_v53 = vld [vmem:[#allocation2 + $0x368] sm:$0xff] }
 0x3b8   : > { %9616 = vmatpush.msra.mxu0 %v14572_v20  ;;  %9638 = vmatpush.msrb.mxu2 %v14430_v62  ;;  %15814 = vst [vmem:[#allocation30_spill] sm:$0xff] %v14690_v42  ;;  %v10496_v20 = vadd.f32 %v10494_v63, %v10490_v38  ;;  %v15816_v62 = vld [vmem:[#allocation85_spill] sm:$0xff]  ;;  %v10503_v17 = vadd.f32 %v10497_v47, %v8400_v0  ;;  %v15822_v38 = vld [vmem:[#allocation100_spill] sm:$0xff]  ;;  %v15825_v47 = vld [vmem:[#allocation86_spill] sm:$0xff] }
 0x3b9   : > { %11000 = vmatmul.msk.f32.gmra.mxu0 %vm7432_vm5, %v14533_v57  ;;  %9658 = vmatpush.msrb.mxu3 %v15813_v61  ;;  %v8449_v37 = vadd.f32 %v15816_v62, %v15815_v9  ;;  %15817 = vst [vmem:[#allocation32_spill] sm:$0xff] %v14700_v41  ;;  %v10507_v1 = vadd.f32 %v10505_v7, %v10501_v56  ;;  %v342_v0 = vpop.permute.xlu0 %341  ;;  %v15827_v13 = vld [vmem:[#allocation101_spill] sm:$0xff]  ;;  %v15828_v61 = vld [vmem:[#allocation24_spill] sm:$0xff]  ;;  %v15873_v41 = vld [vmem:[#allocation18_spill] sm:$0xff] }
 0x3ba   : > { %9684 = vmatpush.msra.mxu1 %v14690_v42  ;;  %9723 = vmatpush.msrb.mxu0 %v14692_v44  ;;  %v10506_v5 = vmul.f32 %v8403_v50, %v8403_v50  ;;  %15818 = vst [vmem:[#allocation31_spill] sm:$0xff] %v14702_v16  ;;  %v10498_v30 = vadd.f32 %v10492_v59, %v8357_v21  ;;  %v15823_v21 = vld [vmem:[#allocation84_spill] sm:$0xff]  ;;  %v14723_v55 = vld [vmem:[#allocation2 + $0x328] sm:$0xff]  ;;  %v15829_v59 = vrot.slane %v15828_v61, 1 }
 0x3bb   : > { %9574 = vmatmul.f32.gmra.mxu1 %v14702_v16  ;;  %9639 = vmatpush.msrb.mxu2 %v14333_v32  ;;  %15819 = vst [vmem:[#allocation33_spill] sm:$0xff] %v14706_v53  ;;  %v10502_v27 = vadd.f32 %v10500_v39, %v10496_v20  ;;  %v8538_v4 = vadd.f32 %v15821_v52, %v15820_v15  ;;  %v361_v32 = vrot.slane %v342_v0, 1  ;;  %v15826_v39 = vld [vmem:[#allocation87_spill] sm:$0xff]  ;;  %v15830_v62 = vld [vmem:[#allocation93_spill] sm:$0xff]  ;;  %v15832_v52 = vld [vmem:[#allocation104_spill] sm:$0xff] }
 0x3bc   : > { %9659 = vmatpush.msrb.mxu3 %v15822_v38  ;;  %9685 = vmatpush.msra.mxu1 %v14706_v53  ;;  %v10509_v63 = vadd.f32 %v10503_v17, %v8446_v45  ;;  %v10513_v31 = vadd.f32 %v10511_v2, %v10507_v1  ;;  %v10517_v49 = vmul.f32 %v8492_v19, %v8492_v19  ;;  %v15831_v17 = vld [vmem:[#allocation92_spill] sm:$0xff] }
 0x3bd   : > { %9724 = vmatpush.msrb.mxu0 %v14604_v54  ;;  %11003 = vmatmul.msk.f32.vlgmr.msrb.gmra.mxu2 %vm7432_vm5, %v14474_v34  ;;  %v10512_v7 = vmul.f32 %v8449_v37, %v8449_v37  ;;  %v8495_v10 = vadd.f32 %v15824_v29, %v15823_v21  ;;  %v8584_v56 = vadd.f32 %v15826_v39, %v15825_v47  ;;  %v14738_v38 = vld [vmem:[#allocation2 + $0x320] sm:$0xff]  ;;  %v14740_v29 = vpop.f32.mrf.mxu2  ;;  %v14749_v39 = vpop.f32.mrf.mxu0 }
 0x3be   : > { %9693 = vmatpush.msra.mxu2 %v14706_v53  ;;  %9739 = vmatpush.msrb.mxu1 %v14690_v42  ;;  %v10504_v45 = vadd.f32 %v10498_v30, %v8403_v50  ;;  %v10508_v2 = vadd.f32 %v10506_v5, %v10502_v27  ;;  %v398_v20 = vsel %vm362_vm1, %v15829_v59, %v361_v32  ;;  %v14734_v5 = vpop.f32.mrf.mxu3 }
 0x3bf   : > { %9660 = vmatpush.msrb.mxu3 %v15827_v13  ;;  %9725 = vmatpush.msrb.mxu0 %v14613_v48  ;;  %v10523_v9 = vmul.f32 %v8538_v4, %v8538_v4  ;;  %v8541_v1 = vadd.f32 %v15831_v17, %v15830_v62  ;;  %v399_v50 = vsel %vm364_vm3, %v15828_v61, %v398_v20  ;;  %v15836_v13 = vld [vmem:[#allocation90_spill] sm:$0xff]  ;;  %v15837_v61 = vld [vmem:[#allocation91_spill] sm:$0xff] }
 0x3c0   : > { %9694 = vmatpush.msra.mxu2 %v14723_v55  ;;  %9740 = vmatpush.msrb.mxu1 %v14219_v35  ;;  %v10515_v30 = vadd.f32 %v10509_v63, %v8492_v19  ;;  %v10519_v27 = vadd.f32 %v10517_v49, %v10513_v31  ;;  %v10510_v15 = vadd.f32 %v10504_v45, %v8449_v37  ;;  %v1300_v35 = vld [vmem:[#allocation2 + $0x240] sm:$0xff]  ;;  %v14744_v19 = vpop.f32.mrf.mxu1  ;;  %v15834_v63 = vld [vmem:[#allocation98_spill] sm:$0xff]  ;;  %v14753_v45 = vld [vmem:[#allocation2 + $0x318] sm:$0xff] }
 0x3c1   : > { %9661 = vmatpush.msrb.mxu3 %v15832_v52  ;;  %9726 = vmatpush.msrb.mxu0 %v14622_v22  ;;  %470 = vst [vmem:[#allocation2 + $0x441] ss:$8 sm:$0xf] %v399_v50  ;;  %v10514_v0 = vadd.f32 %v10512_v7, %v10508_v2  ;;  %v10518_v32 = vmul.f32 %v8495_v10, %v8495_v10  ;;  %v15833_v37 = vld [vmem:[#allocation97_spill] sm:$0xff] }
 0x3c2   : > { %v10529_v21 = vmul.f32 %v8584_v56, %v8584_v56  ;;  %9695 = vmatpush.msra.mxu2 %v14738_v38  ;;  %9741 = vmatpush.msrb.mxu1 %v14723_v55  ;;  %471 = vst [vmem:[#allocation2 + $0x441] ss:$8 sm:$0xf0] %v399_v50  ;;  %v8630_v31 = vadd.f32 %v15834_v63, %v15833_v37  ;;  %v15843_v37 = vld [vmem:[#allocation106_spill] sm:$0xff] }
 0x3c3   : > { %9662 = vmatpush.msrb.mxu3 %v1300_v35  ;;  %9727 = vmatpush.msrb.mxu0 %v14638_v8  ;;  %v10521_v49 = vadd.f32 %v10515_v30, %v8538_v4  ;;  %v10525_v7 = vadd.f32 %v10523_v9, %v10519_v27  ;;  %v10524_v47 = vmul.f32 %v8541_v1, %v8541_v1  ;;  %v14759_v8 = vld [vmem:[#allocation2 + $0x3f0] sm:$0xff]  ;;  %v14761_v4 = vld [vmem:[#allocation2 + $0x388] sm:$0xff]  ;;  %v955_v17 = vpop.permute.xlu0 %954 }
 0x3c4   : > { %9617 = vmatmul.f32.vlgmr.msra.gmra.mxu0 %v14649_v51  ;;  %9663 = vmatmul.f32.vlgmr.msrb.gmra.mxu3 %v14649_v51  ;;  %15835 = vst [vmem:[#allocation34_spill] sm:$0xff] %v14753_v45  ;;  %v10516_v2 = vadd.f32 %v10510_v15, %v8495_v10  ;;  %v8587_v59 = vadd.f32 %v15837_v61, %v15836_v13  ;;  %v547_v10 = vpop.permute.xlu1 %546  ;;  %v14767_v27 = vld [vmem:[#allocation2 + $0x310] sm:$0xff]  ;;  %v974_v15 = vrot.slane %v955_v17, 1  ;;  %v15842_v35 = vld [vmem:[#allocation105_spill] sm:$0xff] }
 0x3c5   : > { %9696 = vmatpush.msra.mxu2 %v14753_v45  ;;  %9742 = vmatpush.msrb.mxu1 %v14738_v38  ;;  %15838 = vst [vmem:[#allocation35_spill] sm:$0xff] %v14761_v4  ;;  %v10520_v20 = vadd.f32 %v10518_v32, %v10514_v0  ;;  %v10527_v9 = vadd.f32 %v10521_v49, %v8584_v56  ;;  %v566_v52 = vrot.slane %v547_v10, 1  ;;  %v15840_v56 = vld [vmem:[#allocation96_spill] sm:$0xff]  ;;  %v15841_v32 = vld [vmem:[#allocation94_spill] sm:$0xff]  ;;  %v15847_v13 = vld [vmem:[#allocation19_spill] sm:$0xff]  ;;  %v14788_v10 = vpop.f32.mrf.mxu2 }
 0x3c6   : > { %v10531_v62 = vadd.f32 %v10529_v21, %v10525_v7  ;;  %9769 = vmatpush.msra.mxu3 %v14759_v8  ;;  %9728 = vmatpush.msrb.mxu0 %v14761_v4  ;;  %v10522_v50 = vadd.f32 %v10516_v2, %v8541_v1  ;;  %v10535_v30 = vmul.f32 %v8630_v31, %v8630_v31  ;;  %v14777_v49 = vld [vmem:[#allocation2 + $0x308] sm:$0xff]  ;;  %v15845_v7 = vld [vmem:[#allocation23_spill] sm:$0xff]  ;;  %v15848_v61 = vrot.slane %v15847_v13, 1 }
 0x3c7   : > { %11004 = vmatmul.msk.f32.gmra.mxu2 %vm7432_vm5, %v14533_v57  ;;  %15839 = vst [vmem:[#allocation36_spill] sm:$0xff] %v14767_v27  ;;  %9743 = vmatpush.msrb.mxu1 %v14753_v45  ;;  %v10526_v0 = vadd.f32 %v10524_v47, %v10520_v20  ;;  %v8676_v21 = vadd.f32 %v15841_v32, %v15840_v56  ;;  %v15846_v2 = vrot.slane %v15845_v7, 1  ;;  %v14794_v32 = vpop.f32.mrf.mxu3 }
 0x3c8   : > { %v8633_v63 = vadd.f32 %v15843_v37, %v15842_v35  ;;  %9697 = vmatpush.msra.mxu2 %v14767_v27  ;;  %9770 = vmatpush.msra.mxu3 %v14692_v44  ;;  %v10528_v1 = vadd.f32 %v10522_v50, %v8587_v59  ;;  %15844 = vst [vmem:[#allocation39_spill] sm:$0xff] %v14777_v49  ;;  %v15850_v37 = vld [vmem:[#allocation110_spill] sm:$0xff] }
 0x3c9   : > { %9729 = vmatpush.msrb.mxu0 %v14666_v26  ;;  %9744 = vmatpush.msrb.mxu1 %v14767_v27  ;;  %v1010_v47 = vsel %vm362_vm1, %v15846_v2, %v974_v15  ;;  %v602_v20 = vsel %vm362_vm1, %v15848_v61, %v566_v52  ;;  %v10530_v17 = vmul.f32 %v8587_v59, %v8587_v59  ;;  %v15851_v2 = vld [vmem:[#allocation109_spill] sm:$0xff]  ;;  %v14803_v61 = vld [vmem:[#allocation2 + $0x2d0] sm:$0xff]  ;;  %v15856_v27 = vld [vmem:[#allocation108_spill] sm:$0xff] }
 0x3ca   : > { %9698 = vmatpush.msra.mxu2 %v14777_v49  ;;  %9771 = vmatpush.msra.mxu3 %v14604_v54  ;;  %v1011_v50 = vsel %vm976_vm4, %v15845_v7, %v1010_v47  ;;  %v603_v56 = vsel %vm568_vm2, %v15847_v13, %v602_v20  ;;  %15849 = vst [vmem:[#allocation40_spill] sm:$0xff] %v14794_v32  ;;  %v14801_v59 = vld [vmem:[#allocation2 + $0x2c8] sm:$0xff]  ;;  %v751_v7 = vpop.permute.xlu2 %750  ;;  %v15853_v20 = vld [vmem:[#allocation103_spill] sm:$0xff] }
 0x3cb   : > { %v10533_v15 = vadd.f32 %v10527_v9, %v8630_v31  ;;  %v10537_v35 = vadd.f32 %v10535_v30, %v10531_v62  ;;  %v8722_v52 = vadd.f32 %v15851_v2, %v15850_v37  ;;  %9730 = vmatpush.msrb.mxu0 %v14674_v46  ;;  %11005 = vmatmul.msk.f32.vlgmr.msra.gmra.mxu1 %vm7432_vm5, %v14474_v34  ;;  %v14807_v31 = vpop.f32.mrf.mxu0  ;;  %v770_v9 = vrot.slane %v751_v7, 1  ;;  %v14809_v62 = vpop.f32.mrf.mxu1  ;;  %v15854_v37 = vld [vmem:[#allocation102_spill] sm:$0xff]  ;;  %v15855_v49 = vld [vmem:[#allocation107_spill] sm:$0xff] }
 0x3cc   : > { %1082 = vst [vmem:[#allocation2 + $0x444] ss:$8 sm:$0xf] %v1011_v50  ;;  %v10541_v47 = vmul.f32 %v8676_v21, %v8676_v21  ;;  %v10534_v13 = vadd.f32 %v10528_v1, %v8633_v63  ;;  %9699 = vmatpush.msra.mxu2 %v14801_v59  ;;  %9745 = vmatpush.msrb.mxu1 %v14803_v61  ;;  %v213_v1 = vld [vmem:[%s11427_s28 + $0x88] sm:$0xff]  ;;  %s11237_s28 = scalar_lea.hbm %s15544_s2, 32 }
 0x3cd   : > { %1083 = vst [vmem:[#allocation2 + $0x444] ss:$8 sm:$0xf0] %v1011_v50  ;;  %v10536_v30 = vmul.f32 %v8633_v63, %v8633_v63  ;;  %v8679_v2 = vadd.f32 %v15854_v37, %v15853_v20  ;;  %v8768_v53 = vadd.f32 %v15856_v27, %v15855_v49  ;;  %9772 = vmatpush.msra.mxu3 %v14613_v48  ;;  %v14820_v50 = vld [vmem:[#allocation2 + $0x2c0] sm:$0xff]  ;;  %v15857_v63 = vld [vmem:[#allocation15_spill] sm:$0xff]  ;;  %v15860_v49 = vld [vmem:[#allocation118_spill] sm:$0xff]  ;;  %p11239_p11 = scmp.lt.s32.totalorder %s11237_s28, %s11233_s12 }
 0x3ce   : > { %15852 = vst [vmem:[#allocation38_spill] sm:$0xff] %v14809_v62  ;;  %9731 = vmatpush.msrb.mxu0 %v14690_v42  ;;  %v10532_v40 = vadd.f32 %v10530_v17, %v10526_v0  ;;  %9666 = vmatmul.f32.gmra.mxu3 %v14702_v16  ;;  %v15858_v7 = vrot.slane %v15857_v63, 1  ;;  %v10547_v37 = vmul.f32 %v8722_v52, %v8722_v52  ;;  %v15859_v27 = vld [vmem:[#allocation117_spill] sm:$0xff]  ;;  %v15861_v62 = vld [vmem:[#allocation114_spill] sm:$0xff] }
 0x3cf   : > { %674 = vst [vmem:[#allocation2 + $0x442] ss:$8 sm:$0xf] %v603_v56  ;;  %9620 = vmatmul.f32.gmra.mxu0 %v14702_v16  ;;  %v8814_v32 = vadd.f32 %v15860_v49, %v15859_v27  ;;  %9700 = vmatpush.msra.mxu2 %v14820_v50  ;;  %v10539_v17 = vadd.f32 %v10533_v15, %v8676_v21  ;;  %v15862_v48 = vld [vmem:[#allocation113_spill] sm:$0xff]  ;;  %v15868_v49 = vld [vmem:[#allocation115_spill] sm:$0xff]  ;;  %p11240_p12 = por %p11239_p11, %p11238_p10 }
 0x3d0   : > { %v806_v20 = vsel %vm362_vm1, %v15858_v7, %v770_v9  ;;  %675 = vst [vmem:[#allocation2 + $0x442] ss:$8 sm:$0xf0] %v603_v56  ;;  %9746 = vmatpush.msrb.mxu1 %v14801_v59  ;;  %v10543_v42 = vadd.f32 %v10541_v47, %v10537_v35  ;;  %v8725_v16 = vadd.f32 %v15862_v48, %v15861_v62  ;;  %v14835_v56 = vld [vmem:[#allocation2 + $0x2b8] sm:$0xff] }
 0x3d1   : > { %v807_v0 = vsel %vm772_vm0, %v15857_v63, %v806_v20  ;;  %265 = vst [vmem:[#allocation2 + $0x440] ss:$8 sm:$0xf] %v213_v1  ;;  %9773 = vmatpush.msra.mxu3 %v14622_v22  ;;  %9785 = vmatpush.msra.mxu0 %v14674_v46  ;;  %v10538_v9 = vadd.f32 %v10536_v30, %v10532_v40  ;;  %v14839_v63 = vld [vmem:[#allocation2 + $0x390] sm:$0xff]  ;;  %v15865_v35 = vld [vmem:[#allocation112_spill] sm:$0xff]  ;;  %p11241_p13 = pnand %p11240_p12, %p11236_p8 }
 0x3d2   : > { %878 = vst [vmem:[#allocation2 + $0x443] ss:$8 sm:$0xf] %v807_v0  ;;  %v10540_v7 = vadd.f32 %v10534_v13, %v8679_v2  ;;  %v10553_v27 = vmul.f32 %v8768_v53, %v8768_v53  ;;  %9701 = vmatpush.msra.mxu2 %v14835_v56  ;;  %9747 = vmatpush.msrb.mxu1 %v14820_v50  ;;  %v15864_v48 = vld [vmem:[#allocation111_spill] sm:$0xff]  ;;  %v9296_v13 = vpop.f32.mrf.mxu3  ;;  %v15867_v20 = vld [vmem:[#allocation116_spill] sm:$0xff] }
 0x3d3   : > { %15863 = vst [vmem:[#allocation37_spill] sm:$0xff] %v14839_v63  ;;  %v10542_v21 = vmul.f32 %v8679_v2, %v8679_v2  ;;  %v10545_v15 = vadd.f32 %v10539_v17, %v8722_v52  ;;  %v8771_v22 = vadd.f32 %v15865_v35, %v15864_v48  ;;  %9774 = vmatpush.msra.mxu3 %v14839_v63  ;;  %v14844_v47 = vld [vmem:[#allocation2 + $0x338] sm:$0xff]  ;;  %v14847_v40 = vld [vmem:[#allocation2 + $0x2b0] sm:$0xff]  ;;  %v15869_v48 = vld [vmem:[#allocation17_spill] sm:$0xff] }
 0x3d4   : > { %879 = vst [vmem:[#allocation2 + $0x443] ss:$8 sm:$0xf0] %v807_v0  ;;  %9786 = vmatpush.msra.mxu0 %v14844_v47  ;;  %v10549_v62 = vadd.f32 %v10547_v37, %v10543_v42  ;;  %v10559_v30 = vmul.f32 %v8814_v32, %v8814_v32  ;;  %v8860_v0 = vadd.f32 %v15868_v49, %v15867_v20  ;;  %v14853_v52 = vld [vmem:[#allocation2 + $0x330] sm:$0xff]  ;;  %v14859_v42 = vld [vmem:[#allocation2 + $0x2a8] sm:$0xff]  ;;  %v9319_v37 = vpop.f32.mrf.mxu1 }
 0x3d5   : > { %15866 = vst [vmem:[#allocation42_spill] sm:$0xff] %v14847_v40  ;;  %9702 = vmatpush.msra.mxu2 %v14847_v40  ;;  %9748 = vmatpush.msrb.mxu1 %v14835_v56  ;;  %v10551_v2 = vadd.f32 %v10545_v15, %v8768_v53  ;;  %v10548_v17 = vmul.f32 %v8725_v16, %v8725_v16  ;;  %v15870_v35 = vld [vmem:[#allocation14_spill] sm:$0xff] }
 0x3d6   : > { %266 = vst [vmem:[#allocation2 + $0x440] ss:$8 sm:$0xf0] %v213_v1  ;;  %v8817_v63 = vadd.f32 %v15870_v35, %v15869_v48  ;;  %9775 = vmatpush.msra.mxu3 %v14761_v4  ;;  %9787 = vmatpush.msra.mxu0 %v14853_v52  ;;  %v14861_v1 = vpop.f32.mrf.mxu2  ;;  %v10555_v20 = vadd.f32 %v10553_v27, %v10549_v62  ;;  %v15872_v49 = vld [vmem:[#allocation22_spill] sm:$0xff]  ;;  %v14874_v27 = vpop.f32.mrf.mxu0 }
 0x3d7   : > { %15871 = vst [vmem:[#allocation41_spill] sm:$0xff] %v14859_v42  ;;  %v8906_v23 = vadd.f32 %v15873_v41, %v15872_v49  ;;  %11006 = vmatmul.msk.f32.gmra.mxu1 %vm7432_vm5, %v14533_v57  ;;  %9703 = vmatpush.msra.mxu2 %v14859_v42  ;;  %v14868_v53 = vadd.f32 %v9319_v37, %v9296_v13  ;;  %v14872_v4 = vld [vmem:[#allocation2 + $0x268] sm:$0xff]  ;;  %v14878_v13 = vld [vmem:[#allocation2 + $0x270] sm:$0xff] }
 0x3d8   : > { %v10544_v15 = vadd.f32 %v10542_v21, %v10538_v9  ;;  %v10546_v48 = vadd.f32 %v10540_v7, %v8725_v16  ;;  %v10554_v35 = vmul.f32 %v8771_v22, %v8771_v22  ;;  %9749 = vmatpush.msrb.mxu1 %v14847_v40  ;;  %9776 = vmatpush.msra.mxu3 %v14666_v26  ;;  %v15874_v7 = vld [vmem:[#allocation20_spill] sm:$0xff]  ;;  %v15875_v21 = vld [vmem:[#allocation67_spill] sm:$0xff] }
 0x3d9   : > { %v10557_v62 = vadd.f32 %v10551_v2, %v8814_v32  ;;  %v10561_v41 = vadd.f32 %v10559_v30, %v10555_v20  ;;  %v10565_v49 = vmul.f32 %v8860_v0, %v8860_v0  ;;  %9788 = vmatpush.msra.mxu0 %v14723_v55  ;;  %9704 = vmatpush.msra.mxu2 %v14872_v4  ;;  %v15876_v40 = vld [vmem:[#allocation16_spill] sm:$0xff]  ;;  %v15877_v32 = vld [vmem:[#allocation13_spill] sm:$0xff] }
 0x3da   : > { %v10550_v9 = vadd.f32 %v10548_v17, %v10544_v15  ;;  %v10560_v16 = vmul.f32 %v8817_v63, %v8817_v63  ;;  %v8952_v37 = vadd.f32 %v15875_v21, %v15874_v7  ;;  %9750 = vmatpush.msrb.mxu1 %v14878_v13  ;;  %9777 = vmatpush.msra.mxu3 %v14674_v46  ;;  %v14888_v20 = vld [vmem:[#allocation2 + $0x260] sm:$0xff]  ;;  %v14895_v21 = vld [vmem:[#allocation2 + $0x258] sm:$0xff] }
 0x3db   : > { %v10552_v42 = vadd.f32 %v10546_v48, %v8771_v22  ;;  %v8863_v30 = vadd.f32 %v15877_v32, %v15876_v40  ;;  %v10571_v2 = vmul.f32 %v8906_v23, %v8906_v23  ;;  %9789 = vmatpush.msra.mxu0 %v14738_v38  ;;  %v8998_v15 = vadd.f32 %v14589_v24, %v14581_v3  ;;  %v11145_v40 = vld [vmem:[#allocation2 + $0x340] sm:$0xff]  ;;  %v9299_v3 = vpop.f32.mrf.mxu3 }
 0x3dc   : > { %9831 = vmatpush.msrb.mxu3 %v14666_v26  ;;  %v10556_v17 = vadd.f32 %v10554_v35, %v10550_v9  ;;  %9705 = vmatpush.msra.mxu2 %v14888_v20  ;;  %v10563_v7 = vadd.f32 %v10557_v62, %v8860_v0  ;;  %v10567_v22 = vadd.f32 %v10565_v49, %v10561_v41  ;;  %v9322_v41 = vpop.f32.mrf.mxu1  ;;  %v15878_v9 = vld [vmem:[#allocation26_spill] sm:$0xff] }
 0x3dd   : > { %9751 = vmatpush.msrb.mxu1 %v14872_v4  ;;  %v10558_v48 = vadd.f32 %v10552_v42, %v8817_v63  ;;  %9790 = vmatpush.msra.mxu0 %v14753_v45  ;;  %v10577_v46 = vmul.f32 %v8952_v37, %v8952_v37  ;;  %v8909_v35 = vadd.f32 %v14538_v12, %v14554_v28  ;;  %v14901_v63 = vld [vmem:[#allocation2 + $0x2d8] sm:$0xff]  ;;  %v1485_v42 = vld [vmem:[#allocation2 + $0x250] sm:$0xff] }
 0x3de   : > { %9832 = vmatpush.msrb.mxu3 %v11145_v40  ;;  %v10562_v32 = vadd.f32 %v10560_v16, %v10556_v17  ;;  %9706 = vmatpush.msra.mxu2 %v14895_v21  ;;  %v10566_v24 = vmul.f32 %v8863_v30, %v8863_v30  ;;  %v10569_v0 = vadd.f32 %v10563_v7, %v8906_v23  ;;  %v14908_v28 = vpop.f32.mrf.mxu2  ;;  %v15879_v17 = vld [vmem:[#allocation21_spill] sm:$0xff]  ;;  %v15880_v7 = vld [vmem:[#allocation72_spill] sm:$0xff] }
 0x3df   : > { %9752 = vmatpush.msrb.mxu1 %v14888_v20  ;;  %v10573_v62 = vadd.f32 %v10571_v2, %v10567_v22  ;;  %9791 = vmatpush.msra.mxu0 %v14901_v63  ;;  %v10583_v49 = vmul.f32 %v8998_v15, %v8998_v15  ;;  %v9044_v12 = vadd.f32 %v15878_v9, %v14556_v11  ;;  %v9250_v9 = vpop.f32.mrf.mxu0 }
 0x3e0   : > { %9833 = vmatpush.msrb.mxu3 %v14844_v47  ;;  %9707 = vmatpush.msra.mxu2 %v1485_v42  ;;  %v14910_v16 = vadd.f32 %v9322_v41, %v9299_v3  ;;  %v10564_v23 = vadd.f32 %v10558_v48, %v8863_v30  ;;  %v10575_v2 = vadd.f32 %v10569_v0, %v8952_v37  ;;  %v1301_v47 = vld [vmem:[#allocation2 + $0x248] sm:$0xff]  ;;  %v14922_v30 = vld [vmem:[#allocation2 + $0x3f8] sm:$0xff] }
 0x3e1   : > { %9753 = vmatpush.msrb.mxu1 %v14895_v21  ;;  %v8955_v22 = vadd.f32 %v15880_v7, %v15879_v17  ;;  %9792 = vmatpush.msra.mxu0 %v14803_v61  ;;  %v10579_v40 = vadd.f32 %v10577_v46, %v10573_v62  ;;  %v10572_v45 = vmul.f32 %v8909_v35, %v8909_v35  ;;  %v14952_v7 = vld [vmem:[#allocation7 + $0x8] sm:$0xff] }
 0x3e2   : > { %9834 = vmatpush.msrb.mxu3 %v14853_v52  ;;  %v9090_v11 = vadd.f32 %v14679_v33, %v14696_v43  ;;  %9708 = vmatpush.msra.mxu2 %v1301_v47  ;;  %v10568_v3 = vadd.f32 %v10566_v24, %v10562_v32  ;;  %v10581_v41 = vadd.f32 %v10575_v2, %v8998_v15  ;;  %v14928_v33 = vld [vmem:[#allocation2 + $0x400] sm:$0xff] }
 0x3e3   : > { %9754 = vmatpush.msrb.mxu1 %v1485_v42  ;;  %v9001_v37 = vadd.f32 %v14640_v36, %v14628_v18  ;;  %9793 = vmatpush.msra.mxu0 %v14801_v59  ;;  %v10585_v48 = vadd.f32 %v10583_v49, %v10579_v40  ;;  %v10589_v46 = vmul.f32 %v9044_v12, %v9044_v12  ;;  %v11147_v42 = vld [vmem:[#allocation2 + $0x2e0] sm:$0xff] }
 0x3e4   : > { %9709 = vmatmul.f32.vlgmr.msra.gmra.mxu2 %v14649_v51  ;;  %v9136_v0 = vadd.f32 %v14644_v60, %v14631_v25  ;;  %9835 = vmatpush.msrb.mxu3 %v14723_v55  ;;  %v10570_v43 = vadd.f32 %v10564_v23, %v8909_v35  ;;  %v10578_v15 = vmul.f32 %v8955_v22, %v8955_v22  ;;  %v15881_v47 = vld [vmem:[#allocation29_spill] sm:$0xff]  ;;  %v15882_v40 = vld [vmem:[#allocation32_spill] sm:$0xff] }
 0x3e5   : > { %9815 = vmatpush.msrb.mxu2 %v14922_v30  ;;  %9861 = vmatpush.msra.mxu1 %v14928_v33  ;;  %v10574_v18 = vadd.f32 %v10572_v45, %v10568_v3  ;;  %v10595_v36 = vmul.f32 %v9090_v11, %v9090_v11  ;;  %v9182_v32 = vadd.f32 %v14807_v31, %v14788_v10 }
 0x3e6   : > { %9794 = vmatpush.msra.mxu0 %v14820_v50  ;;  %11009 = vmatmul.msk.f32.vlgmr.msra.gmra.mxu3 %vm7432_vm5, %v14474_v34  ;;  %v10576_v25 = vadd.f32 %v10570_v43, %v8955_v22  ;;  %v10587_v60 = vadd.f32 %v10581_v41, %v9044_v12  ;;  %v10584_v24 = vmul.f32 %v9001_v37, %v9001_v37  ;;  %v14975_v43 = vld [vmem:[#allocation2 + $0x3a0] sm:$0xff] }
 0x3e7   : > { %9816 = vmatpush.msrb.mxu2 %v14759_v8  ;;  %9836 = vmatpush.msrb.mxu3 %v14738_v38  ;;  %v10591_v35 = vadd.f32 %v10589_v46, %v10585_v48  ;;  %v9047_v45 = vadd.f32 %v14591_v58, %v14601_v6  ;;  %v10601_v62 = vmul.f32 %v9136_v0, %v9136_v0  ;;  %v14948_v58 = vpop.f32.mrf.mxu2 }
 0x3e8   : > { %9862 = vmatpush.msra.mxu1 %v14922_v30  ;;  %9795 = vmatpush.msra.mxu0 %v14835_v56  ;;  %v10580_v10 = vadd.f32 %v10578_v15, %v10574_v18  ;;  %v10582_v34 = vadd.f32 %v10576_v25, %v9001_v37  ;;  %v10593_v31 = vadd.f32 %v10587_v60, %v9090_v11  ;;  %v14968_v37 = vld [vmem:[#allocation2 + $0x398] sm:$0xff] }
 0x3e9   : > { %9817 = vmatpush.msrb.mxu2 %v14692_v44  ;;  %9837 = vmatpush.msrb.mxu3 %v11147_v42  ;;  %v10597_v49 = vadd.f32 %v10595_v36, %v10591_v35  ;;  %v10607_v12 = vmul.f32 %v9182_v32, %v9182_v32  ;;  %v9228_v23 = vadd.f32 %v14734_v5, %v14744_v19  ;;  %v9253_v19 = vpop.f32.mrf.mxu0  ;;  %v15886_v35 = vld [vmem:[#allocation38_spill] sm:$0xff] }
 0x3ea   : > { %9863 = vmatpush.msra.mxu1 %v14759_v8  ;;  %9796 = vmatpush.msra.mxu0 %v14516_v14  ;;  %v10586_v6 = vadd.f32 %v10584_v24, %v10580_v10  ;;  %v10599_v2 = vadd.f32 %v10593_v31, %v9136_v0  ;;  %v9093_v17 = vadd.f32 %v14740_v29, %v14749_v39  ;;  %v15883_v39 = vld [vmem:[#allocation31_spill] sm:$0xff] }
 0x3eb   : > { %9818 = vmatpush.msrb.mxu2 %v14604_v54  ;;  %11007 = vmatmul.msk.f32.vlgmr.msrb.gmra.mxu0 %vm7432_vm5, %v14952_v7  ;;  %v10590_v22 = vmul.f32 %v9047_v45, %v9047_v45  ;;  %v10603_v5 = vadd.f32 %v10601_v62, %v10597_v49  ;;  %v9274_v14 = vadd.f32 %v14908_v28, %v9250_v9 }
 0x3ec   : > { %9838 = vmatpush.msrb.mxu3 %v14901_v63  ;;  %9864 = vmatpush.msra.mxu1 %v14692_v44  ;;  %v9139_v11 = vadd.f32 %v15882_v40, %v15881_v47  ;;  %v10605_v29 = vadd.f32 %v10599_v2, %v9182_v32  ;;  %v10613_v41 = vmul.f32 %v9228_v23, %v9228_v23  ;;  %v15884_v63 = vld [vmem:[#allocation25_spill] sm:$0xff] }
 0x3ed   : > { %9797 = vmatpush.msra.mxu0 %v14878_v13  ;;  %9712 = vmatmul.f32.gmra.mxu2 %v15883_v39  ;;  %v10609_v3 = vadd.f32 %v10607_v12, %v10603_v5  ;;  %v10588_v28 = vadd.f32 %v10582_v34, %v9047_v45  ;;  %v10596_v9 = vmul.f32 %v9093_v17, %v9093_v17  ;;  %v15887_v45 = vld [vmem:[#allocation40_spill] sm:$0xff]  ;;  %v15888_v34 = vld [vmem:[#allocation35_spill] sm:$0xff]  ;;  %v14994_v2 = vld [vmem:[#allocation2 + $0x408] sm:$0xff] }
 0x3ee   : > { %9755 = vmatmul.f32.vlgmr.msrb.gmra.mxu1 %v14649_v51  ;;  %9819 = vmatpush.msrb.mxu2 %v15884_v63  ;;  %v10592_v48 = vadd.f32 %v10590_v22, %v10586_v6  ;;  %v9185_v46 = vadd.f32 %v14874_v27, %v14861_v1  ;;  %v10619_v0 = vmul.f32 %v9274_v14, %v9274_v14  ;;  %v15885_v1 = vld [vmem:[#allocation37_spill] sm:$0xff] }
 0x3ef   : > { %9839 = vmatpush.msrb.mxu3 %v14803_v61  ;;  %9865 = vmatpush.msra.mxu1 %v14604_v54  ;;  %v10594_v15 = vadd.f32 %v10588_v28, %v9093_v17  ;;  %v10602_v18 = vmul.f32 %v9139_v11, %v9139_v11  ;;  %v10611_v36 = vadd.f32 %v10605_v29, %v9228_v23  ;;  %v14990_v23 = vld [vmem:[#allocation7 + $0x18] sm:$0xff] }
 0x3f0   : > { %9798 = vmatpush.msra.mxu0 %v14872_v4  ;;  %11010 = vmatmul.msk.f32.gmra.mxu3 %vm7432_vm5, %v14533_v57  ;;  %v10615_v54 = vadd.f32 %v10613_v41, %v10609_v3  ;;  %v10625_v32 = vmul.f32 %v14868_v53, %v14868_v53  ;;  %v9342_v57 = vpop.f32.mrf.mxu2  ;;  %v10598_v27 = vadd.f32 %v10596_v9, %v10592_v48  ;;  %v9411_v42 = vpop.f32.mrf.mxu3  ;;  %v11150_v6 = vld [vmem:[#allocation2 + $0x280] sm:$0xff]  ;;  %v11151_v3 = vld [vmem:[#allocation2 + $0x278] sm:$0xff]  ;;  %v15011_v9 = vld [vmem:[#allocation2 + $0x348] sm:$0xff] }
 0x3f1   : > { %9820 = vmatpush.msrb.mxu2 %v14968_v37  ;;  %9840 = vmatpush.msrb.mxu3 %v14801_v59  ;;  %v10600_v25 = vadd.f32 %v10594_v15, %v9139_v11  ;;  %v10617_v60 = vadd.f32 %v10611_v36, %v9274_v14  ;;  %v10608_v24 = vmul.f32 %v9185_v46, %v9185_v46  ;;  %v9365_v31 = vpop.f32.mrf.mxu0  ;;  %v15013_v48 = vld [vmem:[#allocation2 + $0x350] sm:$0xff] }
 0x3f2   : > { %9866 = vmatpush.msra.mxu1 %v14975_v43  ;;  %9799 = vmatpush.msra.mxu0 %v14888_v20  ;;  %v9231_v62 = vadd.f32 %v15887_v45, %v15886_v35  ;;  %v10621_v10 = vadd.f32 %v10619_v0, %v10615_v54  ;;  %v10604_v49 = vadd.f32 %v10602_v18, %v10598_v27  ;;  %v9388_v14 = vpop.f32.mrf.mxu1  ;;  %v15023_v54 = vld [vmem:[#allocation2 + $0x340] sm:$0xff]  ;;  %v15032_v35 = vld [vmem:[#allocation2 + $0x338] sm:$0xff] }
 0x3f3   : > { %9821 = vmatpush.msrb.mxu2 %v15885_v1  ;;  %9841 = vmatpush.msrb.mxu3 %v14820_v50  ;;  %v10623_v12 = vadd.f32 %v10617_v60, %v14868_v53  ;;  %v9366_v17 = vadd.f32 %v9365_v31, %v9342_v57  ;;  %v10606_v22 = vadd.f32 %v10600_v25, %v9185_v46 }
 0x3f4   : > { %9867 = vmatpush.msra.mxu1 %v14968_v37  ;;  %9800 = vmatpush.msra.mxu0 %v14895_v21  ;;  %v10627_v5 = vadd.f32 %v10625_v32, %v10621_v10  ;;  %v9277_v21 = vadd.f32 %v14948_v58, %v9253_v19  ;;  %v9412_v40 = vadd.f32 %v9411_v42, %v9388_v14  ;;  %v15889_v14 = vld [vmem:[#allocation28_spill] sm:$0xff] }
 0x3f5   : > { %9822 = vmatpush.msrb.mxu2 %v15888_v34  ;;  %11008 = vmatmul.msk.f32.gmra.mxu0 %vm7432_vm5, %v14990_v23  ;;  %v10629_v53 = vadd.f32 %v10623_v12, %v9366_v17  ;;  %v10631_v47 = vmul.f32 %v9366_v17, %v9366_v17  ;;  %v10610_v11 = vadd.f32 %v10608_v24, %v10604_v49  ;;  %v15058_v49 = vld [vmem:[#allocation2 + $0x2e8] sm:$0xff]  ;;  %v15060_v12 = vld [vmem:[#allocation2 + $0x2f0] sm:$0xff] }
 0x3f6   : > { %9842 = vmatpush.msrb.mxu3 %v11150_v6  ;;  %9868 = vmatpush.msra.mxu1 %v15885_v1  ;;  %v10614_v29 = vmul.f32 %v9231_v62, %v9231_v62  ;;  %v10637_v41 = vmul.f32 %v9412_v40, %v9412_v40  ;;  %v10620_v63 = vmul.f32 %v9277_v21, %v9277_v21  ;;  %v15068_v6 = vld [vmem:[#allocation2 + $0x2e0] sm:$0xff] }
 0x3f7   : > { %9907 = vmatpush.msrb.mxu0 %v14994_v2  ;;  %9758 = vmatmul.f32.gmra.mxu1 %v15883_v39  ;;  %v10633_v58 = vadd.f32 %v10631_v47, %v10627_v5  ;;  %v15005_v19 = vadd.f32 %v10629_v53, %v9412_v40  ;;  %v10612_v28 = vadd.f32 %v10606_v22, %v9231_v62  ;;  %v15036_v62 = vld [vmem:[#allocation2 + $0x410] sm:$0xff]  ;;  %v15074_v22 = vld [vmem:[#allocation2 + $0x2d8] sm:$0xff] }
 0x3f8   : > { %9823 = vmatpush.msrb.mxu2 %v14666_v26  ;;  %9843 = vmatpush.msrb.mxu3 %v11151_v3  ;;  %v10616_v0 = vadd.f32 %v10614_v29, %v10610_v11  ;;  %v10626_v15 = vmul.f32 %v14910_v16, %v14910_v16  ;;  %v9345_v18 = vpop.f32.mrf.mxu2  ;;  %v15093_v11 = vld [vmem:[#allocation2 + $0x288] sm:$0xff]  ;;  %v15097_v3 = vld [vmem:[#allocation2 + $0x290] sm:$0xff] }
 0x3f9   : > { %9869 = vmatpush.msra.mxu1 %v15888_v34  ;;  %9908 = vmatpush.msrb.mxu0 %v14928_v33  ;;  %v15015_v46 = vadd.f32 %v10637_v41, %v10633_v58  ;;  %v10618_v36 = vadd.f32 %v10612_v28, %v9277_v21  ;;  %v9368_v57 = vpop.f32.mrf.mxu0 }
 0x3fa   : > { %11011 = vmatmul.msk.f32.vlgmr.msrb.gmra.mxu2 %vm7432_vm5, %v14952_v7  ;;  %9844 = vmatpush.msrb.mxu3 %v14878_v13  ;;  %v10622_v32 = vadd.f32 %v10620_v63, %v10616_v0  ;;  %v9369_v25 = vadd.f32 %v9368_v57, %v9345_v18  ;;  %v9414_v60 = vpop.f32.mrf.mxu3  ;;  %v15104_v63 = vld [vmem:[#allocation2 + $0x280] sm:$0xff]  ;;  %v2963_v0 = vld [vmem:[#allocation2 + $0x2f8] sm:$0xff] }
 0x3fb   : > { %9877 = vmatpush.msra.mxu2 %v15888_v34  ;;  %9923 = vmatpush.msrb.mxu1 %v15885_v1  ;;  %v10624_v27 = vadd.f32 %v10618_v36, %v14910_v16  ;;  %v9391_v45 = vpop.f32.mrf.mxu1  ;;  %v15038_v16 = vld [vmem:[#allocation2 + $0x3a8] sm:$0xff]  ;;  %v15890_v18 = vld [vmem:[#allocation27_spill] sm:$0xff] }
 0x3fc   : > { %9909 = vmatpush.msrb.mxu0 %v14922_v30  ;;  %9845 = vmatpush.msrb.mxu3 %v14872_v4  ;;  %v10628_v24 = vadd.f32 %v10626_v15, %v10622_v32  ;;  %v9415_v10 = vadd.f32 %v9414_v60, %v9391_v45  ;;  %v15892_v45 = vld [vmem:[#allocation33_spill] sm:$0xff] }
 0x3fd   : > { %9878 = vmatpush.msra.mxu2 %v15011_v9  ;;  %9924 = vmatpush.msrb.mxu1 %v15013_v48 }
 0x3fe   : > { %9910 = vmatpush.msrb.mxu0 %v14759_v8  ;;  %9846 = vmatpush.msrb.mxu3 %v14888_v20  ;;  %v10630_v20 = vadd.f32 %v10624_v27, %v9369_v25  ;;  %v10638_v31 = vmul.f32 %v9415_v10, %v9415_v10  ;;  %v15126_v27 = vld [vmem:[#allocation7] sm:$0xff] }
 0x3ff   : > { %9879 = vmatpush.msra.mxu2 %v15023_v54  ;;  %9925 = vmatpush.msrb.mxu1 %v15011_v9 }
 0x400   : > { %9911 = vmatpush.msrb.mxu0 %v14692_v44  ;;  %9847 = vmatmul.f32.vlgmr.msrb.gmra.mxu3 %v14649_v51  ;;  %v10632_v44 = vmul.f32 %v9369_v25, %v9369_v25  ;;  %v15045_v34 = vadd.f32 %v10630_v20, %v9415_v10  ;;  %v5723_v25 = vld [vmem:[#allocation2 + $0x418] sm:$0xff]  ;;  %v15132_v20 = vld [vmem:[#allocation2 + $0x440] sm:$0xff]  ;;  %v15146_v10 = vld [vmem:[#allocation2 + $0x430] sm:$0xff] }
 0x401   : > { %9801 = vmatmul.f32.vlgmr.msra.gmra.mxu0 %v14649_v51  ;;  %9880 = vmatpush.msra.mxu2 %v15032_v35 }
 0x402   : > { %9926 = vmatpush.msrb.mxu1 %v15023_v54  ;;  %9953 = vmatpush.msra.mxu3 %v15036_v62  ;;  %v10634_v51 = vadd.f32 %v10632_v44, %v10628_v24  ;;  %v15141_v44 = vld [vmem:[#allocation2 + $0x438] sm:$0xff] }
 0x403   : > { %9912 = vmatpush.msrb.mxu0 %v15038_v16  ;;  %11012 = vmatmul.msk.f32.gmra.mxu2 %vm7432_vm5, %v14990_v23 }
 0x404   : > { %9927 = vmatpush.msrb.mxu1 %v15032_v35  ;;  %9881 = vmatpush.msra.mxu2 %v14853_v52  ;;  %v15051_v42 = vadd.f32 %v10638_v31, %v10634_v51  ;;  %v2043_v51 = vld [vmem:[#allocation2 + $0x298] sm:$0xff] }
 0x405   : > { %9954 = vmatpush.msra.mxu3 %v14994_v2  ;;  %9913 = vmatpush.msrb.mxu0 %v14975_v43  ;;  %v15165_v31 = vld [vmem:[#allocation2 + $0x3b8] sm:$0xff] }
 0x406   : > { %9928 = vmatpush.msrb.mxu1 %v14853_v52  ;;  %9882 = vmatpush.msra.mxu2 %v14723_v55  ;;  %v9457_v52 = vpop.f32.mrf.mxu2  ;;  %v9434_v55 = vpop.f32.mrf.mxu0 }
 0x407   : > { %9955 = vmatpush.msra.mxu3 %v14928_v33  ;;  %9914 = vmatpush.msrb.mxu0 %v14968_v37  ;;  %v9458_v17 = vadd.f32 %v9457_v52, %v9434_v55 }
 0x408   : > { %11013 = vmatmul.msk.f32.vlgmr.msra.gmra.mxu1 %vm7432_vm5, %v14952_v7  ;;  %9883 = vmatpush.msra.mxu2 %v15058_v49 }
 0x409   : > { %9929 = vmatpush.msrb.mxu1 %v15060_v12  ;;  %9956 = vmatpush.msra.mxu3 %v14922_v30  ;;  %v10641_v5 = vadd.f32 %v15005_v19, %v9458_v17  ;;  %v10643_v21 = vmul.f32 %v9458_v17, %v9458_v17  ;;  %v15184_v17 = vld [vmem:[#allocation2 + $0x3d0] sm:$0xff] }
 0x40a   : > { %9915 = vmatpush.msrb.mxu0 %v15885_v1  ;;  %9850 = vmatmul.f32.gmra.mxu3 %v15883_v39 }
 0x40b   : > { %9804 = vmatmul.f32.gmra.mxu0 %v15883_v39  ;;  %9884 = vmatpush.msra.mxu2 %v15068_v6  ;;  %v15079_v39 = vld [vmem:[#allocation2 + $0x3b0] sm:$0xff]  ;;  %v10645_v53 = vadd.f32 %v10643_v21, %v15015_v46  ;;  %v15113_v46 = vld [vmem:[#allocation2 + $0x278] sm:$0xff] }
 0x40c   : > { %9930 = vmatpush.msrb.mxu1 %v15058_v49  ;;  %9957 = vmatpush.msra.mxu3 %v14759_v8  ;;  %v9480_v8 = vpop.f32.mrf.mxu3  ;;  %v9503_v47 = vpop.f32.mrf.mxu1 }
 0x40d   : > { %9969 = vmatpush.msra.mxu0 %v14968_v37  ;;  %9885 = vmatpush.msra.mxu2 %v15074_v22  ;;  %v9504_v40 = vadd.f32 %v9503_v47, %v9480_v8  ;;  %v4256_v8 = vld [vmem:[#allocation2 + $0x3c8] sm:$0xff] }
 0x40e   : > { %9931 = vmatpush.msrb.mxu1 %v15068_v6  ;;  %9958 = vmatpush.msra.mxu3 %v15079_v39  ;;  %v9460_v29 = vpop.f32.mrf.mxu2 }
 0x40f   : > { %9970 = vmatpush.msra.mxu0 %v15889_v14  ;;  %9886 = vmatpush.msra.mxu2 %v14803_v61  ;;  %v15099_v58 = vadd.f32 %v10641_v5, %v9504_v40  ;;  %v10649_v19 = vmul.f32 %v9504_v40, %v9504_v40  ;;  %v9437_v41 = vpop.f32.mrf.mxu0  ;;  %v15186_v5 = vld [vmem:[#allocation2 + $0x448] sm:$0xff] }
 0x410   : > { %9932 = vmatpush.msrb.mxu1 %v15074_v22  ;;  %9959 = vmatpush.msra.mxu3 %v15038_v16 }
 0x411   : > { %9971 = vmatpush.msra.mxu0 %v15013_v48  ;;  %11014 = vmatmul.msk.f32.gmra.mxu1 %vm7432_vm5, %v14990_v23  ;;  %v15106_v28 = vadd.f32 %v10649_v19, %v10645_v53  ;;  %v15896_v19 = vld [vmem:[#allocation42_spill] sm:$0xff] }
 0x412   : > { %9887 = vmatpush.msra.mxu2 %v14801_v59  ;;  %9933 = vmatpush.msrb.mxu1 %v14803_v61  ;;  %v9461_v59 = vadd.f32 %v9460_v29, %v9437_v41  ;;  %v11152_v61 = vld [vmem:[#allocation2 + $0x3c0] sm:$0xff] }
 0x413   : > { %9960 = vmatpush.msra.mxu3 %v14975_v43  ;;  %9972 = vmatpush.msra.mxu0 %v15011_v9 }
 0x414   : > { %9888 = vmatpush.msra.mxu2 %v15093_v11  ;;  %9934 = vmatpush.msrb.mxu1 %v15097_v3  ;;  %v10642_v9 = vadd.f32 %v15045_v34, %v9461_v59  ;;  %v10644_v48 = vmul.f32 %v9461_v59, %v9461_v59  ;;  %v15154_v34 = vld [vmem:[#allocation2 + $0x428] sm:$0xff] }
 0x415   : > { %9961 = vmatpush.msra.mxu3 %v14968_v37  ;;  %9973 = vmatpush.msra.mxu0 %v15023_v54  ;;  %v15897_v59 = vld [vmem:[#allocation41_spill] sm:$0xff] }
 0x416   : > { %9889 = vmatpush.msra.mxu2 %v15104_v63  ;;  %9935 = vmatpush.msrb.mxu1 %v15093_v11  ;;  %v10646_v15 = vadd.f32 %v10644_v48, %v15051_v42  ;;  %v9483_v36 = vpop.f32.mrf.mxu3  ;;  %v15170_v42 = vld [vmem:[#allocation2 + $0x3e0] sm:$0xff] }
 0x417   : > { %10015 = vmatpush.msrb.mxu3 %v11152_v61  ;;  %9974 = vmatpush.msra.mxu0 %v15032_v35  ;;  %v15211_v61 = vld [vmem:[#allocation2 + $0x380] sm:$0xff] }
 0x418   : > { %9890 = vmatpush.msra.mxu2 %v15113_v46  ;;  %9936 = vmatpush.msrb.mxu1 %v15104_v63  ;;  %v9506_v32 = vpop.f32.mrf.mxu1 }
 0x419   : > { %10016 = vmatpush.msrb.mxu3 %v14666_v26  ;;  %9975 = vmatpush.msra.mxu0 %v2963_v0  ;;  %v15891_v26 = vld [vmem:[#allocation30_spill] sm:$0xff]  ;;  %v9507_v57 = vadd.f32 %v9506_v32, %v9483_v36 }
 0x41a   : > { %9891 = vmatpush.msra.mxu2 %v14878_v13  ;;  %9937 = vmatpush.msrb.mxu1 %v15113_v46  ;;  %v15222_v0 = vld [vmem:[#allocation2 + $0x450] sm:$0xff] }
 0x41b   : > { %10017 = vmatpush.msrb.mxu3 %v15890_v18  ;;  %9976 = vmatpush.msra.mxu0 %v15060_v12  ;;  %v15129_v60 = vadd.f32 %v10642_v9, %v9507_v57  ;;  %v10650_v24 = vmul.f32 %v9507_v57, %v9507_v57  ;;  %v15176_v12 = vld [vmem:[#allocation2 + $0x3d8] sm:$0xff] }
 0x41c   : > { %9892 = vmatpush.msra.mxu2 %v14872_v4  ;;  %9938 = vmatpush.msrb.mxu1 %v14878_v13  ;;  %v3152_v13 = vld [vmem:[#allocation2 + $0x360] sm:$0xff] }
 0x41d   : > { %10018 = vmatpush.msrb.mxu3 %v15891_v26  ;;  %9977 = vmatpush.msra.mxu0 %v15058_v49  ;;  %v15136_v4 = vadd.f32 %v10650_v24, %v10646_v15  ;;  %v15895_v49 = vld [vmem:[#allocation39_spill] sm:$0xff]  ;;  %v15224_v15 = vld [vmem:[#allocation2 + $0x3e8] sm:$0xff] }
 0x41e   : > { %9893 = vmatmul.f32.vlgmr.msra.gmra.mxu2 %v15126_v27  ;;  %10045 = vmatpush.msra.mxu1 %v15132_v20  ;;  %v3337_v26 = vld [vmem:[#allocation2 + $0x370] sm:$0xff] }
 0x41f   : > { %9999 = vmatpush.msrb.mxu2 %v5723_v25  ;;  %10019 = vmatpush.msrb.mxu3 %v15892_v45 }
 0x420   : > { %9978 = vmatpush.msra.mxu0 %v15068_v6  ;;  %11017 = vmatmul.msk.f32.vlgmr.msra.gmra.mxu3 %vm7432_vm5, %v14952_v7 }
 0x421   : > { %10000 = vmatpush.msrb.mxu2 %v15036_v62  ;;  %10020 = vmatpush.msrb.mxu3 %v3152_v13  ;;  %v15893_v62 = vld [vmem:[#allocation34_spill] sm:$0xff] }
 0x422   : > { %10046 = vmatpush.msra.mxu1 %v15141_v44  ;;  %9979 = vmatpush.msra.mxu0 %v15074_v22  ;;  %v15245_v13 = vld [vmem:[#allocation2 + $0x330] sm:$0xff] }
 0x423   : > { %10001 = vmatpush.msrb.mxu2 %v14994_v2  ;;  %10021 = vmatpush.msrb.mxu3 %v14738_v38  ;;  %v15158_v2 = vld [vmem:[#allocation7 + $0x10] sm:$0xff]  ;;  %v15894_v38 = vld [vmem:[#allocation36_spill] sm:$0xff] }
 0x424   : > { %10047 = vmatpush.msra.mxu1 %v15146_v10  ;;  %9980 = vmatpush.msra.mxu0 %v2043_v51 }
 0x425   : > { %10002 = vmatpush.msrb.mxu2 %v14928_v33  ;;  %11015 = vmatmul.msk.f32.vlgmr.msrb.gmra.mxu0 %vm7432_vm5, %v14952_v7  ;;  %v4992_v33 = vld [vmem:[#allocation2 + $0x420] sm:$0xff] }
 0x426   : > { %10022 = vmatpush.msrb.mxu3 %v15893_v62  ;;  %10048 = vmatpush.msra.mxu1 %v15154_v34 }
 0x427   : > { %9981 = vmatpush.msra.mxu0 %v15097_v3  ;;  %9896 = vmatmul.f32.gmra.mxu2 %v15158_v2 }
 0x428   : > { %9939 = vmatmul.f32.vlgmr.msrb.gmra.mxu1 %v15126_v27  ;;  %10003 = vmatpush.msrb.mxu2 %v14922_v30  ;;  %v2232_v30 = vld [vmem:[#allocation2 + $0x300] sm:$0xff] }
 0x429   : > { %10023 = vmatpush.msrb.mxu3 %v15894_v38  ;;  %10049 = vmatpush.msra.mxu1 %v4992_v33  ;;  %v15259_v33 = vld [vmem:[#allocation2 + $0x318] sm:$0xff] }
 0x42a   : > { %9982 = vmatpush.msra.mxu0 %v15093_v11  ;;  %11018 = vmatmul.msk.f32.gmra.mxu3 %vm7432_vm5, %v14990_v23  ;;  %v9526_v52 = vpop.f32.mrf.mxu2 }
 0x42b   : > { %10004 = vmatpush.msrb.mxu2 %v15165_v31  ;;  %10024 = vmatpush.msrb.mxu3 %v15895_v49 }
 0x42c   : > { %10050 = vmatpush.msra.mxu1 %v15170_v42  ;;  %9983 = vmatpush.msra.mxu0 %v15104_v63  ;;  %v9549_v55 = vpop.f32.mrf.mxu0  ;;  %v1312_v63 = vld [vmem:[#allocation2 + $0x2a0] sm:$0xff] }
 0x42d   : > { %10005 = vmatpush.msrb.mxu2 %v15079_v39  ;;  %10025 = vmatpush.msrb.mxu3 %v2232_v30  ;;  %v9550_v21 = vadd.f32 %v9549_v55, %v9526_v52  ;;  %v9595_v14 = vpop.f32.mrf.mxu3  ;;  %v15264_v52 = vld [vmem:[#allocation2 + $0x3f0] sm:$0xff] }
 0x42e   : > { %10051 = vmatpush.msra.mxu1 %v15176_v12  ;;  %9984 = vmatpush.msra.mxu0 %v15113_v46  ;;  %v9572_v53 = vpop.f32.mrf.mxu1  ;;  %v2417_v55 = vld [vmem:[#allocation2 + $0x310] sm:$0xff] }
 0x42f   : > { %10006 = vmatpush.msrb.mxu2 %v15038_v16  ;;  %11016 = vmatmul.msk.f32.gmra.mxu0 %vm7432_vm5, %v14990_v23  ;;  %v10653_v47 = vadd.f32 %v15099_v58, %v9550_v21  ;;  %v10655_v40 = vmul.f32 %v9550_v21, %v9550_v21  ;;  %v15203_v58 = vld [vmem:[#allocation2 + $0x388] sm:$0xff] }
 0x430   : > { %10026 = vmatpush.msrb.mxu3 %v14820_v50  ;;  %10052 = vmatpush.msra.mxu1 %v15184_v17  ;;  %v9596_v50 = vadd.f32 %v9595_v14, %v9572_v53  ;;  %v2233_v14 = vld [vmem:[#allocation2 + $0x308] sm:$0xff] }
 0x431   : > { %10091 = vmatpush.msrb.mxu0 %v15186_v5  ;;  %9942 = vmatmul.f32.gmra.mxu1 %v15158_v2  ;;  %v10657_v11 = vadd.f32 %v10655_v40, %v15106_v28 }
 0x432   : > { %10007 = vmatpush.msrb.mxu2 %v14975_v43  ;;  %10027 = vmatpush.msrb.mxu3 %v14835_v56  ;;  %v15198_v29 = vadd.f32 %v10653_v47, %v9596_v50  ;;  %v10661_v3 = vmul.f32 %v9596_v50, %v9596_v50  ;;  %v15277_v47 = vld [vmem:[#allocation2 + $0x2c8] sm:$0xff]  ;;  %v15281_v50 = vld [vmem:[#allocation2 + $0x2d0] sm:$0xff] }
 0x433   : > { %10053 = vmatpush.msra.mxu1 %v4256_v8  ;;  %10092 = vmatpush.msrb.mxu0 %v15132_v20 }
 0x434   : > { %11019 = vmatmul.msk.f32.vlgmr.msrb.gmra.mxu2 %vm7432_vm5, %v14952_v7  ;;  %10028 = vmatpush.msrb.mxu3 %v15896_v19  ;;  %v15205_v56 = vadd.f32 %v10661_v3, %v10657_v11  ;;  %v9529_v41 = vpop.f32.mrf.mxu2 }
 0x435   : > { %10061 = vmatpush.msra.mxu2 %v4256_v8  ;;  %10107 = vmatpush.msrb.mxu1 %v15184_v17 }
 0x436   : > { %10093 = vmatpush.msrb.mxu0 %v15141_v44  ;;  %10029 = vmatpush.msrb.mxu3 %v15897_v59  ;;  %v9552_v28 = vpop.f32.mrf.mxu0 }
 0x437   : > { %10062 = vmatpush.msra.mxu2 %v15203_v58  ;;  %10108 = vmatpush.msrb.mxu1 %v15885_v1  ;;  %v9553_v9 = vadd.f32 %v9552_v28, %v9529_v41  ;;  %v9598_v48 = vpop.f32.mrf.mxu3  ;;  %v15218_v1 = vld [vmem:[#allocation2 + $0x378] sm:$0xff] }
 0x438   : > { %10094 = vmatpush.msrb.mxu0 %v15146_v10  ;;  %10030 = vmatpush.msrb.mxu3 %v1312_v63  ;;  %v9575_v46 = vpop.f32.mrf.mxu1 }
 0x439   : > { %10063 = vmatpush.msra.mxu2 %v15211_v61  ;;  %10109 = vmatpush.msrb.mxu1 %v15203_v58  ;;  %v10654_v18 = vadd.f32 %v15129_v60, %v9553_v9  ;;  %v10656_v36 = vmul.f32 %v9553_v9, %v9553_v9  ;;  %v9599_v32 = vadd.f32 %v9598_v48, %v9575_v46  ;;  %v3153_v60 = vld [vmem:[#allocation2 + $0x368] sm:$0xff]  ;;  %v1497_v9 = vld [vmem:[#allocation2 + $0x2b0] sm:$0xff] }
 0x43a   : > { %10095 = vmatpush.msrb.mxu0 %v15154_v34  ;;  %10031 = vmatmul.f32.vlgmr.msrb.gmra.mxu3 %v15126_v27  ;;  %v15253_v34 = vld [vmem:[#allocation2 + $0x320] sm:$0xff] }
 0x43b   : > { %9985 = vmatmul.f32.vlgmr.msra.gmra.mxu0 %v15126_v27  ;;  %10064 = vmatpush.msra.mxu2 %v15218_v1  ;;  %v10658_v57 = vadd.f32 %v10656_v36, %v15136_v4  ;;  %v15233_v25 = vadd.f32 %v10654_v18, %v9599_v32  ;;  %v10662_v24 = vmul.f32 %v9599_v32, %v9599_v32  ;;  %v15243_v4 = vld [vmem:[#allocation2 + $0x328] sm:$0xff]  ;;  %v15306_v18 = vld [vmem:[#allocation2 + $0x458] sm:$0xff]  ;;  %v15312_v32 = vld [vmem:[#allocation2 + $0x460] sm:$0xff] }
 0x43c   : > { %10110 = vmatpush.msrb.mxu1 %v15211_v61  ;;  %10137 = vmatpush.msra.mxu3 %v15222_v0 }
 0x43d   : > { %10096 = vmatpush.msrb.mxu0 %v15224_v15  ;;  %11020 = vmatmul.msk.f32.gmra.mxu2 %vm7432_vm5, %v14990_v23  ;;  %v15237_v45 = vadd.f32 %v10662_v24, %v10658_v57 }
 0x43e   : > { %10111 = vmatpush.msrb.mxu1 %v15218_v1  ;;  %10065 = vmatpush.msra.mxu2 %v3337_v26 }
 0x43f   : > { %10138 = vmatpush.msra.mxu3 %v15186_v5  ;;  %10097 = vmatpush.msrb.mxu0 %v15170_v42 }
 0x440   : > { %10112 = vmatpush.msrb.mxu1 %v3337_v26  ;;  %10066 = vmatpush.msra.mxu2 %v3153_v60  ;;  %v9641_v51 = vpop.f32.mrf.mxu2 }
 0x441   : > { %10139 = vmatpush.msra.mxu3 %v15132_v20  ;;  %10098 = vmatpush.msrb.mxu0 %v15176_v12  ;;  %v9618_v62 = vpop.f32.mrf.mxu0 }
 0x442   : > { %11021 = vmatmul.msk.f32.vlgmr.msra.gmra.mxu1 %vm7432_vm5, %v14952_v7  ;;  %10067 = vmatpush.msra.mxu2 %v15243_v4  ;;  %v9642_v38 = vadd.f32 %v9641_v51, %v9618_v62 }
 0x443   : > { %10113 = vmatpush.msrb.mxu1 %v15245_v13  ;;  %10140 = vmatpush.msra.mxu3 %v15141_v44 }
 0x444   : > { %10099 = vmatpush.msrb.mxu0 %v15184_v17  ;;  %10034 = vmatmul.f32.gmra.mxu3 %v15158_v2  ;;  %v10665_v49 = vadd.f32 %v15198_v29, %v9642_v38  ;;  %v10667_v30 = vmul.f32 %v9642_v38, %v9642_v38  ;;  %v15270_v17 = vld [vmem:[#allocation2 + $0x390] sm:$0xff] }
 0x445   : > { %9988 = vmatmul.f32.gmra.mxu0 %v15158_v2  ;;  %10068 = vmatpush.msra.mxu2 %v15253_v34 }
 0x446   : > { %10114 = vmatpush.msrb.mxu1 %v15243_v4  ;;  %10141 = vmatpush.msra.mxu3 %v15146_v10  ;;  %v10669_v10 = vadd.f32 %v10667_v30, %v15205_v56  ;;  %v15289_v56 = vld [vmem:[#allocation2 + $0x2c0] sm:$0xff]  ;;  %v15396_v30 = vld [vmem:[#allocation2 + $0x470] sm:$0xff] }
 0x447   : > { %10153 = vmatpush.msra.mxu0 %v15176_v12  ;;  %10069 = vmatpush.msra.mxu2 %v15259_v33  ;;  %v9664_v21 = vpop.f32.mrf.mxu3 }
 0x448   : > { %10115 = vmatpush.msrb.mxu1 %v15253_v34  ;;  %10142 = vmatpush.msra.mxu3 %v15264_v52  ;;  %v9687_v53 = vpop.f32.mrf.mxu1 }
 0x449   : > { %10154 = vmatpush.msra.mxu0 %v14968_v37  ;;  %10070 = vmatpush.msra.mxu2 %v2417_v55  ;;  %v9688_v8 = vadd.f32 %v9687_v53, %v9664_v21 }
 0x44a   : > { %10116 = vmatpush.msrb.mxu1 %v15259_v33  ;;  %10143 = vmatpush.msra.mxu3 %v15224_v15  ;;  %v9644_v40 = vpop.f32.mrf.mxu2 }
 0x44b   : > { %10155 = vmatpush.msra.mxu0 %v15270_v17  ;;  %11022 = vmatmul.msk.f32.gmra.mxu1 %vm7432_vm5, %v14990_v23  ;;  %v15283_v11 = vadd.f32 %v10665_v49, %v9688_v8  ;;  %v10673_v29 = vmul.f32 %v9688_v8, %v9688_v8 }
 0x44c   : > { %10071 = vmatpush.msra.mxu2 %v2233_v14  ;;  %10117 = vmatpush.msrb.mxu1 %v2417_v55  ;;  %v9621_v3 = vpop.f32.mrf.mxu0  ;;  %v15398_v55 = vld [vmem:[#allocation2 + $0x408] sm:$0xff] }
 0x44d   : > { %10144 = vmatpush.msra.mxu3 %v15170_v42  ;;  %10156 = vmatpush.msra.mxu0 %v15203_v58  ;;  %v9645_v19 = vadd.f32 %v9644_v40, %v9621_v3  ;;  %v15291_v41 = vadd.f32 %v10673_v29, %v10669_v10  ;;  %v15418_v29 = vld [vmem:[#allocation2 + $0x348] sm:$0xff]  ;;  %v2974_v3 = vld [vmem:[#allocation2 + $0x350] sm:$0xff] }
 0x44e   : > { %10072 = vmatpush.msra.mxu2 %v15277_v47  ;;  %10118 = vmatpush.msrb.mxu1 %v15281_v50 }
 0x44f   : > { %10145 = vmatpush.msra.mxu3 %v15176_v12  ;;  %10157 = vmatpush.msra.mxu0 %v15211_v61  ;;  %v10666_v59 = vadd.f32 %v15233_v25, %v9645_v19  ;;  %v10668_v63 = vmul.f32 %v9645_v19, %v9645_v19  ;;  %v1681_v12 = vld [vmem:[#allocation2 + $0x2b8] sm:$0xff] }
 0x450   : > { %10073 = vmatpush.msra.mxu2 %v15289_v56  ;;  %10119 = vmatpush.msrb.mxu1 %v15277_v47 }
 0x451   : > { %10199 = vmatpush.msrb.mxu3 %v15170_v42  ;;  %10158 = vmatpush.msra.mxu0 %v15218_v1  ;;  %v10670_v28 = vadd.f32 %v10668_v63, %v15237_v45  ;;  %v9667_v48 = vpop.f32.mrf.mxu3 }
 0x452   : > { %10074 = vmatpush.msra.mxu2 %v1681_v12  ;;  %10120 = vmatpush.msrb.mxu1 %v15289_v56 }
 0x453   : > { %10200 = vmatpush.msrb.mxu3 %v14975_v43  ;;  %10159 = vmatpush.msra.mxu0 %v15032_v35  ;;  %v1313_v43 = vld [vmem:[#allocation2 + $0x2a8] sm:$0xff] }
 0x454   : > { %10075 = vmatpush.msra.mxu2 %v1497_v9  ;;  %10121 = vmatpush.msrb.mxu1 %v1681_v12  ;;  %v9690_v46 = vpop.f32.mrf.mxu1 }
 0x455   : > { %10201 = vmatpush.msrb.mxu3 %v14968_v37  ;;  %10160 = vmatpush.msra.mxu0 %v15245_v13  ;;  %v9691_v1 = vadd.f32 %v9690_v46, %v9667_v48  ;;  %v1869_v46 = vld [vmem:[#allocation2 + $0x2e0] sm:$0xff] }
 0x456   : > { %10076 = vmatpush.msra.mxu2 %v1313_v43  ;;  %10122 = vmatpush.msrb.mxu1 %v1497_v9  ;;  %v2054_v9 = vld [vmem:[#allocation2 + $0x2f0] sm:$0xff] }
 0x457   : > { %10202 = vmatpush.msrb.mxu3 %v15270_v17  ;;  %10161 = vmatpush.msra.mxu0 %v15243_v4  ;;  %v15308_v37 = vadd.f32 %v10666_v59, %v9691_v1  ;;  %v10674_v36 = vmul.f32 %v9691_v1, %v9691_v1  ;;  %v2975_v1 = vld [vmem:[#allocation2 + $0x358] sm:$0xff] }
 0x458   : > { %10077 = vmatmul.f32.vlgmr.msra.gmra.mxu2 %v15126_v27  ;;  %10229 = vmatpush.msra.mxu1 %v15312_v32 }
 0x459   : > { %10183 = vmatpush.msrb.mxu2 %v15306_v18  ;;  %10203 = vmatpush.msrb.mxu3 %v15203_v58  ;;  %v15316_v26 = vadd.f32 %v10674_v36, %v10670_v28  ;;  %v5735_v36 = vld [vmem:[#allocation2 + $0x478] sm:$0xff] }
 0x45a   : > { %10162 = vmatpush.msra.mxu0 %v15253_v34  ;;  %11025 = vmatmul.msk.f32.vlgmr.msra.gmra.mxu3 %vm7432_vm5, %v14952_v7 }
 0x45b   : > { %10184 = vmatpush.msrb.mxu2 %v15222_v0  ;;  %10204 = vmatpush.msrb.mxu3 %v15211_v61  ;;  %v15357_v61 = vld [vmem:[#allocation2 + $0x468] sm:$0xff] }
 0x45c   : > { %10230 = vmatpush.msra.mxu1 %v15306_v18  ;;  %10163 = vmatpush.msra.mxu0 %v15259_v33  ;;  %v15392_v33 = vld [vmem:[#allocation2 + $0x398] sm:$0xff] }
 0x45d   : > { %10185 = vmatpush.msrb.mxu2 %v15186_v5  ;;  %10205 = vmatpush.msrb.mxu3 %v15023_v54  ;;  %v15340_v54 = vld [vmem:[#allocation2 + $0x3f8] sm:$0xff] }
 0x45e   : > { %10231 = vmatpush.msra.mxu1 %v15222_v0  ;;  %10164 = vmatpush.msra.mxu0 %v15074_v22 }
 0x45f   : > { %10186 = vmatpush.msrb.mxu2 %v15132_v20  ;;  %11023 = vmatmul.msk.f32.vlgmr.msrb.gmra.mxu0 %vm7432_vm5, %v14952_v7 }
 0x460   : > { %10206 = vmatpush.msrb.mxu3 %v15032_v35  ;;  %10232 = vmatpush.msra.mxu1 %v15186_v5  ;;  %v15345_v35 = vld [vmem:[#allocation2 + $0x400] sm:$0xff] }
 0x461   : > { %10165 = vmatpush.msra.mxu0 %v15281_v50  ;;  %10080 = vmatmul.f32.gmra.mxu2 %v15158_v2 }
 0x462   : > { %10123 = vmatmul.f32.vlgmr.msrb.gmra.mxu1 %v15126_v27  ;;  %10187 = vmatpush.msrb.mxu2 %v15141_v44 }
 0x463   : > { %10207 = vmatpush.msrb.mxu3 %v15245_v13  ;;  %10233 = vmatpush.msra.mxu1 %v15132_v20 }
 0x464   : > { %10166 = vmatpush.msra.mxu0 %v15277_v47  ;;  %11026 = vmatmul.msk.f32.gmra.mxu3 %vm7432_vm5, %v14990_v23 }
 0x465   : > { %10188 = vmatpush.msrb.mxu2 %v15340_v54  ;;  %10208 = vmatpush.msrb.mxu3 %v15243_v4 }
 0x466   : > { %10234 = vmatpush.msra.mxu1 %v15345_v35  ;;  %10167 = vmatpush.msra.mxu0 %v15289_v56 }
 0x467   : > { %10189 = vmatpush.msrb.mxu2 %v15264_v52  ;;  %v9710_v20 = vpop.f32.mrf.mxu2  ;;  %10209 = vmatpush.msrb.mxu3 %v15253_v34 }
 0x468   : > { %10235 = vmatpush.msra.mxu1 %v15340_v54  ;;  %10168 = vmatpush.msra.mxu0 %v1681_v12  ;;  %v9733_v44 = vpop.f32.mrf.mxu0 }
 0x469   : > { %10190 = vmatpush.msrb.mxu2 %v15224_v15  ;;  %11024 = vmatmul.msk.f32.gmra.mxu0 %vm7432_vm5, %v14990_v23  ;;  %v9734_v57 = vadd.f32 %v9733_v44, %v9710_v20  ;;  %v9779_v25 = vpop.f32.mrf.mxu3 }
 0x46a   : > { %10210 = vmatpush.msrb.mxu3 %v15068_v6  ;;  %10236 = vmatpush.msra.mxu1 %v15264_v52 }
 0x46b   : > { %10275 = vmatpush.msrb.mxu0 %v15357_v61  ;;  %v9756_v24 = vpop.f32.mrf.mxu1  ;;  %10126 = vmatmul.f32.gmra.mxu1 %v15158_v2  ;;  %v10677_v60 = vadd.f32 %v15283_v11, %v9734_v57  ;;  %v10679_v45 = vmul.f32 %v9734_v57, %v9734_v57  ;;  %v15414_v11 = vld [vmem:[#allocation7 + $0x8] sm:$0xff] }
 0x46c   : > { %10191 = vmatpush.msrb.mxu2 %v15170_v42  ;;  %v9780_v51 = vadd.f32 %v9779_v25, %v9756_v24  ;;  %10211 = vmatpush.msrb.mxu3 %v15074_v22  ;;  %v15382_v42 = vld [vmem:[#allocation2 + $0x3a0] sm:$0xff] }
 0x46d   : > { %10237 = vmatpush.msra.mxu1 %v15224_v15  ;;  %10276 = vmatpush.msrb.mxu0 %v15312_v32  ;;  %v10681_v6 = vadd.f32 %v10679_v45, %v15291_v41  ;;  %v2605_v41 = vld [vmem:[#allocation2 + $0x338] sm:$0xff] }
 0x46e   : > { %11027 = vmatmul.msk.f32.vlgmr.msrb.gmra.mxu2 %vm7432_vm5, %v14952_v7  ;;  %v15370_v62 = vadd.f32 %v10677_v60, %v9780_v51  ;;  %v10685_v34 = vmul.f32 %v9780_v51, %v9780_v51  ;;  %10212 = vmatpush.msrb.mxu3 %v15281_v50 }
 0x46f   : > { %10245 = vmatpush.msra.mxu2 %v15224_v15  ;;  %10291 = vmatpush.msrb.mxu1 %v15264_v52  ;;  %v15384_v15 = vld [vmem:[#allocation2 + $0x3a8] sm:$0xff] }
 0x470   : > { %10277 = vmatpush.msrb.mxu0 %v15306_v18  ;;  %v15376_v22 = vadd.f32 %v10685_v34, %v10681_v6  ;;  %v9713_v7 = vpop.f32.mrf.mxu2  ;;  %10213 = vmatpush.msrb.mxu3 %v15277_v47 }
 0x471   : > { %10246 = vmatpush.msra.mxu2 %v15038_v16  ;;  %10292 = vmatpush.msrb.mxu1 %v15079_v39 }
 0x472   : > { %10278 = vmatpush.msrb.mxu0 %v15222_v0  ;;  %v9736_v38 = vpop.f32.mrf.mxu0  ;;  %10214 = vmatpush.msrb.mxu3 %v15289_v56 }
 0x473   : > { %10247 = vmatpush.msra.mxu2 %v15382_v42  ;;  %10293 = vmatpush.msrb.mxu1 %v15384_v15  ;;  %v9737_v16 = vadd.f32 %v9736_v38, %v9713_v7  ;;  %v9782_v39 = vpop.f32.mrf.mxu3 }
 0x474   : > { %10279 = vmatpush.msrb.mxu0 %v15186_v5  ;;  %10215 = vmatmul.f32.vlgmr.msrb.gmra.mxu3 %v15126_v27  ;;  %v9759_v49 = vpop.f32.mrf.mxu1 }
 0x475   : > { %10169 = vmatmul.f32.vlgmr.msra.gmra.mxu0 %v15126_v27  ;;  %10248 = vmatpush.msra.mxu2 %v15392_v33  ;;  %v10678_v10 = vadd.f32 %v15308_v37, %v9737_v16  ;;  %v10680_v5 = vmul.f32 %v9737_v16, %v9737_v16  ;;  %v9783_v21 = vadd.f32 %v9782_v39, %v9759_v49 }
 0x476   : > { %10294 = vmatpush.msrb.mxu1 %v15382_v42  ;;  %10321 = vmatpush.msra.mxu3 %v15396_v30 }
 0x477   : > { %10280 = vmatpush.msrb.mxu0 %v15398_v55  ;;  %11028 = vmatmul.msk.f32.gmra.mxu2 %vm7432_vm5, %v14990_v23  ;;  %v10682_v14 = vadd.f32 %v10680_v5, %v15316_v26  ;;  %v10684_v53 = vadd.f32 %v10678_v10, %v9783_v21  ;;  %v10686_v8 = vmul.f32 %v9783_v21, %v9783_v21  ;;  %v11156_v26 = vld [vmem:[#allocation7 + $0x18] sm:$0xff] }
 0x478   : > { %10295 = vmatpush.msrb.mxu1 %v15392_v33  ;;  %10249 = vmatpush.msra.mxu2 %v15270_v17 }
 0x479   : > { %10322 = vmatpush.msra.mxu3 %v15357_v61  ;;  %10281 = vmatpush.msrb.mxu0 %v15345_v35  ;;  %v10688_v40 = vadd.f32 %v10686_v8, %v10682_v14 }
 0x47a   : > { %10296 = vmatpush.msrb.mxu1 %v15270_v17  ;;  %10250 = vmatpush.msra.mxu2 %v15203_v58  ;;  %v2789_v17 = vld [vmem:[#allocation2 + $0x340] sm:$0xff] }
 0x47b   : > { %10323 = vmatpush.msra.mxu3 %v15312_v32  ;;  %10282 = vmatpush.msrb.mxu0 %v15340_v54 }
 0x47c   : > { %11029 = vmatmul.msk.f32.vlgmr.msra.gmra.mxu1 %vm7432_vm5, %v15414_v11  ;;  %10251 = vmatpush.msra.mxu2 %v15418_v29 }
 0x47d   : > { %10297 = vmatpush.msrb.mxu1 %v2974_v3  ;;  %v9825_v19 = vpop.f32.mrf.mxu2  ;;  %10324 = vmatpush.msra.mxu3 %v15306_v18 }
 0x47e   : > { %10283 = vmatpush.msrb.mxu0 %v15264_v52  ;;  %v9802_v58 = vpop.f32.mrf.mxu0  ;;  %10218 = vmatmul.f32.gmra.mxu3 %v15158_v2  ;;  %v15431_v52 = vld [vmem:[#allocation2 + $0x410] sm:$0xff] }
 0x47f   : > { %10172 = vmatmul.f32.gmra.mxu0 %v15158_v2  ;;  %v9826_v56 = vadd.f32 %v9825_v19, %v9802_v58  ;;  %10252 = vmatpush.msra.mxu2 %v2789_v17 }
 0x480   : > { %10298 = vmatpush.msrb.mxu1 %v15418_v29  ;;  %10325 = vmatpush.msra.mxu3 %v15222_v0  ;;  %v3711_v0 = vld [vmem:[#allocation2 + $0x3b0] sm:$0xff] }
 0x481   : > { %10337 = vmatpush.msra.mxu0 %v15340_v54  ;;  %v15429_v59 = vadd.f32 %v15370_v62, %v9826_v56  ;;  %v10691_v63 = vmul.f32 %v9826_v56, %v9826_v56  ;;  %10253 = vmatpush.msra.mxu2 %v2605_v41 }
 0x482   : > { %10299 = vmatpush.msrb.mxu1 %v2789_v17  ;;  %10326 = vmatpush.msra.mxu3 %v15431_v52 }
 0x483   : > { %10338 = vmatpush.msra.mxu0 %v15165_v31  ;;  %v15436_v12 = vadd.f32 %v10691_v63, %v15376_v22  ;;  %10254 = vmatpush.msra.mxu2 %v15245_v13  ;;  %v2053_v31 = vld [vmem:[#allocation2 + $0x2e8] sm:$0xff] }
 0x484   : > { %10300 = vmatpush.msrb.mxu1 %v2605_v41  ;;  %10327 = vmatpush.msra.mxu3 %v15398_v55 }
 0x485   : > { %10339 = vmatpush.msra.mxu0 %v3711_v0  ;;  %11030 = vmatmul.msk.f32.gmra.mxu1 %vm7432_vm5, %v14990_v23  ;;  %v1685_v23 = vld [vmem:[#allocation2 + $0x2d8] sm:$0xff] }
 0x486   : > { %10255 = vmatpush.msra.mxu2 %v15243_v4  ;;  %10301 = vmatpush.msrb.mxu1 %v15245_v13  ;;  %v9828_v28 = vpop.f32.mrf.mxu2 }
 0x487   : > { %10328 = vmatpush.msra.mxu3 %v15345_v35  ;;  %10340 = vmatpush.msra.mxu0 %v15384_v15 }
 0x488   : > { %10256 = vmatpush.msra.mxu2 %v2053_v31  ;;  %v9805_v48 = vpop.f32.mrf.mxu0  ;;  %10302 = vmatpush.msrb.mxu1 %v2054_v9 }
 0x489   : > { %10329 = vmatpush.msra.mxu3 %v15340_v54  ;;  %v9829_v43 = vadd.f32 %v9828_v28, %v9805_v48  ;;  %10341 = vmatpush.msra.mxu0 %v15382_v42  ;;  %v9871_v54 = vpop.f32.mrf.mxu1 }
 0x48a   : > { %10257 = vmatpush.msra.mxu2 %v1869_v46  ;;  %10303 = vmatpush.msrb.mxu1 %v2053_v31 }
 0x48b   : > { %11033 = vmatmul.msk.f32.vlgmr.msra.gmra.mxu3 %vm7432_vm5, %v15414_v11  ;;  %v15450_v4 = vadd.f32 %v10684_v53, %v9829_v43  ;;  %v10692_v13 = vmul.f32 %v9829_v43, %v9829_v43  ;;  %10342 = vmatpush.msra.mxu0 %v15392_v33 }
 0x48c   : > { %10258 = vmatpush.msra.mxu2 %v1685_v23  ;;  %10304 = vmatpush.msrb.mxu1 %v1869_v46 }
 0x48d   : > { %11031 = vmatmul.msk.f32.vlgmr.msrb.gmra.mxu0 %vm7432_vm5, %v15414_v11  ;;  %v15455_v37 = vadd.f32 %v10692_v13, %v10688_v40 }
 0x48e   : > { %10343 = vmatpush.msra.mxu0 %v2975_v1  ;;  %10259 = vmatpush.msra.mxu2 %v15281_v50 }
 0x48f   : > { %10305 = vmatpush.msrb.mxu1 %v1685_v23 }
 0x490   : > { %10344 = vmatpush.msra.mxu0 %v2974_v3  ;;  %10260 = vmatpush.msra.mxu2 %v15277_v47  ;;  %v2055_v47 = vld [vmem:[#allocation2 + $0x2f8] sm:$0xff] }
 0x491   : > { %10306 = vmatpush.msrb.mxu1 %v15281_v50  ;;  %10261 = vmatmul.f32.vlgmr.msra.gmra.mxu2 %v15126_v27  ;;  %v4815_v50 = vld [vmem:[#allocation2 + $0x418] sm:$0xff]  ;;  %v9874_v57 = vpop.f32.mrf.mxu1 }
 0x492   : > { %10345 = vmatpush.msra.mxu0 %v15418_v29  ;;  %10367 = vmatpush.msrb.mxu2 %v5735_v36 }
 0x493   : > { %10307 = vmatmul.f32.vlgmr.msrb.gmra.mxu1 %v15126_v27  ;;  %11034 = vmatmul.msk.f32.gmra.mxu3 %vm7432_vm5, %v11156_v26 }
 0x494   : > { %10346 = vmatpush.msra.mxu0 %v2789_v17  ;;  %10368 = vmatpush.msrb.mxu2 %v15396_v30 }
 0x495   : > { %11032 = vmatmul.msk.f32.gmra.mxu0 %vm7432_vm5, %v11156_v26 }
 0x496   : > { %10347 = vmatpush.msra.mxu0 %v2605_v41  ;;  %10369 = vmatpush.msrb.mxu2 %v15357_v61 }
 0x498   : > { %10348 = vmatpush.msra.mxu0 %v2055_v47  ;;  %10370 = vmatpush.msrb.mxu2 %v15312_v32  ;;  %v9848_v32 = vpop.f32.mrf.mxu3 }
 0x499   : > { %10264 = vmatmul.f32.gmra.mxu2 %v15158_v2  ;;  %v9872_v21 = vadd.f32 %v9871_v54, %v9848_v32 }
 0x49a   : > { %10349 = vmatpush.msra.mxu0 %v2054_v9  ;;  %10371 = vmatpush.msrb.mxu2 %v15306_v18 }
 0x49b   : > { %10310 = vmatmul.f32.gmra.mxu1 %v15158_v2  ;;  %v10697_v53 = vmul.f32 %v9872_v21, %v9872_v21  ;;  %v10695_v29 = vadd.f32 %v15429_v59, %v9872_v21 }
 0x49c   : > { %10350 = vmatpush.msra.mxu0 %v2053_v31  ;;  %10372 = vmatpush.msrb.mxu2 %v4815_v50 }
 0x49d   : > { %v10699_v17 = vadd.f32 %v10697_v53, %v15436_v12 }
 0x49e   : > { %10351 = vmatpush.msra.mxu0 %v1869_v46  ;;  %10373 = vmatpush.msrb.mxu2 %v15431_v52 }
 0x4a0   : > { %10352 = vmatpush.msra.mxu0 %v1685_v23  ;;  %10374 = vmatpush.msrb.mxu2 %v15398_v55  ;;  %v9851_v61 = vpop.f32.mrf.mxu3 }
 0x4a1   : > { %10353 = vmatmul.f32.vlgmr.msra.gmra.mxu0 %v15126_v27  ;;  %v9894_v20 = vpop.f32.mrf.mxu2  ;;  %v9875_v63 = vadd.f32 %v9874_v57, %v9851_v61 }
 0x4a2   : > { %10375 = vmatpush.msrb.mxu2 %v15345_v35  ;;  %v9917_v18 = vpop.f32.mrf.mxu0 }
 0x4a3   : > { %11035 = vmatmul.msk.f32.vlgmr.msrb.gmra.mxu2 %vm7432_vm5, %v15414_v11  ;;  %v9918_v14 = vadd.f32 %v9917_v18, %v9894_v20  ;;  %v10696_v43 = vadd.f32 %v15450_v4, %v9875_v63  ;;  %v10698_v36 = vmul.f32 %v9875_v63, %v9875_v63 }
 0x4a5   : > { %v9940_v60 = vpop.f32.mrf.mxu1  ;;  %v10703_v3 = vmul.f32 %v9918_v14, %v9918_v14  ;;  %v10701_v56 = vadd.f32 %v10695_v29, %v9918_v14  ;;  %v10700_v4 = vadd.f32 %v10698_v36, %v15455_v37 }
 0x4a7   : > { %v10705_v52 = vadd.f32 %v10703_v3, %v10699_v17 }
 0x4a8   : > { %v9963_v24 = vpop.f32.mrf.mxu3 }
 0x4a9   : > { %10356 = vmatmul.f32.gmra.mxu0 %v15158_v2  ;;  %v9964_v19 = vadd.f32 %v9963_v24, %v9940_v60 }
 0x4aa   : > { %v9897_v25 = vpop.f32.mrf.mxu2 }
 0x4ab   : > { %11036 = vmatmul.msk.f32.gmra.mxu2 %vm7432_vm5, %v11156_v26  ;;  %v10709_v0 = vmul.f32 %v9964_v19, %v9964_v19  ;;  %v10707_v9 = vadd.f32 %v10701_v56, %v9964_v19 }
 0x4ac   : > { %v9920_v44 = vpop.f32.mrf.mxu0 }
 0x4ad   : > { %v9921_v28 = vadd.f32 %v9920_v44, %v9897_v25  ;;  %v10711_v13 = vadd.f32 %v10709_v0, %v10705_v52 }
 0x4ae   : > { %v9943_v51 = vpop.f32.mrf.mxu1 }
 0x4af   : > { %v10702_v26 = vadd.f32 %v10696_v43, %v9921_v28  ;;  %v10704_v61 = vmul.f32 %v9921_v28, %v9921_v28 }
 0x4b0   : > { %v9966_v35 = vpop.f32.mrf.mxu3 }
 0x4b1   : > { %v9967_v47 = vadd.f32 %v9966_v35, %v9943_v51  ;;  %v10706_v35 = vadd.f32 %v10704_v61, %v10700_v4 }
 0x4b3   : > { %v10710_v51 = vmul.f32 %v9967_v47, %v9967_v47 }
 0x4b5   : > { %v10712_v19 = vadd.f32 %v10710_v51, %v10706_v35 }
 0x4b7   : > { %v10009_v45 = vpop.f32.mrf.mxu2 }
 0x4b8   : > { %v9986_v27 = vpop.f32.mrf.mxu0 }
 0x4b9   : > { %v10010_v41 = vadd.f32 %v10009_v45, %v9986_v27  ;;  %v10708_v27 = vadd.f32 %v10702_v26, %v9967_v47 }
 0x4bb   : > { %v10715_v48 = vmul.f32 %v10010_v41, %v10010_v41  ;;  %v10713_v59 = vadd.f32 %v10707_v9, %v10010_v41 }
 0x4bd   : > { %v10032_v34 = vpop.f32.mrf.mxu3  ;;  %v10717_v18 = vadd.f32 %v10715_v48, %v10711_v13 }
 0x4bf   : > { %v10055_v2 = vpop.f32.mrf.mxu1 }
 0x4c0   : > { %v10012_v62 = vpop.f32.mrf.mxu2  ;;  %v10056_v31 = vadd.f32 %v10055_v2, %v10032_v34 }
 0x4c2   : > { %v9989_v6 = vpop.f32.mrf.mxu0  ;;  %v10721_v1 = vmul.f32 %v10056_v31, %v10056_v31  ;;  %v10719_v32 = vadd.f32 %v10713_v59, %v10056_v31 }
 0x4c3   : > { %v10013_v44 = vadd.f32 %v10012_v62, %v9989_v6 }
 0x4c4   : > { %v10723_v25 = vadd.f32 %v10721_v1, %v10717_v18 }
 0x4c5   : > { %v10716_v6 = vmul.f32 %v10013_v44, %v10013_v44 }
 0x4c7   : > { %v10035_v42 = vpop.f32.mrf.mxu3  ;;  %v10718_v56 = vadd.f32 %v10716_v6, %v10712_v19 }
 0x4c8   : > { %v10058_v15 = vpop.f32.mrf.mxu1 }
 0x4c9   : > { %v10059_v45 = vadd.f32 %v10058_v15, %v10035_v42 }
 0x4cb   : > { %v10722_v42 = vmul.f32 %v10059_v45, %v10059_v45 }
 0x4cd   : > { %v10724_v31 = vadd.f32 %v10722_v42, %v10718_v56 }
 0x4db   : > { %v10078_v7 = vpop.f32.mrf.mxu2 }
 0x4dc   : > { %v10101_v22 = vpop.f32.mrf.mxu0 }
 0x4dd   : > { %v10147_v39 = vpop.f32.mrf.mxu3  ;;  %v10102_v46 = vadd.f32 %v10101_v22, %v10078_v7  ;;  %v10714_v7 = vadd.f32 %v10708_v27, %v10013_v44 }
 0x4df   : > { %v10124_v33 = vpop.f32.mrf.mxu1  ;;  %v10727_v54 = vmul.f32 %v10102_v46, %v10102_v46  ;;  %v10725_v24 = vadd.f32 %v10719_v32, %v10102_v46  ;;  %v10720_v62 = vadd.f32 %v10714_v7, %v10059_v45 }
 0x4e0   : > { %v10148_v20 = vadd.f32 %v10147_v39, %v10124_v33 }
 0x4e1   : > { %v10729_v34 = vadd.f32 %v10727_v54, %v10723_v25 }
 0x4e2   : > { %v10733_v2 = vmul.f32 %v10148_v20, %v10148_v20  ;;  %v10731_v53 = vadd.f32 %v10725_v24, %v10148_v20 }
 0x4e4   : > { %v10081_v16 = vpop.f32.mrf.mxu2 }
 0x4e6   : > { %v10104_v38 = vpop.f32.mrf.mxu0 }
 0x4e7   : > { %v15479_v55 = vpop.f32.mrf.mxu3  ;;  %v10105_v21 = vadd.f32 %v10104_v38, %v10081_v16 }
 0x4e8   : > { %v15481_v10 = vpop.f32.mrf.mxu1 }
 0x4e9   : > { %v10726_v15 = vadd.f32 %v10720_v62, %v10105_v21  ;;  %v10728_v41 = vmul.f32 %v10105_v21, %v10105_v21 }
 0x4eb   : > { %v10730_v43 = vadd.f32 %v10728_v41, %v10724_v31 }
 0x4f1   : > { %v10193_v30 = vpop.f32.mrf.mxu2 }
 0x4f2   : > { %v10170_v49 = vpop.f32.mrf.mxu0 }
 0x4f3   : > { %v10194_v60 = vadd.f32 %v10193_v30, %v10170_v49  ;;  %v10735_v49 = vadd.f32 %v10733_v2, %v10729_v34 }
 0x4f5   : > { %v10739_v39 = vmul.f32 %v10194_v60, %v10194_v60  ;;  %v10737_v30 = vadd.f32 %v10731_v53, %v10194_v60 }
 0x4f7   : > { %v10216_v8 = vpop.f32.mrf.mxu3 }
 0x4f9   : > { %v10239_v40 = vpop.f32.mrf.mxu1 }
 0x4fa   : > { %v15485_v11 = vpop.f32.mrf.mxu2  ;;  %v10240_v22 = vadd.f32 %v10239_v40, %v10216_v8  ;;  %v10151_v8 = vadd.f32 %v15479_v55, %v15481_v10  ;;  %v10741_v40 = vadd.f32 %v10739_v39, %v10735_v49 }
 0x4fc   : > { %v15483_v5 = vpop.f32.mrf.mxu0  ;;  %v10745_v37 = vmul.f32 %v10240_v22, %v10240_v22  ;;  %v10743_v17 = vadd.f32 %v10737_v30, %v10240_v22  ;;  %v10732_v28 = vadd.f32 %v10726_v15, %v10151_v8 }
 0x4fd   : > { %v10197_v52 = vadd.f32 %v15485_v11, %v15483_v5 }
 0x4fe   : > { %v10747_v63 = vadd.f32 %v10745_v37, %v10741_v40 }
 0x4ff   : > { %v10738_v10 = vadd.f32 %v10732_v28, %v10197_v52  ;;  %v10740_v36 = vmul.f32 %v10197_v52, %v10197_v52 }
 0x501   : > { %v10219_v12 = vpop.f32.mrf.mxu3 }
 0x502   : > { %v10242_v50 = vpop.f32.mrf.mxu1 }
 0x503   : > { %v10243_v9 = vadd.f32 %v10242_v50, %v10219_v12 }
 0x505   : > { %v10744_v18 = vadd.f32 %v10738_v10, %v10243_v9  ;;  %v10746_v20 = vmul.f32 %v10243_v9, %v10243_v9 }
 0x50a   : > { %v10285_v58 = vpop.f32.mrf.mxu0 }
 0x50e   : > { %v10331_v3 = vpop.f32.mrf.mxu3 }
 0x510   : > { %v10308_v29 = vpop.f32.mrf.mxu1 }
 0x511   : > { %v10332_v16 = vadd.f32 %v10331_v3, %v10308_v29 }
 0x512   : > { %v10288_v57 = vpop.f32.mrf.mxu0 }
 0x513   : > { %v10757_v46 = vmul.f32 %v10332_v16, %v10332_v16 }
 0x514   : > { %v10262_v23 = vpop.f32.mrf.mxu2 }
 0x515   : > { %v10286_v33 = vadd.f32 %v10285_v58, %v10262_v23  ;;  %v10734_v23 = vmul.f32 %v10151_v8, %v10151_v8 }
 0x516   : > { %v10334_v47 = vpop.f32.mrf.mxu3 }
 0x517   : > { %v10751_v38 = vmul.f32 %v10286_v33, %v10286_v33  ;;  %v10749_v0 = vadd.f32 %v10743_v17, %v10286_v33  ;;  %v10736_v11 = vadd.f32 %v10734_v23, %v10730_v43 }
 0x518   : > { %v10311_v26 = vpop.f32.mrf.mxu1 }
 0x519   : > { %v10753_v48 = vadd.f32 %v10751_v38, %v10747_v63  ;;  %v10755_v13 = vadd.f32 %v10749_v0, %v10332_v16  ;;  %v10335_v12 = vadd.f32 %v10334_v47, %v10311_v26  ;;  %v10742_v24 = vadd.f32 %v10740_v36, %v10736_v11 }
 0x51b   : > { %v10759_v5 = vadd.f32 %v10757_v46, %v10753_v48  ;;  %v10748_v27 = vadd.f32 %v10746_v20, %v10742_v24  ;;  %v10758_v22 = vmul.f32 %v10335_v12, %v10335_v12 }
 0x51c   : > { %v10265_v14 = vpop.f32.mrf.mxu2 }
 0x51d   : > { %v10289_v59 = vadd.f32 %v10288_v57, %v10265_v14 }
 0x51e   : > { %v10354_v58 = vpop.f32.mrf.mxu0 }
 0x51f   : > { %v10750_v61 = vadd.f32 %v10744_v18, %v10289_v59  ;;  %v10752_v60 = vmul.f32 %v10289_v59, %v10289_v59 }
 0x521   : > { %v10756_v45 = vadd.f32 %v10750_v61, %v10335_v12  ;;  %v10754_v2 = vadd.f32 %v10752_v60, %v10748_v27 }
 0x523   : > { %v10760_v21 = vadd.f32 %v10758_v22, %v10754_v2 }
 0x526   : > { %v10377_v55 = vpop.f32.mrf.mxu2  ;;  %v10357_v25 = vpop.f32.mrf.mxu0 }
 0x527   : > { %v10378_v1 = vadd.f32 %v10377_v55, %v10354_v58 }
 0x529   : > { %v10763_v32 = vmul.f32 %v10378_v1, %v10378_v1  ;;  %v10761_v54 = vadd.f32 %v10755_v13, %v10378_v1 }
 0x52b   : > { %v10767_v50 = vsel %vm976_vm4, %v10761_v54, 0.0  ;;  %v10765_v44 = vadd.f32 %v10763_v32, %v10759_v5 }
 0x52c   : > { %10768 = vadd.xlane.f32.xlu1 %v10767_v50 }
 0x52d   : > { %v10773_v57 = vsel %vm976_vm4, %v10765_v44, 0.0 }
 0x52e   : > { %v10380_v4 = vpop.f32.mrf.mxu2  ;;  %10774 = vadd.xlane.f32.xlu0 %v10773_v57 }
 0x52f   : > { %v10381_v34 = vadd.f32 %v10380_v4, %v10357_v25 }
 0x531   : > { %v10762_v35 = vadd.f32 %v10756_v45, %v10381_v34  ;;  %v10764_v51 = vmul.f32 %v10381_v34, %v10381_v34 }
 0x533   : > { %v10770_v7 = vsel %vm976_vm4, %v10762_v35, 0.0  ;;  %v10766_v14 = vadd.f32 %v10764_v51, %v10760_v21 }
 0x534   : > { %10771 = vadd.xlane.f32.xlu2 %v10770_v7 }
 0x535   : > { %v10776_v53 = vsel %vm976_vm4, %v10766_v14, 0.0 }
 0x53c   : > { %10777 = vadd.xlane.f32.xlu2 %v10776_v53 }
 0x59f   : > { %v10769_v39 = vpop.xlane.xlu1 %10768 }
 0x5a1   : > { %v10775_v33 = vpop.xlane.xlu0 %10774 }
 0x5a2   : > { %v10780_v6 = vsel %vm10779_vm6, %v10769_v39, %v10775_v33 }
 0x5a3   : > { %v10783_v62 = vsel %vm10782_vm7, %v10780_v6, 0.0 }
 0x5a4   : > { %10785 = vst [vmem:[%s195_s7] sm:$0xff] %v10783_v62 }
 0x5a7   : > { %v10772_v29 = vpop.xlane.xlu2 %10771 }
 0x5af   : > { %v10778_v3 = vpop.xlane.xlu2 %10777 }
 0x5b0   : > { %v10781_v49 = vsel %vm10779_vm6, %v10772_v29, %v10778_v3 }
 0x5b1   : > { %v10784_v30 = vsel %vm10782_vm7, %v10781_v49, 0.0 }
 0x5b2   : > { %10786 = vst [vmem:[%s195_s7 + $0x8] sm:$0xff] %v10784_v30 }
 0x5b3   : > { %11244 = shalt.err (!%p11241_p13)
}
 0x5b4   : > { %s11313_s24 = smov 128   ;;  %s11314_s29 = smov 8  }
 0x5b5   : > { %11052 = dma.vmem_to_hbm [thread:$0]  (%p11401_p4), %s10803_s19, 256, %s10805_s21, %s10788_s22, %s11313_s24, %s11313_s24, %s11314_s29  }
 0x5b6 PF: > { %s10819_s16 = sand.u32 1, %s11283_s9   ;;  %p11063_p0 = pnand %p10905_p6, %p11409_p7 }
 0x5b7   : > { %s10820_s6 = scalar_lea.sflag [#allocation6], %s10819_s16 }
 0x5b8   : > { %p11064_p2 = pneg %p11063_p0 }
 0x5ba   : > { %11278 = dma.done.wait (%p11064_p2), %s10820_s6, 256  }
 0x5bb   : > { %11280 = vsyncadd (%p11064_p2), %s10820_s6, 4294967040  ;;  %s19_s14 = sadd.s32 1, %s11303_s14   ;;  %s15898_s9 = smov %s11287_s10 }
 0x5bc   : > { %p16_p5 = scmp.ge.s32.totalorder %s19_s14, 4   ;;  %s15899_s10 = smov %s11291_s11 }
 0x5bd   : > { %s15900_s11 = smov %s11407_s4  ;;  %s15901_s12 = smov %s11299_s13 }
 0x5be   : > { %s15902_s13 = smov %s15904_s26  ;;  %18 = sbr.rel (!%p16_p5) target bundleno = 7 (0x7), region = 166 }
 0x5c3   :  { %10826 = vsyncpa [#allocation5], 1 }
 0x5c4   :  { %10828 = vsyncpa [#allocation5 + $0x1], 1 }
 0x5c5   :  { %10829 = vsyncpa [#allocation8], 1 }
 0x5c6   :  { %10830 = vsyncpa [#allocation6], 1 }
 0x5c7   :  { %10832 = vsyncpa [#allocation6 + $0x1], 1 }

</bundles_post_ra>
